<compile_context>
chip_gen: v5e
topology: v5e:2x2
jax: 0.10.0
libtpu: 0.0.40
codegen_flags: <defaults>
</compile_context>

<pallas_src>
import functools

import jax
import jax.numpy as jnp
import numpy as np
from jax import lax
from jax.experimental import pallas as pl
from jax.experimental.pallas import tpu as pltpu


def _round_up(x, k):
    return (x + k - 1) // k * k


def _pick_bs(n):
    for b in (8, 4, 2, 1):
        if n % b == 0:
            return b
    return 1


# ---------------- fused conv(5x5, pad2) + bias + ReLU + maxpool(2x2/2) ----------------

def _conv_relu_pool_kernel(x_ref, w_ref, b_ref, o_ref, scr_ref, hp_ref, *,
                           H, W, Wn, n_shifts, cout, CR, bs):
    """One batch block per grid step.

    x_ref  : (bs, Lp, ce) bf16   padded activation; for conv1 ce=40 (full im2col),
                                 for conv2 ce=160 (dj-grouped taps, di handled here)
    w_ref  : (n_shifts, ce, cout) bf16  per-shift weight blocks
    b_ref  : (1, cout) f32
    o_ref  : (bs, H//2, W//2, cout) bf16  pooled output
    scr_ref: (bs, H*Wn, cout) f32  pre-pool activation (written once per chunk)
    hp_ref : (bs, H*Wn//2, cout) f32  horizontally pooled activation
    """
    rows = H * Wn
    n_chunks = rows // CR
    H2, W2, Wnh = H // 2, W // 2, Wn // 2
    ce = x_ref.shape[-1]
    M = bs * CR

    # ---- conv (grouped-tap MXU dots) + bias + ReLU, row-chunked, batch folded into M ----
    for c in range(n_chunks):
        r0 = c * CR
        acc = jnp.zeros((M, cout), jnp.float32)
        for s in range(n_shifts):
            xs = x_ref[:, pl.ds(s * Wn + r0, CR), :].reshape(M, ce)
            acc = acc + jnp.dot(xs, w_ref[s], preferred_element_type=jnp.float32)
        acc = jnp.maximum(acc + b_ref[...], 0.0)
        scr_ref[:, pl.ds(r0, CR), :] = acc.reshape(bs, CR, cout)

    # ---- 2x2/2 max-pool: horizontal over adjacent slab rows (stride-2 reads) ----
    a = scr_ref[:, pl.ds(0, rows // 2, stride=2), :]
    b = scr_ref[:, pl.ds(1, rows // 2, stride=2), :]
    hp_ref[...] = jnp.maximum(a, b)

    # ---- ... then vertical over conv-row pairs (contiguous blocks), one store / out row ----
    for i in range(H2):
        t = hp_ref[:, pl.ds((2 * i) * Wnh, Wnh), :]
        u = hp_ref[:, pl.ds((2 * i + 1) * Wnh, Wnh), :]
        o_ref[:, i] = jnp.maximum(t, u)[:, :W2, :].astype(o_ref.dtype)


def conv_relu_pool(x_e, w_e, bias, *, H, W, Wn, n_shifts, cout, CR, bs):
    """x_e: (N, Lp, ce) bf16; w_e: (n_shifts, ce, cout) bf16; bias: (1, cout) f32.
    Returns pooled activation (N, H//2, W//2, cout) bf16."""
    n, Lp, ce = x_e.shape
    H2, W2 = H // 2, W // 2
    rows = H * Wn
    assert rows % CR == 0 and n % bs == 0

    kernel = functools.partial(_conv_relu_pool_kernel, H=H, W=W, Wn=Wn,
                               n_shifts=n_shifts, cout=cout, CR=CR, bs=bs)
    return pl.pallas_call(
        kernel,
        out_shape=jax.ShapeDtypeStruct((n, H2, W2, cout), jnp.bfloat16),
        grid=(n // bs,),
        in_specs=[
            pl.BlockSpec((bs, Lp, ce), lambda i: (i, 0, 0)),
            pl.BlockSpec((n_shifts, ce, cout), lambda i: (0, 0, 0)),
            pl.BlockSpec((1, cout), lambda i: (0, 0)),
        ],
        out_specs=pl.BlockSpec((bs, H2, W2, cout), lambda i: (i, 0, 0, 0)),
        scratch_shapes=[pltpu.VMEM((bs, rows, cout), jnp.float32),
                        pltpu.VMEM((bs, rows // 2, cout), jnp.float32)],
        compiler_params=pltpu.CompilerParams(
            dimension_semantics=("parallel",),
            vmem_limit_bytes=32 * 1024 * 1024),
        cost_estimate=pl.CostEstimate(
            flops=2 * n * rows * n_shifts * ce * cout,
            transcendentals=0,
            bytes_accessed=int(x_e.size) * 2 + int(w_e.size) * 2
                           + n * H2 * W2 * cout * 2),
    )(x_e, w_e, bias)


# ------------------------ layout prep (wrapper-side, tiny data) ------------------------

def _expand_conv1(x_nhwc, Wn=32):
    """(N, 28, 28, 1) -> (N, 28*Wn, 40) bf16: full 5x5 im2col, tap order di*8+dj."""
    n, H, W, _ = x_nhwc.shape
    xp = jnp.pad(x_nhwc[..., 0].astype(jnp.bfloat16),
                 ((0, 0), (2, 2), (2, Wn + 2 - W)))          # (N, H+4, Wn+4)
    pieces = [xp[:, di:di + H, dj:dj + Wn]
              for di in range(5) for dj in range(5)]         # each (N, H, Wn)
    xe = jnp.stack(pieces, axis=-1).reshape(n, H, Wn, 5, 5)
    xe = jnp.pad(xe, ((0, 0), (0, 0), (0, 0), (0, 0), (0, 3)))   # dj 5 -> 8
    return xe.reshape(n, H * Wn, 40)


def _expand_conv2(y_nhwc, Wn=16):
    """(N, 14, 14, 32) bf16 -> (N, 18*Wn, 160) bf16: dj taps grouped into channels,
    di shifts handled inside the kernel."""
    n, H, W, C = y_nhwc.shape
    yp = jnp.pad(y_nhwc, ((0, 0), (2, 2), (2, Wn + 2 - W), (0, 0)))   # (N, H+4, Wn+4, C)
    ye = jnp.concatenate([yp[:, :, dj:dj + Wn, :] for dj in range(5)], axis=-1)
    return ye.reshape(n, (H + 4) * Wn, 5 * C)


# ------------------------------------ FC (matmul) ------------------------------------

def _matmul_bias_kernel(a_ref, w_ref, b_ref, o_ref):
    acc = jnp.dot(a_ref[...], w_ref[...], preferred_element_type=jnp.float32)
    o_ref[...] = (acc + b_ref[...]).astype(o_ref.dtype)


def matmul_bias(a, w, b, *, out_dtype=jnp.float32, tm_cap=512):
    """(M,K) @ (K,N) + (1,N) with a bounded, M-tiled Pallas MXU kernel."""
    m, k = a.shape
    n = w.shape[1]
    tm = min(tm_cap, _round_up(m, 8))
    mp = _round_up(m, tm)
    a_p = jnp.pad(a, ((0, mp - m), (0, 0))) if mp != m else a
    out = pl.pallas_call(
        _matmul_bias_kernel,
        out_shape=jax.ShapeDtypeStruct((mp, n), out_dtype),
        grid=(mp // tm,),
        in_specs=[
            pl.BlockSpec((tm, k), lambda i: (i, 0)),
            pl.BlockSpec((k, n), lambda i: (0, 0)),
            pl.BlockSpec((1, n), lambda i: (0, 0)),
        ],
        out_specs=pl.BlockSpec((tm, n), lambda i: (i, 0)),
        compiler_params=pltpu.CompilerParams(
            dimension_semantics=("parallel",),
            vmem_limit_bytes=32 * 1024 * 1024),
        cost_estimate=pl.CostEstimate(
            flops=2 * mp * k * n, transcendentals=0,
            bytes_accessed=mp * k * 2 + k * n * 2 + mp * n * 4),
    )(a_p, w, b)
    return out[:m] if mp != m else out


# -------------------------------------- model glue --------------------------------------

FC_PAD = 128  # lane-dense FC output width (logical 10, zero-padded)


def init_params(key):
    k1, k2, k3, k4, k5, k6 = jax.random.split(key, 6)
    return dict(
        w1=jax.random.normal(k1, (5, 5, 1, 32), jnp.float32) * 0.05,   # HWIO
        b1=jax.random.normal(k2, (32,), jnp.float32) * 0.05,
        w2=jax.random.normal(k3, (5, 5, 32, 64), jnp.float32) * 0.05,  # HWIO
        b2=jax.random.normal(k4, (64,), jnp.float32) * 0.05,
        # FC weight rows are in torch NCHW-flatten order (c, h, w), like x.view(N,-1).
        wfc=jax.random.normal(k5, (64 * 7 * 7, 10), jnp.float32) * 0.02,
        bfc=jax.random.normal(k6, (10,), jnp.float32) * 0.02,
    )


def prepare_params(p):
    """One-time weight munging so the per-forward path has no layout fixups."""
    # conv1: full 5x5 im2col weight, contraction order di*8 + dj (dj padded 5->8).
    w1e = jnp.zeros((5, 8, 32), jnp.float32).at[:, :5, :].set(p["w1"][:, :, 0, :])
    w1e = w1e.reshape(1, 40, 32).astype(jnp.bfloat16)
    # conv2: per-di weight blocks, contraction order dj*32 + cin.
    w2e = p["w2"].reshape(5, 5 * 32, 64).astype(jnp.bfloat16)
    # FC: permute rows from torch NCHW-flatten to NHWC-flatten order; pad out dim to 128.
    perm = np.arange(64 * 7 * 7).reshape(64, 7, 7).transpose(1, 2, 0).reshape(-1)
    wfc = jnp.take(p["wfc"], jnp.asarray(perm), axis=0)
    wfc = jnp.pad(wfc, ((0, 0), (0, FC_PAD - 10))).astype(jnp.bfloat16)
    bfc = jnp.pad(p["bfc"], (0, FC_PAD - 10)).reshape(1, FC_PAD).astype(jnp.float32)
    return dict(
        w1e=w1e, b1=p["b1"].reshape(1, 32).astype(jnp.float32),
        w2e=w2e, b2=p["b2"].reshape(1, 64).astype(jnp.float32),
        wfc=wfc, bfc=bfc,
    )


def cnn_forward(x_nchw, prep):
    n = x_nchw.shape[0]
    bs = _pick_bs(n)
    x = jnp.transpose(x_nchw, (0, 2, 3, 1))                      # NCHW -> NHWC (C=1)
    x1e = _expand_conv1(x)                                       # (N, 896, 40) bf16
    y1 = conv_relu_pool(x1e, prep["w1e"], prep["b1"],
                        H=28, W=28, Wn=32, n_shifts=1, cout=32, CR=128, bs=bs)
    x2e = _expand_conv2(y1)                                      # (N, 288, 160) bf16
    y2 = conv_relu_pool(x2e, prep["w2e"], prep["b2"],
                        H=14, W=14, Wn=16, n_shifts=5, cout=64, CR=32, bs=bs)
    xf = y2.reshape(n, 7 * 7 * 64)                               # NHWC flatten (wfc permuted)
    y = matmul_bias(xf, prep["wfc"], prep["bfc"])                # (N, 128) f32, dense lanes
    return y[:, :10]


def cnn_reference(x_nchw, p):
    """Pure-JAX f32 reference with the original (torch-ordered) parameters."""
    hi = lax.Precision.HIGHEST
    x = jnp.transpose(x_nchw, (0, 2, 3, 1))
    dn = ("NHWC", "HWIO", "NHWC")
    x = lax.conv_general_dilated(x, p["w1"], (1, 1), ((2, 2), (2, 2)),
                                 dimension_numbers=dn, precision=hi) + p["b1"]
    x = jnp.maximum(x, 0.0)
    x = lax.reduce_window(x, -jnp.inf, lax.max, (1, 2, 2, 1), (1, 2, 2, 1), "VALID")
    x = lax.conv_general_dilated(x, p["w2"], (1, 1), ((2, 2), (2, 2)),
                                 dimension_numbers=dn, precision=hi) + p["b2"]
    x = jnp.maximum(x, 0.0)
    x = lax.reduce_window(x, -jnp.inf, lax.max, (1, 2, 2, 1), (1, 2, 2, 1), "VALID")
    n = x.shape[0]
    xf = jnp.transpose(x, (0, 3, 1, 2)).reshape(n, -1)           # torch x.view(N,-1) order
    return jnp.dot(xf, p["wfc"], precision=hi) + p["bfc"]


if __name__ == "__main__":
    key = jax.random.PRNGKey(0)
    kx, kp = jax.random.split(key)
    # Spatial size must be 28x28 (FC expects 64*7*7 after two 2x2 pools); batch kept small.
    x = jax.random.normal(kx, (2, 1, 28, 28), jnp.float32)
    params = init_params(kp)
    prep = prepare_params(params)

    y = jax.jit(cnn_forward)(x, prep)
    y = jax.block_until_ready(y)
    assert y.shape == (2, 10)

    y_ref = cnn_reference(x, params)
    # bf16 matmul path vs f32 reference.
    np.testing.assert_allclose(np.asarray(y, np.float32), np.asarray(y_ref),
                               rtol=5e-2, atol=3e-2)

    print("KERNEL_OK")
</pallas_src>

<mosaic_0001>
module attributes {stable_mosaic.version = 11 : i64} {
  func.func @_conv_relu_pool_kernel(%arg0: i32, %arg1: memref<2x896x40xbf16, #tpu.memory_space<vmem>>, %arg2: memref<1x40x32xbf16, #tpu.memory_space<vmem>>, %arg3: memref<1x32xf32, #tpu.memory_space<vmem>>, %arg4: memref<2x14x14x32xbf16, #tpu.memory_space<vmem>>, %arg5: memref<2x896x32xf32, #tpu.memory_space<vmem>>, %arg6: memref<2x448x32xf32, #tpu.memory_space<vmem>>) attributes {dimension_semantics = [#tpu.dimension_semantics<parallel>], iteration_bounds = array<i64: 1>, scalar_prefetch = 0 : i64, scratch_operands = 2 : i64, tpu.core_type = #tpu.core_type<tc>, window_params = [{transform_indices = @transform_0, window_bounds = array<i64: 2, 896, 40>}, {pipeline_mode = #tpu.pipeline_mode<synchronous>, transform_indices = @transform_1, window_bounds = array<i64: 1, 40, 32>}, {pipeline_mode = #tpu.pipeline_mode<synchronous>, transform_indices = @transform_2, window_bounds = array<i64: 1, 32>}, {transform_indices = @transform_3, window_bounds = array<i64: 2, 14, 14, 32>}]} {
    %cst = arith.constant 0.000000e+00 : f32
    %0 = vector.broadcast %cst : f32 to vector<256x32xf32>
    %c0 = arith.constant 0 : index
    %c0_0 = arith.constant 0 : index
    %c0_1 = arith.constant 0 : index
    %1 = vector.load %arg1[%c0, %c0_0, %c0_1] : memref<2x896x40xbf16, #tpu.memory_space<vmem>>, vector<2x128x40xbf16>
    %2 = vector.shape_cast %1 : vector<2x128x40xbf16> to vector<256x40xbf16>
    %c0_2 = arith.constant 0 : index
    %c0_3 = arith.constant 0 : index
    %c0_4 = arith.constant 0 : index
    %3 = vector.load %arg2[%c0_2, %c0_3, %c0_4] : memref<1x40x32xbf16, #tpu.memory_space<vmem>>, vector<1x40x32xbf16>
    %4 = vector.shape_cast %3 : vector<1x40x32xbf16> to vector<40x32xbf16>
    %cst_5 = arith.constant dense<0.000000e+00> : vector<256x32xf32>
    %5 = tpu.matmul %2, %4, %cst_5 {dimension_numbers = #tpu.dot_dimension_numbers<[1], [0], [0], [1], [0, 0, 1, 1], [], []>} : vector<256x40xbf16>, vector<40x32xbf16>, vector<256x32xf32> -> vector<256x32xf32>
    %6 = arith.addf %0, %5 : vector<256x32xf32>
    %c0_6 = arith.constant 0 : index
    %c0_7 = arith.constant 0 : index
    %7 = vector.load %arg3[%c0_6, %c0_7] : memref<1x32xf32, #tpu.memory_space<vmem>>, vector<1x32xf32>
    %8 = vector.broadcast %7 : vector<1x32xf32> to vector<256x32xf32>
    %9 = arith.addf %6, %8 : vector<256x32xf32>
    %cst_8 = arith.constant 0.000000e+00 : f32
    %10 = vector.broadcast %cst_8 : f32 to vector<256x32xf32>
    %11 = arith.maximumf %9, %10 : vector<256x32xf32>
    %12 = vector.shape_cast %11 : vector<256x32xf32> to vector<2x128x32xf32>
    %c0_9 = arith.constant 0 : index
    %c0_10 = arith.constant 0 : index
    %c0_11 = arith.constant 0 : index
    %13 = vector.load %arg5[%c0_9, %c0_10, %c0_11] : memref<2x896x32xf32, #tpu.memory_space<vmem>>, vector<2x128x32xf32>
    tpu.vector_store %arg5[%c0_9, %c0_10, %c0_11], %12 {strides = array<i32>} : memref<2x896x32xf32, #tpu.memory_space<vmem>>, vector<2x128x32xf32>,
    %cst_12 = arith.constant 0.000000e+00 : f32
    %14 = vector.broadcast %cst_12 : f32 to vector<256x32xf32>
    %c0_13 = arith.constant 0 : index
    %c128 = arith.constant 128 : index
    %c0_14 = arith.constant 0 : index
    %15 = vector.load %arg1[%c0_13, %c128, %c0_14] : memref<2x896x40xbf16, #tpu.memory_space<vmem>>, vector<2x128x40xbf16>
    %16 = vector.shape_cast %15 : vector<2x128x40xbf16> to vector<256x40xbf16>
    %c0_15 = arith.constant 0 : index
    %c0_16 = arith.constant 0 : index
    %c0_17 = arith.constant 0 : index
    %17 = vector.load %arg2[%c0_15, %c0_16, %c0_17] : memref<1x40x32xbf16, #tpu.memory_space<vmem>>, vector<1x40x32xbf16>
    %18 = vector.shape_cast %17 : vector<1x40x32xbf16> to vector<40x32xbf16>
    %cst_18 = arith.constant dense<0.000000e+00> : vector<256x32xf32>
    %19 = tpu.matmul %16, %18, %cst_18 {dimension_numbers = #tpu.dot_dimension_numbers<[1], [0], [0], [1], [0, 0, 1, 1], [], []>} : vector<256x40xbf16>, vector<40x32xbf16>, vector<256x32xf32> -> vector<256x32xf32>
    %20 = arith.addf %14, %19 : vector<256x32xf32>
    %c0_19 = arith.constant 0 : index
    %c0_20 = arith.constant 0 : index
    %21 = vector.load %arg3[%c0_19, %c0_20] : memref<1x32xf32, #tpu.memory_space<vmem>>, vector<1x32xf32>
    %22 = vector.broadcast %21 : vector<1x32xf32> to vector<256x32xf32>
    %23 = arith.addf %20, %22 : vector<256x32xf32>
    %cst_21 = arith.constant 0.000000e+00 : f32
    %24 = vector.broadcast %cst_21 : f32 to vector<256x32xf32>
    %25 = arith.maximumf %23, %24 : vector<256x32xf32>
    %26 = vector.shape_cast %25 : vector<256x32xf32> to vector<2x128x32xf32>
    %c0_22 = arith.constant 0 : index
    %c128_23 = arith.constant 128 : index
    %c0_24 = arith.constant 0 : index
    %27 = vector.load %arg5[%c0_22, %c128_23, %c0_24] : memref<2x896x32xf32, #tpu.memory_space<vmem>>, vector<2x128x32xf32>
    tpu.vector_store %arg5[%c0_22, %c128_23, %c0_24], %26 {strides = array<i32>} : memref<2x896x32xf32, #tpu.memory_space<vmem>>, vector<2x128x32xf32>,
    %cst_25 = arith.constant 0.000000e+00 : f32
    %28 = vector.broadcast %cst_25 : f32 to vector<256x32xf32>
    %c0_26 = arith.constant 0 : index
    %c256 = arith.constant 256 : index
    %c0_27 = arith.constant 0 : index
    %29 = vector.load %arg1[%c0_26, %c256, %c0_27] : memref<2x896x40xbf16, #tpu.memory_space<vmem>>, vector<2x128x40xbf16>
    %30 = vector.shape_cast %29 : vector<2x128x40xbf16> to vector<256x40xbf16>
    %c0_28 = arith.constant 0 : index
    %c0_29 = arith.constant 0 : index
    %c0_30 = arith.constant 0 : index
    %31 = vector.load %arg2[%c0_28, %c0_29, %c0_30] : memref<1x40x32xbf16, #tpu.memory_space<vmem>>, vector<1x40x32xbf16>
    %32 = vector.shape_cast %31 : vector<1x40x32xbf16> to vector<40x32xbf16>
    %cst_31 = arith.constant dense<0.000000e+00> : vector<256x32xf32>
    %33 = tpu.matmul %30, %32, %cst_31 {dimension_numbers = #tpu.dot_dimension_numbers<[1], [0], [0], [1], [0, 0, 1, 1], [], []>} : vector<256x40xbf16>, vector<40x32xbf16>, vector<256x32xf32> -> vector<256x32xf32>
    %34 = arith.addf %28, %33 : vector<256x32xf32>
    %c0_32 = arith.constant 0 : index
    %c0_33 = arith.constant 0 : index
    %35 = vector.load %arg3[%c0_32, %c0_33] : memref<1x32xf32, #tpu.memory_space<vmem>>, vector<1x32xf32>
    %36 = vector.broadcast %35 : vector<1x32xf32> to vector<256x32xf32>
    %37 = arith.addf %34, %36 : vector<256x32xf32>
    %cst_34 = arith.constant 0.000000e+00 : f32
    %38 = vector.broadcast %cst_34 : f32 to vector<256x32xf32>
    %39 = arith.maximumf %37, %38 : vector<256x32xf32>
    %40 = vector.shape_cast %39 : vector<256x32xf32> to vector<2x128x32xf32>
    %c0_35 = arith.constant 0 : index
    %c256_36 = arith.constant 256 : index
    %c0_37 = arith.constant 0 : index
    %41 = vector.load %arg5[%c0_35, %c256_36, %c0_37] : memref<2x896x32xf32, #tpu.memory_space<vmem>>, vector<2x128x32xf32>
    tpu.vector_store %arg5[%c0_35, %c256_36, %c0_37], %40 {strides = array<i32>} : memref<2x896x32xf32, #tpu.memory_space<vmem>>, vector<2x128x32xf32>,
    %cst_38 = arith.constant 0.000000e+00 : f32
    %42 = vector.broadcast %cst_38 : f32 to vector<256x32xf32>
    %c0_39 = arith.constant 0 : index
    %c384 = arith.constant 384 : index
    %c0_40 = arith.constant 0 : index
    %43 = vector.load %arg1[%c0_39, %c384, %c0_40] : memref<2x896x40xbf16, #tpu.memory_space<vmem>>, vector<2x128x40xbf16>
    %44 = vector.shape_cast %43 : vector<2x128x40xbf16> to vector<256x40xbf16>
    %c0_41 = arith.constant 0 : index
    %c0_42 = arith.constant 0 : index
    %c0_43 = arith.constant 0 : index
    %45 = vector.load %arg2[%c0_41, %c0_42, %c0_43] : memref<1x40x32xbf16, #tpu.memory_space<vmem>>, vector<1x40x32xbf16>
    %46 = vector.shape_cast %45 : vector<1x40x32xbf16> to vector<40x32xbf16>
    %cst_44 = arith.constant dense<0.000000e+00> : vector<256x32xf32>
    %47 = tpu.matmul %44, %46, %cst_44 {dimension_numbers = #tpu.dot_dimension_numbers<[1], [0], [0], [1], [0, 0, 1, 1], [], []>} : vector<256x40xbf16>, vector<40x32xbf16>, vector<256x32xf32> -> vector<256x32xf32>
    %48 = arith.addf %42, %47 : vector<256x32xf32>
    %c0_45 = arith.constant 0 : index
    %c0_46 = arith.constant 0 : index
    %49 = vector.load %arg3[%c0_45, %c0_46] : memref<1x32xf32, #tpu.memory_space<vmem>>, vector<1x32xf32>
    %50 = vector.broadcast %49 : vector<1x32xf32> to vector<256x32xf32>
    %51 = arith.addf %48, %50 : vector<256x32xf32>
    %cst_47 = arith.constant 0.000000e+00 : f32
    %52 = vector.broadcast %cst_47 : f32 to vector<256x32xf32>
    %53 = arith.maximumf %51, %52 : vector<256x32xf32>
    %54 = vector.shape_cast %53 : vector<256x32xf32> to vector<2x128x32xf32>
    %c0_48 = arith.constant 0 : index
    %c384_49 = arith.constant 384 : index
    %c0_50 = arith.constant 0 : index
    %55 = vector.load %arg5[%c0_48, %c384_49, %c0_50] : memref<2x896x32xf32, #tpu.memory_space<vmem>>, vector<2x128x32xf32>
    tpu.vector_store %arg5[%c0_48, %c384_49, %c0_50], %54 {strides = array<i32>} : memref<2x896x32xf32, #tpu.memory_space<vmem>>, vector<2x128x32xf32>,
    %cst_51 = arith.constant 0.000000e+00 : f32
    %56 = vector.broadcast %cst_51 : f32 to vector<256x32xf32>
    %c0_52 = arith.constant 0 : index
    %c512 = arith.constant 512 : index
    %c0_53 = arith.constant 0 : index
    %57 = vector.load %arg1[%c0_52, %c512, %c0_53] : memref<2x896x40xbf16, #tpu.memory_space<vmem>>, vector<2x128x40xbf16>
    %58 = vector.shape_cast %57 : vector<2x128x40xbf16> to vector<256x40xbf16>
    %c0_54 = arith.constant 0 : index
    %c0_55 = arith.constant 0 : index
    %c0_56 = arith.constant 0 : index
    %59 = vector.load %arg2[%c0_54, %c0_55, %c0_56] : memref<1x40x32xbf16, #tpu.memory_space<vmem>>, vector<1x40x32xbf16>
    %60 = vector.shape_cast %59 : vector<1x40x32xbf16> to vector<40x32xbf16>
    %cst_57 = arith.constant dense<0.000000e+00> : vector<256x32xf32>
    %61 = tpu.matmul %58, %60, %cst_57 {dimension_numbers = #tpu.dot_dimension_numbers<[1], [0], [0], [1], [0, 0, 1, 1], [], []>} : vector<256x40xbf16>, vector<40x32xbf16>, vector<256x32xf32> -> vector<256x32xf32>
    %62 = arith.addf %56, %61 : vector<256x32xf32>
    %c0_58 = arith.constant 0 : index
    %c0_59 = arith.constant 0 : index
    %63 = vector.load %arg3[%c0_58, %c0_59] : memref<1x32xf32, #tpu.memory_space<vmem>>, vector<1x32xf32>
    %64 = vector.broadcast %63 : vector<1x32xf32> to vector<256x32xf32>
    %65 = arith.addf %62, %64 : vector<256x32xf32>
    %cst_60 = arith.constant 0.000000e+00 : f32
    %66 = vector.broadcast %cst_60 : f32 to vector<256x32xf32>
    %67 = arith.maximumf %65, %66 : vector<256x32xf32>
    %68 = vector.shape_cast %67 : vector<256x32xf32> to vector<2x128x32xf32>
    %c0_61 = arith.constant 0 : index
    %c512_62 = arith.constant 512 : index
    %c0_63 = arith.constant 0 : index
    %69 = vector.load %arg5[%c0_61, %c512_62, %c0_63] : memref<2x896x32xf32, #tpu.memory_space<vmem>>, vector<2x128x32xf32>
    tpu.vector_store %arg5[%c0_61, %c512_62, %c0_63], %68 {strides = array<i32>} : memref<2x896x32xf32, #tpu.memory_space<vmem>>, vector<2x128x32xf32>,
    %cst_64 = arith.constant 0.000000e+00 : f32
    %70 = vector.broadcast %cst_64 : f32 to vector<256x32xf32>
    %c0_65 = arith.constant 0 : index
    %c640 = arith.constant 640 : index
    %c0_66 = arith.constant 0 : index
    %71 = vector.load %arg1[%c0_65, %c640, %c0_66] : memref<2x896x40xbf16, #tpu.memory_space<vmem>>, vector<2x128x40xbf16>
    %72 = vector.shape_cast %71 : vector<2x128x40xbf16> to vector<256x40xbf16>
    %c0_67 = arith.constant 0 : index
    %c0_68 = arith.constant 0 : index
    %c0_69 = arith.constant 0 : index
    %73 = vector.load %arg2[%c0_67, %c0_68, %c0_69] : memref<1x40x32xbf16, #tpu.memory_space<vmem>>, vector<1x40x32xbf16>
    %74 = vector.shape_cast %73 : vector<1x40x32xbf16> to vector<40x32xbf16>
    %cst_70 = arith.constant dense<0.000000e+00> : vector<256x32xf32>
    %75 = tpu.matmul %72, %74, %cst_70 {dimension_numbers = #tpu.dot_dimension_numbers<[1], [0], [0], [1], [0, 0, 1, 1], [], []>} : vector<256x40xbf16>, vector<40x32xbf16>, vector<256x32xf32> -> vector<256x32xf32>
    %76 = arith.addf %70, %75 : vector<256x32xf32>
    %c0_71 = arith.constant 0 : index
    %c0_72 = arith.constant 0 : index
    %77 = vector.load %arg3[%c0_71, %c0_72] : memref<1x32xf32, #tpu.memory_space<vmem>>, vector<1x32xf32>
    %78 = vector.broadcast %77 : vector<1x32xf32> to vector<256x32xf32>
    %79 = arith.addf %76, %78 : vector<256x32xf32>
    %cst_73 = arith.constant 0.000000e+00 : f32
    %80 = vector.broadcast %cst_73 : f32 to vector<256x32xf32>
    %81 = arith.maximumf %79, %80 : vector<256x32xf32>
    %82 = vector.shape_cast %81 : vector<256x32xf32> to vector<2x128x32xf32>
    %c0_74 = arith.constant 0 : index
    %c640_75 = arith.constant 640 : index
    %c0_76 = arith.constant 0 : index
    %83 = vector.load %arg5[%c0_74, %c640_75, %c0_76] : memref<2x896x32xf32, #tpu.memory_space<vmem>>, vector<2x128x32xf32>
    tpu.vector_store %arg5[%c0_74, %c640_75, %c0_76], %82 {strides = array<i32>} : memref<2x896x32xf32, #tpu.memory_space<vmem>>, vector<2x128x32xf32>,
    %cst_77 = arith.constant 0.000000e+00 : f32
    %84 = vector.broadcast %cst_77 : f32 to vector<256x32xf32>
    %c0_78 = arith.constant 0 : index
    %c768 = arith.constant 768 : index
    %c0_79 = arith.constant 0 : index
    %85 = vector.load %arg1[%c0_78, %c768, %c0_79] : memref<2x896x40xbf16, #tpu.memory_space<vmem>>, vector<2x128x40xbf16>
    %86 = vector.shape_cast %85 : vector<2x128x40xbf16> to vector<256x40xbf16>
    %c0_80 = arith.constant 0 : index
    %c0_81 = arith.constant 0 : index
    %c0_82 = arith.constant 0 : index
    %87 = vector.load %arg2[%c0_80, %c0_81, %c0_82] : memref<1x40x32xbf16, #tpu.memory_space<vmem>>, vector<1x40x32xbf16>
    %88 = vector.shape_cast %87 : vector<1x40x32xbf16> to vector<40x32xbf16>
    %cst_83 = arith.constant dense<0.000000e+00> : vector<256x32xf32>
    %89 = tpu.matmul %86, %88, %cst_83 {dimension_numbers = #tpu.dot_dimension_numbers<[1], [0], [0], [1], [0, 0, 1, 1], [], []>} : vector<256x40xbf16>, vector<40x32xbf16>, vector<256x32xf32> -> vector<256x32xf32>
    %90 = arith.addf %84, %89 : vector<256x32xf32>
    %c0_84 = arith.constant 0 : index
    %c0_85 = arith.constant 0 : index
    %91 = vector.load %arg3[%c0_84, %c0_85] : memref<1x32xf32, #tpu.memory_space<vmem>>, vector<1x32xf32>
    %92 = vector.broadcast %91 : vector<1x32xf32> to vector<256x32xf32>
    %93 = arith.addf %90, %92 : vector<256x32xf32>
    %cst_86 = arith.constant 0.000000e+00 : f32
    %94 = vector.broadcast %cst_86 : f32 to vector<256x32xf32>
    %95 = arith.maximumf %93, %94 : vector<256x32xf32>
    %96 = vector.shape_cast %95 : vector<256x32xf32> to vector<2x128x32xf32>
    %c0_87 = arith.constant 0 : index
    %c768_88 = arith.constant 768 : index
    %c0_89 = arith.constant 0 : index
    %97 = vector.load %arg5[%c0_87, %c768_88, %c0_89] : memref<2x896x32xf32, #tpu.memory_space<vmem>>, vector<2x128x32xf32>
    tpu.vector_store %arg5[%c0_87, %c768_88, %c0_89], %96 {strides = array<i32>} : memref<2x896x32xf32, #tpu.memory_space<vmem>>, vector<2x128x32xf32>,
    %c0_90 = arith.constant 0 : index
    %c0_91 = arith.constant 0 : index
    %c0_92 = arith.constant 0 : index
    %98 = tpu.strided_load %arg5[%c0_90, %c0_91, %c0_92] {strides = array<i32: 1, 2, 1>} : memref<2x896x32xf32, #tpu.memory_space<vmem>>, vector<2x448x32xf32>
    %c0_93 = arith.constant 0 : index
    %c1 = arith.constant 1 : index
    %c0_94 = arith.constant 0 : index
    %99 = tpu.strided_load %arg5[%c0_93, %c1, %c0_94] {strides = array<i32: 1, 2, 1>} : memref<2x896x32xf32, #tpu.memory_space<vmem>>, vector<2x448x32xf32>
    %100 = arith.maximumf %98, %99 : vector<2x448x32xf32>
    %c0_95 = arith.constant 0 : index
    %c0_96 = arith.constant 0 : index
    %c0_97 = arith.constant 0 : index
    %101 = vector.load %arg6[%c0_95, %c0_96, %c0_97] : memref<2x448x32xf32, #tpu.memory_space<vmem>>, vector<2x448x32xf32>
    tpu.vector_store %arg6[%c0_95, %c0_96, %c0_97], %100 {strides = array<i32>} : memref<2x448x32xf32, #tpu.memory_space<vmem>>, vector<2x448x32xf32>,
    %c0_98 = arith.constant 0 : index
    %c0_99 = arith.constant 0 : index
    %c0_100 = arith.constant 0 : index
    %102 = vector.load %arg6[%c0_98, %c0_99, %c0_100] : memref<2x448x32xf32, #tpu.memory_space<vmem>>, vector<2x16x32xf32>
    %c0_101 = arith.constant 0 : index
    %c16 = arith.constant 16 : index
    %c0_102 = arith.constant 0 : index
    %103 = vector.load %arg6[%c0_101, %c16, %c0_102] : memref<2x448x32xf32, #tpu.memory_space<vmem>>, vector<2x16x32xf32>
    %104 = arith.maximumf %102, %103 : vector<2x16x32xf32>
    %105 = vector.extract_strided_slice %104 {offsets = [0, 0, 0], sizes = [2, 14, 32], strides = [1, 1, 1]} : vector<2x16x32xf32> to vector<2x14x32xf32>
    %106 = arith.truncf %105 : vector<2x14x32xf32> to vector<2x14x32xbf16>
    %c0_103 = arith.constant 0 : index
    %c0_104 = arith.constant 0 : index
    %c0_105 = arith.constant 0 : index
    %c0_106 = arith.constant 0 : index
    %107 = vector.load %arg4[%c0_103, %c0_104, %c0_105, %c0_106] : memref<2x14x14x32xbf16, #tpu.memory_space<vmem>>, vector<2x1x14x32xbf16>
    %108 = vector.shape_cast %107 : vector<2x1x14x32xbf16> to vector<2x14x32xbf16>
    %109 = vector.shape_cast %106 : vector<2x14x32xbf16> to vector<2x1x14x32xbf16>
    tpu.vector_store %arg4[%c0_103, %c0_104, %c0_105, %c0_106], %109 {strides = array<i32>} : memref<2x14x14x32xbf16, #tpu.memory_space<vmem>>, vector<2x1x14x32xbf16>,
    %c0_107 = arith.constant 0 : index
    %c32 = arith.constant 32 : index
    %c0_108 = arith.constant 0 : index
    %110 = vector.load %arg6[%c0_107, %c32, %c0_108] : memref<2x448x32xf32, #tpu.memory_space<vmem>>, vector<2x16x32xf32>
    %c0_109 = arith.constant 0 : index
    %c48 = arith.constant 48 : index
    %c0_110 = arith.constant 0 : index
    %111 = vector.load %arg6[%c0_109, %c48, %c0_110] : memref<2x448x32xf32, #tpu.memory_space<vmem>>, vector<2x16x32xf32>
    %112 = arith.maximumf %110, %111 : vector<2x16x32xf32>
    %113 = vector.extract_strided_slice %112 {offsets = [0, 0, 0], sizes = [2, 14, 32], strides = [1, 1, 1]} : vector<2x16x32xf32> to vector<2x14x32xf32>
    %114 = arith.truncf %113 : vector<2x14x32xf32> to vector<2x14x32xbf16>
    %c0_111 = arith.constant 0 : index
    %c1_112 = arith.constant 1 : index
    %c0_113 = arith.constant 0 : index
    %c0_114 = arith.constant 0 : index
    %115 = vector.load %arg4[%c0_111, %c1_112, %c0_113, %c0_114] : memref<2x14x14x32xbf16, #tpu.memory_space<vmem>>, vector<2x1x14x32xbf16>
    %116 = vector.shape_cast %115 : vector<2x1x14x32xbf16> to vector<2x14x32xbf16>
    %117 = vector.shape_cast %114 : vector<2x14x32xbf16> to vector<2x1x14x32xbf16>
    tpu.vector_store %arg4[%c0_111, %c1_112, %c0_113, %c0_114], %117 {strides = array<i32>} : memref<2x14x14x32xbf16, #tpu.memory_space<vmem>>, vector<2x1x14x32xbf16>,
    %c0_115 = arith.constant 0 : index
    %c64 = arith.constant 64 : index
    %c0_116 = arith.constant 0 : index
    %118 = vector.load %arg6[%c0_115, %c64, %c0_116] : memref<2x448x32xf32, #tpu.memory_space<vmem>>, vector<2x16x32xf32>
    %c0_117 = arith.constant 0 : index
    %c80 = arith.constant 80 : index
    %c0_118 = arith.constant 0 : index
    %119 = vector.load %arg6[%c0_117, %c80, %c0_118] : memref<2x448x32xf32, #tpu.memory_space<vmem>>, vector<2x16x32xf32>
    %120 = arith.maximumf %118, %119 : vector<2x16x32xf32>
    %121 = vector.extract_strided_slice %120 {offsets = [0, 0, 0], sizes = [2, 14, 32], strides = [1, 1, 1]} : vector<2x16x32xf32> to vector<2x14x32xf32>
    %122 = arith.truncf %121 : vector<2x14x32xf32> to vector<2x14x32xbf16>
    %c0_119 = arith.constant 0 : index
    %c2 = arith.constant 2 : index
    %c0_120 = arith.constant 0 : index
    %c0_121 = arith.constant 0 : index
    %123 = vector.load %arg4[%c0_119, %c2, %c0_120, %c0_121] : memref<2x14x14x32xbf16, #tpu.memory_space<vmem>>, vector<2x1x14x32xbf16>
    %124 = vector.shape_cast %123 : vector<2x1x14x32xbf16> to vector<2x14x32xbf16>
    %125 = vector.shape_cast %122 : vector<2x14x32xbf16> to vector<2x1x14x32xbf16>
    tpu.vector_store %arg4[%c0_119, %c2, %c0_120, %c0_121], %125 {strides = array<i32>} : memref<2x14x14x32xbf16, #tpu.memory_space<vmem>>, vector<2x1x14x32xbf16>,
    %c0_122 = arith.constant 0 : index
    %c96 = arith.constant 96 : index
    %c0_123 = arith.constant 0 : index
    %126 = vector.load %arg6[%c0_122, %c96, %c0_123] : memref<2x448x32xf32, #tpu.memory_space<vmem>>, vector<2x16x32xf32>
    %c0_124 = arith.constant 0 : index
    %c112 = arith.constant 112 : index
    %c0_125 = arith.constant 0 : index
    %127 = vector.load %arg6[%c0_124, %c112, %c0_125] : memref<2x448x32xf32, #tpu.memory_space<vmem>>, vector<2x16x32xf32>
    %128 = arith.maximumf %126, %127 : vector<2x16x32xf32>
    %129 = vector.extract_strided_slice %128 {offsets = [0, 0, 0], sizes = [2, 14, 32], strides = [1, 1, 1]} : vector<2x16x32xf32> to vector<2x14x32xf32>
    %130 = arith.truncf %129 : vector<2x14x32xf32> to vector<2x14x32xbf16>
    %c0_126 = arith.constant 0 : index
    %c3 = arith.constant 3 : index
    %c0_127 = arith.constant 0 : index
    %c0_128 = arith.constant 0 : index
    %131 = vector.load %arg4[%c0_126, %c3, %c0_127, %c0_128] : memref<2x14x14x32xbf16, #tpu.memory_space<vmem>>, vector<2x1x14x32xbf16>
    %132 = vector.shape_cast %131 : vector<2x1x14x32xbf16> to vector<2x14x32xbf16>
    %133 = vector.shape_cast %130 : vector<2x14x32xbf16> to vector<2x1x14x32xbf16>
    tpu.vector_store %arg4[%c0_126, %c3, %c0_127, %c0_128], %133 {strides = array<i32>} : memref<2x14x14x32xbf16, #tpu.memory_space<vmem>>, vector<2x1x14x32xbf16>,
    %c0_129 = arith.constant 0 : index
    %c128_130 = arith.constant 128 : index
    %c0_131 = arith.constant 0 : index
    %134 = vector.load %arg6[%c0_129, %c128_130, %c0_131] : memref<2x448x32xf32, #tpu.memory_space<vmem>>, vector<2x16x32xf32>
    %c0_132 = arith.constant 0 : index
    %c144 = arith.constant 144 : index
    %c0_133 = arith.constant 0 : index
    %135 = vector.load %arg6[%c0_132, %c144, %c0_133] : memref<2x448x32xf32, #tpu.memory_space<vmem>>, vector<2x16x32xf32>
    %136 = arith.maximumf %134, %135 : vector<2x16x32xf32>
    %137 = vector.extract_strided_slice %136 {offsets = [0, 0, 0], sizes = [2, 14, 32], strides = [1, 1, 1]} : vector<2x16x32xf32> to vector<2x14x32xf32>
    %138 = arith.truncf %137 : vector<2x14x32xf32> to vector<2x14x32xbf16>
    %c0_134 = arith.constant 0 : index
    %c4 = arith.constant 4 : index
    %c0_135 = arith.constant 0 : index
    %c0_136 = arith.constant 0 : index
    %139 = vector.load %arg4[%c0_134, %c4, %c0_135, %c0_136] : memref<2x14x14x32xbf16, #tpu.memory_space<vmem>>, vector<2x1x14x32xbf16>
    %140 = vector.shape_cast %139 : vector<2x1x14x32xbf16> to vector<2x14x32xbf16>
    %141 = vector.shape_cast %138 : vector<2x14x32xbf16> to vector<2x1x14x32xbf16>
    tpu.vector_store %arg4[%c0_134, %c4, %c0_135, %c0_136], %141 {strides = array<i32>} : memref<2x14x14x32xbf16, #tpu.memory_space<vmem>>, vector<2x1x14x32xbf16>,
    %c0_137 = arith.constant 0 : index
    %c160 = arith.constant 160 : index
    %c0_138 = arith.constant 0 : index
    %142 = vector.load %arg6[%c0_137, %c160, %c0_138] : memref<2x448x32xf32, #tpu.memory_space<vmem>>, vector<2x16x32xf32>
    %c0_139 = arith.constant 0 : index
    %c176 = arith.constant 176 : index
    %c0_140 = arith.constant 0 : index
    %143 = vector.load %arg6[%c0_139, %c176, %c0_140] : memref<2x448x32xf32, #tpu.memory_space<vmem>>, vector<2x16x32xf32>
    %144 = arith.maximumf %142, %143 : vector<2x16x32xf32>
    %145 = vector.extract_strided_slice %144 {offsets = [0, 0, 0], sizes = [2, 14, 32], strides = [1, 1, 1]} : vector<2x16x32xf32> to vector<2x14x32xf32>
    %146 = arith.truncf %145 : vector<2x14x32xf32> to vector<2x14x32xbf16>
    %c0_141 = arith.constant 0 : index
    %c5 = arith.constant 5 : index
    %c0_142 = arith.constant 0 : index
    %c0_143 = arith.constant 0 : index
    %147 = vector.load %arg4[%c0_141, %c5, %c0_142, %c0_143] : memref<2x14x14x32xbf16, #tpu.memory_space<vmem>>, vector<2x1x14x32xbf16>
    %148 = vector.shape_cast %147 : vector<2x1x14x32xbf16> to vector<2x14x32xbf16>
    %149 = vector.shape_cast %146 : vector<2x14x32xbf16> to vector<2x1x14x32xbf16>
    tpu.vector_store %arg4[%c0_141, %c5, %c0_142, %c0_143], %149 {strides = array<i32>} : memref<2x14x14x32xbf16, #tpu.memory_space<vmem>>, vector<2x1x14x32xbf16>,
    %c0_144 = arith.constant 0 : index
    %c192 = arith.constant 192 : index
    %c0_145 = arith.constant 0 : index
    %150 = vector.load %arg6[%c0_144, %c192, %c0_145] : memref<2x448x32xf32, #tpu.memory_space<vmem>>, vector<2x16x32xf32>
    %c0_146 = arith.constant 0 : index
    %c208 = arith.constant 208 : index
    %c0_147 = arith.constant 0 : index
    %151 = vector.load %arg6[%c0_146, %c208, %c0_147] : memref<2x448x32xf32, #tpu.memory_space<vmem>>, vector<2x16x32xf32>
    %152 = arith.maximumf %150, %151 : vector<2x16x32xf32>
    %153 = vector.extract_strided_slice %152 {offsets = [0, 0, 0], sizes = [2, 14, 32], strides = [1, 1, 1]} : vector<2x16x32xf32> to vector<2x14x32xf32>
    %154 = arith.truncf %153 : vector<2x14x32xf32> to vector<2x14x32xbf16>
    %c0_148 = arith.constant 0 : index
    %c6 = arith.constant 6 : index
    %c0_149 = arith.constant 0 : index
    %c0_150 = arith.constant 0 : index
    %155 = vector.load %arg4[%c0_148, %c6, %c0_149, %c0_150] : memref<2x14x14x32xbf16, #tpu.memory_space<vmem>>, vector<2x1x14x32xbf16>
    %156 = vector.shape_cast %155 : vector<2x1x14x32xbf16> to vector<2x14x32xbf16>
    %157 = vector.shape_cast %154 : vector<2x14x32xbf16> to vector<2x1x14x32xbf16>
    tpu.vector_store %arg4[%c0_148, %c6, %c0_149, %c0_150], %157 {strides = array<i32>} : memref<2x14x14x32xbf16, #tpu.memory_space<vmem>>, vector<2x1x14x32xbf16>,
    %c0_151 = arith.constant 0 : index
    %c224 = arith.constant 224 : index
    %c0_152 = arith.constant 0 : index
    %158 = vector.load %arg6[%c0_151, %c224, %c0_152] : memref<2x448x32xf32, #tpu.memory_space<vmem>>, vector<2x16x32xf32>
    %c0_153 = arith.constant 0 : index
    %c240 = arith.constant 240 : index
    %c0_154 = arith.constant 0 : index
    %159 = vector.load %arg6[%c0_153, %c240, %c0_154] : memref<2x448x32xf32, #tpu.memory_space<vmem>>, vector<2x16x32xf32>
    %160 = arith.maximumf %158, %159 : vector<2x16x32xf32>
    %161 = vector.extract_strided_slice %160 {offsets = [0, 0, 0], sizes = [2, 14, 32], strides = [1, 1, 1]} : vector<2x16x32xf32> to vector<2x14x32xf32>
    %162 = arith.truncf %161 : vector<2x14x32xf32> to vector<2x14x32xbf16>
    %c0_155 = arith.constant 0 : index
    %c7 = arith.constant 7 : index
    %c0_156 = arith.constant 0 : index
    %c0_157 = arith.constant 0 : index
    %163 = vector.load %arg4[%c0_155, %c7, %c0_156, %c0_157] : memref<2x14x14x32xbf16, #tpu.memory_space<vmem>>, vector<2x1x14x32xbf16>
    %164 = vector.shape_cast %163 : vector<2x1x14x32xbf16> to vector<2x14x32xbf16>
    %165 = vector.shape_cast %162 : vector<2x14x32xbf16> to vector<2x1x14x32xbf16>
    tpu.vector_store %arg4[%c0_155, %c7, %c0_156, %c0_157], %165 {strides = array<i32>} : memref<2x14x14x32xbf16, #tpu.memory_space<vmem>>, vector<2x1x14x32xbf16>,
    %c0_158 = arith.constant 0 : index
    %c256_159 = arith.constant 256 : index
    %c0_160 = arith.constant 0 : index
    %166 = vector.load %arg6[%c0_158, %c256_159, %c0_160] : memref<2x448x32xf32, #tpu.memory_space<vmem>>, vector<2x16x32xf32>
    %c0_161 = arith.constant 0 : index
    %c272 = arith.constant 272 : index
    %c0_162 = arith.constant 0 : index
    %167 = vector.load %arg6[%c0_161, %c272, %c0_162] : memref<2x448x32xf32, #tpu.memory_space<vmem>>, vector<2x16x32xf32>
    %168 = arith.maximumf %166, %167 : vector<2x16x32xf32>
    %169 = vector.extract_strided_slice %168 {offsets = [0, 0, 0], sizes = [2, 14, 32], strides = [1, 1, 1]} : vector<2x16x32xf32> to vector<2x14x32xf32>
    %170 = arith.truncf %169 : vector<2x14x32xf32> to vector<2x14x32xbf16>
    %c0_163 = arith.constant 0 : index
    %c8 = arith.constant 8 : index
    %c0_164 = arith.constant 0 : index
    %c0_165 = arith.constant 0 : index
    %171 = vector.load %arg4[%c0_163, %c8, %c0_164, %c0_165] : memref<2x14x14x32xbf16, #tpu.memory_space<vmem>>, vector<2x1x14x32xbf16>
    %172 = vector.shape_cast %171 : vector<2x1x14x32xbf16> to vector<2x14x32xbf16>
    %173 = vector.shape_cast %170 : vector<2x14x32xbf16> to vector<2x1x14x32xbf16>
    tpu.vector_store %arg4[%c0_163, %c8, %c0_164, %c0_165], %173 {strides = array<i32>} : memref<2x14x14x32xbf16, #tpu.memory_space<vmem>>, vector<2x1x14x32xbf16>,
    %c0_166 = arith.constant 0 : index
    %c288 = arith.constant 288 : index
    %c0_167 = arith.constant 0 : index
    %174 = vector.load %arg6[%c0_166, %c288, %c0_167] : memref<2x448x32xf32, #tpu.memory_space<vmem>>, vector<2x16x32xf32>
    %c0_168 = arith.constant 0 : index
    %c304 = arith.constant 304 : index
    %c0_169 = arith.constant 0 : index
    %175 = vector.load %arg6[%c0_168, %c304, %c0_169] : memref<2x448x32xf32, #tpu.memory_space<vmem>>, vector<2x16x32xf32>
    %176 = arith.maximumf %174, %175 : vector<2x16x32xf32>
    %177 = vector.extract_strided_slice %176 {offsets = [0, 0, 0], sizes = [2, 14, 32], strides = [1, 1, 1]} : vector<2x16x32xf32> to vector<2x14x32xf32>
    %178 = arith.truncf %177 : vector<2x14x32xf32> to vector<2x14x32xbf16>
    %c0_170 = arith.constant 0 : index
    %c9 = arith.constant 9 : index
    %c0_171 = arith.constant 0 : index
    %c0_172 = arith.constant 0 : index
    %179 = vector.load %arg4[%c0_170, %c9, %c0_171, %c0_172] : memref<2x14x14x32xbf16, #tpu.memory_space<vmem>>, vector<2x1x14x32xbf16>
    %180 = vector.shape_cast %179 : vector<2x1x14x32xbf16> to vector<2x14x32xbf16>
    %181 = vector.shape_cast %178 : vector<2x14x32xbf16> to vector<2x1x14x32xbf16>
    tpu.vector_store %arg4[%c0_170, %c9, %c0_171, %c0_172], %181 {strides = array<i32>} : memref<2x14x14x32xbf16, #tpu.memory_space<vmem>>, vector<2x1x14x32xbf16>,
    %c0_173 = arith.constant 0 : index
    %c320 = arith.constant 320 : index
    %c0_174 = arith.constant 0 : index
    %182 = vector.load %arg6[%c0_173, %c320, %c0_174] : memref<2x448x32xf32, #tpu.memory_space<vmem>>, vector<2x16x32xf32>
    %c0_175 = arith.constant 0 : index
    %c336 = arith.constant 336 : index
    %c0_176 = arith.constant 0 : index
    %183 = vector.load %arg6[%c0_175, %c336, %c0_176] : memref<2x448x32xf32, #tpu.memory_space<vmem>>, vector<2x16x32xf32>
    %184 = arith.maximumf %182, %183 : vector<2x16x32xf32>
    %185 = vector.extract_strided_slice %184 {offsets = [0, 0, 0], sizes = [2, 14, 32], strides = [1, 1, 1]} : vector<2x16x32xf32> to vector<2x14x32xf32>
    %186 = arith.truncf %185 : vector<2x14x32xf32> to vector<2x14x32xbf16>
    %c0_177 = arith.constant 0 : index
    %c10 = arith.constant 10 : index
    %c0_178 = arith.constant 0 : index
    %c0_179 = arith.constant 0 : index
    %187 = vector.load %arg4[%c0_177, %c10, %c0_178, %c0_179] : memref<2x14x14x32xbf16, #tpu.memory_space<vmem>>, vector<2x1x14x32xbf16>
    %188 = vector.shape_cast %187 : vector<2x1x14x32xbf16> to vector<2x14x32xbf16>
    %189 = vector.shape_cast %186 : vector<2x14x32xbf16> to vector<2x1x14x32xbf16>
    tpu.vector_store %arg4[%c0_177, %c10, %c0_178, %c0_179], %189 {strides = array<i32>} : memref<2x14x14x32xbf16, #tpu.memory_space<vmem>>, vector<2x1x14x32xbf16>,
    %c0_180 = arith.constant 0 : index
    %c352 = arith.constant 352 : index
    %c0_181 = arith.constant 0 : index
    %190 = vector.load %arg6[%c0_180, %c352, %c0_181] : memref<2x448x32xf32, #tpu.memory_space<vmem>>, vector<2x16x32xf32>
    %c0_182 = arith.constant 0 : index
    %c368 = arith.constant 368 : index
    %c0_183 = arith.constant 0 : index
    %191 = vector.load %arg6[%c0_182, %c368, %c0_183] : memref<2x448x32xf32, #tpu.memory_space<vmem>>, vector<2x16x32xf32>
    %192 = arith.maximumf %190, %191 : vector<2x16x32xf32>
    %193 = vector.extract_strided_slice %192 {offsets = [0, 0, 0], sizes = [2, 14, 32], strides = [1, 1, 1]} : vector<2x16x32xf32> to vector<2x14x32xf32>
    %194 = arith.truncf %193 : vector<2x14x32xf32> to vector<2x14x32xbf16>
    %c0_184 = arith.constant 0 : index
    %c11 = arith.constant 11 : index
    %c0_185 = arith.constant 0 : index
    %c0_186 = arith.constant 0 : index
    %195 = vector.load %arg4[%c0_184, %c11, %c0_185, %c0_186] : memref<2x14x14x32xbf16, #tpu.memory_space<vmem>>, vector<2x1x14x32xbf16>
    %196 = vector.shape_cast %195 : vector<2x1x14x32xbf16> to vector<2x14x32xbf16>
    %197 = vector.shape_cast %194 : vector<2x14x32xbf16> to vector<2x1x14x32xbf16>
    tpu.vector_store %arg4[%c0_184, %c11, %c0_185, %c0_186], %197 {strides = array<i32>} : memref<2x14x14x32xbf16, #tpu.memory_space<vmem>>, vector<2x1x14x32xbf16>,
    %c0_187 = arith.constant 0 : index
    %c384_188 = arith.constant 384 : index
    %c0_189 = arith.constant 0 : index
    %198 = vector.load %arg6[%c0_187, %c384_188, %c0_189] : memref<2x448x32xf32, #tpu.memory_space<vmem>>, vector<2x16x32xf32>
    %c0_190 = arith.constant 0 : index
    %c400 = arith.constant 400 : index
    %c0_191 = arith.constant 0 : index
    %199 = vector.load %arg6[%c0_190, %c400, %c0_191] : memref<2x448x32xf32, #tpu.memory_space<vmem>>, vector<2x16x32xf32>
    %200 = arith.maximumf %198, %199 : vector<2x16x32xf32>
    %201 = vector.extract_strided_slice %200 {offsets = [0, 0, 0], sizes = [2, 14, 32], strides = [1, 1, 1]} : vector<2x16x32xf32> to vector<2x14x32xf32>
    %202 = arith.truncf %201 : vector<2x14x32xf32> to vector<2x14x32xbf16>
    %c0_192 = arith.constant 0 : index
    %c12 = arith.constant 12 : index
    %c0_193 = arith.constant 0 : index
    %c0_194 = arith.constant 0 : index
    %203 = vector.load %arg4[%c0_192, %c12, %c0_193, %c0_194] : memref<2x14x14x32xbf16, #tpu.memory_space<vmem>>, vector<2x1x14x32xbf16>
    %204 = vector.shape_cast %203 : vector<2x1x14x32xbf16> to vector<2x14x32xbf16>
    %205 = vector.shape_cast %202 : vector<2x14x32xbf16> to vector<2x1x14x32xbf16>
    tpu.vector_store %arg4[%c0_192, %c12, %c0_193, %c0_194], %205 {strides = array<i32>} : memref<2x14x14x32xbf16, #tpu.memory_space<vmem>>, vector<2x1x14x32xbf16>,
    %c0_195 = arith.constant 0 : index
    %c416 = arith.constant 416 : index
    %c0_196 = arith.constant 0 : index
    %206 = vector.load %arg6[%c0_195, %c416, %c0_196] : memref<2x448x32xf32, #tpu.memory_space<vmem>>, vector<2x16x32xf32>
    %c0_197 = arith.constant 0 : index
    %c432 = arith.constant 432 : index
    %c0_198 = arith.constant 0 : index
    %207 = vector.load %arg6[%c0_197, %c432, %c0_198] : memref<2x448x32xf32, #tpu.memory_space<vmem>>, vector<2x16x32xf32>
    %208 = arith.maximumf %206, %207 : vector<2x16x32xf32>
    %209 = vector.extract_strided_slice %208 {offsets = [0, 0, 0], sizes = [2, 14, 32], strides = [1, 1, 1]} : vector<2x16x32xf32> to vector<2x14x32xf32>
    %210 = arith.truncf %209 : vector<2x14x32xf32> to vector<2x14x32xbf16>
    %c0_199 = arith.constant 0 : index
    %c13 = arith.constant 13 : index
    %c0_200 = arith.constant 0 : index
    %c0_201 = arith.constant 0 : index
    %211 = vector.load %arg4[%c0_199, %c13, %c0_200, %c0_201] : memref<2x14x14x32xbf16, #tpu.memory_space<vmem>>, vector<2x1x14x32xbf16>
    %212 = vector.shape_cast %211 : vector<2x1x14x32xbf16> to vector<2x14x32xbf16>
    %213 = vector.shape_cast %210 : vector<2x14x32xbf16> to vector<2x1x14x32xbf16>
    tpu.vector_store %arg4[%c0_199, %c13, %c0_200, %c0_201], %213 {strides = array<i32>} : memref<2x14x14x32xbf16, #tpu.memory_space<vmem>>, vector<2x1x14x32xbf16>,
    return
  }
  func.func @transform_0(%arg0: i32) -> (i32, i32, i32) {
    %c0_i32 = arith.constant 0 : i32
    %c0_i32_0 = arith.constant 0 : i32
    %c0_i32_1 = arith.constant 0 : i32
    return %arg0, %c0_i32, %c0_i32_0 : i32, i32, i32
  }
  func.func @transform_1(%arg0: i32) -> (i32, i32, i32) {
    %c0_i32 = arith.constant 0 : i32
    %c0_i32_0 = arith.constant 0 : i32
    %c0_i32_1 = arith.constant 0 : i32
    %c0_i32_2 = arith.constant 0 : i32
    return %c0_i32, %c0_i32_0, %c0_i32_1 : i32, i32, i32
  }
  func.func @transform_2(%arg0: i32) -> (i32, i32) {
    %c0_i32 = arith.constant 0 : i32
    %c0_i32_0 = arith.constant 0 : i32
    %c0_i32_1 = arith.constant 0 : i32
    return %c0_i32, %c0_i32_0 : i32, i32
  }
  func.func @transform_3(%arg0: i32) -> (i32, i32, i32, i32) {
    %c0_i32 = arith.constant 0 : i32
    %c0_i32_0 = arith.constant 0 : i32
    %c0_i32_1 = arith.constant 0 : i32
    %c0_i32_2 = arith.constant 0 : i32
    return %arg0, %c0_i32, %c0_i32_0, %c0_i32_1 : i32, i32, i32, i32
  }
}

module attributes {stable_mosaic.version = 11 : i64} {
  func.func @_conv_relu_pool_kernel(%arg0: i32, %arg1: memref<2x288x160xbf16, #tpu.memory_space<vmem>>, %arg2: memref<5x160x64xbf16, #tpu.memory_space<vmem>>, %arg3: memref<1x64xf32, #tpu.memory_space<vmem>>, %arg4: memref<2x7x7x64xbf16, #tpu.memory_space<vmem>>, %arg5: memref<2x224x64xf32, #tpu.memory_space<vmem>>, %arg6: memref<2x112x64xf32, #tpu.memory_space<vmem>>) attributes {dimension_semantics = [#tpu.dimension_semantics<parallel>], iteration_bounds = array<i64: 1>, scalar_prefetch = 0 : i64, scratch_operands = 2 : i64, tpu.core_type = #tpu.core_type<tc>, window_params = [{transform_indices = @transform_0, window_bounds = array<i64: 2, 288, 160>}, {pipeline_mode = #tpu.pipeline_mode<synchronous>, transform_indices = @transform_1, window_bounds = array<i64: 5, 160, 64>}, {pipeline_mode = #tpu.pipeline_mode<synchronous>, transform_indices = @transform_2, window_bounds = array<i64: 1, 64>}, {transform_indices = @transform_3, window_bounds = array<i64: 2, 7, 7, 64>}]} {
    %cst = arith.constant 0.000000e+00 : f32
    %0 = vector.broadcast %cst : f32 to vector<64x64xf32>
    %c0 = arith.constant 0 : index
    %c0_0 = arith.constant 0 : index
    %c0_1 = arith.constant 0 : index
    %1 = vector.load %arg1[%c0, %c0_0, %c0_1] : memref<2x288x160xbf16, #tpu.memory_space<vmem>>, vector<2x32x160xbf16>
    %2 = vector.shape_cast %1 : vector<2x32x160xbf16> to vector<64x160xbf16>
    %c0_2 = arith.constant 0 : index
    %c0_3 = arith.constant 0 : index
    %c0_4 = arith.constant 0 : index
    %3 = vector.load %arg2[%c0_2, %c0_3, %c0_4] : memref<5x160x64xbf16, #tpu.memory_space<vmem>>, vector<1x160x64xbf16>
    %4 = vector.shape_cast %3 : vector<1x160x64xbf16> to vector<160x64xbf16>
    %cst_5 = arith.constant dense<0.000000e+00> : vector<64x64xf32>
    %5 = tpu.matmul %2, %4, %cst_5 {dimension_numbers = #tpu.dot_dimension_numbers<[1], [0], [0], [1], [0, 0, 1, 1], [], []>} : vector<64x160xbf16>, vector<160x64xbf16>, vector<64x64xf32> -> vector<64x64xf32>
    %6 = arith.addf %0, %5 : vector<64x64xf32>
    %c0_6 = arith.constant 0 : index
    %c16 = arith.constant 16 : index
    %c0_7 = arith.constant 0 : index
    %7 = vector.load %arg1[%c0_6, %c16, %c0_7] : memref<2x288x160xbf16, #tpu.memory_space<vmem>>, vector<2x32x160xbf16>
    %8 = vector.shape_cast %7 : vector<2x32x160xbf16> to vector<64x160xbf16>
    %c1 = arith.constant 1 : index
    %c0_8 = arith.constant 0 : index
    %c0_9 = arith.constant 0 : index
    %9 = vector.load %arg2[%c1, %c0_8, %c0_9] : memref<5x160x64xbf16, #tpu.memory_space<vmem>>, vector<1x160x64xbf16>
    %10 = vector.shape_cast %9 : vector<1x160x64xbf16> to vector<160x64xbf16>
    %cst_10 = arith.constant dense<0.000000e+00> : vector<64x64xf32>
    %11 = tpu.matmul %8, %10, %cst_10 {dimension_numbers = #tpu.dot_dimension_numbers<[1], [0], [0], [1], [0, 0, 1, 1], [], []>} : vector<64x160xbf16>, vector<160x64xbf16>, vector<64x64xf32> -> vector<64x64xf32>
    %12 = arith.addf %6, %11 : vector<64x64xf32>
    %c0_11 = arith.constant 0 : index
    %c32 = arith.constant 32 : index
    %c0_12 = arith.constant 0 : index
    %13 = vector.load %arg1[%c0_11, %c32, %c0_12] : memref<2x288x160xbf16, #tpu.memory_space<vmem>>, vector<2x32x160xbf16>
    %14 = vector.shape_cast %13 : vector<2x32x160xbf16> to vector<64x160xbf16>
    %c2 = arith.constant 2 : index
    %c0_13 = arith.constant 0 : index
    %c0_14 = arith.constant 0 : index
    %15 = vector.load %arg2[%c2, %c0_13, %c0_14] : memref<5x160x64xbf16, #tpu.memory_space<vmem>>, vector<1x160x64xbf16>
    %16 = vector.shape_cast %15 : vector<1x160x64xbf16> to vector<160x64xbf16>
    %cst_15 = arith.constant dense<0.000000e+00> : vector<64x64xf32>
    %17 = tpu.matmul %14, %16, %cst_15 {dimension_numbers = #tpu.dot_dimension_numbers<[1], [0], [0], [1], [0, 0, 1, 1], [], []>} : vector<64x160xbf16>, vector<160x64xbf16>, vector<64x64xf32> -> vector<64x64xf32>
    %18 = arith.addf %12, %17 : vector<64x64xf32>
    %c0_16 = arith.constant 0 : index
    %c48 = arith.constant 48 : index
    %c0_17 = arith.constant 0 : index
    %19 = vector.load %arg1[%c0_16, %c48, %c0_17] : memref<2x288x160xbf16, #tpu.memory_space<vmem>>, vector<2x32x160xbf16>
    %20 = vector.shape_cast %19 : vector<2x32x160xbf16> to vector<64x160xbf16>
    %c3 = arith.constant 3 : index
    %c0_18 = arith.constant 0 : index
    %c0_19 = arith.constant 0 : index
    %21 = vector.load %arg2[%c3, %c0_18, %c0_19] : memref<5x160x64xbf16, #tpu.memory_space<vmem>>, vector<1x160x64xbf16>
    %22 = vector.shape_cast %21 : vector<1x160x64xbf16> to vector<160x64xbf16>
    %cst_20 = arith.constant dense<0.000000e+00> : vector<64x64xf32>
    %23 = tpu.matmul %20, %22, %cst_20 {dimension_numbers = #tpu.dot_dimension_numbers<[1], [0], [0], [1], [0, 0, 1, 1], [], []>} : vector<64x160xbf16>, vector<160x64xbf16>, vector<64x64xf32> -> vector<64x64xf32>
    %24 = arith.addf %18, %23 : vector<64x64xf32>
    %c0_21 = arith.constant 0 : index
    %c64 = arith.constant 64 : index
    %c0_22 = arith.constant 0 : index
    %25 = vector.load %arg1[%c0_21, %c64, %c0_22] : memref<2x288x160xbf16, #tpu.memory_space<vmem>>, vector<2x32x160xbf16>
    %26 = vector.shape_cast %25 : vector<2x32x160xbf16> to vector<64x160xbf16>
    %c4 = arith.constant 4 : index
    %c0_23 = arith.constant 0 : index
    %c0_24 = arith.constant 0 : index
    %27 = vector.load %arg2[%c4, %c0_23, %c0_24] : memref<5x160x64xbf16, #tpu.memory_space<vmem>>, vector<1x160x64xbf16>
    %28 = vector.shape_cast %27 : vector<1x160x64xbf16> to vector<160x64xbf16>
    %cst_25 = arith.constant dense<0.000000e+00> : vector<64x64xf32>
    %29 = tpu.matmul %26, %28, %cst_25 {dimension_numbers = #tpu.dot_dimension_numbers<[1], [0], [0], [1], [0, 0, 1, 1], [], []>} : vector<64x160xbf16>, vector<160x64xbf16>, vector<64x64xf32> -> vector<64x64xf32>
    %30 = arith.addf %24, %29 : vector<64x64xf32>
    %c0_26 = arith.constant 0 : index
    %c0_27 = arith.constant 0 : index
    %31 = vector.load %arg3[%c0_26, %c0_27] : memref<1x64xf32, #tpu.memory_space<vmem>>, vector<1x64xf32>
    %32 = vector.broadcast %31 : vector<1x64xf32> to vector<64x64xf32>
    %33 = arith.addf %30, %32 : vector<64x64xf32>
    %cst_28 = arith.constant 0.000000e+00 : f32
    %34 = vector.broadcast %cst_28 : f32 to vector<64x64xf32>
    %35 = arith.maximumf %33, %34 : vector<64x64xf32>
    %36 = vector.shape_cast %35 : vector<64x64xf32> to vector<2x32x64xf32>
    %c0_29 = arith.constant 0 : index
    %c0_30 = arith.constant 0 : index
    %c0_31 = arith.constant 0 : index
    %37 = vector.load %arg5[%c0_29, %c0_30, %c0_31] : memref<2x224x64xf32, #tpu.memory_space<vmem>>, vector<2x32x64xf32>
    tpu.vector_store %arg5[%c0_29, %c0_30, %c0_31], %36 {strides = array<i32>} : memref<2x224x64xf32, #tpu.memory_space<vmem>>, vector<2x32x64xf32>,
    %cst_32 = arith.constant 0.000000e+00 : f32
    %38 = vector.broadcast %cst_32 : f32 to vector<64x64xf32>
    %c0_33 = arith.constant 0 : index
    %c32_34 = arith.constant 32 : index
    %c0_35 = arith.constant 0 : index
    %39 = vector.load %arg1[%c0_33, %c32_34, %c0_35] : memref<2x288x160xbf16, #tpu.memory_space<vmem>>, vector<2x32x160xbf16>
    %40 = vector.shape_cast %39 : vector<2x32x160xbf16> to vector<64x160xbf16>
    %c0_36 = arith.constant 0 : index
    %c0_37 = arith.constant 0 : index
    %c0_38 = arith.constant 0 : index
    %41 = vector.load %arg2[%c0_36, %c0_37, %c0_38] : memref<5x160x64xbf16, #tpu.memory_space<vmem>>, vector<1x160x64xbf16>
    %42 = vector.shape_cast %41 : vector<1x160x64xbf16> to vector<160x64xbf16>
    %cst_39 = arith.constant dense<0.000000e+00> : vector<64x64xf32>
    %43 = tpu.matmul %40, %42, %cst_39 {dimension_numbers = #tpu.dot_dimension_numbers<[1], [0], [0], [1], [0, 0, 1, 1], [], []>} : vector<64x160xbf16>, vector<160x64xbf16>, vector<64x64xf32> -> vector<64x64xf32>
    %44 = arith.addf %38, %43 : vector<64x64xf32>
    %c0_40 = arith.constant 0 : index
    %c48_41 = arith.constant 48 : index
    %c0_42 = arith.constant 0 : index
    %45 = vector.load %arg1[%c0_40, %c48_41, %c0_42] : memref<2x288x160xbf16, #tpu.memory_space<vmem>>, vector<2x32x160xbf16>
    %46 = vector.shape_cast %45 : vector<2x32x160xbf16> to vector<64x160xbf16>
    %c1_43 = arith.constant 1 : index
    %c0_44 = arith.constant 0 : index
    %c0_45 = arith.constant 0 : index
    %47 = vector.load %arg2[%c1_43, %c0_44, %c0_45] : memref<5x160x64xbf16, #tpu.memory_space<vmem>>, vector<1x160x64xbf16>
    %48 = vector.shape_cast %47 : vector<1x160x64xbf16> to vector<160x64xbf16>
    %cst_46 = arith.constant dense<0.000000e+00> : vector<64x64xf32>
    %49 = tpu.matmul %46, %48, %cst_46 {dimension_numbers = #tpu.dot_dimension_numbers<[1], [0], [0], [1], [0, 0, 1, 1], [], []>} : vector<64x160xbf16>, vector<160x64xbf16>, vector<64x64xf32> -> vector<64x64xf32>
    %50 = arith.addf %44, %49 : vector<64x64xf32>
    %c0_47 = arith.constant 0 : index
    %c64_48 = arith.constant 64 : index
    %c0_49 = arith.constant 0 : index
    %51 = vector.load %arg1[%c0_47, %c64_48, %c0_49] : memref<2x288x160xbf16, #tpu.memory_space<vmem>>, vector<2x32x160xbf16>
    %52 = vector.shape_cast %51 : vector<2x32x160xbf16> to vector<64x160xbf16>
    %c2_50 = arith.constant 2 : index
    %c0_51 = arith.constant 0 : index
    %c0_52 = arith.constant 0 : index
    %53 = vector.load %arg2[%c2_50, %c0_51, %c0_52] : memref<5x160x64xbf16, #tpu.memory_space<vmem>>, vector<1x160x64xbf16>
    %54 = vector.shape_cast %53 : vector<1x160x64xbf16> to vector<160x64xbf16>
    %cst_53 = arith.constant dense<0.000000e+00> : vector<64x64xf32>
    %55 = tpu.matmul %52, %54, %cst_53 {dimension_numbers = #tpu.dot_dimension_numbers<[1], [0], [0], [1], [0, 0, 1, 1], [], []>} : vector<64x160xbf16>, vector<160x64xbf16>, vector<64x64xf32> -> vector<64x64xf32>
    %56 = arith.addf %50, %55 : vector<64x64xf32>
    %c0_54 = arith.constant 0 : index
    %c80 = arith.constant 80 : index
    %c0_55 = arith.constant 0 : index
    %57 = vector.load %arg1[%c0_54, %c80, %c0_55] : memref<2x288x160xbf16, #tpu.memory_space<vmem>>, vector<2x32x160xbf16>
    %58 = vector.shape_cast %57 : vector<2x32x160xbf16> to vector<64x160xbf16>
    %c3_56 = arith.constant 3 : index
    %c0_57 = arith.constant 0 : index
    %c0_58 = arith.constant 0 : index
    %59 = vector.load %arg2[%c3_56, %c0_57, %c0_58] : memref<5x160x64xbf16, #tpu.memory_space<vmem>>, vector<1x160x64xbf16>
    %60 = vector.shape_cast %59 : vector<1x160x64xbf16> to vector<160x64xbf16>
    %cst_59 = arith.constant dense<0.000000e+00> : vector<64x64xf32>
    %61 = tpu.matmul %58, %60, %cst_59 {dimension_numbers = #tpu.dot_dimension_numbers<[1], [0], [0], [1], [0, 0, 1, 1], [], []>} : vector<64x160xbf16>, vector<160x64xbf16>, vector<64x64xf32> -> vector<64x64xf32>
    %62 = arith.addf %56, %61 : vector<64x64xf32>
    %c0_60 = arith.constant 0 : index
    %c96 = arith.constant 96 : index
    %c0_61 = arith.constant 0 : index
    %63 = vector.load %arg1[%c0_60, %c96, %c0_61] : memref<2x288x160xbf16, #tpu.memory_space<vmem>>, vector<2x32x160xbf16>
    %64 = vector.shape_cast %63 : vector<2x32x160xbf16> to vector<64x160xbf16>
    %c4_62 = arith.constant 4 : index
    %c0_63 = arith.constant 0 : index
    %c0_64 = arith.constant 0 : index
    %65 = vector.load %arg2[%c4_62, %c0_63, %c0_64] : memref<5x160x64xbf16, #tpu.memory_space<vmem>>, vector<1x160x64xbf16>
    %66 = vector.shape_cast %65 : vector<1x160x64xbf16> to vector<160x64xbf16>
    %cst_65 = arith.constant dense<0.000000e+00> : vector<64x64xf32>
    %67 = tpu.matmul %64, %66, %cst_65 {dimension_numbers = #tpu.dot_dimension_numbers<[1], [0], [0], [1], [0, 0, 1, 1], [], []>} : vector<64x160xbf16>, vector<160x64xbf16>, vector<64x64xf32> -> vector<64x64xf32>
    %68 = arith.addf %62, %67 : vector<64x64xf32>
    %c0_66 = arith.constant 0 : index
    %c0_67 = arith.constant 0 : index
    %69 = vector.load %arg3[%c0_66, %c0_67] : memref<1x64xf32, #tpu.memory_space<vmem>>, vector<1x64xf32>
    %70 = vector.broadcast %69 : vector<1x64xf32> to vector<64x64xf32>
    %71 = arith.addf %68, %70 : vector<64x64xf32>
    %cst_68 = arith.constant 0.000000e+00 : f32
    %72 = vector.broadcast %cst_68 : f32 to vector<64x64xf32>
    %73 = arith.maximumf %71, %72 : vector<64x64xf32>
    %74 = vector.shape_cast %73 : vector<64x64xf32> to vector<2x32x64xf32>
    %c0_69 = arith.constant 0 : index
    %c32_70 = arith.constant 32 : index
    %c0_71 = arith.constant 0 : index
    %75 = vector.load %arg5[%c0_69, %c32_70, %c0_71] : memref<2x224x64xf32, #tpu.memory_space<vmem>>, vector<2x32x64xf32>
    tpu.vector_store %arg5[%c0_69, %c32_70, %c0_71], %74 {strides = array<i32>} : memref<2x224x64xf32, #tpu.memory_space<vmem>>, vector<2x32x64xf32>,
    %cst_72 = arith.constant 0.000000e+00 : f32
    %76 = vector.broadcast %cst_72 : f32 to vector<64x64xf32>
    %c0_73 = arith.constant 0 : index
    %c64_74 = arith.constant 64 : index
    %c0_75 = arith.constant 0 : index
    %77 = vector.load %arg1[%c0_73, %c64_74, %c0_75] : memref<2x288x160xbf16, #tpu.memory_space<vmem>>, vector<2x32x160xbf16>
    %78 = vector.shape_cast %77 : vector<2x32x160xbf16> to vector<64x160xbf16>
    %c0_76 = arith.constant 0 : index
    %c0_77 = arith.constant 0 : index
    %c0_78 = arith.constant 0 : index
    %79 = vector.load %arg2[%c0_76, %c0_77, %c0_78] : memref<5x160x64xbf16, #tpu.memory_space<vmem>>, vector<1x160x64xbf16>
    %80 = vector.shape_cast %79 : vector<1x160x64xbf16> to vector<160x64xbf16>
    %cst_79 = arith.constant dense<0.000000e+00> : vector<64x64xf32>
    %81 = tpu.matmul %78, %80, %cst_79 {dimension_numbers = #tpu.dot_dimension_numbers<[1], [0], [0], [1], [0, 0, 1, 1], [], []>} : vector<64x160xbf16>, vector<160x64xbf16>, vector<64x64xf32> -> vector<64x64xf32>
    %82 = arith.addf %76, %81 : vector<64x64xf32>
    %c0_80 = arith.constant 0 : index
    %c80_81 = arith.constant 80 : index
    %c0_82 = arith.constant 0 : index
    %83 = vector.load %arg1[%c0_80, %c80_81, %c0_82] : memref<2x288x160xbf16, #tpu.memory_space<vmem>>, vector<2x32x160xbf16>
    %84 = vector.shape_cast %83 : vector<2x32x160xbf16> to vector<64x160xbf16>
    %c1_83 = arith.constant 1 : index
    %c0_84 = arith.constant 0 : index
    %c0_85 = arith.constant 0 : index
    %85 = vector.load %arg2[%c1_83, %c0_84, %c0_85] : memref<5x160x64xbf16, #tpu.memory_space<vmem>>, vector<1x160x64xbf16>
    %86 = vector.shape_cast %85 : vector<1x160x64xbf16> to vector<160x64xbf16>
    %cst_86 = arith.constant dense<0.000000e+00> : vector<64x64xf32>
    %87 = tpu.matmul %84, %86, %cst_86 {dimension_numbers = #tpu.dot_dimension_numbers<[1], [0], [0], [1], [0, 0, 1, 1], [], []>} : vector<64x160xbf16>, vector<160x64xbf16>, vector<64x64xf32> -> vector<64x64xf32>
    %88 = arith.addf %82, %87 : vector<64x64xf32>
    %c0_87 = arith.constant 0 : index
    %c96_88 = arith.constant 96 : index
    %c0_89 = arith.constant 0 : index
    %89 = vector.load %arg1[%c0_87, %c96_88, %c0_89] : memref<2x288x160xbf16, #tpu.memory_space<vmem>>, vector<2x32x160xbf16>
    %90 = vector.shape_cast %89 : vector<2x32x160xbf16> to vector<64x160xbf16>
    %c2_90 = arith.constant 2 : index
    %c0_91 = arith.constant 0 : index
    %c0_92 = arith.constant 0 : index
    %91 = vector.load %arg2[%c2_90, %c0_91, %c0_92] : memref<5x160x64xbf16, #tpu.memory_space<vmem>>, vector<1x160x64xbf16>
    %92 = vector.shape_cast %91 : vector<1x160x64xbf16> to vector<160x64xbf16>
    %cst_93 = arith.constant dense<0.000000e+00> : vector<64x64xf32>
    %93 = tpu.matmul %90, %92, %cst_93 {dimension_numbers = #tpu.dot_dimension_numbers<[1], [0], [0], [1], [0, 0, 1, 1], [], []>} : vector<64x160xbf16>, vector<160x64xbf16>, vector<64x64xf32> -> vector<64x64xf32>
    %94 = arith.addf %88, %93 : vector<64x64xf32>
    %c0_94 = arith.constant 0 : index
    %c112 = arith.constant 112 : index
    %c0_95 = arith.constant 0 : index
    %95 = vector.load %arg1[%c0_94, %c112, %c0_95] : memref<2x288x160xbf16, #tpu.memory_space<vmem>>, vector<2x32x160xbf16>
    %96 = vector.shape_cast %95 : vector<2x32x160xbf16> to vector<64x160xbf16>
    %c3_96 = arith.constant 3 : index
    %c0_97 = arith.constant 0 : index
    %c0_98 = arith.constant 0 : index
    %97 = vector.load %arg2[%c3_96, %c0_97, %c0_98] : memref<5x160x64xbf16, #tpu.memory_space<vmem>>, vector<1x160x64xbf16>
    %98 = vector.shape_cast %97 : vector<1x160x64xbf16> to vector<160x64xbf16>
    %cst_99 = arith.constant dense<0.000000e+00> : vector<64x64xf32>
    %99 = tpu.matmul %96, %98, %cst_99 {dimension_numbers = #tpu.dot_dimension_numbers<[1], [0], [0], [1], [0, 0, 1, 1], [], []>} : vector<64x160xbf16>, vector<160x64xbf16>, vector<64x64xf32> -> vector<64x64xf32>
    %100 = arith.addf %94, %99 : vector<64x64xf32>
    %c0_100 = arith.constant 0 : index
    %c128 = arith.constant 128 : index
    %c0_101 = arith.constant 0 : index
    %101 = vector.load %arg1[%c0_100, %c128, %c0_101] : memref<2x288x160xbf16, #tpu.memory_space<vmem>>, vector<2x32x160xbf16>
    %102 = vector.shape_cast %101 : vector<2x32x160xbf16> to vector<64x160xbf16>
    %c4_102 = arith.constant 4 : index
    %c0_103 = arith.constant 0 : index
    %c0_104 = arith.constant 0 : index
    %103 = vector.load %arg2[%c4_102, %c0_103, %c0_104] : memref<5x160x64xbf16, #tpu.memory_space<vmem>>, vector<1x160x64xbf16>
    %104 = vector.shape_cast %103 : vector<1x160x64xbf16> to vector<160x64xbf16>
    %cst_105 = arith.constant dense<0.000000e+00> : vector<64x64xf32>
    %105 = tpu.matmul %102, %104, %cst_105 {dimension_numbers = #tpu.dot_dimension_numbers<[1], [0], [0], [1], [0, 0, 1, 1], [], []>} : vector<64x160xbf16>, vector<160x64xbf16>, vector<64x64xf32> -> vector<64x64xf32>
    %106 = arith.addf %100, %105 : vector<64x64xf32>
    %c0_106 = arith.constant 0 : index
    %c0_107 = arith.constant 0 : index
    %107 = vector.load %arg3[%c0_106, %c0_107] : memref<1x64xf32, #tpu.memory_space<vmem>>, vector<1x64xf32>
    %108 = vector.broadcast %107 : vector<1x64xf32> to vector<64x64xf32>
    %109 = arith.addf %106, %108 : vector<64x64xf32>
    %cst_108 = arith.constant 0.000000e+00 : f32
    %110 = vector.broadcast %cst_108 : f32 to vector<64x64xf32>
    %111 = arith.maximumf %109, %110 : vector<64x64xf32>
    %112 = vector.shape_cast %111 : vector<64x64xf32> to vector<2x32x64xf32>
    %c0_109 = arith.constant 0 : index
    %c64_110 = arith.constant 64 : index
    %c0_111 = arith.constant 0 : index
    %113 = vector.load %arg5[%c0_109, %c64_110, %c0_111] : memref<2x224x64xf32, #tpu.memory_space<vmem>>, vector<2x32x64xf32>
    tpu.vector_store %arg5[%c0_109, %c64_110, %c0_111], %112 {strides = array<i32>} : memref<2x224x64xf32, #tpu.memory_space<vmem>>, vector<2x32x64xf32>,
    %cst_112 = arith.constant 0.000000e+00 : f32
    %114 = vector.broadcast %cst_112 : f32 to vector<64x64xf32>
    %c0_113 = arith.constant 0 : index
    %c96_114 = arith.constant 96 : index
    %c0_115 = arith.constant 0 : index
    %115 = vector.load %arg1[%c0_113, %c96_114, %c0_115] : memref<2x288x160xbf16, #tpu.memory_space<vmem>>, vector<2x32x160xbf16>
    %116 = vector.shape_cast %115 : vector<2x32x160xbf16> to vector<64x160xbf16>
    %c0_116 = arith.constant 0 : index
    %c0_117 = arith.constant 0 : index
    %c0_118 = arith.constant 0 : index
    %117 = vector.load %arg2[%c0_116, %c0_117, %c0_118] : memref<5x160x64xbf16, #tpu.memory_space<vmem>>, vector<1x160x64xbf16>
    %118 = vector.shape_cast %117 : vector<1x160x64xbf16> to vector<160x64xbf16>
    %cst_119 = arith.constant dense<0.000000e+00> : vector<64x64xf32>
    %119 = tpu.matmul %116, %118, %cst_119 {dimension_numbers = #tpu.dot_dimension_numbers<[1], [0], [0], [1], [0, 0, 1, 1], [], []>} : vector<64x160xbf16>, vector<160x64xbf16>, vector<64x64xf32> -> vector<64x64xf32>
    %120 = arith.addf %114, %119 : vector<64x64xf32>
    %c0_120 = arith.constant 0 : index
    %c112_121 = arith.constant 112 : index
    %c0_122 = arith.constant 0 : index
    %121 = vector.load %arg1[%c0_120, %c112_121, %c0_122] : memref<2x288x160xbf16, #tpu.memory_space<vmem>>, vector<2x32x160xbf16>
    %122 = vector.shape_cast %121 : vector<2x32x160xbf16> to vector<64x160xbf16>
    %c1_123 = arith.constant 1 : index
    %c0_124 = arith.constant 0 : index
    %c0_125 = arith.constant 0 : index
    %123 = vector.load %arg2[%c1_123, %c0_124, %c0_125] : memref<5x160x64xbf16, #tpu.memory_space<vmem>>, vector<1x160x64xbf16>
    %124 = vector.shape_cast %123 : vector<1x160x64xbf16> to vector<160x64xbf16>
    %cst_126 = arith.constant dense<0.000000e+00> : vector<64x64xf32>
    %125 = tpu.matmul %122, %124, %cst_126 {dimension_numbers = #tpu.dot_dimension_numbers<[1], [0], [0], [1], [0, 0, 1, 1], [], []>} : vector<64x160xbf16>, vector<160x64xbf16>, vector<64x64xf32> -> vector<64x64xf32>
    %126 = arith.addf %120, %125 : vector<64x64xf32>
    %c0_127 = arith.constant 0 : index
    %c128_128 = arith.constant 128 : index
    %c0_129 = arith.constant 0 : index
    %127 = vector.load %arg1[%c0_127, %c128_128, %c0_129] : memref<2x288x160xbf16, #tpu.memory_space<vmem>>, vector<2x32x160xbf16>
    %128 = vector.shape_cast %127 : vector<2x32x160xbf16> to vector<64x160xbf16>
    %c2_130 = arith.constant 2 : index
    %c0_131 = arith.constant 0 : index
    %c0_132 = arith.constant 0 : index
    %129 = vector.load %arg2[%c2_130, %c0_131, %c0_132] : memref<5x160x64xbf16, #tpu.memory_space<vmem>>, vector<1x160x64xbf16>
    %130 = vector.shape_cast %129 : vector<1x160x64xbf16> to vector<160x64xbf16>
    %cst_133 = arith.constant dense<0.000000e+00> : vector<64x64xf32>
    %131 = tpu.matmul %128, %130, %cst_133 {dimension_numbers = #tpu.dot_dimension_numbers<[1], [0], [0], [1], [0, 0, 1, 1], [], []>} : vector<64x160xbf16>, vector<160x64xbf16>, vector<64x64xf32> -> vector<64x64xf32>
    %132 = arith.addf %126, %131 : vector<64x64xf32>
    %c0_134 = arith.constant 0 : index
    %c144 = arith.constant 144 : index
    %c0_135 = arith.constant 0 : index
    %133 = vector.load %arg1[%c0_134, %c144, %c0_135] : memref<2x288x160xbf16, #tpu.memory_space<vmem>>, vector<2x32x160xbf16>
    %134 = vector.shape_cast %133 : vector<2x32x160xbf16> to vector<64x160xbf16>
    %c3_136 = arith.constant 3 : index
    %c0_137 = arith.constant 0 : index
    %c0_138 = arith.constant 0 : index
    %135 = vector.load %arg2[%c3_136, %c0_137, %c0_138] : memref<5x160x64xbf16, #tpu.memory_space<vmem>>, vector<1x160x64xbf16>
    %136 = vector.shape_cast %135 : vector<1x160x64xbf16> to vector<160x64xbf16>
    %cst_139 = arith.constant dense<0.000000e+00> : vector<64x64xf32>
    %137 = tpu.matmul %134, %136, %cst_139 {dimension_numbers = #tpu.dot_dimension_numbers<[1], [0], [0], [1], [0, 0, 1, 1], [], []>} : vector<64x160xbf16>, vector<160x64xbf16>, vector<64x64xf32> -> vector<64x64xf32>
    %138 = arith.addf %132, %137 : vector<64x64xf32>
    %c0_140 = arith.constant 0 : index
    %c160 = arith.constant 160 : index
    %c0_141 = arith.constant 0 : index
    %139 = vector.load %arg1[%c0_140, %c160, %c0_141] : memref<2x288x160xbf16, #tpu.memory_space<vmem>>, vector<2x32x160xbf16>
    %140 = vector.shape_cast %139 : vector<2x32x160xbf16> to vector<64x160xbf16>
    %c4_142 = arith.constant 4 : index
    %c0_143 = arith.constant 0 : index
    %c0_144 = arith.constant 0 : index
    %141 = vector.load %arg2[%c4_142, %c0_143, %c0_144] : memref<5x160x64xbf16, #tpu.memory_space<vmem>>, vector<1x160x64xbf16>
    %142 = vector.shape_cast %141 : vector<1x160x64xbf16> to vector<160x64xbf16>
    %cst_145 = arith.constant dense<0.000000e+00> : vector<64x64xf32>
    %143 = tpu.matmul %140, %142, %cst_145 {dimension_numbers = #tpu.dot_dimension_numbers<[1], [0], [0], [1], [0, 0, 1, 1], [], []>} : vector<64x160xbf16>, vector<160x64xbf16>, vector<64x64xf32> -> vector<64x64xf32>
    %144 = arith.addf %138, %143 : vector<64x64xf32>
    %c0_146 = arith.constant 0 : index
    %c0_147 = arith.constant 0 : index
    %145 = vector.load %arg3[%c0_146, %c0_147] : memref<1x64xf32, #tpu.memory_space<vmem>>, vector<1x64xf32>
    %146 = vector.broadcast %145 : vector<1x64xf32> to vector<64x64xf32>
    %147 = arith.addf %144, %146 : vector<64x64xf32>
    %cst_148 = arith.constant 0.000000e+00 : f32
    %148 = vector.broadcast %cst_148 : f32 to vector<64x64xf32>
    %149 = arith.maximumf %147, %148 : vector<64x64xf32>
    %150 = vector.shape_cast %149 : vector<64x64xf32> to vector<2x32x64xf32>
    %c0_149 = arith.constant 0 : index
    %c96_150 = arith.constant 96 : index
    %c0_151 = arith.constant 0 : index
    %151 = vector.load %arg5[%c0_149, %c96_150, %c0_151] : memref<2x224x64xf32, #tpu.memory_space<vmem>>, vector<2x32x64xf32>
    tpu.vector_store %arg5[%c0_149, %c96_150, %c0_151], %150 {strides = array<i32>} : memref<2x224x64xf32, #tpu.memory_space<vmem>>, vector<2x32x64xf32>,
    %cst_152 = arith.constant 0.000000e+00 : f32
    %152 = vector.broadcast %cst_152 : f32 to vector<64x64xf32>
    %c0_153 = arith.constant 0 : index
    %c128_154 = arith.constant 128 : index
    %c0_155 = arith.constant 0 : index
    %153 = vector.load %arg1[%c0_153, %c128_154, %c0_155] : memref<2x288x160xbf16, #tpu.memory_space<vmem>>, vector<2x32x160xbf16>
    %154 = vector.shape_cast %153 : vector<2x32x160xbf16> to vector<64x160xbf16>
    %c0_156 = arith.constant 0 : index
    %c0_157 = arith.constant 0 : index
    %c0_158 = arith.constant 0 : index
    %155 = vector.load %arg2[%c0_156, %c0_157, %c0_158] : memref<5x160x64xbf16, #tpu.memory_space<vmem>>, vector<1x160x64xbf16>
    %156 = vector.shape_cast %155 : vector<1x160x64xbf16> to vector<160x64xbf16>
    %cst_159 = arith.constant dense<0.000000e+00> : vector<64x64xf32>
    %157 = tpu.matmul %154, %156, %cst_159 {dimension_numbers = #tpu.dot_dimension_numbers<[1], [0], [0], [1], [0, 0, 1, 1], [], []>} : vector<64x160xbf16>, vector<160x64xbf16>, vector<64x64xf32> -> vector<64x64xf32>
    %158 = arith.addf %152, %157 : vector<64x64xf32>
    %c0_160 = arith.constant 0 : index
    %c144_161 = arith.constant 144 : index
    %c0_162 = arith.constant 0 : index
    %159 = vector.load %arg1[%c0_160, %c144_161, %c0_162] : memref<2x288x160xbf16, #tpu.memory_space<vmem>>, vector<2x32x160xbf16>
    %160 = vector.shape_cast %159 : vector<2x32x160xbf16> to vector<64x160xbf16>
    %c1_163 = arith.constant 1 : index
    %c0_164 = arith.constant 0 : index
    %c0_165 = arith.constant 0 : index
    %161 = vector.load %arg2[%c1_163, %c0_164, %c0_165] : memref<5x160x64xbf16, #tpu.memory_space<vmem>>, vector<1x160x64xbf16>
    %162 = vector.shape_cast %161 : vector<1x160x64xbf16> to vector<160x64xbf16>
    %cst_166 = arith.constant dense<0.000000e+00> : vector<64x64xf32>
    %163 = tpu.matmul %160, %162, %cst_166 {dimension_numbers = #tpu.dot_dimension_numbers<[1], [0], [0], [1], [0, 0, 1, 1], [], []>} : vector<64x160xbf16>, vector<160x64xbf16>, vector<64x64xf32> -> vector<64x64xf32>
    %164 = arith.addf %158, %163 : vector<64x64xf32>
    %c0_167 = arith.constant 0 : index
    %c160_168 = arith.constant 160 : index
    %c0_169 = arith.constant 0 : index
    %165 = vector.load %arg1[%c0_167, %c160_168, %c0_169] : memref<2x288x160xbf16, #tpu.memory_space<vmem>>, vector<2x32x160xbf16>
    %166 = vector.shape_cast %165 : vector<2x32x160xbf16> to vector<64x160xbf16>
    %c2_170 = arith.constant 2 : index
    %c0_171 = arith.constant 0 : index
    %c0_172 = arith.constant 0 : index
    %167 = vector.load %arg2[%c2_170, %c0_171, %c0_172] : memref<5x160x64xbf16, #tpu.memory_space<vmem>>, vector<1x160x64xbf16>
    %168 = vector.shape_cast %167 : vector<1x160x64xbf16> to vector<160x64xbf16>
    %cst_173 = arith.constant dense<0.000000e+00> : vector<64x64xf32>
    %169 = tpu.matmul %166, %168, %cst_173 {dimension_numbers = #tpu.dot_dimension_numbers<[1], [0], [0], [1], [0, 0, 1, 1], [], []>} : vector<64x160xbf16>, vector<160x64xbf16>, vector<64x64xf32> -> vector<64x64xf32>
    %170 = arith.addf %164, %169 : vector<64x64xf32>
    %c0_174 = arith.constant 0 : index
    %c176 = arith.constant 176 : index
    %c0_175 = arith.constant 0 : index
    %171 = vector.load %arg1[%c0_174, %c176, %c0_175] : memref<2x288x160xbf16, #tpu.memory_space<vmem>>, vector<2x32x160xbf16>
    %172 = vector.shape_cast %171 : vector<2x32x160xbf16> to vector<64x160xbf16>
    %c3_176 = arith.constant 3 : index
    %c0_177 = arith.constant 0 : index
    %c0_178 = arith.constant 0 : index
    %173 = vector.load %arg2[%c3_176, %c0_177, %c0_178] : memref<5x160x64xbf16, #tpu.memory_space<vmem>>, vector<1x160x64xbf16>
    %174 = vector.shape_cast %173 : vector<1x160x64xbf16> to vector<160x64xbf16>
    %cst_179 = arith.constant dense<0.000000e+00> : vector<64x64xf32>
    %175 = tpu.matmul %172, %174, %cst_179 {dimension_numbers = #tpu.dot_dimension_numbers<[1], [0], [0], [1], [0, 0, 1, 1], [], []>} : vector<64x160xbf16>, vector<160x64xbf16>, vector<64x64xf32> -> vector<64x64xf32>
    %176 = arith.addf %170, %175 : vector<64x64xf32>
    %c0_180 = arith.constant 0 : index
    %c192 = arith.constant 192 : index
    %c0_181 = arith.constant 0 : index
    %177 = vector.load %arg1[%c0_180, %c192, %c0_181] : memref<2x288x160xbf16, #tpu.memory_space<vmem>>, vector<2x32x160xbf16>
    %178 = vector.shape_cast %177 : vector<2x32x160xbf16> to vector<64x160xbf16>
    %c4_182 = arith.constant 4 : index
    %c0_183 = arith.constant 0 : index
    %c0_184 = arith.constant 0 : index
    %179 = vector.load %arg2[%c4_182, %c0_183, %c0_184] : memref<5x160x64xbf16, #tpu.memory_space<vmem>>, vector<1x160x64xbf16>
    %180 = vector.shape_cast %179 : vector<1x160x64xbf16> to vector<160x64xbf16>
    %cst_185 = arith.constant dense<0.000000e+00> : vector<64x64xf32>
    %181 = tpu.matmul %178, %180, %cst_185 {dimension_numbers = #tpu.dot_dimension_numbers<[1], [0], [0], [1], [0, 0, 1, 1], [], []>} : vector<64x160xbf16>, vector<160x64xbf16>, vector<64x64xf32> -> vector<64x64xf32>
    %182 = arith.addf %176, %181 : vector<64x64xf32>
    %c0_186 = arith.constant 0 : index
    %c0_187 = arith.constant 0 : index
    %183 = vector.load %arg3[%c0_186, %c0_187] : memref<1x64xf32, #tpu.memory_space<vmem>>, vector<1x64xf32>
    %184 = vector.broadcast %183 : vector<1x64xf32> to vector<64x64xf32>
    %185 = arith.addf %182, %184 : vector<64x64xf32>
    %cst_188 = arith.constant 0.000000e+00 : f32
    %186 = vector.broadcast %cst_188 : f32 to vector<64x64xf32>
    %187 = arith.maximumf %185, %186 : vector<64x64xf32>
    %188 = vector.shape_cast %187 : vector<64x64xf32> to vector<2x32x64xf32>
    %c0_189 = arith.constant 0 : index
    %c128_190 = arith.constant 128 : index
    %c0_191 = arith.constant 0 : index
    %189 = vector.load %arg5[%c0_189, %c128_190, %c0_191] : memref<2x224x64xf32, #tpu.memory_space<vmem>>, vector<2x32x64xf32>
    tpu.vector_store %arg5[%c0_189, %c128_190, %c0_191], %188 {strides = array<i32>} : memref<2x224x64xf32, #tpu.memory_space<vmem>>, vector<2x32x64xf32>,
    %cst_192 = arith.constant 0.000000e+00 : f32
    %190 = vector.broadcast %cst_192 : f32 to vector<64x64xf32>
    %c0_193 = arith.constant 0 : index
    %c160_194 = arith.constant 160 : index
    %c0_195 = arith.constant 0 : index
    %191 = vector.load %arg1[%c0_193, %c160_194, %c0_195] : memref<2x288x160xbf16, #tpu.memory_space<vmem>>, vector<2x32x160xbf16>
    %192 = vector.shape_cast %191 : vector<2x32x160xbf16> to vector<64x160xbf16>
    %c0_196 = arith.constant 0 : index
    %c0_197 = arith.constant 0 : index
    %c0_198 = arith.constant 0 : index
    %193 = vector.load %arg2[%c0_196, %c0_197, %c0_198] : memref<5x160x64xbf16, #tpu.memory_space<vmem>>, vector<1x160x64xbf16>
    %194 = vector.shape_cast %193 : vector<1x160x64xbf16> to vector<160x64xbf16>
    %cst_199 = arith.constant dense<0.000000e+00> : vector<64x64xf32>
    %195 = tpu.matmul %192, %194, %cst_199 {dimension_numbers = #tpu.dot_dimension_numbers<[1], [0], [0], [1], [0, 0, 1, 1], [], []>} : vector<64x160xbf16>, vector<160x64xbf16>, vector<64x64xf32> -> vector<64x64xf32>
    %196 = arith.addf %190, %195 : vector<64x64xf32>
    %c0_200 = arith.constant 0 : index
    %c176_201 = arith.constant 176 : index
    %c0_202 = arith.constant 0 : index
    %197 = vector.load %arg1[%c0_200, %c176_201, %c0_202] : memref<2x288x160xbf16, #tpu.memory_space<vmem>>, vector<2x32x160xbf16>
    %198 = vector.shape_cast %197 : vector<2x32x160xbf16> to vector<64x160xbf16>
    %c1_203 = arith.constant 1 : index
    %c0_204 = arith.constant 0 : index
    %c0_205 = arith.constant 0 : index
    %199 = vector.load %arg2[%c1_203, %c0_204, %c0_205] : memref<5x160x64xbf16, #tpu.memory_space<vmem>>, vector<1x160x64xbf16>
    %200 = vector.shape_cast %199 : vector<1x160x64xbf16> to vector<160x64xbf16>
    %cst_206 = arith.constant dense<0.000000e+00> : vector<64x64xf32>
    %201 = tpu.matmul %198, %200, %cst_206 {dimension_numbers = #tpu.dot_dimension_numbers<[1], [0], [0], [1], [0, 0, 1, 1], [], []>} : vector<64x160xbf16>, vector<160x64xbf16>, vector<64x64xf32> -> vector<64x64xf32>
    %202 = arith.addf %196, %201 : vector<64x64xf32>
    %c0_207 = arith.constant 0 : index
    %c192_208 = arith.constant 192 : index
    %c0_209 = arith.constant 0 : index
    %203 = vector.load %arg1[%c0_207, %c192_208, %c0_209] : memref<2x288x160xbf16, #tpu.memory_space<vmem>>, vector<2x32x160xbf16>
    %204 = vector.shape_cast %203 : vector<2x32x160xbf16> to vector<64x160xbf16>
    %c2_210 = arith.constant 2 : index
    %c0_211 = arith.constant 0 : index
    %c0_212 = arith.constant 0 : index
    %205 = vector.load %arg2[%c2_210, %c0_211, %c0_212] : memref<5x160x64xbf16, #tpu.memory_space<vmem>>, vector<1x160x64xbf16>
    %206 = vector.shape_cast %205 : vector<1x160x64xbf16> to vector<160x64xbf16>
    %cst_213 = arith.constant dense<0.000000e+00> : vector<64x64xf32>
    %207 = tpu.matmul %204, %206, %cst_213 {dimension_numbers = #tpu.dot_dimension_numbers<[1], [0], [0], [1], [0, 0, 1, 1], [], []>} : vector<64x160xbf16>, vector<160x64xbf16>, vector<64x64xf32> -> vector<64x64xf32>
    %208 = arith.addf %202, %207 : vector<64x64xf32>
    %c0_214 = arith.constant 0 : index
    %c208 = arith.constant 208 : index
    %c0_215 = arith.constant 0 : index
    %209 = vector.load %arg1[%c0_214, %c208, %c0_215] : memref<2x288x160xbf16, #tpu.memory_space<vmem>>, vector<2x32x160xbf16>
    %210 = vector.shape_cast %209 : vector<2x32x160xbf16> to vector<64x160xbf16>
    %c3_216 = arith.constant 3 : index
    %c0_217 = arith.constant 0 : index
    %c0_218 = arith.constant 0 : index
    %211 = vector.load %arg2[%c3_216, %c0_217, %c0_218] : memref<5x160x64xbf16, #tpu.memory_space<vmem>>, vector<1x160x64xbf16>
    %212 = vector.shape_cast %211 : vector<1x160x64xbf16> to vector<160x64xbf16>
    %cst_219 = arith.constant dense<0.000000e+00> : vector<64x64xf32>
    %213 = tpu.matmul %210, %212, %cst_219 {dimension_numbers = #tpu.dot_dimension_numbers<[1], [0], [0], [1], [0, 0, 1, 1], [], []>} : vector<64x160xbf16>, vector<160x64xbf16>, vector<64x64xf32> -> vector<64x64xf32>
    %214 = arith.addf %208, %213 : vector<64x64xf32>
    %c0_220 = arith.constant 0 : index
    %c224 = arith.constant 224 : index
    %c0_221 = arith.constant 0 : index
    %215 = vector.load %arg1[%c0_220, %c224, %c0_221] : memref<2x288x160xbf16, #tpu.memory_space<vmem>>, vector<2x32x160xbf16>
    %216 = vector.shape_cast %215 : vector<2x32x160xbf16> to vector<64x160xbf16>
    %c4_222 = arith.constant 4 : index
    %c0_223 = arith.constant 0 : index
    %c0_224 = arith.constant 0 : index
    %217 = vector.load %arg2[%c4_222, %c0_223, %c0_224] : memref<5x160x64xbf16, #tpu.memory_space<vmem>>, vector<1x160x64xbf16>
    %218 = vector.shape_cast %217 : vector<1x160x64xbf16> to vector<160x64xbf16>
    %cst_225 = arith.constant dense<0.000000e+00> : vector<64x64xf32>
    %219 = tpu.matmul %216, %218, %cst_225 {dimension_numbers = #tpu.dot_dimension_numbers<[1], [0], [0], [1], [0, 0, 1, 1], [], []>} : vector<64x160xbf16>, vector<160x64xbf16>, vector<64x64xf32> -> vector<64x64xf32>
    %220 = arith.addf %214, %219 : vector<64x64xf32>
    %c0_226 = arith.constant 0 : index
    %c0_227 = arith.constant 0 : index
    %221 = vector.load %arg3[%c0_226, %c0_227] : memref<1x64xf32, #tpu.memory_space<vmem>>, vector<1x64xf32>
    %222 = vector.broadcast %221 : vector<1x64xf32> to vector<64x64xf32>
    %223 = arith.addf %220, %222 : vector<64x64xf32>
    %cst_228 = arith.constant 0.000000e+00 : f32
    %224 = vector.broadcast %cst_228 : f32 to vector<64x64xf32>
    %225 = arith.maximumf %223, %224 : vector<64x64xf32>
    %226 = vector.shape_cast %225 : vector<64x64xf32> to vector<2x32x64xf32>
    %c0_229 = arith.constant 0 : index
    %c160_230 = arith.constant 160 : index
    %c0_231 = arith.constant 0 : index
    %227 = vector.load %arg5[%c0_229, %c160_230, %c0_231] : memref<2x224x64xf32, #tpu.memory_space<vmem>>, vector<2x32x64xf32>
    tpu.vector_store %arg5[%c0_229, %c160_230, %c0_231], %226 {strides = array<i32>} : memref<2x224x64xf32, #tpu.memory_space<vmem>>, vector<2x32x64xf32>,
    %cst_232 = arith.constant 0.000000e+00 : f32
    %228 = vector.broadcast %cst_232 : f32 to vector<64x64xf32>
    %c0_233 = arith.constant 0 : index
    %c192_234 = arith.constant 192 : index
    %c0_235 = arith.constant 0 : index
    %229 = vector.load %arg1[%c0_233, %c192_234, %c0_235] : memref<2x288x160xbf16, #tpu.memory_space<vmem>>, vector<2x32x160xbf16>
    %230 = vector.shape_cast %229 : vector<2x32x160xbf16> to vector<64x160xbf16>
    %c0_236 = arith.constant 0 : index
    %c0_237 = arith.constant 0 : index
    %c0_238 = arith.constant 0 : index
    %231 = vector.load %arg2[%c0_236, %c0_237, %c0_238] : memref<5x160x64xbf16, #tpu.memory_space<vmem>>, vector<1x160x64xbf16>
    %232 = vector.shape_cast %231 : vector<1x160x64xbf16> to vector<160x64xbf16>
    %cst_239 = arith.constant dense<0.000000e+00> : vector<64x64xf32>
    %233 = tpu.matmul %230, %232, %cst_239 {dimension_numbers = #tpu.dot_dimension_numbers<[1], [0], [0], [1], [0, 0, 1, 1], [], []>} : vector<64x160xbf16>, vector<160x64xbf16>, vector<64x64xf32> -> vector<64x64xf32>
    %234 = arith.addf %228, %233 : vector<64x64xf32>
    %c0_240 = arith.constant 0 : index
    %c208_241 = arith.constant 208 : index
    %c0_242 = arith.constant 0 : index
    %235 = vector.load %arg1[%c0_240, %c208_241, %c0_242] : memref<2x288x160xbf16, #tpu.memory_space<vmem>>, vector<2x32x160xbf16>
    %236 = vector.shape_cast %235 : vector<2x32x160xbf16> to vector<64x160xbf16>
    %c1_243 = arith.constant 1 : index
    %c0_244 = arith.constant 0 : index
    %c0_245 = arith.constant 0 : index
    %237 = vector.load %arg2[%c1_243, %c0_244, %c0_245] : memref<5x160x64xbf16, #tpu.memory_space<vmem>>, vector<1x160x64xbf16>
    %238 = vector.shape_cast %237 : vector<1x160x64xbf16> to vector<160x64xbf16>
    %cst_246 = arith.constant dense<0.000000e+00> : vector<64x64xf32>
    %239 = tpu.matmul %236, %238, %cst_246 {dimension_numbers = #tpu.dot_dimension_numbers<[1], [0], [0], [1], [0, 0, 1, 1], [], []>} : vector<64x160xbf16>, vector<160x64xbf16>, vector<64x64xf32> -> vector<64x64xf32>
    %240 = arith.addf %234, %239 : vector<64x64xf32>
    %c0_247 = arith.constant 0 : index
    %c224_248 = arith.constant 224 : index
    %c0_249 = arith.constant 0 : index
    %241 = vector.load %arg1[%c0_247, %c224_248, %c0_249] : memref<2x288x160xbf16, #tpu.memory_space<vmem>>, vector<2x32x160xbf16>
    %242 = vector.shape_cast %241 : vector<2x32x160xbf16> to vector<64x160xbf16>
    %c2_250 = arith.constant 2 : index
    %c0_251 = arith.constant 0 : index
    %c0_252 = arith.constant 0 : index
    %243 = vector.load %arg2[%c2_250, %c0_251, %c0_252] : memref<5x160x64xbf16, #tpu.memory_space<vmem>>, vector<1x160x64xbf16>
    %244 = vector.shape_cast %243 : vector<1x160x64xbf16> to vector<160x64xbf16>
    %cst_253 = arith.constant dense<0.000000e+00> : vector<64x64xf32>
    %245 = tpu.matmul %242, %244, %cst_253 {dimension_numbers = #tpu.dot_dimension_numbers<[1], [0], [0], [1], [0, 0, 1, 1], [], []>} : vector<64x160xbf16>, vector<160x64xbf16>, vector<64x64xf32> -> vector<64x64xf32>
    %246 = arith.addf %240, %245 : vector<64x64xf32>
    %c0_254 = arith.constant 0 : index
    %c240 = arith.constant 240 : index
    %c0_255 = arith.constant 0 : index
    %247 = vector.load %arg1[%c0_254, %c240, %c0_255] : memref<2x288x160xbf16, #tpu.memory_space<vmem>>, vector<2x32x160xbf16>
    %248 = vector.shape_cast %247 : vector<2x32x160xbf16> to vector<64x160xbf16>
    %c3_256 = arith.constant 3 : index
    %c0_257 = arith.constant 0 : index
    %c0_258 = arith.constant 0 : index
    %249 = vector.load %arg2[%c3_256, %c0_257, %c0_258] : memref<5x160x64xbf16, #tpu.memory_space<vmem>>, vector<1x160x64xbf16>
    %250 = vector.shape_cast %249 : vector<1x160x64xbf16> to vector<160x64xbf16>
    %cst_259 = arith.constant dense<0.000000e+00> : vector<64x64xf32>
    %251 = tpu.matmul %248, %250, %cst_259 {dimension_numbers = #tpu.dot_dimension_numbers<[1], [0], [0], [1], [0, 0, 1, 1], [], []>} : vector<64x160xbf16>, vector<160x64xbf16>, vector<64x64xf32> -> vector<64x64xf32>
    %252 = arith.addf %246, %251 : vector<64x64xf32>
    %c0_260 = arith.constant 0 : index
    %c256 = arith.constant 256 : index
    %c0_261 = arith.constant 0 : index
    %253 = vector.load %arg1[%c0_260, %c256, %c0_261] : memref<2x288x160xbf16, #tpu.memory_space<vmem>>, vector<2x32x160xbf16>
    %254 = vector.shape_cast %253 : vector<2x32x160xbf16> to vector<64x160xbf16>
    %c4_262 = arith.constant 4 : index
    %c0_263 = arith.constant 0 : index
    %c0_264 = arith.constant 0 : index
    %255 = vector.load %arg2[%c4_262, %c0_263, %c0_264] : memref<5x160x64xbf16, #tpu.memory_space<vmem>>, vector<1x160x64xbf16>
    %256 = vector.shape_cast %255 : vector<1x160x64xbf16> to vector<160x64xbf16>
    %cst_265 = arith.constant dense<0.000000e+00> : vector<64x64xf32>
    %257 = tpu.matmul %254, %256, %cst_265 {dimension_numbers = #tpu.dot_dimension_numbers<[1], [0], [0], [1], [0, 0, 1, 1], [], []>} : vector<64x160xbf16>, vector<160x64xbf16>, vector<64x64xf32> -> vector<64x64xf32>
    %258 = arith.addf %252, %257 : vector<64x64xf32>
    %c0_266 = arith.constant 0 : index
    %c0_267 = arith.constant 0 : index
    %259 = vector.load %arg3[%c0_266, %c0_267] : memref<1x64xf32, #tpu.memory_space<vmem>>, vector<1x64xf32>
    %260 = vector.broadcast %259 : vector<1x64xf32> to vector<64x64xf32>
    %261 = arith.addf %258, %260 : vector<64x64xf32>
    %cst_268 = arith.constant 0.000000e+00 : f32
    %262 = vector.broadcast %cst_268 : f32 to vector<64x64xf32>
    %263 = arith.maximumf %261, %262 : vector<64x64xf32>
    %264 = vector.shape_cast %263 : vector<64x64xf32> to vector<2x32x64xf32>
    %c0_269 = arith.constant 0 : index
    %c192_270 = arith.constant 192 : index
    %c0_271 = arith.constant 0 : index
    %265 = vector.load %arg5[%c0_269, %c192_270, %c0_271] : memref<2x224x64xf32, #tpu.memory_space<vmem>>, vector<2x32x64xf32>
    tpu.vector_store %arg5[%c0_269, %c192_270, %c0_271], %264 {strides = array<i32>} : memref<2x224x64xf32, #tpu.memory_space<vmem>>, vector<2x32x64xf32>,
    %c0_272 = arith.constant 0 : index
    %c0_273 = arith.constant 0 : index
    %c0_274 = arith.constant 0 : index
    %266 = tpu.strided_load %arg5[%c0_272, %c0_273, %c0_274] {strides = array<i32: 1, 2, 1>} : memref<2x224x64xf32, #tpu.memory_space<vmem>>, vector<2x112x64xf32>
    %c0_275 = arith.constant 0 : index
    %c1_276 = arith.constant 1 : index
    %c0_277 = arith.constant 0 : index
    %267 = tpu.strided_load %arg5[%c0_275, %c1_276, %c0_277] {strides = array<i32: 1, 2, 1>} : memref<2x224x64xf32, #tpu.memory_space<vmem>>, vector<2x112x64xf32>
    %268 = arith.maximumf %266, %267 : vector<2x112x64xf32>
    %c0_278 = arith.constant 0 : index
    %c0_279 = arith.constant 0 : index
    %c0_280 = arith.constant 0 : index
    %269 = vector.load %arg6[%c0_278, %c0_279, %c0_280] : memref<2x112x64xf32, #tpu.memory_space<vmem>>, vector<2x112x64xf32>
    tpu.vector_store %arg6[%c0_278, %c0_279, %c0_280], %268 {strides = array<i32>} : memref<2x112x64xf32, #tpu.memory_space<vmem>>, vector<2x112x64xf32>,
    %c0_281 = arith.constant 0 : index
    %c0_282 = arith.constant 0 : index
    %c0_283 = arith.constant 0 : index
    %270 = vector.load %arg6[%c0_281, %c0_282, %c0_283] : memref<2x112x64xf32, #tpu.memory_space<vmem>>, vector<2x8x64xf32>
    %c0_284 = arith.constant 0 : index
    %c8 = arith.constant 8 : index
    %c0_285 = arith.constant 0 : index
    %271 = vector.load %arg6[%c0_284, %c8, %c0_285] : memref<2x112x64xf32, #tpu.memory_space<vmem>>, vector<2x8x64xf32>
    %272 = arith.maximumf %270, %271 : vector<2x8x64xf32>
    %273 = vector.extract_strided_slice %272 {offsets = [0, 0, 0], sizes = [2, 7, 64], strides = [1, 1, 1]} : vector<2x8x64xf32> to vector<2x7x64xf32>
    %274 = arith.truncf %273 : vector<2x7x64xf32> to vector<2x7x64xbf16>
    %c0_286 = arith.constant 0 : index
    %c0_287 = arith.constant 0 : index
    %c0_288 = arith.constant 0 : index
    %c0_289 = arith.constant 0 : index
    %275 = vector.load %arg4[%c0_286, %c0_287, %c0_288, %c0_289] : memref<2x7x7x64xbf16, #tpu.memory_space<vmem>>, vector<2x1x7x64xbf16>
    %276 = vector.shape_cast %275 : vector<2x1x7x64xbf16> to vector<2x7x64xbf16>
    %277 = vector.shape_cast %274 : vector<2x7x64xbf16> to vector<2x1x7x64xbf16>
    tpu.vector_store %arg4[%c0_286, %c0_287, %c0_288, %c0_289], %277 {strides = array<i32>} : memref<2x7x7x64xbf16, #tpu.memory_space<vmem>>, vector<2x1x7x64xbf16>,
    %c0_290 = arith.constant 0 : index
    %c16_291 = arith.constant 16 : index
    %c0_292 = arith.constant 0 : index
    %278 = vector.load %arg6[%c0_290, %c16_291, %c0_292] : memref<2x112x64xf32, #tpu.memory_space<vmem>>, vector<2x8x64xf32>
    %c0_293 = arith.constant 0 : index
    %c24 = arith.constant 24 : index
    %c0_294 = arith.constant 0 : index
    %279 = vector.load %arg6[%c0_293, %c24, %c0_294] : memref<2x112x64xf32, #tpu.memory_space<vmem>>, vector<2x8x64xf32>
    %280 = arith.maximumf %278, %279 : vector<2x8x64xf32>
    %281 = vector.extract_strided_slice %280 {offsets = [0, 0, 0], sizes = [2, 7, 64], strides = [1, 1, 1]} : vector<2x8x64xf32> to vector<2x7x64xf32>
    %282 = arith.truncf %281 : vector<2x7x64xf32> to vector<2x7x64xbf16>
    %c0_295 = arith.constant 0 : index
    %c1_296 = arith.constant 1 : index
    %c0_297 = arith.constant 0 : index
    %c0_298 = arith.constant 0 : index
    %283 = vector.load %arg4[%c0_295, %c1_296, %c0_297, %c0_298] : memref<2x7x7x64xbf16, #tpu.memory_space<vmem>>, vector<2x1x7x64xbf16>
    %284 = vector.shape_cast %283 : vector<2x1x7x64xbf16> to vector<2x7x64xbf16>
    %285 = vector.shape_cast %282 : vector<2x7x64xbf16> to vector<2x1x7x64xbf16>
    tpu.vector_store %arg4[%c0_295, %c1_296, %c0_297, %c0_298], %285 {strides = array<i32>} : memref<2x7x7x64xbf16, #tpu.memory_space<vmem>>, vector<2x1x7x64xbf16>,
    %c0_299 = arith.constant 0 : index
    %c32_300 = arith.constant 32 : index
    %c0_301 = arith.constant 0 : index
    %286 = vector.load %arg6[%c0_299, %c32_300, %c0_301] : memref<2x112x64xf32, #tpu.memory_space<vmem>>, vector<2x8x64xf32>
    %c0_302 = arith.constant 0 : index
    %c40 = arith.constant 40 : index
    %c0_303 = arith.constant 0 : index
    %287 = vector.load %arg6[%c0_302, %c40, %c0_303] : memref<2x112x64xf32, #tpu.memory_space<vmem>>, vector<2x8x64xf32>
    %288 = arith.maximumf %286, %287 : vector<2x8x64xf32>
    %289 = vector.extract_strided_slice %288 {offsets = [0, 0, 0], sizes = [2, 7, 64], strides = [1, 1, 1]} : vector<2x8x64xf32> to vector<2x7x64xf32>
    %290 = arith.truncf %289 : vector<2x7x64xf32> to vector<2x7x64xbf16>
    %c0_304 = arith.constant 0 : index
    %c2_305 = arith.constant 2 : index
    %c0_306 = arith.constant 0 : index
    %c0_307 = arith.constant 0 : index
    %291 = vector.load %arg4[%c0_304, %c2_305, %c0_306, %c0_307] : memref<2x7x7x64xbf16, #tpu.memory_space<vmem>>, vector<2x1x7x64xbf16>
    %292 = vector.shape_cast %291 : vector<2x1x7x64xbf16> to vector<2x7x64xbf16>
    %293 = vector.shape_cast %290 : vector<2x7x64xbf16> to vector<2x1x7x64xbf16>
    tpu.vector_store %arg4[%c0_304, %c2_305, %c0_306, %c0_307], %293 {strides = array<i32>} : memref<2x7x7x64xbf16, #tpu.memory_space<vmem>>, vector<2x1x7x64xbf16>,
    %c0_308 = arith.constant 0 : index
    %c48_309 = arith.constant 48 : index
    %c0_310 = arith.constant 0 : index
    %294 = vector.load %arg6[%c0_308, %c48_309, %c0_310] : memref<2x112x64xf32, #tpu.memory_space<vmem>>, vector<2x8x64xf32>
    %c0_311 = arith.constant 0 : index
    %c56 = arith.constant 56 : index
    %c0_312 = arith.constant 0 : index
    %295 = vector.load %arg6[%c0_311, %c56, %c0_312] : memref<2x112x64xf32, #tpu.memory_space<vmem>>, vector<2x8x64xf32>
    %296 = arith.maximumf %294, %295 : vector<2x8x64xf32>
    %297 = vector.extract_strided_slice %296 {offsets = [0, 0, 0], sizes = [2, 7, 64], strides = [1, 1, 1]} : vector<2x8x64xf32> to vector<2x7x64xf32>
    %298 = arith.truncf %297 : vector<2x7x64xf32> to vector<2x7x64xbf16>
    %c0_313 = arith.constant 0 : index
    %c3_314 = arith.constant 3 : index
    %c0_315 = arith.constant 0 : index
    %c0_316 = arith.constant 0 : index
    %299 = vector.load %arg4[%c0_313, %c3_314, %c0_315, %c0_316] : memref<2x7x7x64xbf16, #tpu.memory_space<vmem>>, vector<2x1x7x64xbf16>
    %300 = vector.shape_cast %299 : vector<2x1x7x64xbf16> to vector<2x7x64xbf16>
    %301 = vector.shape_cast %298 : vector<2x7x64xbf16> to vector<2x1x7x64xbf16>
    tpu.vector_store %arg4[%c0_313, %c3_314, %c0_315, %c0_316], %301 {strides = array<i32>} : memref<2x7x7x64xbf16, #tpu.memory_space<vmem>>, vector<2x1x7x64xbf16>,
    %c0_317 = arith.constant 0 : index
    %c64_318 = arith.constant 64 : index
    %c0_319 = arith.constant 0 : index
    %302 = vector.load %arg6[%c0_317, %c64_318, %c0_319] : memref<2x112x64xf32, #tpu.memory_space<vmem>>, vector<2x8x64xf32>
    %c0_320 = arith.constant 0 : index
    %c72 = arith.constant 72 : index
    %c0_321 = arith.constant 0 : index
    %303 = vector.load %arg6[%c0_320, %c72, %c0_321] : memref<2x112x64xf32, #tpu.memory_space<vmem>>, vector<2x8x64xf32>
    %304 = arith.maximumf %302, %303 : vector<2x8x64xf32>
    %305 = vector.extract_strided_slice %304 {offsets = [0, 0, 0], sizes = [2, 7, 64], strides = [1, 1, 1]} : vector<2x8x64xf32> to vector<2x7x64xf32>
    %306 = arith.truncf %305 : vector<2x7x64xf32> to vector<2x7x64xbf16>
    %c0_322 = arith.constant 0 : index
    %c4_323 = arith.constant 4 : index
    %c0_324 = arith.constant 0 : index
    %c0_325 = arith.constant 0 : index
    %307 = vector.load %arg4[%c0_322, %c4_323, %c0_324, %c0_325] : memref<2x7x7x64xbf16, #tpu.memory_space<vmem>>, vector<2x1x7x64xbf16>
    %308 = vector.shape_cast %307 : vector<2x1x7x64xbf16> to vector<2x7x64xbf16>
    %309 = vector.shape_cast %306 : vector<2x7x64xbf16> to vector<2x1x7x64xbf16>
    tpu.vector_store %arg4[%c0_322, %c4_323, %c0_324, %c0_325], %309 {strides = array<i32>} : memref<2x7x7x64xbf16, #tpu.memory_space<vmem>>, vector<2x1x7x64xbf16>,
    %c0_326 = arith.constant 0 : index
    %c80_327 = arith.constant 80 : index
    %c0_328 = arith.constant 0 : index
    %310 = vector.load %arg6[%c0_326, %c80_327, %c0_328] : memref<2x112x64xf32, #tpu.memory_space<vmem>>, vector<2x8x64xf32>
    %c0_329 = arith.constant 0 : index
    %c88 = arith.constant 88 : index
    %c0_330 = arith.constant 0 : index
    %311 = vector.load %arg6[%c0_329, %c88, %c0_330] : memref<2x112x64xf32, #tpu.memory_space<vmem>>, vector<2x8x64xf32>
    %312 = arith.maximumf %310, %311 : vector<2x8x64xf32>
    %313 = vector.extract_strided_slice %312 {offsets = [0, 0, 0], sizes = [2, 7, 64], strides = [1, 1, 1]} : vector<2x8x64xf32> to vector<2x7x64xf32>
    %314 = arith.truncf %313 : vector<2x7x64xf32> to vector<2x7x64xbf16>
    %c0_331 = arith.constant 0 : index
    %c5 = arith.constant 5 : index
    %c0_332 = arith.constant 0 : index
    %c0_333 = arith.constant 0 : index
    %315 = vector.load %arg4[%c0_331, %c5, %c0_332, %c0_333] : memref<2x7x7x64xbf16, #tpu.memory_space<vmem>>, vector<2x1x7x64xbf16>
    %316 = vector.shape_cast %315 : vector<2x1x7x64xbf16> to vector<2x7x64xbf16>
    %317 = vector.shape_cast %314 : vector<2x7x64xbf16> to vector<2x1x7x64xbf16>
    tpu.vector_store %arg4[%c0_331, %c5, %c0_332, %c0_333], %317 {strides = array<i32>} : memref<2x7x7x64xbf16, #tpu.memory_space<vmem>>, vector<2x1x7x64xbf16>,
    %c0_334 = arith.constant 0 : index
    %c96_335 = arith.constant 96 : index
    %c0_336 = arith.constant 0 : index
    %318 = vector.load %arg6[%c0_334, %c96_335, %c0_336] : memref<2x112x64xf32, #tpu.memory_space<vmem>>, vector<2x8x64xf32>
    %c0_337 = arith.constant 0 : index
    %c104 = arith.constant 104 : index
    %c0_338 = arith.constant 0 : index
    %319 = vector.load %arg6[%c0_337, %c104, %c0_338] : memref<2x112x64xf32, #tpu.memory_space<vmem>>, vector<2x8x64xf32>
    %320 = arith.maximumf %318, %319 : vector<2x8x64xf32>
    %321 = vector.extract_strided_slice %320 {offsets = [0, 0, 0], sizes = [2, 7, 64], strides = [1, 1, 1]} : vector<2x8x64xf32> to vector<2x7x64xf32>
    %322 = arith.truncf %321 : vector<2x7x64xf32> to vector<2x7x64xbf16>
    %c0_339 = arith.constant 0 : index
    %c6 = arith.constant 6 : index
    %c0_340 = arith.constant 0 : index
    %c0_341 = arith.constant 0 : index
    %323 = vector.load %arg4[%c0_339, %c6, %c0_340, %c0_341] : memref<2x7x7x64xbf16, #tpu.memory_space<vmem>>, vector<2x1x7x64xbf16>
    %324 = vector.shape_cast %323 : vector<2x1x7x64xbf16> to vector<2x7x64xbf16>
    %325 = vector.shape_cast %322 : vector<2x7x64xbf16> to vector<2x1x7x64xbf16>
    tpu.vector_store %arg4[%c0_339, %c6, %c0_340, %c0_341], %325 {strides = array<i32>} : memref<2x7x7x64xbf16, #tpu.memory_space<vmem>>, vector<2x1x7x64xbf16>,
    return
  }
  func.func @transform_0(%arg0: i32) -> (i32, i32, i32) {
    %c0_i32 = arith.constant 0 : i32
    %c0_i32_0 = arith.constant 0 : i32
    %c0_i32_1 = arith.constant 0 : i32
    return %arg0, %c0_i32, %c0_i32_0 : i32, i32, i32
  }
  func.func @transform_1(%arg0: i32) -> (i32, i32, i32) {
    %c0_i32 = arith.constant 0 : i32
    %c0_i32_0 = arith.constant 0 : i32
    %c0_i32_1 = arith.constant 0 : i32
    %c0_i32_2 = arith.constant 0 : i32
    return %c0_i32, %c0_i32_0, %c0_i32_1 : i32, i32, i32
  }
  func.func @transform_2(%arg0: i32) -> (i32, i32) {
    %c0_i32 = arith.constant 0 : i32
    %c0_i32_0 = arith.constant 0 : i32
    %c0_i32_1 = arith.constant 0 : i32
    return %c0_i32, %c0_i32_0 : i32, i32
  }
  func.func @transform_3(%arg0: i32) -> (i32, i32, i32, i32) {
    %c0_i32 = arith.constant 0 : i32
    %c0_i32_0 = arith.constant 0 : i32
    %c0_i32_1 = arith.constant 0 : i32
    %c0_i32_2 = arith.constant 0 : i32
    return %arg0, %c0_i32, %c0_i32_0, %c0_i32_1 : i32, i32, i32, i32
  }
}

module attributes {stable_mosaic.version = 11 : i64} {
  func.func @_matmul_bias_kernel(%arg0: i32, %arg1: memref<8x3136xbf16, #tpu.memory_space<vmem>>, %arg2: memref<3136x128xbf16, #tpu.memory_space<vmem>>, %arg3: memref<1x128xf32, #tpu.memory_space<vmem>>, %arg4: memref<8x128xf32, #tpu.memory_space<vmem>>) attributes {dimension_semantics = [#tpu.dimension_semantics<parallel>], iteration_bounds = array<i64: 1>, scalar_prefetch = 0 : i64, scratch_operands = 0 : i64, tpu.core_type = #tpu.core_type<tc>, window_params = [{transform_indices = @transform_0, window_bounds = array<i64: 8, 3136>}, {pipeline_mode = #tpu.pipeline_mode<synchronous>, transform_indices = @transform_1, window_bounds = array<i64: 3136, 128>}, {pipeline_mode = #tpu.pipeline_mode<synchronous>, transform_indices = @transform_2, window_bounds = array<i64: 1, 128>}, {transform_indices = @transform_3, window_bounds = array<i64: 8, 128>}]} {
    %c0 = arith.constant 0 : index
    %c0_0 = arith.constant 0 : index
    %0 = vector.load %arg1[%c0, %c0_0] : memref<8x3136xbf16, #tpu.memory_space<vmem>>, vector<8x3136xbf16>
    %c0_1 = arith.constant 0 : index
    %c0_2 = arith.constant 0 : index
    %1 = vector.load %arg2[%c0_1, %c0_2] : memref<3136x128xbf16, #tpu.memory_space<vmem>>, vector<3136x128xbf16>
    %cst = arith.constant dense<0.000000e+00> : vector<8x128xf32>
    %2 = tpu.matmul %0, %1, %cst {dimension_numbers = #tpu.dot_dimension_numbers<[1], [0], [0], [1], [0, 0, 1, 1], [], []>} : vector<8x3136xbf16>, vector<3136x128xbf16>, vector<8x128xf32> -> vector<8x128xf32>
    %c0_3 = arith.constant 0 : index
    %c0_4 = arith.constant 0 : index
    %3 = vector.load %arg3[%c0_3, %c0_4] : memref<1x128xf32, #tpu.memory_space<vmem>>, vector<1x128xf32>
    %4 = vector.broadcast %3 : vector<1x128xf32> to vector<8x128xf32>
    %5 = arith.addf %2, %4 : vector<8x128xf32>
    %c0_5 = arith.constant 0 : index
    %c0_6 = arith.constant 0 : index
    %6 = vector.load %arg4[%c0_5, %c0_6] : memref<8x128xf32, #tpu.memory_space<vmem>>, vector<8x128xf32>
    tpu.vector_store %arg4[%c0_5, %c0_6], %5 {strides = array<i32>} : memref<8x128xf32, #tpu.memory_space<vmem>>, vector<8x128xf32>,
    return
  }
  func.func @transform_0(%arg0: i32) -> (i32, i32) {
    %c0_i32 = arith.constant 0 : i32
    %c0_i32_0 = arith.constant 0 : i32
    return %arg0, %c0_i32 : i32, i32
  }
  func.func @transform_1(%arg0: i32) -> (i32, i32) {
    %c0_i32 = arith.constant 0 : i32
    %c0_i32_0 = arith.constant 0 : i32
    %c0_i32_1 = arith.constant 0 : i32
    return %c0_i32, %c0_i32_0 : i32, i32
  }
  func.func @transform_2(%arg0: i32) -> (i32, i32) {
    %c0_i32 = arith.constant 0 : i32
    %c0_i32_0 = arith.constant 0 : i32
    %c0_i32_1 = arith.constant 0 : i32
    return %c0_i32, %c0_i32_0 : i32, i32
  }
  func.func @transform_3(%arg0: i32) -> (i32, i32) {
    %c0_i32 = arith.constant 0 : i32
    %c0_i32_0 = arith.constant 0 : i32
    return %arg0, %c0_i32 : i32, i32
  }
}

</mosaic_0001>

<bundles_post_ra>
// kernel: cnn_forward.3
= control target key start
LH: loop header
LB: loop body
LE: loop exit
PB: predicated region body
PF: predicated region fallthrough
CT: control target
= control target key end

     0   :  { %vm200_vm0 = vcmask 1043456   ;;  %vm151_vm1 = vcmask 326656   ;;  %vm325_vm2 = vcmask 261120   ;;  %vm3085_vm3 = vcmask 257024   ;;  %s5577_s1 = inlined_call_operand.vmem [shape: bf16[1,40,32], index: 1, kind: input, shape index: {}]   ;;  %s5578_s2 = inlined_call_operand.vmem [shape: f32[1,32], index: 2, kind: input, shape index: {}]   ;;  %s5579_s0 = inlined_call_operand.vmem [shape: bf16[2,896,40], index: 0, kind: input, shape index: {}]   ;;  %s5580_s3 = inlined_call_operand.vmem [shape: bf16[2,14,14,32], index: 3, kind: output, shape index: {}]  }
   0x1   :  { %v51_v0 = vld [vmem:[%s5577_s1 + $0x10] sm:$0xf]  ;;  %v4053_v16 = vld [vmem:[%s5577_s1 + $0x8] sm:$0xff]  ;;  %v4052_v22 = vld [vmem:[%s5577_s1] sm:$0xff]  ;;  %vm3087_vm4 = vcmask 256000  }
   0x2   :  { %v394_v1 = vld [vmem:[%s5577_s1 + $0x10] sm:$0xf]  ;;  %v145_v3 = vunpack.c.l.b16 %v51_v0  ;;  %v4071_v17 = vld [vmem:[%s5577_s1 + $0x8] sm:$0xff]  ;;  %v4070_v23 = vld [vmem:[%s5577_s1] sm:$0xff] }
   0x3   :  { %v734_v2 = vld [vmem:[%s5577_s1 + $0x10] sm:$0xf]  ;;  %v488_v4 = vunpack.c.l.b16 %v394_v1  ;;  %v4089_v18 = vld [vmem:[%s5577_s1 + $0x8] sm:$0xff]  ;;  %v4088_v24 = vld [vmem:[%s5577_s1] sm:$0xff] }
   0x4   :  { %v828_v5 = vunpack.c.l.b16 %v734_v2  ;;  %v148_v6 = vpack.c.b16 %v145_v3, %v145_v3  ;;  %v2094_v9 = vld [vmem:[%s5577_s1 + $0x10] sm:$0xf]  ;;  %v4036_v27 = vld [vmem:[%s5579_s0] sm:$0xff]  ;;  %v4037_v34 = vld [vmem:[%s5579_s0 + $0x8] sm:$0xff] }
   0x5   :  { %v491_v7 = vpack.c.b16 %v488_v4, %v488_v4  ;;  %v1414_v10 = vld [vmem:[%s5577_s1 + $0x10] sm:$0xf]  ;;  %v2188_v14 = vunpack.c.l.b16 %v2094_v9  ;;  %v4048_v28 = vld [vmem:[%s5579_s0 + $0x1e0] sm:$0xff]  ;;  %v4049_v35 = vld [vmem:[%s5579_s0 + $0x1e8] sm:$0xff] }
   0x6   :  { %v831_v8 = vpack.c.b16 %v828_v5, %v828_v5  ;;  %v202_v11 = vsel %vm200_vm0, %v148_v6, 0  ;;  %v1754_v15 = vld [vmem:[%s5577_s1 + $0x10] sm:$0xf]  ;;  %v1508_v19 = vunpack.c.l.b16 %v1414_v10  ;;  %v4054_v30 = vld [vmem:[%s5579_s0 + $0x40] sm:$0xff]  ;;  %v4055_v36 = vld [vmem:[%s5579_s0 + $0x48] sm:$0xff] }
   0x7   :  { %v543_v12 = vsel %vm200_vm0, %v491_v7, 0  ;;  %209 = vmatpush.bf16.msra.mxu0 %v202_v11  ;;  %4162 = vmatpush.bf16.msra.mxu3 %v202_v11  ;;  %v1848_v20 = vunpack.c.l.b16 %v1754_v15  ;;  %v2191_v21 = vpack.c.b16 %v2188_v14, %v2188_v14  ;;  %v4072_v31 = vld [vmem:[%s5579_s0 + $0x80] sm:$0xff]  ;;  %v4073_v37 = vld [vmem:[%s5579_s0 + $0x88] sm:$0xff]  ;;  %v4038_v38 = vld [vmem:[%s5579_s0 + $0x10] sm:$0xff] }
   0x8   :  { %v883_v13 = vsel %vm200_vm0, %v831_v8, 0  ;;  %550 = vmatpush.bf16.msra.mxu1 %v543_v12  ;;  %v1511_v25 = vpack.c.b16 %v1508_v19, %v1508_v19  ;;  %v4050_v39 = vld [vmem:[%s5579_s0 + $0x1f0] sm:$0xff]  ;;  %v4161_v42 = vld [vmem:[%s5577_s1 + $0x8] sm:$0xff]  ;;  %v4039_v45 = vld [vmem:[%s5579_s0 + $0x18] sm:$0xff] }
   0x9   :  { %890 = vmatpush.bf16.msra.mxu2 %v883_v13  ;;  %v1851_v26 = vpack.c.b16 %v1848_v20, %v1848_v20  ;;  %v2243_v29 = vsel %vm200_vm0, %v2191_v21, 0  ;;  %v4056_v40 = vld [vmem:[%s5579_s0 + $0x50] sm:$0xff]  ;;  %v4125_v43 = vld [vmem:[%s5577_s1 + $0x8] sm:$0xff]  ;;  %v4051_v46 = vld [vmem:[%s5579_s0 + $0x1f8] sm:$0xff] }
   0xa   :  { %v1563_v32 = vsel %vm200_vm0, %v1511_v25, 0  ;;  %v4074_v41 = vld [vmem:[%s5579_s0 + $0x90] sm:$0xff]  ;;  %v4143_v44 = vld [vmem:[%s5577_s1 + $0x8] sm:$0xff]  ;;  %v4057_v47 = vld [vmem:[%s5579_s0 + $0x58] sm:$0xff] }
   0xb   :  { %210 = vmatpush.bf16.msra.mxu0 %v4053_v16  ;;  %4163 = vmatpush.bf16.msra.mxu3 %v4053_v16  ;;  %v1903_v33 = vsel %vm200_vm0, %v1851_v26, 0  ;;  %v4075_v48 = vld [vmem:[%s5579_s0 + $0x98] sm:$0xff]  ;;  %v4040_v49 = vld [vmem:[%s5579_s0 + $0x20] sm:$0xff]  ;;  %v4041_v53 = vld [vmem:[%s5579_s0 + $0x28] sm:$0xff] }
   0xc   :  { %551 = vmatpush.bf16.msra.mxu1 %v4071_v17  ;;  %v4066_v50 = vld [vmem:[%s5579_s0 + $0x220] sm:$0xff]  ;;  %v4067_v54 = vld [vmem:[%s5579_s0 + $0x228] sm:$0xff]  ;;  %v4042_v57 = vld [vmem:[%s5579_s0 + $0x30] sm:$0xff] }
   0xd   :  { %891 = vmatpush.bf16.msra.mxu2 %v4089_v18  ;;  %v4058_v51 = vld [vmem:[%s5579_s0 + $0x60] sm:$0xff]  ;;  %v4059_v55 = vld [vmem:[%s5579_s0 + $0x68] sm:$0xff]  ;;  %v4068_v58 = vld [vmem:[%s5579_s0 + $0x230] sm:$0xff] }
   0xe   :  { %v4076_v52 = vld [vmem:[%s5579_s0 + $0xa0] sm:$0xff]  ;;  %v4077_v56 = vld [vmem:[%s5579_s0 + $0xa8] sm:$0xff]  ;;  %v4060_v59 = vld [vmem:[%s5579_s0 + $0x70] sm:$0xff] }
   0xf   :  { %211 = vmatpush.bf16.msra.mxu0 %v4052_v22  ;;  %4164 = vmatpush.bf16.msra.mxu3 %v4052_v22  ;;  %v4078_v60 = vld [vmem:[%s5579_s0 + $0xb0] sm:$0xff]  ;;  %v4160_v62 = vld [vmem:[%s5577_s1] sm:$0xff]  ;;  %v4043_v2 = vld [vmem:[%s5579_s0 + $0x38] sm:$0xff] }
  0x10   :  { %552 = vmatpush.bf16.msra.mxu1 %v4070_v23  ;;  %v1074_v61 = vld [vmem:[%s5577_s1 + $0x10] sm:$0xf]  ;;  %v4069_v3 = vld [vmem:[%s5579_s0 + $0x238] sm:$0xff]  ;;  %v4394_v6 = vld [vmem:[%s5578_s2] ss:$0 sm:$0xff] }
  0x11   :  { %892 = vmatpush.bf16.msra.mxu2 %v4088_v24  ;;  %v1168_v63 = vunpack.c.l.b16 %v1074_v61  ;;  %v4061_v4 = vld [vmem:[%s5579_s0 + $0x78] sm:$0xff]  ;;  %v4399_v7 = vld [vmem:[%s5578_s2] ss:$0 sm:$0xff] }
  0x12   :  { %3440 = vmatmul.msk.bf16.vlgmr.msra.gmra.mxu0 %vm151_vm1, %v4036_v27  ;;  %3452 = vmatmul.msk.bf16.vlgmr.msra.gmra.mxu3 %vm151_vm1, %v4048_v28  ;;  %v4079_v5 = vld [vmem:[%s5579_s0 + $0xb8] sm:$0xff]  ;;  %v4044_v8 = vld [vmem:[%s5579_s0 + $0x1c0] sm:$0xff] }
  0x13   :  { %4165 = vmatpush.bf16.msrb.mxu3 %v543_v12  ;;  %3528 = vmatmul.msk.bf16.vlgmr.msra.gmra.mxu1 %vm151_vm1, %v4054_v30  ;;  %v1171_v0 = vpack.c.b16 %v1168_v63, %v1168_v63  ;;  %v4084_v9 = vld [vmem:[%s5579_s0 + $0x260] sm:$0xff] }
  0x14   :  { %3616 = vmatmul.msk.bf16.vlgmr.msra.gmra.mxu2 %vm151_vm1, %v4072_v31  ;;  %1570 = vmatpush.bf16.msrb.mxu0 %v1563_v32  ;;  %v4124_v10 = vld [vmem:[%s5577_s1] sm:$0xff] }
  0x15   :  { %2250 = vmatpush.bf16.msrb.mxu2 %v2243_v29  ;;  %1910 = vmatpush.bf16.msrb.mxu1 %v1903_v33  ;;  %v1223_v1 = vsel %vm200_vm0, %v1171_v0, 0  ;;  %v4142_v11 = vld [vmem:[%s5577_s1] sm:$0xff] }
  0x16   :  { %v4080_v14 = vld [vmem:[%s5579_s0 + $0x240] sm:$0xff] }
  0x17   :  { %4166 = vmatpush.bf16.msrb.mxu3 %v4071_v17  ;;  %v4428_v20 = vld [vmem:[%s5578_s2] ss:$0 sm:$0xff] }
  0x18   :  { %1571 = vmatpush.bf16.msrb.mxu0 %v4125_v43 }
  0x19   :  { %2251 = vmatpush.bf16.msrb.mxu2 %v4161_v42  ;;  %1911 = vmatpush.bf16.msrb.mxu1 %v4143_v44 }
  0x1b   :  { %4167 = vmatpush.bf16.msrb.mxu3 %v4070_v23 }
  0x1c   :  { %1572 = vmatpush.bf16.msrb.mxu0 %v4124_v10 }
  0x1d   :  { %2252 = vmatpush.bf16.msrb.mxu2 %v4160_v62  ;;  %1912 = vmatpush.bf16.msrb.mxu1 %v4142_v11 }
  0x1f   :  { %4168 = vmatpush.bf16.msra.mxu3 %v883_v13  ;;  %v4062_v13 = vld [vmem:[%s5579_s0 + $0x200] sm:$0xff] }
  0x22   :  { %3441 = vmatmul.msk.bf16.gmra.mxu0 %vm151_vm1, %v4037_v34  ;;  %3453 = vmatmul.msk.bf16.gmra.mxu3 %vm151_vm1, %v4049_v35 }
  0x23   :  { %4169 = vmatpush.bf16.msra.mxu3 %v4089_v18  ;;  %3529 = vmatmul.msk.bf16.gmra.mxu1 %vm151_vm1, %v4055_v36  ;;  %v4045_v36 = vld [vmem:[%s5579_s0 + $0x1c8] sm:$0xff] }
  0x24   :  { %3617 = vmatmul.msk.bf16.gmra.mxu2 %vm151_vm1, %v4073_v37  ;;  %v4085_v37 = vld [vmem:[%s5579_s0 + $0x268] sm:$0xff] }
  0x27   :  { %4170 = vmatpush.bf16.msra.mxu3 %v4088_v24 }
  0x32   :  { %3442 = vmatmul.msk.bf16.gmra.mxu0 %vm151_vm1, %v4038_v38  ;;  %3454 = vmatmul.msk.bf16.gmra.mxu3 %vm151_vm1, %v4050_v39 }
  0x33   :  { %3530 = vmatmul.msk.bf16.gmra.mxu1 %vm151_vm1, %v4056_v40  ;;  %v4063_v40 = vld [vmem:[%s5579_s0 + $0x208] sm:$0xff] }
  0x34   :  { %3618 = vmatmul.msk.bf16.gmra.mxu2 %vm151_vm1, %v4074_v41  ;;  %v4081_v41 = vld [vmem:[%s5579_s0 + $0x248] sm:$0xff] }
  0x42   :  { %3443 = vmatmul.msk.bf16.gmra.mxu0 %vm151_vm1, %v4039_v45  ;;  %3455 = vmatmul.msk.bf16.gmra.mxu3 %vm151_vm1, %v4051_v46  ;;  %v4107_v45 = vld [vmem:[%s5577_s1 + $0x8] sm:$0xff] }
  0x43   :  { %3531 = vmatmul.msk.bf16.gmra.mxu1 %vm151_vm1, %v4057_v47 }
  0x44   :  { %3619 = vmatmul.msk.bf16.gmra.mxu2 %vm151_vm1, %v4075_v48 }
  0x52   :  { %3444 = vmatmul.msk.bf16.gmra.mxu0 %vm151_vm1, %v4040_v49  ;;  %3540 = vmatmul.msk.bf16.vlgmr.msrb.gmra.mxu3 %vm151_vm1, %v4066_v50 }
  0x53   :  { %3532 = vmatmul.msk.bf16.gmra.mxu1 %vm151_vm1, %v4058_v51  ;;  %1230 = vmatpush.bf16.msrb.mxu3 %v1223_v1 }
  0x54   :  { %3620 = vmatmul.msk.bf16.gmra.mxu2 %vm151_vm1, %v4076_v52 }
  0x57   :  { %1231 = vmatpush.bf16.msrb.mxu3 %v4107_v45 }
  0x62   :  { %3445 = vmatmul.msk.bf16.gmra.mxu0 %vm151_vm1, %v4041_v53  ;;  %3541 = vmatmul.msk.bf16.gmra.mxu3 %vm151_vm1, %v4067_v54 }
  0x63   :  { %3533 = vmatmul.msk.bf16.gmra.mxu1 %vm151_vm1, %v4059_v55 }
  0x64   :  { %3621 = vmatmul.msk.bf16.gmra.mxu2 %vm151_vm1, %v4077_v56 }
  0x72   :  { %3446 = vmatmul.msk.bf16.gmra.mxu0 %vm151_vm1, %v4042_v57  ;;  %3542 = vmatmul.msk.bf16.gmra.mxu3 %vm151_vm1, %v4068_v58 }
  0x73   :  { %3534 = vmatmul.msk.bf16.gmra.mxu1 %vm151_vm1, %v4060_v59 }
  0x74   :  { %3622 = vmatmul.msk.bf16.gmra.mxu2 %vm151_vm1, %v4078_v60 }
  0x82   :  { %3447 = vmatmul.msk.bf16.gmra.mxu0 %vm151_vm1, %v4043_v2  ;;  %3543 = vmatmul.msk.bf16.gmra.mxu3 %vm151_vm1, %v4069_v3 }
  0x83   :  { %3535 = vmatmul.msk.bf16.gmra.mxu1 %vm151_vm1, %v4061_v4 }
  0x84   :  { %3623 = vmatmul.msk.bf16.gmra.mxu2 %vm151_vm1, %v4079_v5 }
  0x8f   :  { %v213_v12 = vpop.f32.mrf.mxu0 }
  0x90   :  { %v214_v15 = vadd.f32 %v4394_v6, %v213_v12  ;;  %v554_v16 = vpop.f32.mrf.mxu1 }
  0x91   :  { %v555_v17 = vadd.f32 %v4399_v7, %v554_v16  ;;  %v4086_v16 = vld [vmem:[%s5579_s0 + $0x270] sm:$0xff] }
  0x92   :  { %v293_v18 = vmax.f32 %v214_v15, 0.0  ;;  %3448 = vmatmul.msk.bf16.gmra.mxu0 %vm151_vm1, %v4044_v8  ;;  %3628 = vmatmul.msk.bf16.vlgmr.msra.gmra.mxu3 %vm151_vm1, %v4084_v9  ;;  %v4046_v15 = vld [vmem:[%s5579_s0 + $0x1d0] sm:$0xff] }
  0x93   :  { %v634_v19 = vmax.f32 %v555_v17, 0.0  ;;  %3536 = vmatmul.msk.bf16.gmra.mxu1 %vm151_vm1, %v4062_v13 }
  0x94   :  { %3624 = vmatmul.msk.bf16.gmra.mxu2 %vm151_vm1, %v4080_v14  ;;  %326 = vst.msk [vmem:[#allocation2] sm:$0xff] %vm325_vm2, %v293_v18 }
  0x95   :  { %666 = vst.msk [vmem:[#allocation2 + $0x80] sm:$0xff] %vm325_vm2, %v634_v19  ;;  %v273_v21 = vpop.f32.mrf.mxu3  ;;  %v4064_v19 = vld [vmem:[%s5579_s0 + $0x210] sm:$0xff] }
  0x96   :  { %v274_v22 = vadd.f32 %v4394_v6, %v273_v21  ;;  %v4082_v21 = vld [vmem:[%s5579_s0 + $0x250] sm:$0xff] }
  0x97   :  { %v894_v23 = vpop.f32.mrf.mxu2  ;;  %v215_v25 = vpop.f32.mrf.mxu0 }
  0x98   :  { %v895_v24 = vadd.f32 %v4428_v20, %v894_v23  ;;  %v317_v26 = vmax.f32 %v274_v22, 0.0  ;;  %v216_v27 = vadd.f32 %v4394_v6, %v215_v25  ;;  %v556_v28 = vpop.f32.mrf.mxu1  ;;  %v4106_v25 = vld [vmem:[%s5577_s1] sm:$0xff] }
  0x99   :  { %v557_v30 = vadd.f32 %v4399_v7, %v556_v28  ;;  %1232 = vmatpush.bf16.msrb.mxu3 %v4106_v25 }
  0x9a   :  { %v974_v29 = vmax.f32 %v895_v24, 0.0  ;;  %350 = vst.msk [vmem:[#allocation2 + $0x3c0] sm:$0xff] %vm325_vm2, %v317_v26  ;;  %v294_v31 = vmax.f32 %v216_v27, 0.0 }
  0x9b   :  { %v635_v32 = vmax.f32 %v557_v30, 0.0 }
  0x9c   :  { %1006 = vst.msk [vmem:[#allocation2 + $0x100] sm:$0xff] %vm325_vm2, %v974_v29 }
  0x9d   :  { %327 = vst.msk [vmem:[#allocation2 + $0x8] sm:$0xff] %vm325_vm2, %v294_v31  ;;  %v275_v33 = vpop.f32.mrf.mxu3 }
  0x9e   :  { %667 = vst.msk [vmem:[#allocation2 + $0x88] sm:$0xff] %vm325_vm2, %v635_v32  ;;  %v276_v34 = vadd.f32 %v4394_v6, %v275_v33 }
  0x9f   :  { %v896_v35 = vpop.f32.mrf.mxu2  ;;  %v218_v39 = vpop.f32.mrf.mxu0 }
  0xa0   :  { %v897_v38 = vadd.f32 %v4428_v20, %v896_v35  ;;  %v318_v42 = vmax.f32 %v276_v34, 0.0  ;;  %v219_v43 = vadd.f32 %v4394_v6, %v218_v39  ;;  %v559_v44 = vpop.f32.mrf.mxu1 }
  0xa1   :  { %v560_v47 = vadd.f32 %v4399_v7, %v559_v44 }
  0xa2   :  { %v975_v46 = vmax.f32 %v897_v38, 0.0  ;;  %351 = vst.msk [vmem:[#allocation2 + $0x3c8] sm:$0xff] %vm325_vm2, %v318_v42  ;;  %v295_v48 = vmax.f32 %v219_v43, 0.0  ;;  %3449 = vmatmul.msk.bf16.gmra.mxu0 %vm151_vm1, %v4045_v36  ;;  %3629 = vmatmul.msk.bf16.gmra.mxu3 %vm151_vm1, %v4085_v37 }
  0xa3   :  { %v636_v51 = vmax.f32 %v560_v47, 0.0  ;;  %3537 = vmatmul.msk.bf16.gmra.mxu1 %vm151_vm1, %v4063_v40 }
  0xa4   :  { %v2398_v49 = vld [vmem:[#allocation2] ss:$2 sm:$0xff]  ;;  %v2622_v50 = vld [vmem:[#allocation2 + $0x1] ss:$2 sm:$0xff]  ;;  %1007 = vst.msk [vmem:[#allocation2 + $0x108] sm:$0xff] %vm325_vm2, %v975_v46  ;;  %3625 = vmatmul.msk.bf16.gmra.mxu2 %vm151_vm1, %v4081_v41 }
  0xa5   :  { %v2845_v52 = vmax.f32 %v2398_v49, %v2622_v50  ;;  %v2414_v53 = vld [vmem:[#allocation2 + $0x80] ss:$2 sm:$0xff]  ;;  %v2638_v54 = vld [vmem:[#allocation2 + $0x81] ss:$2 sm:$0xff]  ;;  %328 = vst.msk [vmem:[#allocation2 + $0x10] sm:$0xff] %vm325_vm2, %v295_v48  ;;  %v278_v56 = vpop.f32.mrf.mxu3 }
  0xa6   :  { %v2853_v55 = vmax.f32 %v2414_v53, %v2638_v54  ;;  %668 = vst.msk [vmem:[#allocation2 + $0x90] sm:$0xff] %vm325_vm2, %v636_v51  ;;  %v279_v57 = vadd.f32 %v4394_v6, %v278_v56 }
  0xa7   :  { %2957 = vst.msk [vmem:[#allocation3] sm:$0xff] %vm325_vm2, %v2845_v52  ;;  %v899_v58 = vpop.f32.mrf.mxu2  ;;  %v220_v60 = vpop.f32.mrf.mxu0 }
  0xa8   :  { %2965 = vst.msk [vmem:[#allocation3 + $0x40] sm:$0xff] %vm325_vm2, %v2853_v55  ;;  %v900_v59 = vadd.f32 %v4428_v20, %v899_v58  ;;  %v319_v61 = vmax.f32 %v279_v57, 0.0  ;;  %v221_v62 = vadd.f32 %v4394_v6, %v220_v60  ;;  %v561_v63 = vpop.f32.mrf.mxu1  ;;  %v4047_v57 = vld [vmem:[%s5579_s0 + $0x1d8] sm:$0xff] }
  0xa9   :  { %v2518_v0 = vld [vmem:[#allocation2 + $0x3c0] ss:$2 sm:$0xff]  ;;  %v2742_v1 = vld [vmem:[#allocation2 + $0x3c1] ss:$2 sm:$0xff]  ;;  %v562_v3 = vadd.f32 %v4399_v7, %v561_v63  ;;  %v4087_v58 = vld [vmem:[%s5579_s0 + $0x278] sm:$0xff] }
  0xaa   :  { %v976_v2 = vmax.f32 %v900_v59, 0.0  ;;  %v2905_v4 = vmax.f32 %v2518_v0, %v2742_v1  ;;  %352 = vst.msk [vmem:[#allocation2 + $0x3d0] sm:$0xff] %vm325_vm2, %v319_v61  ;;  %v296_v9 = vmax.f32 %v221_v62, 0.0  ;;  %v4065_v61 = vld [vmem:[%s5579_s0 + $0x218] sm:$0xff] }
  0xab   :  { %v2430_v5 = vld [vmem:[#allocation2 + $0x100] ss:$2 sm:$0xff]  ;;  %v2654_v8 = vld [vmem:[#allocation2 + $0x101] ss:$2 sm:$0xff]  ;;  %v637_v11 = vmax.f32 %v562_v3, 0.0  ;;  %v4083_v62 = vld [vmem:[%s5579_s0 + $0x258] sm:$0xff] }
  0xac   :  { %v2861_v10 = vmax.f32 %v2430_v5, %v2654_v8  ;;  %1008 = vst.msk [vmem:[#allocation2 + $0x110] sm:$0xff] %vm325_vm2, %v976_v2 }
  0xad   :  { %3017 = vst.msk [vmem:[#allocation3 + $0x1e0] sm:$0xff] %vm325_vm2, %v2905_v4  ;;  %v280_v12 = vpop.f32.mrf.mxu3 }
  0xae   :  { %2973 = vst.msk [vmem:[#allocation3 + $0x80] sm:$0xff] %vm325_vm2, %v2861_v10  ;;  %v281_v13 = vadd.f32 %v4394_v6, %v280_v12 }
  0xaf   :  { %329 = vst.msk [vmem:[#allocation2 + $0x18] sm:$0xff] %vm325_vm2, %v296_v9  ;;  %v901_v14 = vpop.f32.mrf.mxu2  ;;  %v223_v18 = vpop.f32.mrf.mxu0 }
  0xb0   :  { %669 = vst.msk [vmem:[#allocation2 + $0x98] sm:$0xff] %vm325_vm2, %v637_v11  ;;  %v902_v17 = vadd.f32 %v4428_v20, %v901_v14  ;;  %v320_v22 = vmax.f32 %v281_v13, 0.0  ;;  %v224_v23 = vadd.f32 %v4394_v6, %v223_v18  ;;  %v564_v24 = vpop.f32.mrf.mxu1 }
  0xb1   :  { %v565_v27 = vadd.f32 %v4399_v7, %v564_v24 }
  0xb2   :  { %v977_v26 = vmax.f32 %v902_v17, 0.0  ;;  %353 = vst.msk [vmem:[#allocation2 + $0x3d8] sm:$0xff] %vm325_vm2, %v320_v22  ;;  %v297_v28 = vmax.f32 %v224_v23, 0.0  ;;  %3450 = vmatmul.msk.bf16.gmra.mxu0 %vm151_vm1, %v4046_v15  ;;  %3630 = vmatmul.msk.bf16.gmra.mxu3 %vm151_vm1, %v4086_v16 }
  0xb3   :  { %v638_v29 = vmax.f32 %v565_v27, 0.0  ;;  %3538 = vmatmul.msk.bf16.gmra.mxu1 %vm151_vm1, %v4064_v19 }
  0xb4   :  { %1009 = vst.msk [vmem:[#allocation2 + $0x118] sm:$0xff] %vm325_vm2, %v977_v26  ;;  %3626 = vmatmul.msk.bf16.gmra.mxu2 %vm151_vm1, %v4082_v21 }
  0xb5   :  { %330 = vst.msk [vmem:[#allocation2 + $0x20] sm:$0xff] %vm325_vm2, %v297_v28  ;;  %v283_v32 = vpop.f32.mrf.mxu3 }
  0xb6   :  { %v2400_v30 = vld [vmem:[#allocation2 + $0x10] ss:$2 sm:$0xff]  ;;  %v2624_v31 = vld [vmem:[#allocation2 + $0x11] ss:$2 sm:$0xff]  ;;  %670 = vst.msk [vmem:[#allocation2 + $0xa0] sm:$0xff] %vm325_vm2, %v638_v29  ;;  %v284_v36 = vadd.f32 %v4394_v6, %v283_v32 }
  0xb7   :  { %v2846_v33 = vmax.f32 %v2400_v30, %v2624_v31  ;;  %v2416_v34 = vld [vmem:[#allocation2 + $0x90] ss:$2 sm:$0xff]  ;;  %v2640_v35 = vld [vmem:[#allocation2 + $0x91] ss:$2 sm:$0xff]  ;;  %v904_v37 = vpop.f32.mrf.mxu2  ;;  %v225_v40 = vpop.f32.mrf.mxu0 }
  0xb8   :  { %v2854_v38 = vmax.f32 %v2416_v34, %v2640_v35  ;;  %v905_v39 = vadd.f32 %v4428_v20, %v904_v37  ;;  %v321_v41 = vmax.f32 %v284_v36, 0.0  ;;  %v226_v42 = vadd.f32 %v4394_v6, %v225_v40  ;;  %v566_v43 = vpop.f32.mrf.mxu1  ;;  %v3069_v34 = vld [vmem:[#allocation3] sm:$0xff] }
  0xb9   :  { %2958 = vst.msk [vmem:[#allocation3 + $0x8] sm:$0xff] %vm325_vm2, %v2846_v33  ;;  %v2520_v44 = vld [vmem:[#allocation2 + $0x3d0] ss:$2 sm:$0xff]  ;;  %v2744_v45 = vld [vmem:[#allocation2 + $0x3d1] ss:$2 sm:$0xff]  ;;  %v567_v47 = vadd.f32 %v4399_v7, %v566_v43  ;;  %v4090_v37 = vld [vmem:[%s5579_s0 + $0xc0] sm:$0xff] }
  0xba   :  { %2966 = vst.msk [vmem:[#allocation3 + $0x48] sm:$0xff] %vm325_vm2, %v2854_v38  ;;  %v978_v46 = vmax.f32 %v905_v39, 0.0  ;;  %v2906_v48 = vmax.f32 %v2520_v44, %v2744_v45  ;;  %v298_v51 = vmax.f32 %v226_v42, 0.0  ;;  %v4108_v38 = vld [vmem:[%s5579_s0 + $0x100] sm:$0xff] }
  0xbb   :  { %v2432_v49 = vld [vmem:[#allocation2 + $0x110] ss:$2 sm:$0xff]  ;;  %v2656_v50 = vld [vmem:[#allocation2 + $0x111] ss:$2 sm:$0xff]  ;;  %354 = vst.msk [vmem:[#allocation2 + $0x3e0] sm:$0xff] %vm325_vm2, %v321_v41  ;;  %v639_v53 = vmax.f32 %v567_v47, 0.0 }
  0xbc   :  { %v2862_v52 = vmax.f32 %v2432_v49, %v2656_v50  ;;  %1010 = vst.msk [vmem:[#allocation2 + $0x120] sm:$0xff] %vm325_vm2, %v978_v46  ;;  %v4126_v42 = vld [vmem:[%s5579_s0 + $0x140] sm:$0xff] }
  0xbd   :  { %3018 = vst.msk [vmem:[#allocation3 + $0x1e8] sm:$0xff] %vm325_vm2, %v2906_v48  ;;  %v285_v54 = vpop.f32.mrf.mxu3  ;;  %v4144_v43 = vld [vmem:[%s5579_s0 + $0x180] sm:$0xff] }
  0xbe   :  { %2974 = vst.msk [vmem:[#allocation3 + $0x88] sm:$0xff] %vm325_vm2, %v2862_v52  ;;  %v286_v55 = vadd.f32 %v4394_v6, %v285_v54  ;;  %v3112_v44 = vld [vmem:[#allocation3 + $0x40] sm:$0xff] }
  0xbf   :  { %331 = vst.msk [vmem:[#allocation2 + $0x28] sm:$0xff] %vm325_vm2, %v298_v51  ;;  %v906_v56 = vpop.f32.mrf.mxu2  ;;  %v228_v60 = vpop.f32.mrf.mxu0 }
  0xc0   :  { %671 = vst.msk [vmem:[#allocation2 + $0xa8] sm:$0xff] %vm325_vm2, %v639_v53  ;;  %v907_v59 = vadd.f32 %v4428_v20, %v906_v56  ;;  %v322_v63 = vmax.f32 %v286_v55, 0.0  ;;  %v229_v0 = vadd.f32 %v4394_v6, %v228_v60  ;;  %v569_v1 = vpop.f32.mrf.mxu1  ;;  %v3093_v55 = vld [vmem:[#allocation3 + $0x1e0] sm:$0xff] }
  0xc1   :  { %v570_v3 = vadd.f32 %v4399_v7, %v569_v1 }
  0xc2   :  { %v979_v2 = vmax.f32 %v907_v59, 0.0  ;;  %355 = vst.msk [vmem:[#allocation2 + $0x3e8] sm:$0xff] %vm325_vm2, %v322_v63  ;;  %v299_v4 = vmax.f32 %v229_v0, 0.0  ;;  %3451 = vmatmul.msk.bf16.gmra.mxu0 %vm151_vm1, %v4047_v57  ;;  %3631 = vmatmul.msk.bf16.gmra.mxu3 %vm151_vm1, %v4087_v58  ;;  %v3154_v59 = vld [vmem:[#allocation3 + $0x80] sm:$0xff] }
  0xc3   :  { %v640_v5 = vmax.f32 %v570_v3, 0.0  ;;  %3539 = vmatmul.msk.bf16.gmra.mxu1 %vm151_vm1, %v4065_v61 }
  0xc4   :  { %1011 = vst.msk [vmem:[#allocation2 + $0x128] sm:$0xff] %vm325_vm2, %v979_v2  ;;  %3627 = vmatmul.msk.bf16.gmra.mxu2 %vm151_vm1, %v4083_v62 }
  0xc5   :  { %332 = vst.msk [vmem:[#allocation2 + $0x30] sm:$0xff] %vm325_vm2, %v299_v4  ;;  %v288_v10 = vpop.f32.mrf.mxu3 }
  0xc6   :  { %v2402_v8 = vld [vmem:[#allocation2 + $0x20] ss:$2 sm:$0xff]  ;;  %v2626_v9 = vld [vmem:[#allocation2 + $0x21] ss:$2 sm:$0xff]  ;;  %672 = vst.msk [vmem:[#allocation2 + $0xb0] sm:$0xff] %vm325_vm2, %v640_v5  ;;  %v289_v14 = vadd.f32 %v4394_v6, %v288_v10 }
  0xc7   :  { %v2847_v11 = vmax.f32 %v2402_v8, %v2626_v9  ;;  %v2418_v12 = vld [vmem:[#allocation2 + $0xa0] ss:$2 sm:$0xff]  ;;  %v2642_v13 = vld [vmem:[#allocation2 + $0xa1] ss:$2 sm:$0xff]  ;;  %v909_v15 = vpop.f32.mrf.mxu2  ;;  %v230_v18 = vpop.f32.mrf.mxu0 }
  0xc8   :  { %v2855_v16 = vmax.f32 %v2418_v12, %v2642_v13  ;;  %v910_v17 = vadd.f32 %v4428_v20, %v909_v15  ;;  %v323_v19 = vmax.f32 %v289_v14, 0.0  ;;  %v231_v21 = vadd.f32 %v4394_v6, %v230_v18  ;;  %v571_v22 = vpop.f32.mrf.mxu1 }
  0xc9   :  { %2959 = vst.msk [vmem:[#allocation3 + $0x10] sm:$0xff] %vm325_vm2, %v2847_v11  ;;  %v2522_v23 = vld [vmem:[#allocation2 + $0x3e0] ss:$2 sm:$0xff]  ;;  %v2746_v24 = vld [vmem:[#allocation2 + $0x3e1] ss:$2 sm:$0xff]  ;;  %v572_v26 = vadd.f32 %v4399_v7, %v571_v22 }
  0xca   :  { %2967 = vst.msk [vmem:[#allocation3 + $0x50] sm:$0xff] %vm325_vm2, %v2855_v16  ;;  %v980_v25 = vmax.f32 %v910_v17, 0.0  ;;  %v2907_v27 = vmax.f32 %v2522_v23, %v2746_v24  ;;  %v300_v30 = vmax.f32 %v231_v21, 0.0 }
  0xcb   :  { %v2434_v28 = vld [vmem:[#allocation2 + $0x120] ss:$2 sm:$0xff]  ;;  %v2658_v29 = vld [vmem:[#allocation2 + $0x121] ss:$2 sm:$0xff]  ;;  %356 = vst.msk [vmem:[#allocation2 + $0x3f0] sm:$0xff] %vm325_vm2, %v323_v19  ;;  %v641_v32 = vmax.f32 %v572_v26, 0.0 }
  0xcc   :  { %v2863_v31 = vmax.f32 %v2434_v28, %v2658_v29  ;;  %1012 = vst.msk [vmem:[#allocation2 + $0x130] sm:$0xff] %vm325_vm2, %v980_v25 }
  0xcd   :  { %3019 = vst.msk [vmem:[#allocation3 + $0x1f0] sm:$0xff] %vm325_vm2, %v2907_v27  ;;  %v290_v33 = vpop.f32.mrf.mxu3 }
  0xce   :  { %2975 = vst.msk [vmem:[#allocation3 + $0x90] sm:$0xff] %vm325_vm2, %v2863_v31  ;;  %v291_v35 = vadd.f32 %v4394_v6, %v290_v33  ;;  %v4091_v31 = vld [vmem:[%s5579_s0 + $0xc8] sm:$0xff] }
  0xcf   :  { %333 = vst.msk [vmem:[#allocation2 + $0x38] sm:$0xff] %vm325_vm2, %v300_v30  ;;  %v911_v36 = vpop.f32.mrf.mxu2  ;;  %v233_v41 = vpop.f32.mrf.mxu0 }
  0xd0   :  { %v3073_v39 = vld [vmem:[#allocation3 + $0x10] sm:$0xff]  ;;  %673 = vst.msk [vmem:[#allocation2 + $0xb8] sm:$0xff] %vm325_vm2, %v641_v32  ;;  %v912_v40 = vadd.f32 %v4428_v20, %v911_v36  ;;  %v324_v47 = vmax.f32 %v291_v35, 0.0  ;;  %v234_v48 = vadd.f32 %v4394_v6, %v233_v41  ;;  %v574_v49 = vpop.f32.mrf.mxu1  ;;  %v4109_v32 = vld [vmem:[%s5579_s0 + $0x108] sm:$0xff] }
  0xd1   :  { %v3077_v45 = vmax.f32 %v3069_v34, %v3073_v39  ;;  %v3116_v46 = vld [vmem:[#allocation3 + $0x50] sm:$0xff]  ;;  %v575_v52 = vadd.f32 %v4399_v7, %v574_v49  ;;  %v4127_v35 = vld [vmem:[%s5579_s0 + $0x148] sm:$0xff] }
  0xd2   :  { %v3120_v50 = vmax.f32 %v3112_v44, %v3116_v46  ;;  %v981_v51 = vmax.f32 %v912_v40, 0.0  ;;  %357 = vst.msk [vmem:[#allocation2 + $0x3f8] sm:$0xff] %vm325_vm2, %v324_v47  ;;  %v301_v54 = vmax.f32 %v234_v48, 0.0  ;;  %3704 = vmatmul.msk.bf16.vlgmr.msrb.gmra.mxu3 %vm151_vm1, %v4090_v37  ;;  %3792 = vmatmul.msk.bf16.vlgmr.msrb.gmra.mxu0 %vm151_vm1, %v4108_v38  ;;  %v4145_v36 = vld [vmem:[%s5579_s0 + $0x188] sm:$0xff] }
  0xd3   :  { %v3081_v53 = vpack.c.bf16 %v3077_v45, %v3077_v45  ;;  %v642_v58 = vmax.f32 %v575_v52, 0.0  ;;  %3880 = vmatmul.msk.bf16.vlgmr.msrb.gmra.mxu1 %vm151_vm1, %v4126_v42  ;;  %v3070_v40 = vld [vmem:[#allocation3 + $0x8] sm:$0xff] }
  0xd4   :  { %v3124_v56 = vpack.c.bf16 %v3120_v50, %v3120_v50  ;;  %v3097_v57 = vld [vmem:[#allocation3 + $0x1f0] sm:$0xff]  ;;  %1013 = vst.msk [vmem:[#allocation2 + $0x138] sm:$0xff] %vm325_vm2, %v981_v51  ;;  %3968 = vmatmul.msk.bf16.vlgmr.msrb.gmra.mxu2 %vm151_vm1, %v4144_v43  ;;  %v3113_v44 = vld [vmem:[#allocation3 + $0x48] sm:$0xff] }
  0xd5   :  { %3086 = vst.msk [vmem:[%s5580_s3] sm:$0xf] %vm3085_vm3, %v3081_v53  ;;  %v3101_v60 = vmax.f32 %v3093_v55, %v3097_v57  ;;  %v3158_v61 = vld [vmem:[#allocation3 + $0x90] sm:$0xff]  ;;  %v614_v1 = vpop.f32.mrf.mxu3  ;;  %v3094_v48 = vld [vmem:[#allocation3 + $0x1e8] sm:$0xff] }
  0xd6   :  { %3988 = vst.msk [vmem:[%s5580_s3 + $0x10] sm:$0xf] %vm3085_vm3, %v3124_v56  ;;  %v3162_v62 = vmax.f32 %v3154_v59, %v3158_v61  ;;  %v2404_v63 = vld [vmem:[#allocation2 + $0x30] ss:$2 sm:$0xff]  ;;  %v2628_v0 = vld [vmem:[#allocation2 + $0x31] ss:$2 sm:$0xff]  ;;  %v615_v8 = vadd.f32 %v4399_v7, %v614_v1 }
  0xd7   :  { %v3105_v2 = vpack.c.bf16 %v3101_v60, %v3101_v60  ;;  %v2848_v3 = vmax.f32 %v2404_v63, %v2628_v0  ;;  %v2420_v4 = vld [vmem:[#allocation2 + $0xb0] ss:$2 sm:$0xff]  ;;  %v2644_v5 = vld [vmem:[#allocation2 + $0xb1] ss:$2 sm:$0xff]  ;;  %334 = vst.msk [vmem:[#allocation2 + $0x40] sm:$0xff] %vm325_vm2, %v301_v54  ;;  %v914_v9 = vpop.f32.mrf.mxu2  ;;  %v235_v13 = vpop.f32.mrf.mxu0  ;;  %v3155_v52 = vld [vmem:[#allocation3 + $0x88] sm:$0xff] }
  0xd8   :  { %v3166_v10 = vpack.c.bf16 %v3162_v62, %v3162_v62  ;;  %v2856_v11 = vmax.f32 %v2420_v4, %v2644_v5  ;;  %674 = vst.msk [vmem:[#allocation2 + $0xc0] sm:$0xff] %vm325_vm2, %v642_v58  ;;  %v915_v12 = vadd.f32 %v4428_v20, %v914_v9  ;;  %v236_v14 = vadd.f32 %v4394_v6, %v235_v13  ;;  %v576_v15 = vpop.f32.mrf.mxu1 }
  0xd9   :  { %3986 = vst.msk [vmem:[%s5580_s3 + $0x78] sm:$0xf] %vm3085_vm3, %v3105_v2  ;;  %v2524_v16 = vld [vmem:[#allocation2 + $0x3f0] ss:$2 sm:$0xff]  ;;  %v2748_v17 = vld [vmem:[#allocation2 + $0x3f1] ss:$2 sm:$0xff]  ;;  %v577_v18 = vadd.f32 %v4399_v7, %v576_v15 }
  0xda   :  { %3996 = vst.msk [vmem:[%s5580_s3 + $0x20] sm:$0xf] %vm3085_vm3, %v3166_v10  ;;  %v2908_v19 = vmax.f32 %v2524_v16, %v2748_v17  ;;  %v658_v23 = vmax.f32 %v615_v8, 0.0  ;;  %v982_v25 = vmax.f32 %v915_v12, 0.0  ;;  %v302_v26 = vmax.f32 %v236_v14, 0.0 }
  0xdb   :  { %2960 = vst.msk [vmem:[#allocation3 + $0x18] sm:$0xff] %vm325_vm2, %v2848_v3  ;;  %v2436_v21 = vld [vmem:[#allocation2 + $0x130] ss:$2 sm:$0xff]  ;;  %v2660_v22 = vld [vmem:[#allocation2 + $0x131] ss:$2 sm:$0xff]  ;;  %v643_v27 = vmax.f32 %v577_v18, 0.0 }
  0xdc   :  { %2968 = vst.msk [vmem:[#allocation3 + $0x58] sm:$0xff] %vm325_vm2, %v2856_v11  ;;  %v2864_v24 = vmax.f32 %v2436_v21, %v2660_v22 }
  0xdd   :  { %3020 = vst.msk [vmem:[#allocation3 + $0x1f8] sm:$0xff] %vm325_vm2, %v2908_v19  ;;  %v616_v28 = vpop.f32.mrf.mxu3 }
  0xde   :  { %2976 = vst.msk [vmem:[#allocation3 + $0x98] sm:$0xff] %vm325_vm2, %v2864_v24  ;;  %v617_v29 = vadd.f32 %v4399_v7, %v616_v28 }
  0xdf   :  { %690 = vst.msk [vmem:[#allocation2 + $0x440] sm:$0xff] %vm325_vm2, %v658_v23  ;;  %v916_v30 = vpop.f32.mrf.mxu2  ;;  %v238_v34 = vpop.f32.mrf.mxu0 }
  0xe0   :  { %1014 = vst.msk [vmem:[#allocation2 + $0x140] sm:$0xff] %vm325_vm2, %v982_v25  ;;  %v917_v33 = vadd.f32 %v4428_v20, %v916_v30  ;;  %v659_v37 = vmax.f32 %v617_v29, 0.0  ;;  %v239_v38 = vadd.f32 %v4394_v6, %v238_v34  ;;  %v579_v39 = vpop.f32.mrf.mxu1  ;;  %v4128_v30 = vld [vmem:[%s5579_s0 + $0x150] sm:$0xff] }
  0xe1   :  { %335 = vst.msk [vmem:[#allocation2 + $0x48] sm:$0xff] %vm325_vm2, %v302_v26  ;;  %v580_v43 = vadd.f32 %v4399_v7, %v579_v39  ;;  %v4092_v26 = vld [vmem:[%s5579_s0 + $0xd0] sm:$0xff] }
  0xe2   :  { %v3074_v41 = vld [vmem:[#allocation3 + $0x18] sm:$0xff]  ;;  %675 = vst.msk [vmem:[#allocation2 + $0xc8] sm:$0xff] %vm325_vm2, %v643_v27  ;;  %v983_v42 = vmax.f32 %v917_v33, 0.0  ;;  %v303_v47 = vmax.f32 %v239_v38, 0.0  ;;  %3705 = vmatmul.msk.bf16.gmra.mxu3 %vm151_vm1, %v4091_v31  ;;  %3793 = vmatmul.msk.bf16.gmra.mxu0 %vm151_vm1, %v4109_v32  ;;  %v4110_v27 = vld [vmem:[%s5579_s0 + $0x110] sm:$0xff] }
  0xe3   :  { %v3078_v45 = vmax.f32 %v3070_v40, %v3074_v41  ;;  %v3117_v46 = vld [vmem:[#allocation3 + $0x58] sm:$0xff]  ;;  %691 = vst.msk [vmem:[#allocation2 + $0x448] sm:$0xff] %vm325_vm2, %v659_v37  ;;  %v644_v51 = vmax.f32 %v580_v43, 0.0  ;;  %3881 = vmatmul.msk.bf16.gmra.mxu1 %vm151_vm1, %v4127_v35  ;;  %v4146_v31 = vld [vmem:[%s5579_s0 + $0x190] sm:$0xff] }
  0xe4   :  { %v3121_v49 = vmax.f32 %v3113_v44, %v3117_v46  ;;  %v3098_v50 = vld [vmem:[#allocation3 + $0x1f8] sm:$0xff]  ;;  %1015 = vst.msk [vmem:[#allocation2 + $0x148] sm:$0xff] %vm325_vm2, %v983_v42  ;;  %3969 = vmatmul.msk.bf16.gmra.mxu2 %vm151_vm1, %v4145_v36 }
  0xe5   :  { %v3082_v53 = vpack.c.bf16 %v3078_v45, %v3078_v45  ;;  %v3102_v54 = vmax.f32 %v3094_v48, %v3098_v50  ;;  %v3159_v55 = vld [vmem:[#allocation3 + $0x98] sm:$0xff]  ;;  %336 = vst.msk [vmem:[#allocation2 + $0x50] sm:$0xff] %vm325_vm2, %v303_v47  ;;  %v619_v58 = vpop.f32.mrf.mxu3 }
  0xe6   :  { %v3125_v56 = vpack.c.bf16 %v3121_v49, %v3121_v49  ;;  %v3163_v57 = vmax.f32 %v3155_v52, %v3159_v55  ;;  %676 = vst.msk [vmem:[#allocation2 + $0xd0] sm:$0xff] %vm325_vm2, %v644_v51  ;;  %v620_v60 = vadd.f32 %v4399_v7, %v619_v58 }
  0xe7   :  { %3088 = vst.msk [vmem:[%s5580_s3 + $0x4] sm:$0x7] %vm3087_vm4, %v3082_v53  ;;  %v3106_v59 = vpack.c.bf16 %v3102_v54, %v3102_v54  ;;  %v919_v61 = vpop.f32.mrf.mxu2  ;;  %v240_v2 = vpop.f32.mrf.mxu0 }
  0xe8   :  { %3989 = vst.msk [vmem:[%s5580_s3 + $0x14] sm:$0x7] %vm3087_vm4, %v3125_v56  ;;  %v3167_v62 = vpack.c.bf16 %v3163_v57, %v3163_v57  ;;  %v2406_v63 = vld [vmem:[#allocation2 + $0x40] ss:$2 sm:$0xff]  ;;  %v2630_v0 = vld [vmem:[#allocation2 + $0x41] ss:$2 sm:$0xff]  ;;  %v920_v1 = vadd.f32 %v4428_v20, %v919_v61  ;;  %v241_v8 = vadd.f32 %v4394_v6, %v240_v2  ;;  %v581_v9 = vpop.f32.mrf.mxu1 }
  0xe9   :  { %3987 = vst.msk [vmem:[%s5580_s3 + $0x7c] sm:$0x7] %vm3087_vm4, %v3106_v59  ;;  %v2849_v3 = vmax.f32 %v2406_v63, %v2630_v0  ;;  %v2422_v4 = vld [vmem:[#allocation2 + $0xc0] ss:$2 sm:$0xff]  ;;  %v2646_v5 = vld [vmem:[#allocation2 + $0xc1] ss:$2 sm:$0xff]  ;;  %v582_v13 = vadd.f32 %v4399_v7, %v581_v9 }
  0xea   :  { %3997 = vst.msk [vmem:[%s5580_s3 + $0x24] sm:$0x7] %vm3087_vm4, %v3167_v62  ;;  %v2857_v10 = vmax.f32 %v2422_v4, %v2646_v5  ;;  %v2534_v11 = vld [vmem:[#allocation2 + $0x440] ss:$2 sm:$0xff]  ;;  %v2758_v12 = vld [vmem:[#allocation2 + $0x441] ss:$2 sm:$0xff] }
  0xeb   :  { %2961 = vst.msk [vmem:[#allocation3 + $0x20] sm:$0xff] %vm325_vm2, %v2849_v3  ;;  %v2913_v14 = vmax.f32 %v2534_v11, %v2758_v12  ;;  %v2438_v15 = vld [vmem:[#allocation2 + $0x140] ss:$2 sm:$0xff]  ;;  %v2662_v16 = vld [vmem:[#allocation2 + $0x141] ss:$2 sm:$0xff]  ;;  %v660_v17 = vmax.f32 %v620_v60, 0.0 }
  0xec   :  { %2969 = vst.msk [vmem:[#allocation3 + $0x60] sm:$0xff] %vm325_vm2, %v2857_v10  ;;  %v2865_v18 = vmax.f32 %v2438_v15, %v2662_v16  ;;  %v984_v19 = vmax.f32 %v920_v1, 0.0  ;;  %v304_v21 = vmax.f32 %v241_v8, 0.0  ;;  %v645_v22 = vmax.f32 %v582_v13, 0.0  ;;  %v4093_v2 = vld [vmem:[%s5579_s0 + $0xd8] sm:$0xff] }
  0xed   :  { %3025 = vst.msk [vmem:[#allocation3 + $0x220] sm:$0xff] %vm325_vm2, %v2913_v14  ;;  %v621_v23 = vpop.f32.mrf.mxu3  ;;  %v4111_v3 = vld [vmem:[%s5579_s0 + $0x118] sm:$0xff] }
  0xee   :  { %2977 = vst.msk [vmem:[#allocation3 + $0xa0] sm:$0xff] %vm325_vm2, %v2865_v18  ;;  %v622_v24 = vadd.f32 %v4399_v7, %v621_v23  ;;  %v4129_v8 = vld [vmem:[%s5579_s0 + $0x158] sm:$0xff] }
  0xef   :  { %692 = vst.msk [vmem:[#allocation2 + $0x450] sm:$0xff] %vm325_vm2, %v660_v17  ;;  %v921_v25 = vpop.f32.mrf.mxu2  ;;  %v243_v29 = vpop.f32.mrf.mxu0  ;;  %v4147_v9 = vld [vmem:[%s5579_s0 + $0x198] sm:$0xff] }
  0xf0   :  { %1016 = vst.msk [vmem:[#allocation2 + $0x150] sm:$0xff] %vm325_vm2, %v984_v19  ;;  %v922_v28 = vadd.f32 %v4428_v20, %v921_v25  ;;  %v661_v32 = vmax.f32 %v622_v24, 0.0  ;;  %v244_v33 = vadd.f32 %v4394_v6, %v243_v29  ;;  %v584_v34 = vpop.f32.mrf.mxu1 }
  0xf1   :  { %337 = vst.msk [vmem:[#allocation2 + $0x58] sm:$0xff] %vm325_vm2, %v304_v21  ;;  %v585_v36 = vadd.f32 %v4399_v7, %v584_v34 }
  0xf2   :  { %677 = vst.msk [vmem:[#allocation2 + $0xd8] sm:$0xff] %vm325_vm2, %v645_v22  ;;  %v985_v35 = vmax.f32 %v922_v28, 0.0  ;;  %v305_v37 = vmax.f32 %v244_v33, 0.0  ;;  %3706 = vmatmul.msk.bf16.gmra.mxu3 %vm151_vm1, %v4092_v26  ;;  %3794 = vmatmul.msk.bf16.gmra.mxu0 %vm151_vm1, %v4110_v27 }
  0xf3   :  { %693 = vst.msk [vmem:[#allocation2 + $0x458] sm:$0xff] %vm325_vm2, %v661_v32  ;;  %v646_v38 = vmax.f32 %v585_v36, 0.0  ;;  %3882 = vmatmul.msk.bf16.gmra.mxu1 %vm151_vm1, %v4128_v30 }
  0xf4   :  { %1017 = vst.msk [vmem:[#allocation2 + $0x158] sm:$0xff] %vm325_vm2, %v985_v35  ;;  %3970 = vmatmul.msk.bf16.gmra.mxu2 %vm151_vm1, %v4146_v31 }
  0xf5   :  { %338 = vst.msk [vmem:[#allocation2 + $0x60] sm:$0xff] %vm325_vm2, %v305_v37  ;;  %v624_v39 = vpop.f32.mrf.mxu3 }
  0xf6   :  { %678 = vst.msk [vmem:[#allocation2 + $0xe0] sm:$0xff] %vm325_vm2, %v646_v38  ;;  %v625_v40 = vadd.f32 %v4399_v7, %v624_v39 }
  0xf7   :  { %v924_v41 = vpop.f32.mrf.mxu2  ;;  %v245_v45 = vpop.f32.mrf.mxu0 }
  0xf8   :  { %v2408_v42 = vld [vmem:[#allocation2 + $0x50] ss:$2 sm:$0xff]  ;;  %v2632_v43 = vld [vmem:[#allocation2 + $0x51] ss:$2 sm:$0xff]  ;;  %v925_v44 = vadd.f32 %v4428_v20, %v924_v41  ;;  %v246_v49 = vadd.f32 %v4394_v6, %v245_v45  ;;  %v586_v50 = vpop.f32.mrf.mxu1  ;;  %v662_v58 = vmax.f32 %v625_v40, 0.0  ;;  %v4094_v45 = vld [vmem:[%s5579_s0 + $0xe0] sm:$0xff] }
  0xf9   :  { %v2850_v46 = vmax.f32 %v2408_v42, %v2632_v43  ;;  %v2424_v47 = vld [vmem:[#allocation2 + $0xd0] ss:$2 sm:$0xff]  ;;  %v2648_v48 = vld [vmem:[#allocation2 + $0xd1] ss:$2 sm:$0xff]  ;;  %v587_v54 = vadd.f32 %v4399_v7, %v586_v50  ;;  %v4148_v50 = vld [vmem:[%s5579_s0 + $0x1a0] sm:$0xff] }
  0xfa   :  { %v2858_v51 = vmax.f32 %v2424_v47, %v2648_v48  ;;  %v2536_v52 = vld [vmem:[#allocation2 + $0x450] ss:$2 sm:$0xff]  ;;  %v2760_v53 = vld [vmem:[#allocation2 + $0x451] ss:$2 sm:$0xff]  ;;  %v986_v60 = vmax.f32 %v925_v44, 0.0  ;;  %v306_v61 = vmax.f32 %v246_v49, 0.0 }
  0xfb   :  { %2962 = vst.msk [vmem:[#allocation3 + $0x28] sm:$0xff] %vm325_vm2, %v2850_v46  ;;  %v2914_v55 = vmax.f32 %v2536_v52, %v2760_v53  ;;  %v2440_v56 = vld [vmem:[#allocation2 + $0x150] ss:$2 sm:$0xff]  ;;  %v2664_v57 = vld [vmem:[#allocation2 + $0x151] ss:$2 sm:$0xff]  ;;  %v647_v62 = vmax.f32 %v587_v54, 0.0 }
  0xfc   :  { %2970 = vst.msk [vmem:[#allocation3 + $0x68] sm:$0xff] %vm325_vm2, %v2858_v51  ;;  %v2866_v59 = vmax.f32 %v2440_v56, %v2664_v57  ;;  %v4112_v46 = vld [vmem:[%s5579_s0 + $0x120] sm:$0xff] }
  0xfd   :  { %3026 = vst.msk [vmem:[#allocation3 + $0x228] sm:$0xff] %vm325_vm2, %v2914_v55  ;;  %v626_v63 = vpop.f32.mrf.mxu3  ;;  %v4130_v49 = vld [vmem:[%s5579_s0 + $0x160] sm:$0xff] }
  0xfe   :  { %2978 = vst.msk [vmem:[#allocation3 + $0xa8] sm:$0xff] %vm325_vm2, %v2866_v59  ;;  %v627_v0 = vadd.f32 %v4399_v7, %v626_v63  ;;  %v3091_v54 = vld [vmem:[#allocation3 + $0x20] sm:$0xff] }
  0xff   :  { %694 = vst.msk [vmem:[#allocation2 + $0x460] sm:$0xff] %vm325_vm2, %v662_v58  ;;  %v926_v1 = vpop.f32.mrf.mxu2  ;;  %v248_v5 = vpop.f32.mrf.mxu0  ;;  %v3133_v58 = vld [vmem:[#allocation3 + $0x60] sm:$0xff] }
 0x100   :  { %1018 = vst.msk [vmem:[#allocation2 + $0x160] sm:$0xff] %vm325_vm2, %v986_v60  ;;  %v927_v4 = vadd.f32 %v4428_v20, %v926_v1  ;;  %v663_v10 = vmax.f32 %v627_v0, 0.0  ;;  %v249_v11 = vadd.f32 %v4394_v6, %v248_v5  ;;  %v589_v12 = vpop.f32.mrf.mxu1 }
 0x101   :  { %339 = vst.msk [vmem:[#allocation2 + $0x68] sm:$0xff] %vm325_vm2, %v306_v61  ;;  %v590_v14 = vadd.f32 %v4399_v7, %v589_v12 }
 0x102   :  { %679 = vst.msk [vmem:[#allocation2 + $0xe8] sm:$0xff] %vm325_vm2, %v647_v62  ;;  %v987_v13 = vmax.f32 %v927_v4, 0.0  ;;  %v307_v15 = vmax.f32 %v249_v11, 0.0  ;;  %3707 = vmatmul.msk.bf16.gmra.mxu3 %vm151_vm1, %v4093_v2  ;;  %3795 = vmatmul.msk.bf16.gmra.mxu0 %vm151_vm1, %v4111_v3  ;;  %v3135_v62 = vld [vmem:[#allocation3 + $0x220] sm:$0xff] }
 0x103   :  { %695 = vst.msk [vmem:[#allocation2 + $0x468] sm:$0xff] %vm325_vm2, %v663_v10  ;;  %v648_v16 = vmax.f32 %v590_v14, 0.0  ;;  %3883 = vmatmul.msk.bf16.gmra.mxu1 %vm151_vm1, %v4129_v8 }
 0x104   :  { %1019 = vst.msk [vmem:[#allocation2 + $0x168] sm:$0xff] %vm325_vm2, %v987_v13  ;;  %3971 = vmatmul.msk.bf16.gmra.mxu2 %vm151_vm1, %v4147_v9 }
 0x105   :  { %340 = vst.msk [vmem:[#allocation2 + $0x70] sm:$0xff] %vm325_vm2, %v307_v15  ;;  %v629_v17 = vpop.f32.mrf.mxu3 }
 0x106   :  { %680 = vst.msk [vmem:[#allocation2 + $0xf0] sm:$0xff] %vm325_vm2, %v648_v16  ;;  %v630_v18 = vadd.f32 %v4399_v7, %v629_v17 }
 0x107   :  { %v929_v19 = vpop.f32.mrf.mxu2  ;;  %v250_v24 = vpop.f32.mrf.mxu0 }
 0x108   :  { %v2410_v21 = vld [vmem:[#allocation2 + $0x60] ss:$2 sm:$0xff]  ;;  %v2634_v22 = vld [vmem:[#allocation2 + $0x61] ss:$2 sm:$0xff]  ;;  %v930_v23 = vadd.f32 %v4428_v20, %v929_v19  ;;  %v251_v28 = vadd.f32 %v4394_v6, %v250_v24  ;;  %v591_v29 = vpop.f32.mrf.mxu1  ;;  %v664_v37 = vmax.f32 %v630_v18, 0.0 }
 0x109   :  { %v2851_v25 = vmax.f32 %v2410_v21, %v2634_v22  ;;  %v2426_v26 = vld [vmem:[#allocation2 + $0xe0] ss:$2 sm:$0xff]  ;;  %v2650_v27 = vld [vmem:[#allocation2 + $0xe1] ss:$2 sm:$0xff]  ;;  %v592_v33 = vadd.f32 %v4399_v7, %v591_v29 }
 0x10a   :  { %v2859_v30 = vmax.f32 %v2426_v26, %v2650_v27  ;;  %v2538_v31 = vld [vmem:[#allocation2 + $0x460] ss:$2 sm:$0xff]  ;;  %v2762_v32 = vld [vmem:[#allocation2 + $0x461] ss:$2 sm:$0xff]  ;;  %v988_v39 = vmax.f32 %v930_v23, 0.0  ;;  %v308_v40 = vmax.f32 %v251_v28, 0.0 }
 0x10b   :  { %2963 = vst.msk [vmem:[#allocation3 + $0x30] sm:$0xff] %vm325_vm2, %v2851_v25  ;;  %v2915_v34 = vmax.f32 %v2538_v31, %v2762_v32  ;;  %v2442_v35 = vld [vmem:[#allocation2 + $0x160] ss:$2 sm:$0xff]  ;;  %v2666_v36 = vld [vmem:[#allocation2 + $0x161] ss:$2 sm:$0xff]  ;;  %v649_v41 = vmax.f32 %v592_v33, 0.0 }
 0x10c   :  { %2971 = vst.msk [vmem:[#allocation3 + $0x70] sm:$0xff] %vm325_vm2, %v2859_v30  ;;  %v2867_v38 = vmax.f32 %v2442_v35, %v2666_v36  ;;  %v4771_v21 = vld [vmem:[%s5578_s2] ss:$0 sm:$0xff] }
 0x10d   :  { %3027 = vst.msk [vmem:[#allocation3 + $0x230] sm:$0xff] %vm325_vm2, %v2915_v34  ;;  %v631_v42 = vpop.f32.mrf.mxu3  ;;  %v4781_v26 = vld [vmem:[%s5578_s2] ss:$0 sm:$0xff] }
 0x10e   :  { %2979 = vst.msk [vmem:[#allocation3 + $0xb0] sm:$0xff] %vm325_vm2, %v2867_v38  ;;  %v632_v43 = vadd.f32 %v4399_v7, %v631_v42  ;;  %v4792_v38 = vld [vmem:[%s5578_s2] ss:$0 sm:$0xff] }
 0x10f   :  { %696 = vst.msk [vmem:[#allocation2 + $0x470] sm:$0xff] %vm325_vm2, %v664_v37  ;;  %v931_v44 = vpop.f32.mrf.mxu2  ;;  %v253_v48 = vpop.f32.mrf.mxu0 }
 0x110   :  { %1020 = vst.msk [vmem:[#allocation2 + $0x170] sm:$0xff] %vm325_vm2, %v988_v39  ;;  %v932_v47 = vadd.f32 %v4428_v20, %v931_v44  ;;  %v665_v51 = vmax.f32 %v632_v43, 0.0  ;;  %v254_v52 = vadd.f32 %v4394_v6, %v253_v48  ;;  %v594_v53 = vpop.f32.mrf.mxu1  ;;  %v4131_v44 = vld [vmem:[%s5579_s0 + $0x168] sm:$0xff] }
 0x111   :  { %341 = vst.msk [vmem:[#allocation2 + $0x78] sm:$0xff] %vm325_vm2, %v308_v40  ;;  %v595_v57 = vadd.f32 %v4399_v7, %v594_v53  ;;  %v3175_v7 = vld [vmem:[#allocation3 + $0xa0] sm:$0xff]  ;;  %v4095_v40 = vld [vmem:[%s5579_s0 + $0xe8] sm:$0xff] }
 0x112   :  { %v3095_v55 = vld [vmem:[#allocation3 + $0x30] sm:$0xff]  ;;  %681 = vst.msk [vmem:[#allocation2 + $0xf8] sm:$0xff] %vm325_vm2, %v649_v41  ;;  %v989_v56 = vmax.f32 %v932_v47, 0.0  ;;  %v309_v61 = vmax.f32 %v254_v52, 0.0  ;;  %3708 = vmatmul.msk.bf16.gmra.mxu3 %vm151_vm1, %v4094_v45  ;;  %3796 = vmatmul.msk.bf16.gmra.mxu0 %vm151_vm1, %v4112_v46  ;;  %v4113_v41 = vld [vmem:[%s5579_s0 + $0x128] sm:$0xff] }
 0x113   :  { %v3099_v59 = vmax.f32 %v3091_v54, %v3095_v55  ;;  %v3137_v60 = vld [vmem:[#allocation3 + $0x70] sm:$0xff]  ;;  %697 = vst.msk [vmem:[#allocation2 + $0x478] sm:$0xff] %vm325_vm2, %v665_v51  ;;  %v650_v0 = vmax.f32 %v595_v57, 0.0  ;;  %3884 = vmatmul.msk.bf16.gmra.mxu1 %vm151_vm1, %v4130_v49  ;;  %v4149_v45 = vld [vmem:[%s5579_s0 + $0x1a8] sm:$0xff] }
 0x114   :  { %v3141_v6 = vmax.f32 %v3133_v58, %v3137_v60  ;;  %v3139_v63 = vld [vmem:[#allocation3 + $0x230] sm:$0xff]  ;;  %1021 = vst.msk [vmem:[#allocation2 + $0x178] sm:$0xff] %vm325_vm2, %v989_v56  ;;  %3972 = vmatmul.msk.bf16.gmra.mxu2 %vm151_vm1, %v4148_v50  ;;  %v3092_v49 = vld [vmem:[#allocation3 + $0x28] sm:$0xff] }
 0x115   :  { %v3103_v1 = vpack.c.bf16 %v3099_v59, %v3099_v59  ;;  %v3143_v2 = vmax.f32 %v3135_v62, %v3139_v63  ;;  %v3179_v3 = vld [vmem:[#allocation3 + $0xb0] sm:$0xff]  ;;  %342 = vst.msk [vmem:[#allocation2 + $0x380] sm:$0xff] %vm325_vm2, %v309_v61  ;;  %v954_v8 = vpop.f32.mrf.mxu3  ;;  %v3134_v53 = vld [vmem:[#allocation3 + $0x68] sm:$0xff] }
 0x116   :  { %v3145_v4 = vpack.c.bf16 %v3141_v6, %v3141_v6  ;;  %v3183_v5 = vmax.f32 %v3175_v7, %v3179_v3  ;;  %682 = vst.msk [vmem:[#allocation2 + $0x400] sm:$0xff] %vm325_vm2, %v650_v0  ;;  %v955_v15 = vadd.f32 %v4428_v20, %v954_v8  ;;  %v3136_v57 = vld [vmem:[#allocation3 + $0x228] sm:$0xff] }
 0x117   :  { %3984 = vst.msk [vmem:[%s5580_s3 + $0x8] sm:$0xf] %vm3085_vm3, %v3103_v1  ;;  %v3147_v9 = vpack.c.bf16 %v3143_v2, %v3143_v2  ;;  %v934_v10 = vpop.f32.mrf.mxu2  ;;  %v255_v16 = vpop.f32.mrf.mxu0  ;;  %v3176_v61 = vld [vmem:[#allocation3 + $0xa8] sm:$0xff] }
 0x118   :  { %3992 = vst.msk [vmem:[%s5580_s3 + $0x18] sm:$0xf] %vm3085_vm3, %v3145_v4  ;;  %v3187_v11 = vpack.c.bf16 %v3183_v5, %v3183_v5  ;;  %v2412_v12 = vld [vmem:[#allocation2 + $0x70] ss:$2 sm:$0xff]  ;;  %v2636_v13 = vld [vmem:[#allocation2 + $0x71] ss:$2 sm:$0xff]  ;;  %v935_v14 = vadd.f32 %v4428_v20, %v934_v10  ;;  %v256_v22 = vadd.f32 %v4771_v21, %v255_v16  ;;  %v596_v23 = vpop.f32.mrf.mxu1 }
 0x119   :  { %3994 = vst.msk [vmem:[%s5580_s3 + $0x88] sm:$0xf] %vm3085_vm3, %v3147_v9  ;;  %v2852_v17 = vmax.f32 %v2412_v12, %v2636_v13  ;;  %v2428_v18 = vld [vmem:[#allocation2 + $0xf0] ss:$2 sm:$0xff]  ;;  %v2652_v19 = vld [vmem:[#allocation2 + $0xf1] ss:$2 sm:$0xff]  ;;  %v597_v27 = vadd.f32 %v4781_v26, %v596_v23 }
 0x11a   :  { %4000 = vst.msk [vmem:[%s5580_s3 + $0x28] sm:$0xf] %vm3085_vm3, %v3187_v11  ;;  %v2860_v20 = vmax.f32 %v2428_v18, %v2652_v19  ;;  %v2540_v24 = vld [vmem:[#allocation2 + $0x470] ss:$2 sm:$0xff]  ;;  %v2764_v25 = vld [vmem:[#allocation2 + $0x471] ss:$2 sm:$0xff] }
 0x11b   :  { %2964 = vst.msk [vmem:[#allocation3 + $0x38] sm:$0xff] %vm325_vm2, %v2852_v17  ;;  %v2916_v28 = vmax.f32 %v2540_v24, %v2764_v25  ;;  %v2444_v29 = vld [vmem:[#allocation2 + $0x170] ss:$2 sm:$0xff]  ;;  %v2668_v30 = vld [vmem:[#allocation2 + $0x171] ss:$2 sm:$0xff]  ;;  %v990_v31 = vmax.f32 %v935_v14, 0.0 }
 0x11c   :  { %2972 = vst.msk [vmem:[#allocation3 + $0x78] sm:$0xff] %vm325_vm2, %v2860_v20  ;;  %v2868_v32 = vmax.f32 %v2444_v29, %v2668_v30  ;;  %v998_v33 = vmax.f32 %v955_v15, 0.0  ;;  %v310_v34 = vmax.f32 %v256_v22, 0.0  ;;  %v651_v35 = vmax.f32 %v597_v27, 0.0 }
 0x11d   :  { %3028 = vst.msk [vmem:[#allocation3 + $0x238] sm:$0xff] %vm325_vm2, %v2916_v28  ;;  %v956_v36 = vpop.f32.mrf.mxu3 }
 0x11e   :  { %2980 = vst.msk [vmem:[#allocation3 + $0xb8] sm:$0xff] %vm325_vm2, %v2868_v32  ;;  %v957_v39 = vadd.f32 %v4792_v38, %v956_v36 }
 0x11f   :  { %1022 = vst.msk [vmem:[#allocation2 + $0x480] sm:$0xff] %vm325_vm2, %v990_v31  ;;  %v936_v37 = vpop.f32.mrf.mxu2  ;;  %v258_v43 = vpop.f32.mrf.mxu0 }
 0x120   :  { %1030 = vst.msk [vmem:[#allocation2 + $0x4c0] sm:$0xff] %vm325_vm2, %v998_v33  ;;  %v937_v42 = vadd.f32 %v4792_v38, %v936_v37  ;;  %v999_v46 = vmax.f32 %v957_v39, 0.0  ;;  %v259_v47 = vadd.f32 %v4771_v21, %v258_v43  ;;  %v599_v48 = vpop.f32.mrf.mxu1  ;;  %v4132_v39 = vld [vmem:[%s5579_s0 + $0x170] sm:$0xff] }
 0x121   :  { %343 = vst.msk [vmem:[#allocation2 + $0x388] sm:$0xff] %vm325_vm2, %v310_v34  ;;  %v600_v52 = vadd.f32 %v4781_v26, %v599_v48  ;;  %v4096_v34 = vld [vmem:[%s5579_s0 + $0xf0] sm:$0xff] }
 0x122   :  { %v3096_v50 = vld [vmem:[#allocation3 + $0x38] sm:$0xff]  ;;  %683 = vst.msk [vmem:[#allocation2 + $0x408] sm:$0xff] %vm325_vm2, %v651_v35  ;;  %v991_v51 = vmax.f32 %v937_v42, 0.0  ;;  %v311_v56 = vmax.f32 %v259_v47, 0.0  ;;  %3709 = vmatmul.msk.bf16.gmra.mxu3 %vm151_vm1, %v4095_v40  ;;  %3797 = vmatmul.msk.bf16.gmra.mxu0 %vm151_vm1, %v4113_v41  ;;  %v4114_v35 = vld [vmem:[%s5579_s0 + $0x130] sm:$0xff] }
 0x123   :  { %v3100_v54 = vmax.f32 %v3092_v49, %v3096_v50  ;;  %v3138_v55 = vld [vmem:[#allocation3 + $0x78] sm:$0xff]  ;;  %1031 = vst.msk [vmem:[#allocation2 + $0x4c8] sm:$0xff] %vm325_vm2, %v999_v46  ;;  %v652_v60 = vmax.f32 %v600_v52, 0.0  ;;  %3885 = vmatmul.msk.bf16.gmra.mxu1 %vm151_vm1, %v4131_v44  ;;  %v4150_v40 = vld [vmem:[%s5579_s0 + $0x1b0] sm:$0xff] }
 0x124   :  { %v3142_v58 = vmax.f32 %v3134_v53, %v3138_v55  ;;  %v3140_v59 = vld [vmem:[#allocation3 + $0x238] sm:$0xff]  ;;  %1023 = vst.msk [vmem:[#allocation2 + $0x488] sm:$0xff] %vm325_vm2, %v991_v51  ;;  %3973 = vmatmul.msk.bf16.gmra.mxu2 %vm151_vm1, %v4149_v45 }
 0x125   :  { %v3104_v62 = vpack.c.bf16 %v3100_v54, %v3100_v54  ;;  %v3144_v6 = vmax.f32 %v3136_v57, %v3140_v59  ;;  %v3180_v63 = vld [vmem:[#allocation3 + $0xb8] sm:$0xff]  ;;  %344 = vst.msk [vmem:[#allocation2 + $0x390] sm:$0xff] %vm325_vm2, %v311_v56  ;;  %v959_v1 = vpop.f32.mrf.mxu3 }
 0x126   :  { %v3146_v0 = vpack.c.bf16 %v3142_v58, %v3142_v58  ;;  %v3184_v7 = vmax.f32 %v3176_v61, %v3180_v63  ;;  %684 = vst.msk [vmem:[#allocation2 + $0x410] sm:$0xff] %vm325_vm2, %v652_v60  ;;  %v960_v10 = vadd.f32 %v4792_v38, %v959_v1 }
 0x127   :  { %3985 = vst.msk [vmem:[%s5580_s3 + $0xc] sm:$0x7] %vm3087_vm4, %v3104_v62  ;;  %v3148_v2 = vpack.c.bf16 %v3144_v6, %v3144_v6  ;;  %v939_v3 = vpop.f32.mrf.mxu2  ;;  %v260_v11 = vpop.f32.mrf.mxu0 }
 0x128   :  { %3993 = vst.msk [vmem:[%s5580_s3 + $0x1c] sm:$0x7] %vm3087_vm4, %v3146_v0  ;;  %v3188_v4 = vpack.c.bf16 %v3184_v7, %v3184_v7  ;;  %v2510_v5 = vld [vmem:[#allocation2 + $0x380] ss:$2 sm:$0xff]  ;;  %v2734_v8 = vld [vmem:[#allocation2 + $0x381] ss:$2 sm:$0xff]  ;;  %v940_v9 = vadd.f32 %v4792_v38, %v939_v3  ;;  %v261_v15 = vadd.f32 %v4771_v21, %v260_v11  ;;  %v601_v16 = vpop.f32.mrf.mxu1 }
 0x129   :  { %3995 = vst.msk [vmem:[%s5580_s3 + $0x8c] sm:$0x7] %vm3087_vm4, %v3148_v2  ;;  %v2901_v12 = vmax.f32 %v2510_v5, %v2734_v8  ;;  %v2526_v13 = vld [vmem:[#allocation2 + $0x400] ss:$2 sm:$0xff]  ;;  %v2750_v14 = vld [vmem:[#allocation2 + $0x401] ss:$2 sm:$0xff]  ;;  %v602_v22 = vadd.f32 %v4781_v26, %v601_v16 }
 0x12a   :  { %4001 = vst.msk [vmem:[%s5580_s3 + $0x2c] sm:$0x7] %vm3087_vm4, %v3188_v4  ;;  %v2909_v17 = vmax.f32 %v2526_v13, %v2750_v14  ;;  %v2550_v18 = vld [vmem:[#allocation2 + $0x4c0] ss:$2 sm:$0xff]  ;;  %v2774_v19 = vld [vmem:[#allocation2 + $0x4c1] ss:$2 sm:$0xff] }
 0x12b   :  { %3013 = vst.msk [vmem:[#allocation3 + $0x1c0] sm:$0xff] %vm325_vm2, %v2901_v12  ;;  %v2542_v23 = vld [vmem:[#allocation2 + $0x480] ss:$2 sm:$0xff]  ;;  %v2766_v20 = vld [vmem:[#allocation2 + $0x481] ss:$2 sm:$0xff]  ;;  %v2921_v24 = vmax.f32 %v2550_v18, %v2774_v19  ;;  %v992_v25 = vmax.f32 %v940_v9, 0.0 }
 0x12c   :  { %3021 = vst.msk [vmem:[#allocation3 + $0x200] sm:$0xff] %vm325_vm2, %v2909_v17  ;;  %v2917_v27 = vmax.f32 %v2542_v23, %v2766_v20  ;;  %v1000_v28 = vmax.f32 %v960_v10, 0.0  ;;  %v312_v29 = vmax.f32 %v261_v15, 0.0  ;;  %v653_v30 = vmax.f32 %v602_v22, 0.0  ;;  %v4097_v11 = vld [vmem:[%s5579_s0 + $0xf8] sm:$0xff] }
 0x12d   :  { %3033 = vst.msk [vmem:[#allocation3 + $0x260] sm:$0xff] %vm325_vm2, %v2921_v24  ;;  %v961_v31 = vpop.f32.mrf.mxu3  ;;  %v4115_v12 = vld [vmem:[%s5579_s0 + $0x138] sm:$0xff] }
 0x12e   :  { %3029 = vst.msk [vmem:[#allocation3 + $0x240] sm:$0xff] %vm325_vm2, %v2917_v27  ;;  %v962_v33 = vadd.f32 %v4792_v38, %v961_v31  ;;  %v4133_v15 = vld [vmem:[%s5579_s0 + $0x178] sm:$0xff] }
 0x12f   :  { %1024 = vst.msk [vmem:[#allocation2 + $0x490] sm:$0xff] %vm325_vm2, %v992_v25  ;;  %v941_v32 = vpop.f32.mrf.mxu2  ;;  %v263_v37 = vpop.f32.mrf.mxu0  ;;  %v4151_v16 = vld [vmem:[%s5579_s0 + $0x1b8] sm:$0xff] }
 0x130   :  { %1032 = vst.msk [vmem:[#allocation2 + $0x4d0] sm:$0xff] %vm325_vm2, %v1000_v28  ;;  %v942_v36 = vadd.f32 %v4792_v38, %v941_v32  ;;  %v1001_v41 = vmax.f32 %v962_v33, 0.0  ;;  %v264_v42 = vadd.f32 %v4771_v21, %v263_v37  ;;  %v604_v43 = vpop.f32.mrf.mxu1 }
 0x131   :  { %345 = vst.msk [vmem:[#allocation2 + $0x398] sm:$0xff] %vm325_vm2, %v312_v29  ;;  %v605_v45 = vadd.f32 %v4781_v26, %v604_v43 }
 0x132   :  { %685 = vst.msk [vmem:[#allocation2 + $0x418] sm:$0xff] %vm325_vm2, %v653_v30  ;;  %v993_v44 = vmax.f32 %v942_v36, 0.0  ;;  %v313_v46 = vmax.f32 %v264_v42, 0.0  ;;  %3710 = vmatmul.msk.bf16.gmra.mxu3 %vm151_vm1, %v4096_v34  ;;  %3798 = vmatmul.msk.bf16.gmra.mxu0 %vm151_vm1, %v4114_v35 }
 0x133   :  { %1033 = vst.msk [vmem:[#allocation2 + $0x4d8] sm:$0xff] %vm325_vm2, %v1001_v41  ;;  %v654_v47 = vmax.f32 %v605_v45, 0.0  ;;  %3886 = vmatmul.msk.bf16.gmra.mxu1 %vm151_vm1, %v4132_v39 }
 0x134   :  { %1025 = vst.msk [vmem:[#allocation2 + $0x498] sm:$0xff] %vm325_vm2, %v993_v44  ;;  %3974 = vmatmul.msk.bf16.gmra.mxu2 %vm151_vm1, %v4150_v40 }
 0x135   :  { %346 = vst.msk [vmem:[#allocation2 + $0x3a0] sm:$0xff] %vm325_vm2, %v313_v46  ;;  %v964_v48 = vpop.f32.mrf.mxu3 }
 0x136   :  { %686 = vst.msk [vmem:[#allocation2 + $0x420] sm:$0xff] %vm325_vm2, %v654_v47  ;;  %v965_v53 = vadd.f32 %v4792_v38, %v964_v48 }
 0x137   :  { %v944_v49 = vpop.f32.mrf.mxu2  ;;  %v265_v54 = vpop.f32.mrf.mxu0 }
 0x138   :  { %v2512_v50 = vld [vmem:[#allocation2 + $0x390] ss:$2 sm:$0xff]  ;;  %v2736_v51 = vld [vmem:[#allocation2 + $0x391] ss:$2 sm:$0xff]  ;;  %v945_v52 = vadd.f32 %v4792_v38, %v944_v49  ;;  %v266_v58 = vadd.f32 %v4771_v21, %v265_v54  ;;  %v606_v59 = vpop.f32.mrf.mxu1  ;;  %v1002_v3 = vmax.f32 %v965_v53, 0.0  ;;  %v4098_v54 = vld [vmem:[%s5579_s0 + $0x280] sm:$0xff] }
 0x139   :  { %v2902_v55 = vmax.f32 %v2512_v50, %v2736_v51  ;;  %v2528_v56 = vld [vmem:[#allocation2 + $0x410] ss:$2 sm:$0xff]  ;;  %v2752_v57 = vld [vmem:[#allocation2 + $0x411] ss:$2 sm:$0xff]  ;;  %v607_v6 = vadd.f32 %v4781_v26, %v606_v59  ;;  %v4925_v51 = vld [vmem:[%s5578_s2] ss:$0 sm:$0xff] }
 0x13a   :  { %v2910_v60 = vmax.f32 %v2528_v56, %v2752_v57  ;;  %v2552_v61 = vld [vmem:[#allocation2 + $0x4d0] ss:$2 sm:$0xff]  ;;  %v2776_v62 = vld [vmem:[#allocation2 + $0x4d1] ss:$2 sm:$0xff]  ;;  %v994_v1 = vmax.f32 %v945_v52, 0.0  ;;  %v314_v4 = vmax.f32 %v266_v58, 0.0 }
 0x13b   :  { %3014 = vst.msk [vmem:[#allocation3 + $0x1c8] sm:$0xff] %vm325_vm2, %v2902_v55  ;;  %v2544_v63 = vld [vmem:[#allocation2 + $0x490] ss:$2 sm:$0xff]  ;;  %v2768_v0 = vld [vmem:[#allocation2 + $0x491] ss:$2 sm:$0xff]  ;;  %v2922_v7 = vmax.f32 %v2552_v61, %v2776_v62  ;;  %v655_v5 = vmax.f32 %v607_v6, 0.0 }
 0x13c   :  { %3022 = vst.msk [vmem:[#allocation3 + $0x208] sm:$0xff] %vm325_vm2, %v2910_v60  ;;  %v2918_v2 = vmax.f32 %v2544_v63, %v2768_v0  ;;  %v4116_v55 = vld [vmem:[%s5579_s0 + $0x2c0] sm:$0xff] }
 0x13d   :  { %3034 = vst.msk [vmem:[#allocation3 + $0x268] sm:$0xff] %vm325_vm2, %v2922_v7  ;;  %v966_v8 = vpop.f32.mrf.mxu3  ;;  %v4134_v58 = vld [vmem:[%s5579_s0 + $0x300] sm:$0xff] }
 0x13e   :  { %3030 = vst.msk [vmem:[#allocation3 + $0x248] sm:$0xff] %vm325_vm2, %v2918_v2  ;;  %v967_v10 = vadd.f32 %v4792_v38, %v966_v8  ;;  %v4152_v59 = vld [vmem:[%s5579_s0 + $0x340] sm:$0xff] }
 0x13f   :  { %1026 = vst.msk [vmem:[#allocation2 + $0x4a0] sm:$0xff] %vm325_vm2, %v994_v1  ;;  %v946_v9 = vpop.f32.mrf.mxu2  ;;  %v268_v14 = vpop.f32.mrf.mxu0  ;;  %v3071_v6 = vld [vmem:[#allocation3 + $0x1c0] sm:$0xff] }
 0x140   :  { %1034 = vst.msk [vmem:[#allocation2 + $0x4e0] sm:$0xff] %vm325_vm2, %v1002_v3  ;;  %v947_v13 = vadd.f32 %v4792_v38, %v946_v9  ;;  %v1003_v17 = vmax.f32 %v967_v10, 0.0  ;;  %v269_v18 = vadd.f32 %v4771_v21, %v268_v14  ;;  %v609_v19 = vpop.f32.mrf.mxu1  ;;  %v3114_v7 = vld [vmem:[#allocation3 + $0x200] sm:$0xff] }
 0x141   :  { %347 = vst.msk [vmem:[#allocation2 + $0x3a8] sm:$0xff] %vm325_vm2, %v314_v4  ;;  %v610_v23 = vadd.f32 %v4781_v26, %v609_v19  ;;  %v4953_v4 = vld [vmem:[%s5578_s2] ss:$0 sm:$0xff] }
 0x142   :  { %687 = vst.msk [vmem:[#allocation2 + $0x428] sm:$0xff] %vm325_vm2, %v655_v5  ;;  %v995_v22 = vmax.f32 %v947_v13, 0.0  ;;  %v315_v20 = vmax.f32 %v269_v18, 0.0  ;;  %3711 = vmatmul.msk.bf16.gmra.mxu3 %vm151_vm1, %v4097_v11  ;;  %3799 = vmatmul.msk.bf16.gmra.mxu0 %vm151_vm1, %v4115_v12  ;;  %v3177_v5 = vld [vmem:[#allocation3 + $0x260] sm:$0xff] }
 0x143   :  { %1035 = vst.msk [vmem:[#allocation2 + $0x4e8] sm:$0xff] %vm325_vm2, %v1003_v17  ;;  %v656_v24 = vmax.f32 %v610_v23, 0.0  ;;  %3887 = vmatmul.msk.bf16.gmra.mxu1 %vm151_vm1, %v4133_v15  ;;  %v4961_v11 = vld [vmem:[%s5578_s2] ss:$0 sm:$0xff] }
 0x144   :  { %1027 = vst.msk [vmem:[#allocation2 + $0x4a8] sm:$0xff] %vm325_vm2, %v995_v22  ;;  %3975 = vmatmul.msk.bf16.gmra.mxu2 %vm151_vm1, %v4151_v16  ;;  %v3156_v12 = vld [vmem:[#allocation3 + $0x240] sm:$0xff] }
 0x145   :  { %348 = vst.msk [vmem:[#allocation2 + $0x3b0] sm:$0xff] %vm325_vm2, %v315_v20  ;;  %v969_v25 = vpop.f32.mrf.mxu3 }
 0x146   :  { %688 = vst.msk [vmem:[#allocation2 + $0x430] sm:$0xff] %vm325_vm2, %v656_v24  ;;  %v970_v31 = vadd.f32 %v4792_v38, %v969_v25 }
 0x147   :  { %v949_v27 = vpop.f32.mrf.mxu2  ;;  %v270_v32 = vpop.f32.mrf.mxu0 }
 0x148   :  { %v2514_v28 = vld [vmem:[#allocation2 + $0x3a0] ss:$2 sm:$0xff]  ;;  %v2738_v29 = vld [vmem:[#allocation2 + $0x3a1] ss:$2 sm:$0xff]  ;;  %v950_v30 = vadd.f32 %v4792_v38, %v949_v27  ;;  %v271_v36 = vadd.f32 %v4771_v21, %v270_v32  ;;  %v611_v37 = vpop.f32.mrf.mxu1  ;;  %v1004_v48 = vmax.f32 %v970_v31, 0.0 }
 0x149   :  { %v2903_v33 = vmax.f32 %v2514_v28, %v2738_v29  ;;  %v2530_v34 = vld [vmem:[#allocation2 + $0x420] ss:$2 sm:$0xff]  ;;  %v2754_v35 = vld [vmem:[#allocation2 + $0x421] ss:$2 sm:$0xff]  ;;  %v612_v42 = vadd.f32 %v4781_v26, %v611_v37 }
 0x14a   :  { %v2911_v39 = vmax.f32 %v2530_v34, %v2754_v35  ;;  %v2554_v40 = vld [vmem:[#allocation2 + $0x4e0] ss:$2 sm:$0xff]  ;;  %v2778_v41 = vld [vmem:[#allocation2 + $0x4e1] ss:$2 sm:$0xff]  ;;  %v996_v46 = vmax.f32 %v950_v30, 0.0  ;;  %v316_v49 = vmax.f32 %v271_v36, 0.0 }
 0x14b   :  { %3015 = vst.msk [vmem:[#allocation3 + $0x1d0] sm:$0xff] %vm325_vm2, %v2903_v33  ;;  %v2546_v43 = vld [vmem:[#allocation2 + $0x4a0] ss:$2 sm:$0xff]  ;;  %v2770_v44 = vld [vmem:[#allocation2 + $0x4a1] ss:$2 sm:$0xff]  ;;  %v2923_v45 = vmax.f32 %v2554_v40, %v2778_v41  ;;  %v657_v26 = vmax.f32 %v612_v42, 0.0 }
 0x14c   :  { %3023 = vst.msk [vmem:[#allocation3 + $0x210] sm:$0xff] %vm325_vm2, %v2911_v39  ;;  %v2919_v47 = vmax.f32 %v2546_v43, %v2770_v44  ;;  %v4919_v21 = vld [vmem:[%s5578_s2] ss:$0 sm:$0xff] }
 0x14d   :  { %3035 = vst.msk [vmem:[#allocation3 + $0x270] sm:$0xff] %vm325_vm2, %v2923_v45  ;;  %v971_v50 = vpop.f32.mrf.mxu3 }
 0x14e   :  { %3031 = vst.msk [vmem:[#allocation3 + $0x250] sm:$0xff] %vm325_vm2, %v2919_v47  ;;  %v972_v53 = vadd.f32 %v4792_v38, %v971_v50  ;;  %v4117_v50 = vld [vmem:[%s5579_s0 + $0x2c8] sm:$0xff] }
 0x14f   :  { %1028 = vst.msk [vmem:[#allocation2 + $0x4b0] sm:$0xff] %vm325_vm2, %v996_v46  ;;  %v951_v52 = vpop.f32.mrf.mxu2  ;;  %v1574_v57 = vpop.f32.mrf.mxu0 }
 0x150   :  { %1036 = vst.msk [vmem:[#allocation2 + $0x4f0] sm:$0xff] %vm325_vm2, %v1004_v48  ;;  %v952_v56 = vadd.f32 %v4792_v38, %v951_v52  ;;  %v1005_v60 = vmax.f32 %v972_v53, 0.0  ;;  %v1575_v61 = vadd.f32 %v4919_v21, %v1574_v57  ;;  %v1914_v62 = vpop.f32.mrf.mxu1 }
 0x151   :  { %349 = vst.msk [vmem:[#allocation2 + $0x3b8] sm:$0xff] %vm325_vm2, %v316_v49  ;;  %v1915_v0 = vadd.f32 %v4925_v51, %v1914_v62 }
 0x152   :  { %v3075_v63 = vld [vmem:[#allocation3 + $0x1d0] sm:$0xff]  ;;  %689 = vst.msk [vmem:[#allocation2 + $0x438] sm:$0xff] %vm325_vm2, %v657_v26  ;;  %v997_v38 = vmax.f32 %v952_v56, 0.0  ;;  %v1654_v3 = vmax.f32 %v1575_v61, 0.0  ;;  %3712 = vmatmul.msk.bf16.gmra.mxu3 %vm151_vm1, %v4098_v54  ;;  %3800 = vmatmul.msk.bf16.gmra.mxu0 %vm151_vm1, %v4116_v55  ;;  %v4099_v26 = vld [vmem:[%s5579_s0 + $0x288] sm:$0xff] }
 0x153   :  { %v3079_v1 = vmax.f32 %v3071_v6, %v3075_v63  ;;  %v3118_v2 = vld [vmem:[#allocation3 + $0x210] sm:$0xff]  ;;  %1037 = vst.msk [vmem:[#allocation2 + $0x4f8] sm:$0xff] %vm325_vm2, %v1005_v60  ;;  %v1994_v10 = vmax.f32 %v1915_v0, 0.0  ;;  %3888 = vmatmul.msk.bf16.gmra.mxu1 %vm151_vm1, %v4134_v58  ;;  %v4135_v54 = vld [vmem:[%s5579_s0 + $0x308] sm:$0xff] }
 0x154   :  { %v3122_v8 = vmax.f32 %v3114_v7, %v3118_v2  ;;  %v3181_v9 = vld [vmem:[#allocation3 + $0x270] sm:$0xff]  ;;  %1029 = vst.msk [vmem:[#allocation2 + $0x4b8] sm:$0xff] %vm325_vm2, %v997_v38  ;;  %3976 = vmatmul.msk.bf16.gmra.mxu2 %vm151_vm1, %v4152_v59  ;;  %v4153_v55 = vld [vmem:[%s5579_s0 + $0x348] sm:$0xff] }
 0x155   :  { %v3083_v13 = vpack.c.bf16 %v3079_v1, %v3079_v1  ;;  %v3160_v14 = vld [vmem:[#allocation3 + $0x250] sm:$0xff]  ;;  %v3185_v15 = vmax.f32 %v3177_v5, %v3181_v9  ;;  %1686 = vst.msk [vmem:[#allocation2 + $0x200] sm:$0xff] %vm325_vm2, %v1654_v3  ;;  %v1234_v18 = vpop.f32.mrf.mxu3  ;;  %v3072_v59 = vld [vmem:[#allocation3 + $0x1c8] sm:$0xff] }
 0x156   :  { %v3126_v16 = vpack.c.bf16 %v3122_v8, %v3122_v8  ;;  %v3164_v17 = vmax.f32 %v3156_v12, %v3160_v14  ;;  %2026 = vst.msk [vmem:[#allocation2 + $0x280] sm:$0xff] %vm325_vm2, %v1994_v10  ;;  %v1235_v22 = vadd.f32 %v4953_v4, %v1234_v18  ;;  %v3115_v6 = vld [vmem:[#allocation3 + $0x208] sm:$0xff] }
 0x157   :  { %3089 = vst.msk [vmem:[%s5580_s3 + $0x70] sm:$0xf] %vm3085_vm3, %v3083_v13  ;;  %v3189_v19 = vpack.c.bf16 %v3185_v15, %v3185_v15  ;;  %v2254_v23 = vpop.f32.mrf.mxu2  ;;  %v1576_v28 = vpop.f32.mrf.mxu0  ;;  %v3178_v7 = vld [vmem:[#allocation3 + $0x268] sm:$0xff] }
 0x158   :  { %3990 = vst.msk [vmem:[%s5580_s3 + $0x80] sm:$0xf] %vm3085_vm3, %v3126_v16  ;;  %v3168_v20 = vpack.c.bf16 %v3164_v17, %v3164_v17  ;;  %v2516_v24 = vld [vmem:[#allocation2 + $0x3b0] ss:$2 sm:$0xff]  ;;  %v2740_v25 = vld [vmem:[#allocation2 + $0x3b1] ss:$2 sm:$0xff]  ;;  %v2255_v27 = vadd.f32 %v4961_v11, %v2254_v23  ;;  %v1577_v32 = vadd.f32 %v4919_v21, %v1576_v28  ;;  %v1916_v33 = vpop.f32.mrf.mxu1 }
 0x159   :  { %4002 = vst.msk [vmem:[%s5580_s3 + $0x98] sm:$0xf] %vm3085_vm3, %v3189_v19  ;;  %v2904_v29 = vmax.f32 %v2516_v24, %v2740_v25  ;;  %v2532_v30 = vld [vmem:[#allocation2 + $0x430] ss:$2 sm:$0xff]  ;;  %v2756_v31 = vld [vmem:[#allocation2 + $0x431] ss:$2 sm:$0xff]  ;;  %v1917_v37 = vadd.f32 %v4925_v51, %v1916_v33 }
 0x15a   :  { %3998 = vst.msk [vmem:[%s5580_s3 + $0x90] sm:$0xf] %vm3085_vm3, %v3168_v20  ;;  %v2912_v34 = vmax.f32 %v2532_v30, %v2756_v31  ;;  %v2556_v35 = vld [vmem:[#allocation2 + $0x4f0] ss:$2 sm:$0xff]  ;;  %v2780_v36 = vld [vmem:[#allocation2 + $0x4f1] ss:$2 sm:$0xff] }
 0x15b   :  { %3016 = vst.msk [vmem:[#allocation3 + $0x1d8] sm:$0xff] %vm325_vm2, %v2904_v29  ;;  %v2548_v39 = vld [vmem:[#allocation2 + $0x4b0] ss:$2 sm:$0xff]  ;;  %v2772_v40 = vld [vmem:[#allocation2 + $0x4b1] ss:$2 sm:$0xff]  ;;  %v2924_v41 = vmax.f32 %v2556_v35, %v2780_v36  ;;  %v1314_v42 = vmax.f32 %v1235_v22, 0.0 }
 0x15c   :  { %3024 = vst.msk [vmem:[#allocation3 + $0x218] sm:$0xff] %vm325_vm2, %v2912_v34  ;;  %v2920_v43 = vmax.f32 %v2548_v39, %v2772_v40  ;;  %v2334_v44 = vmax.f32 %v2255_v27, 0.0  ;;  %v1655_v45 = vmax.f32 %v1577_v32, 0.0  ;;  %v1995_v46 = vmax.f32 %v1917_v37, 0.0  ;;  %v3157_v5 = vld [vmem:[#allocation3 + $0x248] sm:$0xff] }
 0x15d   :  { %3036 = vst.msk [vmem:[#allocation3 + $0x278] sm:$0xff] %vm325_vm2, %v2924_v41  ;;  %v1236_v47 = vpop.f32.mrf.mxu3 }
 0x15e   :  { %3032 = vst.msk [vmem:[#allocation3 + $0x258] sm:$0xff] %vm325_vm2, %v2920_v43  ;;  %v1237_v48 = vadd.f32 %v4953_v4, %v1236_v47  ;;  %v4118_v47 = vld [vmem:[%s5579_s0 + $0x2d0] sm:$0xff] }
 0x15f   :  { %1346 = vst.msk [vmem:[#allocation2 + $0x180] sm:$0xff] %vm325_vm2, %v1314_v42  ;;  %v2256_v49 = vpop.f32.mrf.mxu2  ;;  %v1579_v53 = vpop.f32.mrf.mxu0 }
 0x160   :  { %2366 = vst.msk [vmem:[#allocation2 + $0x300] sm:$0xff] %vm325_vm2, %v2334_v44  ;;  %v2257_v52 = vadd.f32 %v4961_v11, %v2256_v49  ;;  %v1315_v56 = vmax.f32 %v1237_v48, 0.0  ;;  %v1580_v57 = vadd.f32 %v4919_v21, %v1579_v53  ;;  %v1919_v58 = vpop.f32.mrf.mxu1 }
 0x161   :  { %1687 = vst.msk [vmem:[#allocation2 + $0x208] sm:$0xff] %vm325_vm2, %v1655_v45  ;;  %v1920_v62 = vadd.f32 %v4925_v51, %v1919_v58 }
 0x162   :  { %v3076_v60 = vld [vmem:[#allocation3 + $0x1d8] sm:$0xff]  ;;  %2027 = vst.msk [vmem:[#allocation2 + $0x288] sm:$0xff] %vm325_vm2, %v1995_v46  ;;  %v2335_v61 = vmax.f32 %v2257_v52, 0.0  ;;  %v1656_v0 = vmax.f32 %v1580_v57, 0.0  ;;  %3713 = vmatmul.msk.bf16.gmra.mxu3 %vm151_vm1, %v4099_v26  ;;  %3801 = vmatmul.msk.bf16.gmra.mxu0 %vm151_vm1, %v4117_v50  ;;  %v4100_v46 = vld [vmem:[%s5579_s0 + $0x290] sm:$0xff] }
 0x163   :  { %v3080_v63 = vmax.f32 %v3072_v59, %v3076_v60  ;;  %v3119_v38 = vld [vmem:[#allocation3 + $0x218] sm:$0xff]  ;;  %1347 = vst.msk [vmem:[#allocation2 + $0x188] sm:$0xff] %vm325_vm2, %v1315_v56  ;;  %v1996_v3 = vmax.f32 %v1920_v62, 0.0  ;;  %3889 = vmatmul.msk.bf16.gmra.mxu1 %vm151_vm1, %v4135_v54  ;;  %v4136_v26 = vld [vmem:[%s5579_s0 + $0x310] sm:$0xff] }
 0x164   :  { %v3123_v1 = vmax.f32 %v3115_v6, %v3119_v38  ;;  %v3182_v2 = vld [vmem:[#allocation3 + $0x278] sm:$0xff]  ;;  %2367 = vst.msk [vmem:[#allocation2 + $0x308] sm:$0xff] %vm325_vm2, %v2335_v61  ;;  %3977 = vmatmul.msk.bf16.gmra.mxu2 %vm151_vm1, %v4153_v55  ;;  %v4154_v50 = vld [vmem:[%s5579_s0 + $0x350] sm:$0xff] }
 0x165   :  { %v3084_v8 = vpack.c.bf16 %v3080_v63, %v3080_v63  ;;  %v3161_v9 = vld [vmem:[#allocation3 + $0x258] sm:$0xff]  ;;  %v3186_v10 = vmax.f32 %v3178_v7, %v3182_v2  ;;  %1688 = vst.msk [vmem:[#allocation2 + $0x210] sm:$0xff] %vm325_vm2, %v1656_v0  ;;  %v1239_v14 = vpop.f32.mrf.mxu3 }
 0x166   :  { %v3127_v12 = vpack.c.bf16 %v3123_v1, %v3123_v1  ;;  %v3165_v13 = vmax.f32 %v3157_v5, %v3161_v9  ;;  %2028 = vst.msk [vmem:[#allocation2 + $0x290] sm:$0xff] %vm325_vm2, %v1996_v3  ;;  %v1240_v16 = vadd.f32 %v4953_v4, %v1239_v14 }
 0x167   :  { %3090 = vst.msk [vmem:[%s5580_s3 + $0x74] sm:$0x7] %vm3087_vm4, %v3084_v8  ;;  %v3190_v15 = vpack.c.bf16 %v3186_v10, %v3186_v10  ;;  %v2259_v17 = vpop.f32.mrf.mxu2  ;;  %v1581_v20 = vpop.f32.mrf.mxu0 }
 0x168   :  { %3991 = vst.msk [vmem:[%s5580_s3 + $0x84] sm:$0x7] %vm3087_vm4, %v3127_v12  ;;  %v3169_v18 = vpack.c.bf16 %v3165_v13, %v3165_v13  ;;  %v2462_v19 = vld [vmem:[#allocation2 + $0x200] ss:$2 sm:$0xff]  ;;  %v2686_v22 = vld [vmem:[#allocation2 + $0x201] ss:$2 sm:$0xff]  ;;  %v2260_v23 = vadd.f32 %v4961_v11, %v2259_v17  ;;  %v1582_v28 = vadd.f32 %v4919_v21, %v1581_v20  ;;  %v1921_v29 = vpop.f32.mrf.mxu1 }
 0x169   :  { %4003 = vst.msk [vmem:[%s5580_s3 + $0x9c] sm:$0x7] %vm3087_vm4, %v3190_v15  ;;  %v2877_v24 = vmax.f32 %v2462_v19, %v2686_v22  ;;  %v2478_v25 = vld [vmem:[#allocation2 + $0x280] ss:$2 sm:$0xff]  ;;  %v2702_v27 = vld [vmem:[#allocation2 + $0x281] ss:$2 sm:$0xff]  ;;  %v1922_v33 = vadd.f32 %v4925_v51, %v1921_v29 }
 0x16a   :  { %3999 = vst.msk [vmem:[%s5580_s3 + $0x94] sm:$0x7] %vm3087_vm4, %v3169_v18  ;;  %v2885_v30 = vmax.f32 %v2478_v25, %v2702_v27  ;;  %v2446_v31 = vld [vmem:[#allocation2 + $0x180] ss:$2 sm:$0xff]  ;;  %v2670_v32 = vld [vmem:[#allocation2 + $0x181] ss:$2 sm:$0xff] }
 0x16b   :  { %2989 = vst.msk [vmem:[#allocation3 + $0x100] sm:$0xff] %vm325_vm2, %v2877_v24  ;;  %v2869_v34 = vmax.f32 %v2446_v31, %v2670_v32  ;;  %v2494_v35 = vld [vmem:[#allocation2 + $0x300] ss:$2 sm:$0xff]  ;;  %v2718_v36 = vld [vmem:[#allocation2 + $0x301] ss:$2 sm:$0xff]  ;;  %v1316_v37 = vmax.f32 %v1240_v16, 0.0 }
 0x16c   :  { %2997 = vst.msk [vmem:[#allocation3 + $0x140] sm:$0xff] %vm325_vm2, %v2885_v30  ;;  %v2893_v39 = vmax.f32 %v2494_v35, %v2718_v36  ;;  %v2336_v40 = vmax.f32 %v2260_v23, 0.0  ;;  %v1657_v41 = vmax.f32 %v1582_v28, 0.0  ;;  %v1997_v42 = vmax.f32 %v1922_v33, 0.0  ;;  %v4101_v24 = vld [vmem:[%s5579_s0 + $0x298] sm:$0xff] }
 0x16d   :  { %2981 = vst.msk [vmem:[#allocation3 + $0xc0] sm:$0xff] %vm325_vm2, %v2869_v34  ;;  %v1241_v43 = vpop.f32.mrf.mxu3  ;;  %v4119_v25 = vld [vmem:[%s5579_s0 + $0x2d8] sm:$0xff] }
 0x16e   :  { %3005 = vst.msk [vmem:[#allocation3 + $0x180] sm:$0xff] %vm325_vm2, %v2893_v39  ;;  %v1242_v44 = vadd.f32 %v4953_v4, %v1241_v43  ;;  %v4137_v29 = vld [vmem:[%s5579_s0 + $0x318] sm:$0xff] }
 0x16f   :  { %1348 = vst.msk [vmem:[#allocation2 + $0x190] sm:$0xff] %vm325_vm2, %v1316_v37  ;;  %v2261_v45 = vpop.f32.mrf.mxu2  ;;  %v1584_v49 = vpop.f32.mrf.mxu0  ;;  %v4155_v30 = vld [vmem:[%s5579_s0 + $0x358] sm:$0xff] }
 0x170   :  { %2368 = vst.msk [vmem:[#allocation2 + $0x310] sm:$0xff] %vm325_vm2, %v2336_v40  ;;  %v2262_v48 = vadd.f32 %v4961_v11, %v2261_v45  ;;  %v1317_v52 = vmax.f32 %v1242_v44, 0.0  ;;  %v1585_v53 = vadd.f32 %v4919_v21, %v1584_v49  ;;  %v1924_v54 = vpop.f32.mrf.mxu1 }
 0x171   :  { %1689 = vst.msk [vmem:[#allocation2 + $0x218] sm:$0xff] %vm325_vm2, %v1657_v41  ;;  %v1925_v56 = vadd.f32 %v4925_v51, %v1924_v54 }
 0x172   :  { %2029 = vst.msk [vmem:[#allocation2 + $0x298] sm:$0xff] %vm325_vm2, %v1997_v42  ;;  %v2337_v55 = vmax.f32 %v2262_v48, 0.0  ;;  %v1658_v57 = vmax.f32 %v1585_v53, 0.0  ;;  %3714 = vmatmul.msk.bf16.gmra.mxu3 %vm151_vm1, %v4100_v46  ;;  %3802 = vmatmul.msk.bf16.gmra.mxu0 %vm151_vm1, %v4118_v47 }
 0x173   :  { %1349 = vst.msk [vmem:[#allocation2 + $0x198] sm:$0xff] %vm325_vm2, %v1317_v52  ;;  %v1998_v58 = vmax.f32 %v1925_v56, 0.0  ;;  %3890 = vmatmul.msk.bf16.gmra.mxu1 %vm151_vm1, %v4136_v26 }
 0x174   :  { %2369 = vst.msk [vmem:[#allocation2 + $0x318] sm:$0xff] %vm325_vm2, %v2337_v55  ;;  %3978 = vmatmul.msk.bf16.gmra.mxu2 %vm151_vm1, %v4154_v50 }
 0x175   :  { %1690 = vst.msk [vmem:[#allocation2 + $0x220] sm:$0xff] %vm325_vm2, %v1658_v57  ;;  %v1244_v59 = vpop.f32.mrf.mxu3 }
 0x176   :  { %2030 = vst.msk [vmem:[#allocation2 + $0x2a0] sm:$0xff] %vm325_vm2, %v1998_v58  ;;  %v1245_v60 = vadd.f32 %v4953_v4, %v1244_v59 }
 0x177   :  { %v2264_v61 = vpop.f32.mrf.mxu2  ;;  %v1586_v38 = vpop.f32.mrf.mxu0 }
 0x178   :  { %v2464_v62 = vld [vmem:[#allocation2 + $0x210] ss:$2 sm:$0xff]  ;;  %v2688_v6 = vld [vmem:[#allocation2 + $0x211] ss:$2 sm:$0xff]  ;;  %v2265_v63 = vadd.f32 %v4961_v11, %v2264_v61  ;;  %v1587_v2 = vadd.f32 %v4919_v21, %v1586_v38  ;;  %v1926_v3 = vpop.f32.mrf.mxu1  ;;  %v1318_v15 = vmax.f32 %v1245_v60, 0.0 }
 0x179   :  { %v2878_v0 = vmax.f32 %v2464_v62, %v2688_v6  ;;  %v2480_v7 = vld [vmem:[#allocation2 + $0x290] ss:$2 sm:$0xff]  ;;  %v2704_v1 = vld [vmem:[#allocation2 + $0x291] ss:$2 sm:$0xff]  ;;  %v1927_v10 = vadd.f32 %v4925_v51, %v1926_v3  ;;  %v4138_v3 = vld [vmem:[%s5579_s0 + $0x320] sm:$0xff] }
 0x17a   :  { %v2886_v5 = vmax.f32 %v2480_v7, %v2704_v1  ;;  %v2448_v8 = vld [vmem:[#allocation2 + $0x190] ss:$2 sm:$0xff]  ;;  %v2672_v9 = vld [vmem:[#allocation2 + $0x191] ss:$2 sm:$0xff]  ;;  %v2338_v17 = vmax.f32 %v2265_v63, 0.0  ;;  %v1659_v18 = vmax.f32 %v1587_v2, 0.0 }
 0x17b   :  { %2990 = vst.msk [vmem:[#allocation3 + $0x108] sm:$0xff] %vm325_vm2, %v2878_v0  ;;  %v2870_v12 = vmax.f32 %v2448_v8, %v2672_v9  ;;  %v2496_v13 = vld [vmem:[#allocation2 + $0x310] ss:$2 sm:$0xff]  ;;  %v2720_v14 = vld [vmem:[#allocation2 + $0x311] ss:$2 sm:$0xff]  ;;  %v1999_v19 = vmax.f32 %v1927_v10, 0.0 }
 0x17c   :  { %2998 = vst.msk [vmem:[#allocation3 + $0x148] sm:$0xff] %vm325_vm2, %v2886_v5  ;;  %v2894_v16 = vmax.f32 %v2496_v13, %v2720_v14  ;;  %v4102_v0 = vld [vmem:[%s5579_s0 + $0x2a0] sm:$0xff] }
 0x17d   :  { %2982 = vst.msk [vmem:[#allocation3 + $0xc8] sm:$0xff] %vm325_vm2, %v2870_v12  ;;  %v1246_v22 = vpop.f32.mrf.mxu3  ;;  %v4120_v7 = vld [vmem:[%s5579_s0 + $0x2e0] sm:$0xff] }
 0x17e   :  { %3006 = vst.msk [vmem:[#allocation3 + $0x188] sm:$0xff] %vm325_vm2, %v2894_v16  ;;  %v1247_v23 = vadd.f32 %v4953_v4, %v1246_v22  ;;  %v4156_v5 = vld [vmem:[%s5579_s0 + $0x360] sm:$0xff] }
 0x17f   :  { %1350 = vst.msk [vmem:[#allocation2 + $0x1a0] sm:$0xff] %vm325_vm2, %v1318_v15  ;;  %v2266_v20 = vpop.f32.mrf.mxu2  ;;  %v1589_v28 = vpop.f32.mrf.mxu0  ;;  %v3238_v12 = vld [vmem:[#allocation3 + $0x100] sm:$0xff] }
 0x180   :  { %2370 = vst.msk [vmem:[#allocation2 + $0x320] sm:$0xff] %vm325_vm2, %v2338_v17  ;;  %v2267_v27 = vadd.f32 %v4961_v11, %v2266_v20  ;;  %v1319_v31 = vmax.f32 %v1247_v23, 0.0  ;;  %v1590_v32 = vadd.f32 %v4919_v21, %v1589_v28  ;;  %v1929_v33 = vpop.f32.mrf.mxu1  ;;  %v3280_v16 = vld [vmem:[#allocation3 + $0x140] sm:$0xff] }
 0x181   :  { %1691 = vst.msk [vmem:[#allocation2 + $0x228] sm:$0xff] %vm325_vm2, %v1659_v18  ;;  %v1930_v35 = vadd.f32 %v4925_v51, %v1929_v33  ;;  %v3196_v22 = vld [vmem:[#allocation3 + $0xc0] sm:$0xff] }
 0x182   :  { %2031 = vst.msk [vmem:[#allocation2 + $0x2a8] sm:$0xff] %vm325_vm2, %v1999_v19  ;;  %v2339_v34 = vmax.f32 %v2267_v27, 0.0  ;;  %v1660_v36 = vmax.f32 %v1590_v32, 0.0  ;;  %3715 = vmatmul.msk.bf16.gmra.mxu3 %vm151_vm1, %v4101_v24  ;;  %3803 = vmatmul.msk.bf16.gmra.mxu0 %vm151_vm1, %v4119_v25  ;;  %v3322_v25 = vld [vmem:[#allocation3 + $0x180] sm:$0xff] }
 0x183   :  { %1351 = vst.msk [vmem:[#allocation2 + $0x1a8] sm:$0xff] %vm325_vm2, %v1319_v31  ;;  %v2000_v37 = vmax.f32 %v1930_v35, 0.0  ;;  %3891 = vmatmul.msk.bf16.gmra.mxu1 %vm151_vm1, %v4137_v29 }
 0x184   :  { %2371 = vst.msk [vmem:[#allocation2 + $0x328] sm:$0xff] %vm325_vm2, %v2339_v34  ;;  %3979 = vmatmul.msk.bf16.gmra.mxu2 %vm151_vm1, %v4155_v30 }
 0x185   :  { %1692 = vst.msk [vmem:[#allocation2 + $0x230] sm:$0xff] %vm325_vm2, %v1660_v36  ;;  %v1249_v39 = vpop.f32.mrf.mxu3 }
 0x186   :  { %2032 = vst.msk [vmem:[#allocation2 + $0x2b0] sm:$0xff] %vm325_vm2, %v2000_v37  ;;  %v1250_v40 = vadd.f32 %v4953_v4, %v1249_v39 }
 0x187   :  { %v2269_v41 = vpop.f32.mrf.mxu2  ;;  %v1591_v45 = vpop.f32.mrf.mxu0 }
 0x188   :  { %v2466_v42 = vld [vmem:[#allocation2 + $0x220] ss:$2 sm:$0xff]  ;;  %v2690_v43 = vld [vmem:[#allocation2 + $0x221] ss:$2 sm:$0xff]  ;;  %v2270_v44 = vadd.f32 %v4961_v11, %v2269_v41  ;;  %v1592_v49 = vadd.f32 %v4919_v21, %v1591_v45  ;;  %v1931_v26 = vpop.f32.mrf.mxu1  ;;  %v1320_v58 = vmax.f32 %v1250_v40, 0.0 }
 0x189   :  { %v2879_v46 = vmax.f32 %v2466_v42, %v2690_v43  ;;  %v2482_v47 = vld [vmem:[#allocation2 + $0x2a0] ss:$2 sm:$0xff]  ;;  %v2706_v48 = vld [vmem:[#allocation2 + $0x2a1] ss:$2 sm:$0xff]  ;;  %v1932_v54 = vadd.f32 %v4925_v51, %v1931_v26 }
 0x18a   :  { %v2887_v50 = vmax.f32 %v2482_v47, %v2706_v48  ;;  %v2450_v52 = vld [vmem:[#allocation2 + $0x1a0] ss:$2 sm:$0xff]  ;;  %v2674_v53 = vld [vmem:[#allocation2 + $0x1a1] ss:$2 sm:$0xff]  ;;  %v2340_v60 = vmax.f32 %v2270_v44, 0.0  ;;  %v1661_v61 = vmax.f32 %v1592_v49, 0.0 }
 0x18b   :  { %2991 = vst.msk [vmem:[#allocation3 + $0x110] sm:$0xff] %vm325_vm2, %v2879_v46  ;;  %v2871_v55 = vmax.f32 %v2450_v52, %v2674_v53  ;;  %v2498_v56 = vld [vmem:[#allocation2 + $0x320] ss:$2 sm:$0xff]  ;;  %v2722_v57 = vld [vmem:[#allocation2 + $0x321] ss:$2 sm:$0xff]  ;;  %v2001_v62 = vmax.f32 %v1932_v54, 0.0 }
 0x18c   :  { %2999 = vst.msk [vmem:[#allocation3 + $0x150] sm:$0xff] %vm325_vm2, %v2887_v50  ;;  %v2895_v59 = vmax.f32 %v2498_v56, %v2722_v57 }
 0x18d   :  { %2983 = vst.msk [vmem:[#allocation3 + $0xd0] sm:$0xff] %vm325_vm2, %v2871_v55  ;;  %v1251_v6 = vpop.f32.mrf.mxu3 }
 0x18e   :  { %3007 = vst.msk [vmem:[#allocation3 + $0x190] sm:$0xff] %vm325_vm2, %v2895_v59  ;;  %v1252_v63 = vadd.f32 %v4953_v4, %v1251_v6  ;;  %v4121_v6 = vld [vmem:[%s5579_s0 + $0x2e8] sm:$0xff] }
 0x18f   :  { %1352 = vst.msk [vmem:[#allocation2 + $0x1b0] sm:$0xff] %vm325_vm2, %v1320_v58  ;;  %v2271_v38 = vpop.f32.mrf.mxu2  ;;  %v1594_v2 = vpop.f32.mrf.mxu0 }
 0x190   :  { %2372 = vst.msk [vmem:[#allocation2 + $0x330] sm:$0xff] %vm325_vm2, %v2340_v60  ;;  %v2272_v1 = vadd.f32 %v4961_v11, %v2271_v38  ;;  %v1321_v8 = vmax.f32 %v1252_v63, 0.0  ;;  %v1595_v9 = vadd.f32 %v4919_v21, %v1594_v2  ;;  %v1934_v10 = vpop.f32.mrf.mxu1 }
 0x191   :  { %1693 = vst.msk [vmem:[#allocation2 + $0x238] sm:$0xff] %vm325_vm2, %v1661_v61  ;;  %v1935_v15 = vadd.f32 %v4925_v51, %v1934_v10 }
 0x192   :  { %v3242_v13 = vld [vmem:[#allocation3 + $0x110] sm:$0xff]  ;;  %2033 = vst.msk [vmem:[#allocation2 + $0x2b8] sm:$0xff] %vm325_vm2, %v2001_v62  ;;  %v2341_v14 = vmax.f32 %v2272_v1, 0.0  ;;  %v1662_v19 = vmax.f32 %v1595_v9, 0.0  ;;  %3716 = vmatmul.msk.bf16.gmra.mxu3 %vm151_vm1, %v4102_v0  ;;  %3804 = vmatmul.msk.bf16.gmra.mxu0 %vm151_vm1, %v4120_v7  ;;  %v4103_v62 = vld [vmem:[%s5579_s0 + $0x2a8] sm:$0xff] }
 0x193   :  { %v3246_v17 = vmax.f32 %v3238_v12, %v3242_v13  ;;  %v3284_v18 = vld [vmem:[#allocation3 + $0x150] sm:$0xff]  ;;  %1353 = vst.msk [vmem:[#allocation2 + $0x1b8] sm:$0xff] %vm325_vm2, %v1321_v8  ;;  %v2002_v24 = vmax.f32 %v1935_v15, 0.0  ;;  %3892 = vmatmul.msk.bf16.gmra.mxu1 %vm151_vm1, %v4138_v3  ;;  %v4139_v0 = vld [vmem:[%s5579_s0 + $0x328] sm:$0xff] }
 0x194   :  { %v3288_v23 = vmax.f32 %v3280_v16, %v3284_v18  ;;  %v3200_v20 = vld [vmem:[#allocation3 + $0xd0] sm:$0xff]  ;;  %2373 = vst.msk [vmem:[#allocation2 + $0x338] sm:$0xff] %vm325_vm2, %v2341_v14  ;;  %3980 = vmatmul.msk.bf16.gmra.mxu2 %vm151_vm1, %v4156_v5  ;;  %v4157_v7 = vld [vmem:[%s5579_s0 + $0x368] sm:$0xff] }
 0x195   :  { %v3250_v27 = vpack.c.bf16 %v3246_v17, %v3246_v17  ;;  %v3204_v28 = vmax.f32 %v3196_v22, %v3200_v20  ;;  %v3326_v29 = vld [vmem:[#allocation3 + $0x190] sm:$0xff]  ;;  %1694 = vst.msk [vmem:[#allocation2 + $0x240] sm:$0xff] %vm325_vm2, %v1662_v19  ;;  %v1254_v32 = vpop.f32.mrf.mxu3  ;;  %v3239_v5 = vld [vmem:[#allocation3 + $0x108] sm:$0xff] }
 0x196   :  { %v3292_v30 = vpack.c.bf16 %v3288_v23, %v3288_v23  ;;  %v3330_v31 = vmax.f32 %v3322_v25, %v3326_v29  ;;  %2034 = vst.msk [vmem:[#allocation2 + $0x2c0] sm:$0xff] %vm325_vm2, %v2002_v24  ;;  %v1255_v34 = vadd.f32 %v4953_v4, %v1254_v32  ;;  %v3281_v12 = vld [vmem:[#allocation3 + $0x148] sm:$0xff] }
 0x197   :  { %4012 = vst.msk [vmem:[%s5580_s3 + $0x40] sm:$0xf] %vm3085_vm3, %v3250_v27  ;;  %v3208_v33 = vpack.c.bf16 %v3204_v28, %v3204_v28  ;;  %v2274_v35 = vpop.f32.mrf.mxu2  ;;  %v1596_v41 = vpop.f32.mrf.mxu0  ;;  %v3197_v16 = vld [vmem:[#allocation3 + $0xc8] sm:$0xff] }
 0x198   :  { %4020 = vst.msk [vmem:[%s5580_s3 + $0x50] sm:$0xf] %vm3085_vm3, %v3292_v30  ;;  %v3334_v36 = vpack.c.bf16 %v3330_v31, %v3330_v31  ;;  %v2468_v37 = vld [vmem:[#allocation2 + $0x230] ss:$2 sm:$0xff]  ;;  %v2692_v39 = vld [vmem:[#allocation2 + $0x231] ss:$2 sm:$0xff]  ;;  %v2275_v40 = vadd.f32 %v4961_v11, %v2274_v35  ;;  %v1597_v45 = vadd.f32 %v4919_v21, %v1596_v41  ;;  %v1936_v46 = vpop.f32.mrf.mxu1 }
 0x199   :  { %4004 = vst.msk [vmem:[%s5580_s3 + $0x30] sm:$0xf] %vm3085_vm3, %v3208_v33  ;;  %v2880_v42 = vmax.f32 %v2468_v37, %v2692_v39  ;;  %v2484_v43 = vld [vmem:[#allocation2 + $0x2b0] ss:$2 sm:$0xff]  ;;  %v2708_v44 = vld [vmem:[#allocation2 + $0x2b1] ss:$2 sm:$0xff]  ;;  %v1937_v26 = vadd.f32 %v4925_v51, %v1936_v46 }
 0x19a   :  { %4028 = vst.msk [vmem:[%s5580_s3 + $0x60] sm:$0xf] %vm3085_vm3, %v3334_v36  ;;  %v2888_v47 = vmax.f32 %v2484_v43, %v2708_v44  ;;  %v2452_v48 = vld [vmem:[#allocation2 + $0x1b0] ss:$2 sm:$0xff]  ;;  %v2676_v49 = vld [vmem:[#allocation2 + $0x1b1] ss:$2 sm:$0xff] }
 0x19b   :  { %2992 = vst.msk [vmem:[#allocation3 + $0x118] sm:$0xff] %vm325_vm2, %v2880_v42  ;;  %v2872_v50 = vmax.f32 %v2452_v48, %v2676_v49  ;;  %v2500_v52 = vld [vmem:[#allocation2 + $0x330] ss:$2 sm:$0xff]  ;;  %v2724_v53 = vld [vmem:[#allocation2 + $0x331] ss:$2 sm:$0xff]  ;;  %v1322_v54 = vmax.f32 %v1255_v34, 0.0 }
 0x19c   :  { %3000 = vst.msk [vmem:[#allocation3 + $0x158] sm:$0xff] %vm325_vm2, %v2888_v47  ;;  %v2896_v55 = vmax.f32 %v2500_v52, %v2724_v53  ;;  %v2342_v56 = vmax.f32 %v2275_v40, 0.0  ;;  %v1663_v57 = vmax.f32 %v1597_v45, 0.0  ;;  %v2003_v58 = vmax.f32 %v1937_v26, 0.0  ;;  %v3323_v22 = vld [vmem:[#allocation3 + $0x188] sm:$0xff] }
 0x19d   :  { %2984 = vst.msk [vmem:[#allocation3 + $0xd8] sm:$0xff] %vm325_vm2, %v2872_v50  ;;  %v1256_v59 = vpop.f32.mrf.mxu3 }
 0x19e   :  { %3008 = vst.msk [vmem:[#allocation3 + $0x198] sm:$0xff] %vm325_vm2, %v2896_v55  ;;  %v1257_v60 = vadd.f32 %v4953_v4, %v1256_v59  ;;  %v4122_v59 = vld [vmem:[%s5579_s0 + $0x2f0] sm:$0xff] }
 0x19f   :  { %1354 = vst.msk [vmem:[#allocation2 + $0x1c0] sm:$0xff] %vm325_vm2, %v1322_v54  ;;  %v2276_v61 = vpop.f32.mrf.mxu2  ;;  %v1599_v38 = vpop.f32.mrf.mxu0 }
 0x1a0   :  { %2374 = vst.msk [vmem:[#allocation2 + $0x340] sm:$0xff] %vm325_vm2, %v2342_v56  ;;  %v2277_v63 = vadd.f32 %v4961_v11, %v2276_v61  ;;  %v1323_v1 = vmax.f32 %v1257_v60, 0.0  ;;  %v1600_v2 = vadd.f32 %v4919_v21, %v1599_v38  ;;  %v1939_v3 = vpop.f32.mrf.mxu1 }
 0x1a1   :  { %1695 = vst.msk [vmem:[#allocation2 + $0x248] sm:$0xff] %vm325_vm2, %v1663_v57  ;;  %v1940_v10 = vadd.f32 %v4925_v51, %v1939_v3 }
 0x1a2   :  { %v3243_v8 = vld [vmem:[#allocation3 + $0x118] sm:$0xff]  ;;  %2035 = vst.msk [vmem:[#allocation2 + $0x2c8] sm:$0xff] %vm325_vm2, %v2003_v58  ;;  %v2343_v9 = vmax.f32 %v2277_v63, 0.0  ;;  %v1664_v15 = vmax.f32 %v1600_v2, 0.0  ;;  %3717 = vmatmul.msk.bf16.gmra.mxu3 %vm151_vm1, %v4103_v62  ;;  %3805 = vmatmul.msk.bf16.gmra.mxu0 %vm151_vm1, %v4121_v6  ;;  %v4104_v58 = vld [vmem:[%s5579_s0 + $0x2b0] sm:$0xff] }
 0x1a3   :  { %v3247_v13 = vmax.f32 %v3239_v5, %v3243_v8  ;;  %v3285_v14 = vld [vmem:[#allocation3 + $0x158] sm:$0xff]  ;;  %1355 = vst.msk [vmem:[#allocation2 + $0x1c8] sm:$0xff] %vm325_vm2, %v1323_v1  ;;  %v2004_v19 = vmax.f32 %v1940_v10, 0.0  ;;  %3893 = vmatmul.msk.bf16.gmra.mxu1 %vm151_vm1, %v4139_v0  ;;  %v4140_v62 = vld [vmem:[%s5579_s0 + $0x330] sm:$0xff] }
 0x1a4   :  { %v3289_v17 = vmax.f32 %v3281_v12, %v3285_v14  ;;  %v3201_v18 = vld [vmem:[#allocation3 + $0xd8] sm:$0xff]  ;;  %2375 = vst.msk [vmem:[#allocation2 + $0x348] sm:$0xff] %vm325_vm2, %v2343_v9  ;;  %3981 = vmatmul.msk.bf16.gmra.mxu2 %vm151_vm1, %v4157_v7  ;;  %v4158_v6 = vld [vmem:[%s5579_s0 + $0x370] sm:$0xff] }
 0x1a5   :  { %v3251_v23 = vpack.c.bf16 %v3247_v13, %v3247_v13  ;;  %v3205_v20 = vmax.f32 %v3197_v16, %v3201_v18  ;;  %v3327_v24 = vld [vmem:[#allocation3 + $0x198] sm:$0xff]  ;;  %1696 = vst.msk [vmem:[#allocation2 + $0x250] sm:$0xff] %vm325_vm2, %v1664_v15  ;;  %v1259_v28 = vpop.f32.mrf.mxu3 }
 0x1a6   :  { %v3293_v25 = vpack.c.bf16 %v3289_v17, %v3289_v17  ;;  %v3331_v27 = vmax.f32 %v3323_v22, %v3327_v24  ;;  %2036 = vst.msk [vmem:[#allocation2 + $0x2d0] sm:$0xff] %vm325_vm2, %v2004_v19  ;;  %v1260_v30 = vadd.f32 %v4953_v4, %v1259_v28 }
 0x1a7   :  { %4013 = vst.msk [vmem:[%s5580_s3 + $0x44] sm:$0x7] %vm3087_vm4, %v3251_v23  ;;  %v3209_v29 = vpack.c.bf16 %v3205_v20, %v3205_v20  ;;  %v2279_v31 = vpop.f32.mrf.mxu2  ;;  %v1601_v36 = vpop.f32.mrf.mxu0 }
 0x1a8   :  { %4021 = vst.msk [vmem:[%s5580_s3 + $0x54] sm:$0x7] %vm3087_vm4, %v3293_v25  ;;  %v3335_v32 = vpack.c.bf16 %v3331_v27, %v3331_v27  ;;  %v2470_v33 = vld [vmem:[#allocation2 + $0x240] ss:$2 sm:$0xff]  ;;  %v2694_v34 = vld [vmem:[#allocation2 + $0x241] ss:$2 sm:$0xff]  ;;  %v2280_v35 = vadd.f32 %v4961_v11, %v2279_v31  ;;  %v1602_v41 = vadd.f32 %v4919_v21, %v1601_v36  ;;  %v1941_v42 = vpop.f32.mrf.mxu1 }
 0x1a9   :  { %4005 = vst.msk [vmem:[%s5580_s3 + $0x34] sm:$0x7] %vm3087_vm4, %v3209_v29  ;;  %v2881_v37 = vmax.f32 %v2470_v33, %v2694_v34  ;;  %v2486_v39 = vld [vmem:[#allocation2 + $0x2c0] ss:$2 sm:$0xff]  ;;  %v2710_v40 = vld [vmem:[#allocation2 + $0x2c1] ss:$2 sm:$0xff]  ;;  %v1942_v46 = vadd.f32 %v4925_v51, %v1941_v42 }
 0x1aa   :  { %4029 = vst.msk [vmem:[%s5580_s3 + $0x64] sm:$0x7] %vm3087_vm4, %v3335_v32  ;;  %v2889_v43 = vmax.f32 %v2486_v39, %v2710_v40  ;;  %v2454_v44 = vld [vmem:[#allocation2 + $0x1c0] ss:$2 sm:$0xff]  ;;  %v2678_v45 = vld [vmem:[#allocation2 + $0x1c1] ss:$2 sm:$0xff] }
 0x1ab   :  { %2993 = vst.msk [vmem:[#allocation3 + $0x120] sm:$0xff] %vm325_vm2, %v2881_v37  ;;  %v2873_v47 = vmax.f32 %v2454_v44, %v2678_v45  ;;  %v2502_v48 = vld [vmem:[#allocation2 + $0x340] ss:$2 sm:$0xff]  ;;  %v2726_v49 = vld [vmem:[#allocation2 + $0x341] ss:$2 sm:$0xff]  ;;  %v1324_v26 = vmax.f32 %v1260_v30, 0.0 }
 0x1ac   :  { %3001 = vst.msk [vmem:[#allocation3 + $0x160] sm:$0xff] %vm325_vm2, %v2889_v43  ;;  %v2897_v50 = vmax.f32 %v2502_v48, %v2726_v49  ;;  %v2344_v52 = vmax.f32 %v2280_v35, 0.0  ;;  %v1665_v53 = vmax.f32 %v1602_v41, 0.0  ;;  %v2005_v54 = vmax.f32 %v1942_v46, 0.0  ;;  %v4105_v37 = vld [vmem:[%s5579_s0 + $0x2b8] sm:$0xff] }
 0x1ad   :  { %2985 = vst.msk [vmem:[#allocation3 + $0xe0] sm:$0xff] %vm325_vm2, %v2873_v47  ;;  %v1261_v55 = vpop.f32.mrf.mxu3  ;;  %v4123_v39 = vld [vmem:[%s5579_s0 + $0x2f8] sm:$0xff] }
 0x1ae   :  { %3009 = vst.msk [vmem:[#allocation3 + $0x1a0] sm:$0xff] %vm325_vm2, %v2897_v50  ;;  %v1262_v56 = vadd.f32 %v4953_v4, %v1261_v55  ;;  %v4141_v42 = vld [vmem:[%s5579_s0 + $0x338] sm:$0xff] }
 0x1af   :  { %1356 = vst.msk [vmem:[#allocation2 + $0x1d0] sm:$0xff] %vm325_vm2, %v1324_v26  ;;  %v2281_v57 = vpop.f32.mrf.mxu2  ;;  %v1604_v61 = vpop.f32.mrf.mxu0  ;;  %v4159_v43 = vld [vmem:[%s5579_s0 + $0x378] sm:$0xff] }
 0x1b0   :  { %2376 = vst.msk [vmem:[#allocation2 + $0x350] sm:$0xff] %vm325_vm2, %v2344_v52  ;;  %v2282_v60 = vadd.f32 %v4961_v11, %v2281_v57  ;;  %v1325_v63 = vmax.f32 %v1262_v56, 0.0  ;;  %v1605_v38 = vadd.f32 %v4919_v21, %v1604_v61  ;;  %v1944_v0 = vpop.f32.mrf.mxu1 }
 0x1b1   :  { %1697 = vst.msk [vmem:[#allocation2 + $0x258] sm:$0xff] %vm325_vm2, %v1665_v53  ;;  %v1945_v1 = vadd.f32 %v4925_v51, %v1944_v0 }
 0x1b2   :  { %2037 = vst.msk [vmem:[#allocation2 + $0x2d8] sm:$0xff] %vm325_vm2, %v2005_v54  ;;  %v2345_v7 = vmax.f32 %v2282_v60, 0.0  ;;  %v1666_v2 = vmax.f32 %v1605_v38, 0.0  ;;  %3718 = vmatmul.msk.bf16.gmra.mxu3 %vm151_vm1, %v4104_v58  ;;  %3806 = vmatmul.msk.bf16.gmra.mxu0 %vm151_vm1, %v4122_v59  ;;  %v5286_v59 = vld [vmem:[%s5578_s2] ss:$0 sm:$0xff] }
 0x1b3   :  { %1357 = vst.msk [vmem:[#allocation2 + $0x1d8] sm:$0xff] %vm325_vm2, %v1325_v63  ;;  %v2006_v3 = vmax.f32 %v1945_v1, 0.0  ;;  %3894 = vmatmul.msk.bf16.gmra.mxu1 %vm151_vm1, %v4140_v62  ;;  %v5292_v38 = vld [vmem:[%s5578_s2] ss:$0 sm:$0xff] }
 0x1b4   :  { %2377 = vst.msk [vmem:[#allocation2 + $0x358] sm:$0xff] %vm325_vm2, %v2345_v7  ;;  %3982 = vmatmul.msk.bf16.gmra.mxu2 %vm151_vm1, %v4158_v6 }
 0x1b5   :  { %1698 = vst.msk [vmem:[#allocation2 + $0x260] sm:$0xff] %vm325_vm2, %v1666_v2  ;;  %v1264_v5 = vpop.f32.mrf.mxu3 }
 0x1b6   :  { %2038 = vst.msk [vmem:[#allocation2 + $0x2e0] sm:$0xff] %vm325_vm2, %v2006_v3  ;;  %v1265_v8 = vadd.f32 %v4953_v4, %v1264_v5 }
 0x1b7   :  { %v2284_v9 = vpop.f32.mrf.mxu2  ;;  %v1606_v14 = vpop.f32.mrf.mxu0 }
 0x1b8   :  { %v2472_v10 = vld [vmem:[#allocation2 + $0x250] ss:$2 sm:$0xff]  ;;  %v2696_v12 = vld [vmem:[#allocation2 + $0x251] ss:$2 sm:$0xff]  ;;  %v2285_v13 = vadd.f32 %v4961_v11, %v2284_v9  ;;  %v1607_v18 = vadd.f32 %v4919_v21, %v1606_v14  ;;  %v1946_v19 = vpop.f32.mrf.mxu1  ;;  %v1326_v29 = vmax.f32 %v1265_v8, 0.0 }
 0x1b9   :  { %v2882_v15 = vmax.f32 %v2472_v10, %v2696_v12  ;;  %v2488_v16 = vld [vmem:[#allocation2 + $0x2d0] ss:$2 sm:$0xff]  ;;  %v2712_v17 = vld [vmem:[#allocation2 + $0x2d1] ss:$2 sm:$0xff]  ;;  %v1947_v24 = vadd.f32 %v4925_v51, %v1946_v19 }
 0x1ba   :  { %v2890_v22 = vmax.f32 %v2488_v16, %v2712_v17  ;;  %v2456_v23 = vld [vmem:[#allocation2 + $0x1d0] ss:$2 sm:$0xff]  ;;  %v2680_v20 = vld [vmem:[#allocation2 + $0x1d1] ss:$2 sm:$0xff]  ;;  %v2346_v31 = vmax.f32 %v2285_v13, 0.0  ;;  %v1667_v32 = vmax.f32 %v1607_v18, 0.0 }
 0x1bb   :  { %2994 = vst.msk [vmem:[#allocation3 + $0x128] sm:$0xff] %vm325_vm2, %v2882_v15  ;;  %v2874_v25 = vmax.f32 %v2456_v23, %v2680_v20  ;;  %v2504_v27 = vld [vmem:[#allocation2 + $0x350] ss:$2 sm:$0xff]  ;;  %v2728_v28 = vld [vmem:[#allocation2 + $0x351] ss:$2 sm:$0xff]  ;;  %v2007_v33 = vmax.f32 %v1947_v24, 0.0 }
 0x1bc   :  { %3002 = vst.msk [vmem:[#allocation3 + $0x168] sm:$0xff] %vm325_vm2, %v2890_v22  ;;  %v2898_v30 = vmax.f32 %v2504_v27, %v2728_v28  ;;  %v3259_v22 = vld [vmem:[#allocation3 + $0x120] sm:$0xff] }
 0x1bd   :  { %2986 = vst.msk [vmem:[#allocation3 + $0xe8] sm:$0xff] %vm325_vm2, %v2874_v25  ;;  %v1266_v34 = vpop.f32.mrf.mxu3  ;;  %v3217_v28 = vld [vmem:[#allocation3 + $0xe0] sm:$0xff] }
 0x1be   :  { %3010 = vst.msk [vmem:[#allocation3 + $0x1a8] sm:$0xff] %vm325_vm2, %v2898_v30  ;;  %v1267_v35 = vadd.f32 %v4953_v4, %v1266_v34 }
 0x1bf   :  { %1358 = vst.msk [vmem:[#allocation2 + $0x1e0] sm:$0xff] %vm325_vm2, %v1326_v29  ;;  %v2286_v36 = vpop.f32.mrf.mxu2  ;;  %v1609_v41 = vpop.f32.mrf.mxu0 }
 0x1c0   :  { %2378 = vst.msk [vmem:[#allocation2 + $0x360] sm:$0xff] %vm325_vm2, %v2346_v31  ;;  %v2287_v40 = vadd.f32 %v4961_v11, %v2286_v36  ;;  %v1327_v44 = vmax.f32 %v1267_v35, 0.0  ;;  %v1610_v45 = vadd.f32 %v4919_v21, %v1609_v41  ;;  %v1949_v46 = vpop.f32.mrf.mxu1  ;;  %v5318_v41 = vld [vmem:[%s5578_s2] ss:$0 sm:$0xff] }
 0x1c1   :  { %1699 = vst.msk [vmem:[#allocation2 + $0x268] sm:$0xff] %vm325_vm2, %v1667_v32  ;;  %v1950_v48 = vadd.f32 %v4925_v51, %v1949_v46  ;;  %v3343_v32 = vld [vmem:[#allocation3 + $0x1a0] sm:$0xff] }
 0x1c2   :  { %2039 = vst.msk [vmem:[#allocation2 + $0x2e8] sm:$0xff] %vm325_vm2, %v2007_v33  ;;  %v2347_v47 = vmax.f32 %v2287_v40, 0.0  ;;  %v1668_v49 = vmax.f32 %v1610_v45, 0.0  ;;  %3719 = vmatmul.msk.bf16.gmra.mxu3 %vm151_vm1, %v4105_v37  ;;  %3807 = vmatmul.msk.bf16.gmra.mxu0 %vm151_vm1, %v4123_v39 }
 0x1c3   :  { %1359 = vst.msk [vmem:[#allocation2 + $0x1e8] sm:$0xff] %vm325_vm2, %v1327_v44  ;;  %v2008_v26 = vmax.f32 %v1950_v48, 0.0  ;;  %3895 = vmatmul.msk.bf16.gmra.mxu1 %vm151_vm1, %v4141_v42 }
 0x1c4   :  { %2379 = vst.msk [vmem:[#allocation2 + $0x368] sm:$0xff] %vm325_vm2, %v2347_v47  ;;  %3983 = vmatmul.msk.bf16.gmra.mxu2 %vm151_vm1, %v4159_v43  ;;  %v5328_v47 = vld [vmem:[%s5578_s2] ss:$0 sm:$0xff] }
 0x1c5   :  { %1700 = vst.msk [vmem:[#allocation2 + $0x270] sm:$0xff] %vm325_vm2, %v1668_v49  ;;  %v1269_v21 = vpop.f32.mrf.mxu3 }
 0x1c6   :  { %2040 = vst.msk [vmem:[#allocation2 + $0x2f0] sm:$0xff] %vm325_vm2, %v2008_v26  ;;  %v1270_v51 = vadd.f32 %v4953_v4, %v1269_v21 }
 0x1c7   :  { %v2289_v50 = vpop.f32.mrf.mxu2  ;;  %v1611_v55 = vpop.f32.mrf.mxu0 }
 0x1c8   :  { %v2474_v52 = vld [vmem:[#allocation2 + $0x260] ss:$2 sm:$0xff]  ;;  %v2698_v53 = vld [vmem:[#allocation2 + $0x261] ss:$2 sm:$0xff]  ;;  %v2290_v54 = vadd.f32 %v4961_v11, %v2289_v50  ;;  %v1612_v60 = vadd.f32 %v5286_v59, %v1611_v55  ;;  %v1951_v61 = vpop.f32.mrf.mxu1  ;;  %v1328_v3 = vmax.f32 %v1270_v51, 0.0 }
 0x1c9   :  { %v2883_v56 = vmax.f32 %v2474_v52, %v2698_v53  ;;  %v2490_v57 = vld [vmem:[#allocation2 + $0x2e0] ss:$2 sm:$0xff]  ;;  %v2714_v58 = vld [vmem:[#allocation2 + $0x2e1] ss:$2 sm:$0xff]  ;;  %v1952_v0 = vadd.f32 %v5292_v38, %v1951_v61 }
 0x1ca   :  { %v2891_v62 = vmax.f32 %v2490_v57, %v2714_v58  ;;  %v2458_v6 = vld [vmem:[#allocation2 + $0x1e0] ss:$2 sm:$0xff]  ;;  %v2682_v63 = vld [vmem:[#allocation2 + $0x1e1] ss:$2 sm:$0xff]  ;;  %v2348_v8 = vmax.f32 %v2290_v54, 0.0  ;;  %v1669_v9 = vmax.f32 %v1612_v60, 0.0 }
 0x1cb   :  { %2995 = vst.msk [vmem:[#allocation3 + $0x130] sm:$0xff] %vm325_vm2, %v2883_v56  ;;  %v2875_v7 = vmax.f32 %v2458_v6, %v2682_v63  ;;  %v2506_v1 = vld [vmem:[#allocation2 + $0x360] ss:$2 sm:$0xff]  ;;  %v2730_v2 = vld [vmem:[#allocation2 + $0x361] ss:$2 sm:$0xff]  ;;  %v2009_v10 = vmax.f32 %v1952_v0, 0.0 }
 0x1cc   :  { %3003 = vst.msk [vmem:[#allocation3 + $0x170] sm:$0xff] %vm325_vm2, %v2891_v62  ;;  %v2899_v5 = vmax.f32 %v2506_v1, %v2730_v2 }
 0x1cd   :  { %2987 = vst.msk [vmem:[#allocation3 + $0xf0] sm:$0xff] %vm325_vm2, %v2875_v7  ;;  %v1271_v12 = vpop.f32.mrf.mxu3 }
 0x1ce   :  { %3011 = vst.msk [vmem:[#allocation3 + $0x1b0] sm:$0xff] %vm325_vm2, %v2899_v5  ;;  %v1272_v13 = vadd.f32 %v4953_v4, %v1271_v12  ;;  %v3301_v4 = vld [vmem:[#allocation3 + $0x160] sm:$0xff]  ;;  %v3260_v12 = vld [vmem:[#allocation3 + $0x128] sm:$0xff] }
 0x1cf   :  { %1360 = vst.msk [vmem:[#allocation2 + $0x1f0] sm:$0xff] %vm325_vm2, %v1328_v3  ;;  %v2291_v14 = vpop.f32.mrf.mxu2  ;;  %v1614_v16 = vpop.f32.mrf.mxu0 }
 0x1d0   :  { %2380 = vst.msk [vmem:[#allocation2 + $0x370] sm:$0xff] %vm325_vm2, %v2348_v8  ;;  %v2292_v15 = vadd.f32 %v4961_v11, %v2291_v14  ;;  %v1329_v17 = vmax.f32 %v1272_v13, 0.0  ;;  %v1615_v18 = vadd.f32 %v5286_v59, %v1614_v16  ;;  %v1954_v19 = vpop.f32.mrf.mxu1  ;;  %v3302_v16 = vld [vmem:[#allocation3 + $0x168] sm:$0xff] }
 0x1d1   :  { %1701 = vst.msk [vmem:[#allocation2 + $0x278] sm:$0xff] %vm325_vm2, %v1669_v9  ;;  %v1955_v24 = vadd.f32 %v5292_v38, %v1954_v19 }
 0x1d2   :  { %v3263_v23 = vld [vmem:[#allocation3 + $0x130] sm:$0xff]  ;;  %2041 = vst.msk [vmem:[#allocation2 + $0x2f8] sm:$0xff] %vm325_vm2, %v2009_v10  ;;  %v2349_v20 = vmax.f32 %v2292_v15, 0.0  ;;  %v1670_v11 = vmax.f32 %v1615_v18, 0.0 }
 0x1d3   :  { %v3267_v25 = vmax.f32 %v3259_v22, %v3263_v23  ;;  %v3305_v27 = vld [vmem:[#allocation3 + $0x170] sm:$0xff]  ;;  %1361 = vst.msk [vmem:[#allocation2 + $0x1f8] sm:$0xff] %vm325_vm2, %v1329_v17  ;;  %v2010_v31 = vmax.f32 %v1955_v24, 0.0  ;;  %v3218_v22 = vld [vmem:[#allocation3 + $0xe8] sm:$0xff] }
 0x1d4   :  { %v3309_v29 = vmax.f32 %v3301_v4, %v3305_v27  ;;  %v3221_v30 = vld [vmem:[#allocation3 + $0xf0] sm:$0xff]  ;;  %2381 = vst.msk [vmem:[#allocation2 + $0x378] sm:$0xff] %vm325_vm2, %v2349_v20  ;;  %v3344_v4 = vld [vmem:[#allocation3 + $0x1a8] sm:$0xff] }
 0x1d5   :  { %v3271_v33 = vpack.c.bf16 %v3267_v25, %v3267_v25  ;;  %v3225_v34 = vmax.f32 %v3217_v28, %v3221_v30  ;;  %v3347_v35 = vld [vmem:[#allocation3 + $0x1b0] sm:$0xff]  ;;  %1702 = vst.msk [vmem:[#allocation2 + $0x580] sm:$0xff] %vm325_vm2, %v1670_v11  ;;  %v1274_v39 = vpop.f32.mrf.mxu3 }
 0x1d6   :  { %v3313_v36 = vpack.c.bf16 %v3309_v29, %v3309_v29  ;;  %v3351_v37 = vmax.f32 %v3343_v32, %v3347_v35  ;;  %2042 = vst.msk [vmem:[#allocation2 + $0x600] sm:$0xff] %vm325_vm2, %v2010_v31  ;;  %v1275_v42 = vadd.f32 %v5318_v41, %v1274_v39 }
 0x1d7   :  { %4016 = vst.msk [vmem:[%s5580_s3 + $0x48] sm:$0xf] %vm3085_vm3, %v3271_v33  ;;  %v3229_v40 = vpack.c.bf16 %v3225_v34, %v3225_v34  ;;  %v2294_v43 = vpop.f32.mrf.mxu2  ;;  %v1616_v49 = vpop.f32.mrf.mxu0 }
 0x1d8   :  { %4024 = vst.msk [vmem:[%s5580_s3 + $0x58] sm:$0xf] %vm3085_vm3, %v3313_v36  ;;  %v3355_v44 = vpack.c.bf16 %v3351_v37, %v3351_v37  ;;  %v2476_v45 = vld [vmem:[#allocation2 + $0x270] ss:$2 sm:$0xff]  ;;  %v2700_v46 = vld [vmem:[#allocation2 + $0x271] ss:$2 sm:$0xff]  ;;  %v2295_v48 = vadd.f32 %v5328_v47, %v2294_v43  ;;  %v1617_v50 = vadd.f32 %v5286_v59, %v1616_v49  ;;  %v1956_v52 = vpop.f32.mrf.mxu1 }
 0x1d9   :  { %4008 = vst.msk [vmem:[%s5580_s3 + $0x38] sm:$0xf] %vm3085_vm3, %v3229_v40  ;;  %v2884_v26 = vmax.f32 %v2476_v45, %v2700_v46  ;;  %v2492_v21 = vld [vmem:[#allocation2 + $0x2f0] ss:$2 sm:$0xff]  ;;  %v2716_v51 = vld [vmem:[#allocation2 + $0x2f1] ss:$2 sm:$0xff]  ;;  %v1957_v56 = vadd.f32 %v5292_v38, %v1956_v52 }
 0x1da   :  { %4032 = vst.msk [vmem:[%s5580_s3 + $0x68] sm:$0xf] %vm3085_vm3, %v3355_v44  ;;  %v2892_v53 = vmax.f32 %v2492_v21, %v2716_v51  ;;  %v2460_v54 = vld [vmem:[#allocation2 + $0x1f0] ss:$2 sm:$0xff]  ;;  %v2684_v55 = vld [vmem:[#allocation2 + $0x1f1] ss:$2 sm:$0xff] }
 0x1db   :  { %2996 = vst.msk [vmem:[#allocation3 + $0x138] sm:$0xff] %vm325_vm2, %v2884_v26  ;;  %v2876_v57 = vmax.f32 %v2460_v54, %v2684_v55  ;;  %v2508_v58 = vld [vmem:[#allocation2 + $0x370] ss:$2 sm:$0xff]  ;;  %v2732_v60 = vld [vmem:[#allocation2 + $0x371] ss:$2 sm:$0xff]  ;;  %v1330_v61 = vmax.f32 %v1275_v42, 0.0 }
 0x1dc   :  { %3004 = vst.msk [vmem:[#allocation3 + $0x178] sm:$0xff] %vm325_vm2, %v2892_v53  ;;  %v2900_v62 = vmax.f32 %v2508_v58, %v2732_v60  ;;  %v2350_v6 = vmax.f32 %v2295_v48, 0.0  ;;  %v1671_v63 = vmax.f32 %v1617_v50, 0.0  ;;  %v2011_v0 = vmax.f32 %v1957_v56, 0.0 }
 0x1dd   :  { %2988 = vst.msk [vmem:[#allocation3 + $0xf8] sm:$0xff] %vm325_vm2, %v2876_v57  ;;  %v1276_v7 = vpop.f32.mrf.mxu3 }
 0x1de   :  { %3012 = vst.msk [vmem:[#allocation3 + $0x1b8] sm:$0xff] %vm325_vm2, %v2900_v62  ;;  %v1277_v1 = vadd.f32 %v5318_v41, %v1276_v7 }
 0x1df   :  { %1362 = vst.msk [vmem:[#allocation2 + $0x500] sm:$0xff] %vm325_vm2, %v1330_v61  ;;  %v2296_v2 = vpop.f32.mrf.mxu2  ;;  %v1619_v5 = vpop.f32.mrf.mxu0 }
 0x1e0   :  { %2382 = vst.msk [vmem:[#allocation2 + $0x680] sm:$0xff] %vm325_vm2, %v2350_v6  ;;  %v2297_v3 = vadd.f32 %v5328_v47, %v2296_v2  ;;  %v1331_v8 = vmax.f32 %v1277_v1, 0.0  ;;  %v1620_v9 = vadd.f32 %v5286_v59, %v1619_v5  ;;  %v1959_v10 = vpop.f32.mrf.mxu1 }
 0x1e1   :  { %1703 = vst.msk [vmem:[#allocation2 + $0x588] sm:$0xff] %vm325_vm2, %v1671_v63  ;;  %v1960_v15 = vadd.f32 %v5292_v38, %v1959_v10 }
 0x1e2   :  { %v3264_v13 = vld [vmem:[#allocation3 + $0x138] sm:$0xff]  ;;  %2043 = vst.msk [vmem:[#allocation2 + $0x608] sm:$0xff] %vm325_vm2, %v2011_v0  ;;  %v2351_v14 = vmax.f32 %v2297_v3, 0.0  ;;  %v1672_v19 = vmax.f32 %v1620_v9, 0.0 }
 0x1e3   :  { %v3268_v17 = vmax.f32 %v3260_v12, %v3264_v13  ;;  %v3306_v18 = vld [vmem:[#allocation3 + $0x178] sm:$0xff]  ;;  %1363 = vst.msk [vmem:[#allocation2 + $0x508] sm:$0xff] %vm325_vm2, %v1331_v8  ;;  %v2012_v24 = vmax.f32 %v1960_v15, 0.0 }
 0x1e4   :  { %v3310_v23 = vmax.f32 %v3302_v16, %v3306_v18  ;;  %v3222_v20 = vld [vmem:[#allocation3 + $0xf8] sm:$0xff]  ;;  %2383 = vst.msk [vmem:[#allocation2 + $0x688] sm:$0xff] %vm325_vm2, %v2351_v14 }
 0x1e5   :  { %v3272_v25 = vpack.c.bf16 %v3268_v17, %v3268_v17  ;;  %v3226_v27 = vmax.f32 %v3218_v22, %v3222_v20  ;;  %v3348_v11 = vld [vmem:[#allocation3 + $0x1b8] sm:$0xff]  ;;  %1704 = vst.msk [vmem:[#allocation2 + $0x590] sm:$0xff] %vm325_vm2, %v1672_v19  ;;  %v1279_v30 = vpop.f32.mrf.mxu3 }
 0x1e6   :  { %v3314_v28 = vpack.c.bf16 %v3310_v23, %v3310_v23  ;;  %v3352_v29 = vmax.f32 %v3344_v4, %v3348_v11  ;;  %2044 = vst.msk [vmem:[#allocation2 + $0x610] sm:$0xff] %vm325_vm2, %v2012_v24  ;;  %v1280_v32 = vadd.f32 %v5318_v41, %v1279_v30 }
 0x1e7   :  { %4017 = vst.msk [vmem:[%s5580_s3 + $0x4c] sm:$0x7] %vm3087_vm4, %v3272_v25  ;;  %v3230_v31 = vpack.c.bf16 %v3226_v27, %v3226_v27  ;;  %v2299_v33 = vpop.f32.mrf.mxu2  ;;  %v1621_v39 = vpop.f32.mrf.mxu0 }
 0x1e8   :  { %4025 = vst.msk [vmem:[%s5580_s3 + $0x5c] sm:$0x7] %vm3087_vm4, %v3314_v28  ;;  %v3356_v34 = vpack.c.bf16 %v3352_v29, %v3352_v29  ;;  %v2574_v35 = vld [vmem:[#allocation2 + $0x580] ss:$2 sm:$0xff]  ;;  %v2798_v36 = vld [vmem:[#allocation2 + $0x581] ss:$2 sm:$0xff]  ;;  %v2300_v37 = vadd.f32 %v5328_v47, %v2299_v33  ;;  %v1622_v44 = vadd.f32 %v5286_v59, %v1621_v39  ;;  %v1961_v45 = vpop.f32.mrf.mxu1 }
 0x1e9   :  { %4009 = vst.msk [vmem:[%s5580_s3 + $0x3c] sm:$0x7] %vm3087_vm4, %v3230_v31  ;;  %v2933_v40 = vmax.f32 %v2574_v35, %v2798_v36  ;;  %v2590_v42 = vld [vmem:[#allocation2 + $0x600] ss:$2 sm:$0xff]  ;;  %v2814_v43 = vld [vmem:[#allocation2 + $0x601] ss:$2 sm:$0xff]  ;;  %v1962_v26 = vadd.f32 %v5292_v38, %v1961_v45 }
 0x1ea   :  { %4033 = vst.msk [vmem:[%s5580_s3 + $0x6c] sm:$0x7] %vm3087_vm4, %v3356_v34  ;;  %v2941_v46 = vmax.f32 %v2590_v42, %v2814_v43  ;;  %v2558_v48 = vld [vmem:[#allocation2 + $0x500] ss:$2 sm:$0xff]  ;;  %v2782_v49 = vld [vmem:[#allocation2 + $0x501] ss:$2 sm:$0xff] }
 0x1eb   :  { %3045 = vst.msk [vmem:[#allocation3 + $0x2c0] sm:$0xff] %vm325_vm2, %v2933_v40  ;;  %v2925_v21 = vmax.f32 %v2558_v48, %v2782_v49  ;;  %v2606_v51 = vld [vmem:[#allocation2 + $0x680] ss:$2 sm:$0xff]  ;;  %v2830_v50 = vld [vmem:[#allocation2 + $0x681] ss:$2 sm:$0xff]  ;;  %v1332_v52 = vmax.f32 %v1280_v32, 0.0 }
 0x1ec   :  { %3053 = vst.msk [vmem:[#allocation3 + $0x300] sm:$0xff] %vm325_vm2, %v2941_v46  ;;  %v2949_v53 = vmax.f32 %v2606_v51, %v2830_v50  ;;  %v2352_v54 = vmax.f32 %v2300_v37, 0.0  ;;  %v1673_v55 = vmax.f32 %v1622_v44, 0.0  ;;  %v2013_v56 = vmax.f32 %v1962_v26, 0.0 }
 0x1ed   :  { %3037 = vst.msk [vmem:[#allocation3 + $0x280] sm:$0xff] %vm325_vm2, %v2925_v21  ;;  %v1281_v57 = vpop.f32.mrf.mxu3 }
 0x1ee   :  { %3061 = vst.msk [vmem:[#allocation3 + $0x340] sm:$0xff] %vm325_vm2, %v2949_v53  ;;  %v1282_v58 = vadd.f32 %v5318_v41, %v1281_v57 }
 0x1ef   :  { %1364 = vst.msk [vmem:[#allocation2 + $0x510] sm:$0xff] %vm325_vm2, %v1332_v52  ;;  %v2301_v60 = vpop.f32.mrf.mxu2  ;;  %v1624_v62 = vpop.f32.mrf.mxu0 }
 0x1f0   :  { %2384 = vst.msk [vmem:[#allocation2 + $0x690] sm:$0xff] %vm325_vm2, %v2352_v54  ;;  %v2302_v61 = vadd.f32 %v5328_v47, %v2301_v60  ;;  %v1333_v6 = vmax.f32 %v1282_v58, 0.0  ;;  %v1625_v63 = vadd.f32 %v5286_v59, %v1624_v62  ;;  %v1964_v0 = vpop.f32.mrf.mxu1 }
 0x1f1   :  { %1705 = vst.msk [vmem:[#allocation2 + $0x598] sm:$0xff] %vm325_vm2, %v1673_v55  ;;  %v1965_v1 = vadd.f32 %v5292_v38, %v1964_v0 }
 0x1f2   :  { %2045 = vst.msk [vmem:[#allocation2 + $0x618] sm:$0xff] %vm325_vm2, %v2013_v56  ;;  %v2353_v7 = vmax.f32 %v2302_v61, 0.0  ;;  %v1674_v2 = vmax.f32 %v1625_v63, 0.0 }
 0x1f3   :  { %1365 = vst.msk [vmem:[#allocation2 + $0x518] sm:$0xff] %vm325_vm2, %v1333_v6  ;;  %v2014_v3 = vmax.f32 %v1965_v1, 0.0 }
 0x1f4   :  { %2385 = vst.msk [vmem:[#allocation2 + $0x698] sm:$0xff] %vm325_vm2, %v2353_v7 }
 0x1f5   :  { %1706 = vst.msk [vmem:[#allocation2 + $0x5a0] sm:$0xff] %vm325_vm2, %v1674_v2  ;;  %v1284_v5 = vpop.f32.mrf.mxu3 }
 0x1f6   :  { %2046 = vst.msk [vmem:[#allocation2 + $0x620] sm:$0xff] %vm325_vm2, %v2014_v3  ;;  %v1285_v8 = vadd.f32 %v5318_v41, %v1284_v5 }
 0x1f7   :  { %v2304_v9 = vpop.f32.mrf.mxu2  ;;  %v1626_v14 = vpop.f32.mrf.mxu0 }
 0x1f8   :  { %v2576_v10 = vld [vmem:[#allocation2 + $0x590] ss:$2 sm:$0xff]  ;;  %v2800_v12 = vld [vmem:[#allocation2 + $0x591] ss:$2 sm:$0xff]  ;;  %v2305_v13 = vadd.f32 %v5328_v47, %v2304_v9  ;;  %v1627_v18 = vadd.f32 %v5286_v59, %v1626_v14  ;;  %v1966_v19 = vpop.f32.mrf.mxu1  ;;  %v1334_v11 = vmax.f32 %v1285_v8, 0.0 }
 0x1f9   :  { %v2934_v15 = vmax.f32 %v2576_v10, %v2800_v12  ;;  %v2592_v16 = vld [vmem:[#allocation2 + $0x610] ss:$2 sm:$0xff]  ;;  %v2816_v17 = vld [vmem:[#allocation2 + $0x611] ss:$2 sm:$0xff]  ;;  %v1967_v24 = vadd.f32 %v5292_v38, %v1966_v19 }
 0x1fa   :  { %v2942_v22 = vmax.f32 %v2592_v16, %v2816_v17  ;;  %v2560_v23 = vld [vmem:[#allocation2 + $0x510] ss:$2 sm:$0xff]  ;;  %v2784_v20 = vld [vmem:[#allocation2 + $0x511] ss:$2 sm:$0xff]  ;;  %v2354_v29 = vmax.f32 %v2305_v13, 0.0  ;;  %v1675_v30 = vmax.f32 %v1627_v18, 0.0 }
 0x1fb   :  { %3046 = vst.msk [vmem:[#allocation3 + $0x2c8] sm:$0xff] %vm325_vm2, %v2934_v15  ;;  %v2926_v4 = vmax.f32 %v2560_v23, %v2784_v20  ;;  %v2608_v25 = vld [vmem:[#allocation2 + $0x690] ss:$2 sm:$0xff]  ;;  %v2832_v27 = vld [vmem:[#allocation2 + $0x691] ss:$2 sm:$0xff]  ;;  %v2015_v31 = vmax.f32 %v1967_v24, 0.0 }
 0x1fc   :  { %3054 = vst.msk [vmem:[#allocation3 + $0x308] sm:$0xff] %vm325_vm2, %v2942_v22  ;;  %v2950_v28 = vmax.f32 %v2608_v25, %v2832_v27  ;;  %v3240_v16 = vld [vmem:[#allocation3 + $0x2c0] sm:$0xff] }
 0x1fd   :  { %3038 = vst.msk [vmem:[#allocation3 + $0x288] sm:$0xff] %vm325_vm2, %v2926_v4  ;;  %v1286_v32 = vpop.f32.mrf.mxu3  ;;  %v3282_v22 = vld [vmem:[#allocation3 + $0x300] sm:$0xff] }
 0x1fe   :  { %3062 = vst.msk [vmem:[#allocation3 + $0x348] sm:$0xff] %vm325_vm2, %v2950_v28  ;;  %v1287_v33 = vadd.f32 %v5318_v41, %v1286_v32  ;;  %v3198_v4 = vld [vmem:[#allocation3 + $0x280] sm:$0xff] }
 0x1ff   :  { %1366 = vst.msk [vmem:[#allocation2 + $0x520] sm:$0xff] %vm325_vm2, %v1334_v11  ;;  %v2306_v34 = vpop.f32.mrf.mxu2  ;;  %v1629_v36 = vpop.f32.mrf.mxu0  ;;  %v3324_v28 = vld [vmem:[#allocation3 + $0x340] sm:$0xff] }
 0x200   :  { %2386 = vst.msk [vmem:[#allocation2 + $0x6a0] sm:$0xff] %vm325_vm2, %v2354_v29  ;;  %v2307_v35 = vadd.f32 %v5328_v47, %v2306_v34  ;;  %v1335_v37 = vmax.f32 %v1287_v33, 0.0  ;;  %v1630_v39 = vadd.f32 %v5286_v59, %v1629_v36  ;;  %v1969_v40 = vpop.f32.mrf.mxu1 }
 0x201   :  { %1707 = vst.msk [vmem:[#allocation2 + $0x5a8] sm:$0xff] %vm325_vm2, %v1675_v30  ;;  %v1970_v43 = vadd.f32 %v5292_v38, %v1969_v40 }
 0x202   :  { %2047 = vst.msk [vmem:[#allocation2 + $0x628] sm:$0xff] %vm325_vm2, %v2015_v31  ;;  %v2355_v42 = vmax.f32 %v2307_v35, 0.0  ;;  %v1676_v44 = vmax.f32 %v1630_v39, 0.0 }
 0x203   :  { %1367 = vst.msk [vmem:[#allocation2 + $0x528] sm:$0xff] %vm325_vm2, %v1335_v37  ;;  %v2016_v45 = vmax.f32 %v1970_v43, 0.0 }
 0x204   :  { %2387 = vst.msk [vmem:[#allocation2 + $0x6a8] sm:$0xff] %vm325_vm2, %v2355_v42 }
 0x205   :  { %1708 = vst.msk [vmem:[#allocation2 + $0x5b0] sm:$0xff] %vm325_vm2, %v1676_v44  ;;  %v1289_v46 = vpop.f32.mrf.mxu3 }
 0x206   :  { %2048 = vst.msk [vmem:[#allocation2 + $0x630] sm:$0xff] %vm325_vm2, %v2016_v45  ;;  %v1290_v48 = vadd.f32 %v5318_v41, %v1289_v46 }
 0x207   :  { %v2309_v49 = vpop.f32.mrf.mxu2  ;;  %v1631_v50 = vpop.f32.mrf.mxu0 }
 0x208   :  { %v2578_v26 = vld [vmem:[#allocation2 + $0x5a0] ss:$2 sm:$0xff]  ;;  %v2802_v21 = vld [vmem:[#allocation2 + $0x5a1] ss:$2 sm:$0xff]  ;;  %v2310_v51 = vadd.f32 %v5328_v47, %v2309_v49  ;;  %v1632_v55 = vadd.f32 %v5286_v59, %v1631_v50  ;;  %v1971_v56 = vpop.f32.mrf.mxu1  ;;  %v1336_v0 = vmax.f32 %v1290_v48, 0.0 }
 0x209   :  { %v2935_v52 = vmax.f32 %v2578_v26, %v2802_v21  ;;  %v2594_v53 = vld [vmem:[#allocation2 + $0x620] ss:$2 sm:$0xff]  ;;  %v2818_v54 = vld [vmem:[#allocation2 + $0x621] ss:$2 sm:$0xff]  ;;  %v1972_v61 = vadd.f32 %v5292_v38, %v1971_v56 }
 0x20a   :  { %v2943_v57 = vmax.f32 %v2594_v53, %v2818_v54  ;;  %v2562_v58 = vld [vmem:[#allocation2 + $0x520] ss:$2 sm:$0xff]  ;;  %v2786_v60 = vld [vmem:[#allocation2 + $0x521] ss:$2 sm:$0xff]  ;;  %v2356_v1 = vmax.f32 %v2310_v51, 0.0  ;;  %v1677_v2 = vmax.f32 %v1632_v55, 0.0 }
 0x20b   :  { %3047 = vst.msk [vmem:[#allocation3 + $0x2d0] sm:$0xff] %vm325_vm2, %v2935_v52  ;;  %v2927_v62 = vmax.f32 %v2562_v58, %v2786_v60  ;;  %v2610_v6 = vld [vmem:[#allocation2 + $0x6a0] ss:$2 sm:$0xff]  ;;  %v2834_v63 = vld [vmem:[#allocation2 + $0x6a1] ss:$2 sm:$0xff]  ;;  %v2017_v3 = vmax.f32 %v1972_v61, 0.0 }
 0x20c   :  { %3055 = vst.msk [vmem:[#allocation3 + $0x310] sm:$0xff] %vm325_vm2, %v2943_v57  ;;  %v2951_v7 = vmax.f32 %v2610_v6, %v2834_v63 }
 0x20d   :  { %3039 = vst.msk [vmem:[#allocation3 + $0x290] sm:$0xff] %vm325_vm2, %v2927_v62  ;;  %v1291_v5 = vpop.f32.mrf.mxu3 }
 0x20e   :  { %3063 = vst.msk [vmem:[#allocation3 + $0x350] sm:$0xff] %vm325_vm2, %v2951_v7  ;;  %v1292_v8 = vadd.f32 %v5318_v41, %v1291_v5  ;;  %v3241_v5 = vld [vmem:[#allocation3 + $0x2c8] sm:$0xff] }
 0x20f   :  { %1368 = vst.msk [vmem:[#allocation2 + $0x530] sm:$0xff] %vm325_vm2, %v1336_v0  ;;  %v2311_v9 = vpop.f32.mrf.mxu2  ;;  %v1634_v12 = vpop.f32.mrf.mxu0 }
 0x210   :  { %2388 = vst.msk [vmem:[#allocation2 + $0x6b0] sm:$0xff] %vm325_vm2, %v2356_v1  ;;  %v2312_v10 = vadd.f32 %v5328_v47, %v2311_v9  ;;  %v1337_v13 = vmax.f32 %v1292_v8, 0.0  ;;  %v1635_v14 = vadd.f32 %v5286_v59, %v1634_v12  ;;  %v1974_v15 = vpop.f32.mrf.mxu1  ;;  %v3283_v12 = vld [vmem:[#allocation3 + $0x308] sm:$0xff] }
 0x211   :  { %1709 = vst.msk [vmem:[#allocation2 + $0x5b8] sm:$0xff] %vm325_vm2, %v1677_v2  ;;  %v1975_v19 = vadd.f32 %v5292_v38, %v1974_v15 }
 0x212   :  { %v3244_v17 = vld [vmem:[#allocation3 + $0x2d0] sm:$0xff]  ;;  %2049 = vst.msk [vmem:[#allocation2 + $0x638] sm:$0xff] %vm325_vm2, %v2017_v3  ;;  %v2357_v18 = vmax.f32 %v2312_v10, 0.0  ;;  %v1678_v24 = vmax.f32 %v1635_v14, 0.0 }
 0x213   :  { %v3248_v23 = vmax.f32 %v3240_v16, %v3244_v17  ;;  %v3286_v20 = vld [vmem:[#allocation3 + $0x310] sm:$0xff]  ;;  %1369 = vst.msk [vmem:[#allocation2 + $0x538] sm:$0xff] %vm325_vm2, %v1337_v13  ;;  %v2018_v11 = vmax.f32 %v1975_v19, 0.0  ;;  %v3199_v16 = vld [vmem:[#allocation3 + $0x288] sm:$0xff] }
 0x214   :  { %v3290_v25 = vmax.f32 %v3282_v22, %v3286_v20  ;;  %v3202_v27 = vld [vmem:[#allocation3 + $0x290] sm:$0xff]  ;;  %2389 = vst.msk [vmem:[#allocation2 + $0x6b8] sm:$0xff] %vm325_vm2, %v2357_v18  ;;  %v3325_v22 = vld [vmem:[#allocation3 + $0x348] sm:$0xff] }
 0x215   :  { %v3252_v29 = vpack.c.bf16 %v3248_v23, %v3248_v23  ;;  %v3206_v30 = vmax.f32 %v3198_v4, %v3202_v27  ;;  %v3328_v31 = vld [vmem:[#allocation3 + $0x350] sm:$0xff]  ;;  %1710 = vst.msk [vmem:[#allocation2 + $0x5c0] sm:$0xff] %vm325_vm2, %v1678_v24  ;;  %v1294_v34 = vpop.f32.mrf.mxu3 }
 0x216   :  { %v3294_v32 = vpack.c.bf16 %v3290_v25, %v3290_v25  ;;  %v3332_v33 = vmax.f32 %v3324_v28, %v3328_v31  ;;  %2050 = vst.msk [vmem:[#allocation2 + $0x640] sm:$0xff] %vm325_vm2, %v2018_v11  ;;  %v1295_v36 = vadd.f32 %v5318_v41, %v1294_v34 }
 0x217   :  { %4014 = vst.msk [vmem:[%s5580_s3 + $0xb0] sm:$0xf] %vm3085_vm3, %v3252_v29  ;;  %v3210_v35 = vpack.c.bf16 %v3206_v30, %v3206_v30  ;;  %v2314_v37 = vpop.f32.mrf.mxu2  ;;  %v1636_v44 = vpop.f32.mrf.mxu0 }
 0x218   :  { %4022 = vst.msk [vmem:[%s5580_s3 + $0xc0] sm:$0xf] %vm3085_vm3, %v3294_v32  ;;  %v3336_v39 = vpack.c.bf16 %v3332_v33, %v3332_v33  ;;  %v2580_v40 = vld [vmem:[#allocation2 + $0x5b0] ss:$2 sm:$0xff]  ;;  %v2804_v42 = vld [vmem:[#allocation2 + $0x5b1] ss:$2 sm:$0xff]  ;;  %v2315_v43 = vadd.f32 %v5328_v47, %v2314_v37  ;;  %v1637_v49 = vadd.f32 %v5286_v59, %v1636_v44  ;;  %v1976_v26 = vpop.f32.mrf.mxu1 }
 0x219   :  { %4006 = vst.msk [vmem:[%s5580_s3 + $0xa0] sm:$0xf] %vm3085_vm3, %v3210_v35  ;;  %v2936_v45 = vmax.f32 %v2580_v40, %v2804_v42  ;;  %v2596_v46 = vld [vmem:[#allocation2 + $0x630] ss:$2 sm:$0xff]  ;;  %v2820_v48 = vld [vmem:[#allocation2 + $0x631] ss:$2 sm:$0xff]  ;;  %v1977_v52 = vadd.f32 %v5292_v38, %v1976_v26 }
 0x21a   :  { %4030 = vst.msk [vmem:[%s5580_s3 + $0xd0] sm:$0xf] %vm3085_vm3, %v3336_v39  ;;  %v2944_v21 = vmax.f32 %v2596_v46, %v2820_v48  ;;  %v2564_v51 = vld [vmem:[#allocation2 + $0x530] ss:$2 sm:$0xff]  ;;  %v2788_v50 = vld [vmem:[#allocation2 + $0x531] ss:$2 sm:$0xff] }
 0x21b   :  { %3048 = vst.msk [vmem:[#allocation3 + $0x2d8] sm:$0xff] %vm325_vm2, %v2936_v45  ;;  %v2928_v53 = vmax.f32 %v2564_v51, %v2788_v50  ;;  %v2612_v54 = vld [vmem:[#allocation2 + $0x6b0] ss:$2 sm:$0xff]  ;;  %v2836_v55 = vld [vmem:[#allocation2 + $0x6b1] ss:$2 sm:$0xff]  ;;  %v1338_v56 = vmax.f32 %v1295_v36, 0.0 }
 0x21c   :  { %3056 = vst.msk [vmem:[#allocation3 + $0x318] sm:$0xff] %vm325_vm2, %v2944_v21  ;;  %v2952_v57 = vmax.f32 %v2612_v54, %v2836_v55  ;;  %v2358_v58 = vmax.f32 %v2315_v43, 0.0  ;;  %v1679_v60 = vmax.f32 %v1637_v49, 0.0  ;;  %v2019_v61 = vmax.f32 %v1977_v52, 0.0 }
 0x21d   :  { %3040 = vst.msk [vmem:[#allocation3 + $0x298] sm:$0xff] %vm325_vm2, %v2928_v53  ;;  %v1296_v62 = vpop.f32.mrf.mxu3 }
 0x21e   :  { %3064 = vst.msk [vmem:[#allocation3 + $0x358] sm:$0xff] %vm325_vm2, %v2952_v57  ;;  %v1297_v6 = vadd.f32 %v5318_v41, %v1296_v62 }
 0x21f   :  { %1370 = vst.msk [vmem:[#allocation2 + $0x540] sm:$0xff] %vm325_vm2, %v1338_v56  ;;  %v2316_v63 = vpop.f32.mrf.mxu2  ;;  %v1639_v7 = vpop.f32.mrf.mxu0 }
 0x220   :  { %2390 = vst.msk [vmem:[#allocation2 + $0x6c0] sm:$0xff] %vm325_vm2, %v2358_v58  ;;  %v2317_v0 = vadd.f32 %v5328_v47, %v2316_v63  ;;  %v1339_v1 = vmax.f32 %v1297_v6, 0.0  ;;  %v1640_v2 = vadd.f32 %v5286_v59, %v1639_v7  ;;  %v1979_v3 = vpop.f32.mrf.mxu1 }
 0x221   :  { %1711 = vst.msk [vmem:[#allocation2 + $0x5c8] sm:$0xff] %vm325_vm2, %v1679_v60  ;;  %v1980_v10 = vadd.f32 %v5292_v38, %v1979_v3 }
 0x222   :  { %v3245_v8 = vld [vmem:[#allocation3 + $0x2d8] sm:$0xff]  ;;  %2051 = vst.msk [vmem:[#allocation2 + $0x648] sm:$0xff] %vm325_vm2, %v2019_v61  ;;  %v2359_v9 = vmax.f32 %v2317_v0, 0.0  ;;  %v1680_v15 = vmax.f32 %v1640_v2, 0.0 }
 0x223   :  { %v3249_v13 = vmax.f32 %v3241_v5, %v3245_v8  ;;  %v3287_v14 = vld [vmem:[#allocation3 + $0x318] sm:$0xff]  ;;  %1371 = vst.msk [vmem:[#allocation2 + $0x548] sm:$0xff] %vm325_vm2, %v1339_v1  ;;  %v2020_v19 = vmax.f32 %v1980_v10, 0.0 }
 0x224   :  { %v3291_v17 = vmax.f32 %v3283_v12, %v3287_v14  ;;  %v3203_v18 = vld [vmem:[#allocation3 + $0x298] sm:$0xff]  ;;  %2391 = vst.msk [vmem:[#allocation2 + $0x6c8] sm:$0xff] %vm325_vm2, %v2359_v9 }
 0x225   :  { %v3253_v23 = vpack.c.bf16 %v3249_v13, %v3249_v13  ;;  %v3207_v20 = vmax.f32 %v3199_v16, %v3203_v18  ;;  %v3329_v24 = vld [vmem:[#allocation3 + $0x358] sm:$0xff]  ;;  %1712 = vst.msk [vmem:[#allocation2 + $0x5d0] sm:$0xff] %vm325_vm2, %v1680_v15  ;;  %v1299_v27 = vpop.f32.mrf.mxu3 }
 0x226   :  { %v3295_v4 = vpack.c.bf16 %v3291_v17, %v3291_v17  ;;  %v3333_v25 = vmax.f32 %v3325_v22, %v3329_v24  ;;  %2052 = vst.msk [vmem:[#allocation2 + $0x650] sm:$0xff] %vm325_vm2, %v2020_v19  ;;  %v1300_v28 = vadd.f32 %v5318_v41, %v1299_v27 }
 0x227   :  { %4015 = vst.msk [vmem:[%s5580_s3 + $0xb4] sm:$0x7] %vm3087_vm4, %v3253_v23  ;;  %v3211_v11 = vpack.c.bf16 %v3207_v20, %v3207_v20  ;;  %v2319_v29 = vpop.f32.mrf.mxu2  ;;  %v1641_v34 = vpop.f32.mrf.mxu0 }
 0x228   :  { %4023 = vst.msk [vmem:[%s5580_s3 + $0xc4] sm:$0x7] %vm3087_vm4, %v3295_v4  ;;  %v3337_v30 = vpack.c.bf16 %v3333_v25, %v3333_v25  ;;  %v2582_v31 = vld [vmem:[#allocation2 + $0x5c0] ss:$2 sm:$0xff]  ;;  %v2806_v32 = vld [vmem:[#allocation2 + $0x5c1] ss:$2 sm:$0xff]  ;;  %v2320_v33 = vadd.f32 %v5328_v47, %v2319_v29  ;;  %v1642_v39 = vadd.f32 %v5286_v59, %v1641_v34  ;;  %v1981_v40 = vpop.f32.mrf.mxu1 }
 0x229   :  { %4007 = vst.msk [vmem:[%s5580_s3 + $0xa4] sm:$0x7] %vm3087_vm4, %v3211_v11  ;;  %v2937_v35 = vmax.f32 %v2582_v31, %v2806_v32  ;;  %v2598_v36 = vld [vmem:[#allocation2 + $0x640] ss:$2 sm:$0xff]  ;;  %v2822_v37 = vld [vmem:[#allocation2 + $0x641] ss:$2 sm:$0xff]  ;;  %v1982_v45 = vadd.f32 %v5292_v38, %v1981_v40 }
 0x22a   :  { %4031 = vst.msk [vmem:[%s5580_s3 + $0xd4] sm:$0x7] %vm3087_vm4, %v3337_v30  ;;  %v2945_v42 = vmax.f32 %v2598_v36, %v2822_v37  ;;  %v2566_v43 = vld [vmem:[#allocation2 + $0x540] ss:$2 sm:$0xff]  ;;  %v2790_v44 = vld [vmem:[#allocation2 + $0x541] ss:$2 sm:$0xff] }
 0x22b   :  { %3049 = vst.msk [vmem:[#allocation3 + $0x2e0] sm:$0xff] %vm325_vm2, %v2937_v35  ;;  %v2929_v46 = vmax.f32 %v2566_v43, %v2790_v44  ;;  %v2614_v48 = vld [vmem:[#allocation2 + $0x6c0] ss:$2 sm:$0xff]  ;;  %v2838_v49 = vld [vmem:[#allocation2 + $0x6c1] ss:$2 sm:$0xff]  ;;  %v1340_v26 = vmax.f32 %v1300_v28, 0.0 }
 0x22c   :  { %3057 = vst.msk [vmem:[#allocation3 + $0x320] sm:$0xff] %vm325_vm2, %v2945_v42  ;;  %v2953_v21 = vmax.f32 %v2614_v48, %v2838_v49  ;;  %v2360_v51 = vmax.f32 %v2320_v33, 0.0  ;;  %v1681_v50 = vmax.f32 %v1642_v39, 0.0  ;;  %v2021_v52 = vmax.f32 %v1982_v45, 0.0 }
 0x22d   :  { %3041 = vst.msk [vmem:[#allocation3 + $0x2a0] sm:$0xff] %vm325_vm2, %v2929_v46  ;;  %v1301_v53 = vpop.f32.mrf.mxu3 }
 0x22e   :  { %3065 = vst.msk [vmem:[#allocation3 + $0x360] sm:$0xff] %vm325_vm2, %v2953_v21  ;;  %v1302_v54 = vadd.f32 %v5318_v41, %v1301_v53 }
 0x22f   :  { %1372 = vst.msk [vmem:[#allocation2 + $0x550] sm:$0xff] %vm325_vm2, %v1340_v26  ;;  %v2321_v55 = vpop.f32.mrf.mxu2  ;;  %v1644_v57 = vpop.f32.mrf.mxu0 }
 0x230   :  { %2392 = vst.msk [vmem:[#allocation2 + $0x6d0] sm:$0xff] %vm325_vm2, %v2360_v51  ;;  %v2322_v56 = vadd.f32 %v5328_v47, %v2321_v55  ;;  %v1341_v58 = vmax.f32 %v1302_v54, 0.0  ;;  %v1645_v60 = vadd.f32 %v5286_v59, %v1644_v57  ;;  %v1984_v61 = vpop.f32.mrf.mxu1 }
 0x231   :  { %1713 = vst.msk [vmem:[#allocation2 + $0x5d8] sm:$0xff] %vm325_vm2, %v1681_v50  ;;  %v1985_v6 = vadd.f32 %v5292_v38, %v1984_v61 }
 0x232   :  { %2053 = vst.msk [vmem:[#allocation2 + $0x658] sm:$0xff] %vm325_vm2, %v2021_v52  ;;  %v2361_v62 = vmax.f32 %v2322_v56, 0.0  ;;  %v1682_v63 = vmax.f32 %v1645_v60, 0.0 }
 0x233   :  { %1373 = vst.msk [vmem:[#allocation2 + $0x558] sm:$0xff] %vm325_vm2, %v1341_v58  ;;  %v2022_v0 = vmax.f32 %v1985_v6, 0.0 }
 0x234   :  { %2393 = vst.msk [vmem:[#allocation2 + $0x6d8] sm:$0xff] %vm325_vm2, %v2361_v62 }
 0x235   :  { %1714 = vst.msk [vmem:[#allocation2 + $0x5e0] sm:$0xff] %vm325_vm2, %v1682_v63  ;;  %v1304_v7 = vpop.f32.mrf.mxu3 }
 0x236   :  { %2054 = vst.msk [vmem:[#allocation2 + $0x660] sm:$0xff] %vm325_vm2, %v2022_v0  ;;  %v1305_v1 = vadd.f32 %v5318_v41, %v1304_v7 }
 0x237   :  { %v2324_v2 = vpop.f32.mrf.mxu2  ;;  %v1646_v9 = vpop.f32.mrf.mxu0 }
 0x238   :  { %v2584_v3 = vld [vmem:[#allocation2 + $0x5d0] ss:$2 sm:$0xff]  ;;  %v2808_v5 = vld [vmem:[#allocation2 + $0x5d1] ss:$2 sm:$0xff]  ;;  %v2325_v8 = vadd.f32 %v5328_v47, %v2324_v2  ;;  %v1647_v14 = vadd.f32 %v5286_v59, %v1646_v9  ;;  %v1986_v15 = vpop.f32.mrf.mxu1  ;;  %v1342_v24 = vmax.f32 %v1305_v1, 0.0  ;;  %v3303_v9 = vld [vmem:[#allocation3 + $0x320] sm:$0xff] }
 0x239   :  { %v2938_v10 = vmax.f32 %v2584_v3, %v2808_v5  ;;  %v2600_v12 = vld [vmem:[#allocation2 + $0x650] ss:$2 sm:$0xff]  ;;  %v2824_v13 = vld [vmem:[#allocation2 + $0x651] ss:$2 sm:$0xff]  ;;  %v1987_v19 = vadd.f32 %v5292_v38, %v1986_v15  ;;  %v3261_v3 = vld [vmem:[#allocation3 + $0x2e0] sm:$0xff] }
 0x23a   :  { %v2946_v16 = vmax.f32 %v2600_v12, %v2824_v13  ;;  %v2568_v17 = vld [vmem:[#allocation2 + $0x550] ss:$2 sm:$0xff]  ;;  %v2792_v18 = vld [vmem:[#allocation2 + $0x551] ss:$2 sm:$0xff]  ;;  %v2362_v25 = vmax.f32 %v2325_v8, 0.0  ;;  %v1683_v27 = vmax.f32 %v1647_v14, 0.0 }
 0x23b   :  { %3050 = vst.msk [vmem:[#allocation3 + $0x2e8] sm:$0xff] %vm325_vm2, %v2938_v10  ;;  %v2930_v22 = vmax.f32 %v2568_v17, %v2792_v18  ;;  %v2616_v23 = vld [vmem:[#allocation2 + $0x6d0] ss:$2 sm:$0xff]  ;;  %v2840_v20 = vld [vmem:[#allocation2 + $0x6d1] ss:$2 sm:$0xff]  ;;  %v2023_v11 = vmax.f32 %v1987_v19, 0.0 }
 0x23c   :  { %3058 = vst.msk [vmem:[#allocation3 + $0x328] sm:$0xff] %vm325_vm2, %v2946_v16  ;;  %v2954_v4 = vmax.f32 %v2616_v23, %v2840_v20  ;;  %v3219_v13 = vld [vmem:[#allocation3 + $0x2a0] sm:$0xff] }
 0x23d   :  { %3042 = vst.msk [vmem:[#allocation3 + $0x2a8] sm:$0xff] %vm325_vm2, %v2930_v22  ;;  %v1306_v28 = vpop.f32.mrf.mxu3  ;;  %v3345_v15 = vld [vmem:[#allocation3 + $0x360] sm:$0xff] }
 0x23e   :  { %3066 = vst.msk [vmem:[#allocation3 + $0x368] sm:$0xff] %vm325_vm2, %v2954_v4  ;;  %v1307_v29 = vadd.f32 %v5318_v41, %v1306_v28 }
 0x23f   :  { %1374 = vst.msk [vmem:[#allocation2 + $0x560] sm:$0xff] %vm325_vm2, %v1342_v24  ;;  %v2326_v30 = vpop.f32.mrf.mxu2  ;;  %v1649_v32 = vpop.f32.mrf.mxu0 }
 0x240   :  { %2394 = vst.msk [vmem:[#allocation2 + $0x6e0] sm:$0xff] %vm325_vm2, %v2362_v25  ;;  %v2327_v31 = vadd.f32 %v5328_v47, %v2326_v30  ;;  %v1343_v33 = vmax.f32 %v1307_v29, 0.0  ;;  %v1650_v34 = vadd.f32 %v5286_v59, %v1649_v32  ;;  %v1989_v35 = vpop.f32.mrf.mxu1 }
 0x241   :  { %1715 = vst.msk [vmem:[#allocation2 + $0x5e8] sm:$0xff] %vm325_vm2, %v1683_v27  ;;  %v1990_v37 = vadd.f32 %v5292_v38, %v1989_v35 }
 0x242   :  { %2055 = vst.msk [vmem:[#allocation2 + $0x668] sm:$0xff] %vm325_vm2, %v2023_v11  ;;  %v2363_v36 = vmax.f32 %v2327_v31, 0.0  ;;  %v1684_v39 = vmax.f32 %v1650_v34, 0.0  ;;  %v3262_v34 = vld [vmem:[#allocation3 + $0x2e8] sm:$0xff] }
 0x243   :  { %1375 = vst.msk [vmem:[#allocation2 + $0x568] sm:$0xff] %vm325_vm2, %v1343_v33  ;;  %v2024_v40 = vmax.f32 %v1990_v37, 0.0 }
 0x244   :  { %2395 = vst.msk [vmem:[#allocation2 + $0x6e8] sm:$0xff] %vm325_vm2, %v2363_v36  ;;  %v3304_v36 = vld [vmem:[#allocation3 + $0x328] sm:$0xff] }
 0x245   :  { %1716 = vst.msk [vmem:[#allocation2 + $0x5f0] sm:$0xff] %vm325_vm2, %v1684_v39  ;;  %v1309_v42 = vpop.f32.mrf.mxu3 }
 0x246   :  { %2056 = vst.msk [vmem:[#allocation2 + $0x670] sm:$0xff] %vm325_vm2, %v2024_v40  ;;  %v1310_v43 = vadd.f32 %v5318_v41, %v1309_v42  ;;  %v3220_v40 = vld [vmem:[#allocation3 + $0x2a8] sm:$0xff] }
 0x247   :  { %v2329_v44 = vpop.f32.mrf.mxu2  ;;  %v1651_v49 = vpop.f32.mrf.mxu0 }
 0x248   :  { %v2586_v45 = vld [vmem:[#allocation2 + $0x5e0] ss:$2 sm:$0xff]  ;;  %v2810_v46 = vld [vmem:[#allocation2 + $0x5e1] ss:$2 sm:$0xff]  ;;  %v2330_v48 = vadd.f32 %v5328_v47, %v2329_v44  ;;  %v1652_v50 = vadd.f32 %v5286_v59, %v1651_v49  ;;  %v1991_v52 = vpop.f32.mrf.mxu1  ;;  %v1344_v61 = vmax.f32 %v1310_v43, 0.0 }
 0x249   :  { %v2939_v26 = vmax.f32 %v2586_v45, %v2810_v46  ;;  %v2602_v21 = vld [vmem:[#allocation2 + $0x660] ss:$2 sm:$0xff]  ;;  %v2826_v51 = vld [vmem:[#allocation2 + $0x661] ss:$2 sm:$0xff]  ;;  %v1992_v56 = vadd.f32 %v5292_v38, %v1991_v52 }
 0x24a   :  { %v2947_v53 = vmax.f32 %v2602_v21, %v2826_v51  ;;  %v2570_v54 = vld [vmem:[#allocation2 + $0x560] ss:$2 sm:$0xff]  ;;  %v2794_v55 = vld [vmem:[#allocation2 + $0x561] ss:$2 sm:$0xff]  ;;  %v2364_v6 = vmax.f32 %v2330_v48, 0.0  ;;  %v1685_v63 = vmax.f32 %v1652_v50, 0.0 }
 0x24b   :  { %3051 = vst.msk [vmem:[#allocation3 + $0x2f0] sm:$0xff] %vm325_vm2, %v2939_v26  ;;  %v2931_v57 = vmax.f32 %v2570_v54, %v2794_v55  ;;  %v2618_v58 = vld [vmem:[#allocation2 + $0x6e0] ss:$2 sm:$0xff]  ;;  %v2842_v60 = vld [vmem:[#allocation2 + $0x6e1] ss:$2 sm:$0xff]  ;;  %v2025_v59 = vmax.f32 %v1992_v56, 0.0 }
 0x24c   :  { %3059 = vst.msk [vmem:[#allocation3 + $0x330] sm:$0xff] %vm325_vm2, %v2947_v53  ;;  %v2955_v62 = vmax.f32 %v2618_v58, %v2842_v60  ;;  %v3346_v44 = vld [vmem:[#allocation3 + $0x368] sm:$0xff] }
 0x24d   :  { %3043 = vst.msk [vmem:[#allocation3 + $0x2b0] sm:$0xff] %vm325_vm2, %v2931_v57  ;;  %v1311_v0 = vpop.f32.mrf.mxu3 }
 0x24e   :  { %3067 = vst.msk [vmem:[#allocation3 + $0x370] sm:$0xff] %vm325_vm2, %v2955_v62  ;;  %v1312_v38 = vadd.f32 %v5318_v41, %v1311_v0 }
 0x24f   :  { %1376 = vst.msk [vmem:[#allocation2 + $0x570] sm:$0xff] %vm325_vm2, %v1344_v61  ;;  %v2331_v7 = vpop.f32.mrf.mxu2 }
 0x250   :  { %2396 = vst.msk [vmem:[#allocation2 + $0x6f0] sm:$0xff] %vm325_vm2, %v2364_v6  ;;  %v2332_v1 = vadd.f32 %v5328_v47, %v2331_v7  ;;  %v1345_v2 = vmax.f32 %v1312_v38, 0.0 }
 0x251   :  { %1717 = vst.msk [vmem:[#allocation2 + $0x5f8] sm:$0xff] %vm325_vm2, %v1685_v63 }
 0x252   :  { %v3265_v5 = vld [vmem:[#allocation3 + $0x2f0] sm:$0xff]  ;;  %2057 = vst.msk [vmem:[#allocation2 + $0x678] sm:$0xff] %vm325_vm2, %v2025_v59  ;;  %v2365_v8 = vmax.f32 %v2332_v1, 0.0 }
 0x253   :  { %v3269_v10 = vmax.f32 %v3261_v3, %v3265_v5  ;;  %v3307_v12 = vld [vmem:[#allocation3 + $0x330] sm:$0xff]  ;;  %1377 = vst.msk [vmem:[#allocation2 + $0x578] sm:$0xff] %vm325_vm2, %v1345_v2 }
 0x254   :  { %v3311_v41 = vmax.f32 %v3303_v9, %v3307_v12  ;;  %v3223_v14 = vld [vmem:[#allocation3 + $0x2b0] sm:$0xff]  ;;  %2397 = vst.msk [vmem:[#allocation2 + $0x6f8] sm:$0xff] %vm325_vm2, %v2365_v8 }
 0x255   :  { %v3273_v47 = vpack.c.bf16 %v3269_v10, %v3269_v10  ;;  %v3227_v16 = vmax.f32 %v3219_v13, %v3223_v14  ;;  %v3349_v17 = vld [vmem:[#allocation3 + $0x370] sm:$0xff] }
 0x256   :  { %v3315_v18 = vpack.c.bf16 %v3311_v41, %v3311_v41  ;;  %v3353_v19 = vmax.f32 %v3345_v15, %v3349_v17 }
 0x257   :  { %4018 = vst.msk [vmem:[%s5580_s3 + $0xb8] sm:$0xf] %vm3085_vm3, %v3273_v47  ;;  %v3231_v22 = vpack.c.bf16 %v3227_v16, %v3227_v16 }
 0x258   :  { %4026 = vst.msk [vmem:[%s5580_s3 + $0xc8] sm:$0xf] %vm3085_vm3, %v3315_v18  ;;  %v3357_v23 = vpack.c.bf16 %v3353_v19, %v3353_v19  ;;  %v2588_v20 = vld [vmem:[#allocation2 + $0x5f0] ss:$2 sm:$0xff]  ;;  %v2812_v24 = vld [vmem:[#allocation2 + $0x5f1] ss:$2 sm:$0xff] }
 0x259   :  { %4010 = vst.msk [vmem:[%s5580_s3 + $0xa8] sm:$0xf] %vm3085_vm3, %v3231_v22  ;;  %v2940_v4 = vmax.f32 %v2588_v20, %v2812_v24  ;;  %v2604_v25 = vld [vmem:[#allocation2 + $0x670] ss:$2 sm:$0xff]  ;;  %v2828_v27 = vld [vmem:[#allocation2 + $0x671] ss:$2 sm:$0xff] }
 0x25a   :  { %4034 = vst.msk [vmem:[%s5580_s3 + $0xd8] sm:$0xf] %vm3085_vm3, %v3357_v23  ;;  %v2948_v11 = vmax.f32 %v2604_v25, %v2828_v27  ;;  %v2572_v28 = vld [vmem:[#allocation2 + $0x570] ss:$2 sm:$0xff]  ;;  %v2796_v29 = vld [vmem:[#allocation2 + $0x571] ss:$2 sm:$0xff] }
 0x25b   :  { %3052 = vst.msk [vmem:[#allocation3 + $0x2f8] sm:$0xff] %vm325_vm2, %v2940_v4  ;;  %v2932_v30 = vmax.f32 %v2572_v28, %v2796_v29  ;;  %v2620_v31 = vld [vmem:[#allocation2 + $0x6f0] ss:$2 sm:$0xff]  ;;  %v2844_v32 = vld [vmem:[#allocation2 + $0x6f1] ss:$2 sm:$0xff] }
 0x25c   :  { %3060 = vst.msk [vmem:[#allocation3 + $0x338] sm:$0xff] %vm325_vm2, %v2948_v11  ;;  %v2956_v33 = vmax.f32 %v2620_v31, %v2844_v32 }
 0x25d   :  { %3044 = vst.msk [vmem:[#allocation3 + $0x2b8] sm:$0xff] %vm325_vm2, %v2932_v30 }
 0x25e   :  { %3068 = vst.msk [vmem:[#allocation3 + $0x378] sm:$0xff] %vm325_vm2, %v2956_v33 }
 0x262   :  { %v3266_v35 = vld [vmem:[#allocation3 + $0x2f8] sm:$0xff] }
 0x263   :  { %v3270_v37 = vmax.f32 %v3262_v34, %v3266_v35  ;;  %v3308_v39 = vld [vmem:[#allocation3 + $0x338] sm:$0xff] }
 0x264   :  { %v3312_v42 = vmax.f32 %v3304_v36, %v3308_v39  ;;  %v3224_v43 = vld [vmem:[#allocation3 + $0x2b8] sm:$0xff] }
 0x265   :  { %v3274_v45 = vpack.c.bf16 %v3270_v37, %v3270_v37  ;;  %v3228_v46 = vmax.f32 %v3220_v40, %v3224_v43  ;;  %v3350_v48 = vld [vmem:[#allocation3 + $0x378] sm:$0xff] }
 0x266   :  { %v3316_v49 = vpack.c.bf16 %v3312_v42, %v3312_v42  ;;  %v3354_v26 = vmax.f32 %v3346_v44, %v3350_v48 }
 0x267   :  { %4019 = vst.msk [vmem:[%s5580_s3 + $0xbc] sm:$0x7] %vm3087_vm4, %v3274_v45  ;;  %v3232_v21 = vpack.c.bf16 %v3228_v46, %v3228_v46 }
 0x268   :  { %4027 = vst.msk [vmem:[%s5580_s3 + $0xcc] sm:$0x7] %vm3087_vm4, %v3316_v49  ;;  %v3358_v51 = vpack.c.bf16 %v3354_v26, %v3354_v26 }
 0x269   :  { %4011 = vst.msk [vmem:[%s5580_s3 + $0xac] sm:$0x7] %vm3087_vm4, %v3232_v21 }
 0x26a   :  { %4035 = vst.msk [vmem:[%s5580_s3 + $0xdc] sm:$0x7] %vm3087_vm4, %v3358_v51 }

// kernel: cnn_forward.5
= control target key start
LH: loop header
LB: loop body
LE: loop exit
PB: predicated region body
PF: predicated region fallthrough
CT: control target
= control target key end

     0   :  { %vm1687_vm0 = vcmask 523264   ;;  %s3656_s1 = inlined_call_operand.vmem [shape: bf16[3136,128], index: 1, kind: input, shape index: {}]   ;;  %s3657_s0 = inlined_call_operand.vmem [shape: bf16[8,3136], index: 0, kind: input, shape index: {}]   ;;  %s3658_s2 = inlined_call_operand.vmem [shape: f32[1,128], index: 2, kind: input, shape index: {}]   ;;  %s3659_s3 = inlined_call_operand.vmem [shape: f32[8,128], index: 3, kind: output, shape index: {}]  }
   0x1   :  { %v2813_v0 = vld [vmem:[%s3656_s1 + $0x38] sm:$0xff]  ;;  %v2812_v4 = vld [vmem:[%s3656_s1 + $0x30] sm:$0xff]  ;;  %v2811_v8 = vld [vmem:[%s3656_s1 + $0x28] sm:$0xff] }
   0x2   :  { %v2829_v1 = vld [vmem:[%s3656_s1 + $0xb8] sm:$0xff]  ;;  %1691 = vmatpush.bf16.msra.mxu0 %v2813_v0  ;;  %v2828_v5 = vld [vmem:[%s3656_s1 + $0xb0] sm:$0xff]  ;;  %v2827_v9 = vld [vmem:[%s3656_s1 + $0xa8] sm:$0xff] }
   0x3   :  { %v2821_v2 = vld [vmem:[%s3656_s1 + $0x78] sm:$0xff]  ;;  %1717 = vmatpush.bf16.msra.mxu2 %v2829_v1  ;;  %v2820_v6 = vld [vmem:[%s3656_s1 + $0x70] sm:$0xff]  ;;  %v2819_v10 = vld [vmem:[%s3656_s1 + $0x68] sm:$0xff] }
   0x4   :  { %v2837_v3 = vld [vmem:[%s3656_s1 + $0xf8] sm:$0xff]  ;;  %1704 = vmatpush.bf16.msra.mxu1 %v2821_v2  ;;  %v2836_v7 = vld [vmem:[%s3656_s1 + $0xf0] sm:$0xff]  ;;  %v2835_v11 = vld [vmem:[%s3656_s1 + $0xe8] sm:$0xff] }
   0x5   :  { %1730 = vmatpush.bf16.msra.mxu3 %v2837_v3  ;;  %v2810_v12 = vld [vmem:[%s3656_s1 + $0x20] sm:$0xff]  ;;  %v2809_v16 = vld [vmem:[%s3656_s1 + $0x18] sm:$0xff]  ;;  %v2808_v20 = vld [vmem:[%s3656_s1 + $0x10] sm:$0xff] }
   0x6   :  { %1692 = vmatpush.bf16.msra.mxu0 %v2812_v4  ;;  %v2826_v13 = vld [vmem:[%s3656_s1 + $0xa0] sm:$0xff]  ;;  %v2825_v17 = vld [vmem:[%s3656_s1 + $0x98] sm:$0xff]  ;;  %v2824_v21 = vld [vmem:[%s3656_s1 + $0x90] sm:$0xff] }
   0x7   :  { %1718 = vmatpush.bf16.msra.mxu2 %v2828_v5  ;;  %v2818_v14 = vld [vmem:[%s3656_s1 + $0x60] sm:$0xff]  ;;  %v2817_v18 = vld [vmem:[%s3656_s1 + $0x58] sm:$0xff]  ;;  %v2816_v22 = vld [vmem:[%s3656_s1 + $0x50] sm:$0xff] }
   0x8   :  { %1705 = vmatpush.bf16.msra.mxu1 %v2820_v6  ;;  %v2834_v15 = vld [vmem:[%s3656_s1 + $0xe0] sm:$0xff]  ;;  %v2833_v19 = vld [vmem:[%s3656_s1 + $0xd8] sm:$0xff]  ;;  %v2832_v23 = vld [vmem:[%s3656_s1 + $0xd0] sm:$0xff] }
   0x9   :  { %1731 = vmatpush.bf16.msra.mxu3 %v2836_v7  ;;  %v2807_v24 = vld [vmem:[%s3656_s1 + $0x8] sm:$0xff]  ;;  %v15_v29 = vld [vmem:[%s3657_s0] sm:$0xff]  ;;  %v2845_v34 = vld [vmem:[%s3656_s1 + $0x138] sm:$0xff] }
   0xa   :  { %1693 = vmatpush.bf16.msra.mxu0 %v2811_v8  ;;  %v2823_v25 = vld [vmem:[%s3656_s1 + $0x88] sm:$0xff]  ;;  %v2806_v30 = vld [vmem:[%s3656_s1] sm:$0xff]  ;;  %v437_v33 = vunpack.c.l.b16 %v15_v29  ;;  %v2861_v35 = vld [vmem:[%s3656_s1 + $0x1b8] sm:$0xff]  ;;  %v438_v39 = vunpack.c.h.b16 %v15_v29 }
   0xb   :  { %1719 = vmatpush.bf16.msra.mxu2 %v2827_v9  ;;  %v2815_v26 = vld [vmem:[%s3656_s1 + $0x48] sm:$0xff]  ;;  %v2822_v31 = vld [vmem:[%s3656_s1 + $0x80] sm:$0xff]  ;;  %v2853_v40 = vld [vmem:[%s3656_s1 + $0x178] sm:$0xff] }
   0xc   :  { %1706 = vmatpush.bf16.msra.mxu1 %v2819_v10  ;;  %v2831_v27 = vld [vmem:[%s3656_s1 + $0xc8] sm:$0xff]  ;;  %v2814_v36 = vld [vmem:[%s3656_s1 + $0x40] sm:$0xff]  ;;  %v2869_v41 = vld [vmem:[%s3656_s1 + $0x1f8] sm:$0xff]  ;;  %v462_v43 = vpack.c.b16 %v437_v33, %v437_v33  ;;  %v463_v47 = vpack.c.b16 %v438_v39, %v438_v39 }
   0xd   :  { %1732 = vmatpush.bf16.msra.mxu3 %v2835_v11  ;;  %v16_v28 = vld [vmem:[%s3657_s0 + $0x8] sm:$0xff]  ;;  %v2830_v37 = vld [vmem:[%s3656_s1 + $0xc0] sm:$0xff]  ;;  %v2844_v44 = vld [vmem:[%s3656_s1 + $0x130] sm:$0xff] }
   0xe   :  { %1694 = vmatpush.bf16.msra.mxu0 %v2810_v12  ;;  %v439_v32 = vunpack.c.l.b16 %v16_v28  ;;  %v440_v38 = vunpack.c.h.b16 %v16_v28  ;;  %v2860_v45 = vld [vmem:[%s3656_s1 + $0x1b0] sm:$0xff]  ;;  %v2843_v50 = vld [vmem:[%s3656_s1 + $0x128] sm:$0xff]  ;;  %v2842_v54 = vld [vmem:[%s3656_s1 + $0x120] sm:$0xff] }
   0xf   :  { %1720 = vmatpush.bf16.msra.mxu2 %v2826_v13  ;;  %v2852_v48 = vld [vmem:[%s3656_s1 + $0x170] sm:$0xff]  ;;  %v2859_v51 = vld [vmem:[%s3656_s1 + $0x1a8] sm:$0xff]  ;;  %v2858_v55 = vld [vmem:[%s3656_s1 + $0x1a0] sm:$0xff] }
  0x10   :  { %1707 = vmatpush.bf16.msra.mxu1 %v2818_v14  ;;  %v464_v42 = vpack.c.b16 %v439_v32, %v439_v32  ;;  %v465_v46 = vpack.c.b16 %v440_v38, %v440_v38  ;;  %v2868_v49 = vld [vmem:[%s3656_s1 + $0x1f0] sm:$0xff]  ;;  %v2851_v52 = vld [vmem:[%s3656_s1 + $0x168] sm:$0xff]  ;;  %v2850_v56 = vld [vmem:[%s3656_s1 + $0x160] sm:$0xff] }
  0x11   :  { %1733 = vmatpush.bf16.msra.mxu3 %v2834_v15  ;;  %v2867_v53 = vld [vmem:[%s3656_s1 + $0x1e8] sm:$0xff]  ;;  %v2866_v57 = vld [vmem:[%s3656_s1 + $0x1e0] sm:$0xff]  ;;  %v2841_v58 = vld [vmem:[%s3656_s1 + $0x118] sm:$0xff] }
  0x12   :  { %1695 = vmatpush.bf16.msra.mxu0 %v2809_v16  ;;  %v2857_v59 = vld [vmem:[%s3656_s1 + $0x198] sm:$0xff]  ;;  %v2840_v62 = vld [vmem:[%s3656_s1 + $0x110] sm:$0xff]  ;;  %v2839_v2 = vld [vmem:[%s3656_s1 + $0x108] sm:$0xff] }
  0x13   :  { %1721 = vmatpush.bf16.msra.mxu2 %v2825_v17  ;;  %v2849_v60 = vld [vmem:[%s3656_s1 + $0x158] sm:$0xff]  ;;  %v2856_v63 = vld [vmem:[%s3656_s1 + $0x190] sm:$0xff]  ;;  %v2855_v3 = vld [vmem:[%s3656_s1 + $0x188] sm:$0xff] }
  0x14   :  { %1708 = vmatpush.bf16.msra.mxu1 %v2817_v18  ;;  %v2865_v61 = vld [vmem:[%s3656_s1 + $0x1d8] sm:$0xff]  ;;  %v2848_v0 = vld [vmem:[%s3656_s1 + $0x150] sm:$0xff]  ;;  %v2847_v6 = vld [vmem:[%s3656_s1 + $0x148] sm:$0xff] }
  0x15   :  { %1734 = vmatpush.bf16.msra.mxu3 %v2833_v19  ;;  %v2864_v1 = vld [vmem:[%s3656_s1 + $0x1d0] sm:$0xff]  ;;  %v18_v4 = vld [vmem:[%s3657_s0 + $0x18] sm:$0xff]  ;;  %v2863_v7 = vld [vmem:[%s3656_s1 + $0x1c8] sm:$0xff] }
  0x16   :  { %1696 = vmatpush.bf16.msra.mxu0 %v2808_v20  ;;  %v17_v5 = vld [vmem:[%s3657_s0 + $0x10] sm:$0xff]  ;;  %v2838_v8 = vld [vmem:[%s3656_s1 + $0x100] sm:$0xff]  ;;  %v443_v10 = vunpack.c.l.b16 %v18_v4  ;;  %v2877_v12 = vld [vmem:[%s3656_s1 + $0x238] sm:$0xff]  ;;  %v444_v16 = vunpack.c.h.b16 %v18_v4 }
  0x17   :  { %1722 = vmatpush.bf16.msra.mxu2 %v2824_v21  ;;  %v2854_v9 = vld [vmem:[%s3656_s1 + $0x180] sm:$0xff]  ;;  %v441_v11 = vunpack.c.l.b16 %v17_v5  ;;  %v2893_v13 = vld [vmem:[%s3656_s1 + $0x2b8] sm:$0xff]  ;;  %v442_v17 = vunpack.c.h.b16 %v17_v5  ;;  %v2875_v28 = vld [vmem:[%s3656_s1 + $0x228] sm:$0xff] }
  0x18   :  { %1709 = vmatpush.bf16.msra.mxu1 %v2816_v22  ;;  %v2846_v14 = vld [vmem:[%s3656_s1 + $0x140] sm:$0xff]  ;;  %v2885_v18 = vld [vmem:[%s3656_s1 + $0x278] sm:$0xff]  ;;  %v468_v20 = vpack.c.b16 %v443_v10, %v443_v10  ;;  %v2876_v22 = vld [vmem:[%s3656_s1 + $0x230] sm:$0xff] }
  0x19   :  { %1735 = vmatpush.bf16.msra.mxu3 %v2832_v23  ;;  %v2862_v15 = vld [vmem:[%s3656_s1 + $0x1c0] sm:$0xff]  ;;  %v2901_v19 = vld [vmem:[%s3656_s1 + $0x2f8] sm:$0xff]  ;;  %v466_v21 = vpack.c.b16 %v441_v11, %v441_v11  ;;  %v2892_v23 = vld [vmem:[%s3656_s1 + $0x2b0] sm:$0xff] }
  0x1a   :  { %1697 = vmatpush.bf16.msra.mxu0 %v2807_v24  ;;  %v469_v24 = vpack.c.b16 %v444_v16, %v444_v16  ;;  %v2891_v29 = vld [vmem:[%s3656_s1 + $0x2a8] sm:$0xff]  ;;  %v2874_v32 = vld [vmem:[%s3656_s1 + $0x220] sm:$0xff]  ;;  %v2881_v38 = vld [vmem:[%s3656_s1 + $0x258] sm:$0xff] }
  0x1b   :  { %1723 = vmatpush.bf16.msra.mxu2 %v2823_v25  ;;  %v467_v25 = vpack.c.b16 %v442_v17, %v442_v17  ;;  %v2890_v33 = vld [vmem:[%s3656_s1 + $0x2a0] sm:$0xff]  ;;  %v2897_v39 = vld [vmem:[%s3656_s1 + $0x2d8] sm:$0xff]  ;;  %v2916_v4 = vld [vmem:[%s3656_s1 + $0x370] sm:$0xff] }
  0x1c   :  { %1710 = vmatpush.bf16.msra.mxu1 %v2815_v26  ;;  %v2884_v26 = vld [vmem:[%s3656_s1 + $0x270] sm:$0xff]  ;;  %v2906_v10 = vld [vmem:[%s3656_s1 + $0x320] sm:$0xff]  ;;  %v2913_v16 = vld [vmem:[%s3656_s1 + $0x358] sm:$0xff] }
  0x1d   :  { %1736 = vmatpush.bf16.msra.mxu3 %v2831_v27  ;;  %v2900_v27 = vld [vmem:[%s3656_s1 + $0x2f0] sm:$0xff]  ;;  %v2922_v11 = vld [vmem:[%s3656_s1 + $0x3a0] sm:$0xff]  ;;  %v2929_v17 = vld [vmem:[%s3656_s1 + $0x3d8] sm:$0xff] }
  0x1e   :  { %1698 = vmatpush.bf16.msra.mxu0 %v2806_v30  ;;  %v2883_v30 = vld [vmem:[%s3656_s1 + $0x268] sm:$0xff]  ;;  %v2932_v5 = vld [vmem:[%s3656_s1 + $0x3f0] sm:$0xff] }
  0x1f   :  { %1724 = vmatpush.bf16.msra.mxu2 %v2822_v31  ;;  %v2899_v31 = vld [vmem:[%s3656_s1 + $0x2e8] sm:$0xff] }
  0x20   :  { %1711 = vmatpush.bf16.msra.mxu1 %v2814_v36  ;;  %v2873_v36 = vld [vmem:[%s3656_s1 + $0x218] sm:$0xff] }
  0x21   :  { %1737 = vmatpush.bf16.msra.mxu3 %v2830_v37  ;;  %1699 = vmatmul.bf16.vlgmr.msra.gmra.mxu0 %v462_v43  ;;  %v2889_v37 = vld [vmem:[%s3656_s1 + $0x298] sm:$0xff]  ;;  %v2896_v43 = vld [vmem:[%s3656_s1 + $0x2d0] sm:$0xff] }
  0x22   :  { %1743 = vmatpush.bf16.msrb.mxu0 %v2845_v34  ;;  %1725 = vmatmul.bf16.vlgmr.msra.gmra.mxu2 %v464_v42  ;;  %v2882_v34 = vld [vmem:[%s3656_s1 + $0x260] sm:$0xff]  ;;  %v2880_v42 = vld [vmem:[%s3656_s1 + $0x250] sm:$0xff] }
  0x23   :  { %1769 = vmatpush.bf16.msrb.mxu2 %v2861_v35  ;;  %1712 = vmatmul.bf16.vlgmr.msra.gmra.mxu1 %v463_v47  ;;  %v2898_v35 = vld [vmem:[%s3656_s1 + $0x2e0] sm:$0xff]  ;;  %v20_v47 = vld [vmem:[%s3657_s0 + $0x28] sm:$0xff] }
  0x24   :  { %1756 = vmatpush.bf16.msrb.mxu1 %v2853_v40  ;;  %1738 = vmatmul.bf16.vlgmr.msra.gmra.mxu3 %v465_v46  ;;  %v2872_v40 = vld [vmem:[%s3656_s1 + $0x210] sm:$0xff]  ;;  %v19_v46 = vld [vmem:[%s3657_s0 + $0x20] sm:$0xff] }
  0x25   :  { %1782 = vmatpush.bf16.msrb.mxu3 %v2869_v41  ;;  %v2888_v41 = vld [vmem:[%s3656_s1 + $0x290] sm:$0xff] }
  0x26   :  { %1744 = vmatpush.bf16.msrb.mxu0 %v2844_v44  ;;  %v2871_v44 = vld [vmem:[%s3656_s1 + $0x208] sm:$0xff] }
  0x27   :  { %1770 = vmatpush.bf16.msrb.mxu2 %v2860_v45  ;;  %v2887_v45 = vld [vmem:[%s3656_s1 + $0x288] sm:$0xff] }
  0x28   :  { %1757 = vmatpush.bf16.msrb.mxu1 %v2852_v48  ;;  %v2879_v48 = vld [vmem:[%s3656_s1 + $0x248] sm:$0xff] }
  0x29   :  { %1783 = vmatpush.bf16.msrb.mxu3 %v2868_v49  ;;  %v2895_v49 = vld [vmem:[%s3656_s1 + $0x2c8] sm:$0xff] }
  0x2a   :  { %1745 = vmatpush.bf16.msrb.mxu0 %v2843_v50  ;;  %v445_v50 = vunpack.c.l.b16 %v19_v46 }
  0x2b   :  { %1771 = vmatpush.bf16.msrb.mxu2 %v2859_v51  ;;  %v447_v51 = vunpack.c.l.b16 %v20_v47 }
  0x2c   :  { %1758 = vmatpush.bf16.msrb.mxu1 %v2851_v52  ;;  %v2870_v52 = vld [vmem:[%s3656_s1 + $0x200] sm:$0xff] }
  0x2d   :  { %1784 = vmatpush.bf16.msrb.mxu3 %v2867_v53  ;;  %v2886_v53 = vld [vmem:[%s3656_s1 + $0x280] sm:$0xff] }
  0x2e   :  { %1746 = vmatpush.bf16.msrb.mxu0 %v2842_v54  ;;  %v2909_v54 = vld [vmem:[%s3656_s1 + $0x338] sm:$0xff] }
  0x2f   :  { %1772 = vmatpush.bf16.msrb.mxu2 %v2858_v55  ;;  %v2925_v55 = vld [vmem:[%s3656_s1 + $0x3b8] sm:$0xff] }
  0x30   :  { %1759 = vmatpush.bf16.msrb.mxu1 %v2850_v56  ;;  %v446_v56 = vunpack.c.h.b16 %v19_v46  ;;  %v2948_v46 = vld [vmem:[%s3656_s1 + $0x470] sm:$0xff] }
  0x31   :  { %1785 = vmatpush.bf16.msrb.mxu3 %v2866_v57  ;;  %v448_v57 = vunpack.c.h.b16 %v20_v47  ;;  %v2964_v47 = vld [vmem:[%s3656_s1 + $0x4f0] sm:$0xff] }
  0x32   :  { %1747 = vmatpush.bf16.msrb.mxu0 %v2841_v58  ;;  %v2878_v58 = vld [vmem:[%s3656_s1 + $0x240] sm:$0xff] }
  0x33   :  { %1773 = vmatpush.bf16.msrb.mxu2 %v2857_v59  ;;  %v2894_v59 = vld [vmem:[%s3656_s1 + $0x2c0] sm:$0xff] }
  0x34   :  { %1760 = vmatpush.bf16.msrb.mxu1 %v2849_v60  ;;  %v470_v60 = vpack.c.b16 %v445_v50, %v445_v50  ;;  %v2947_v50 = vld [vmem:[%s3656_s1 + $0x468] sm:$0xff] }
  0x35   :  { %1786 = vmatpush.bf16.msrb.mxu3 %v2865_v61  ;;  %v472_v61 = vpack.c.b16 %v447_v51, %v447_v51  ;;  %v2963_v51 = vld [vmem:[%s3656_s1 + $0x4e8] sm:$0xff] }
  0x36   :  { %1748 = vmatpush.bf16.msrb.mxu0 %v2840_v62  ;;  %v2917_v62 = vld [vmem:[%s3656_s1 + $0x378] sm:$0xff] }
  0x37   :  { %1774 = vmatpush.bf16.msrb.mxu2 %v2856_v63  ;;  %v2933_v63 = vld [vmem:[%s3656_s1 + $0x3f8] sm:$0xff] }
  0x38   :  { %1761 = vmatpush.bf16.msrb.mxu1 %v2848_v0  ;;  %v471_v0 = vpack.c.b16 %v446_v56, %v446_v56  ;;  %v2937_v56 = vld [vmem:[%s3656_s1 + $0x418] sm:$0xff] }
  0x39   :  { %1787 = vmatpush.bf16.msrb.mxu3 %v2864_v1  ;;  %v473_v1 = vpack.c.b16 %v448_v57, %v448_v57  ;;  %v2953_v57 = vld [vmem:[%s3656_s1 + $0x498] sm:$0xff] }
  0x3a   :  { %1749 = vmatpush.bf16.msrb.mxu0 %v2839_v2  ;;  %v2908_v2 = vld [vmem:[%s3656_s1 + $0x330] sm:$0xff] }
  0x3b   :  { %1775 = vmatpush.bf16.msrb.mxu2 %v2855_v3  ;;  %v2924_v3 = vld [vmem:[%s3656_s1 + $0x3b0] sm:$0xff] }
  0x3c   :  { %1762 = vmatpush.bf16.msrb.mxu1 %v2847_v6  ;;  %v2907_v6 = vld [vmem:[%s3656_s1 + $0x328] sm:$0xff] }
  0x3d   :  { %1788 = vmatpush.bf16.msrb.mxu3 %v2863_v7  ;;  %v2923_v7 = vld [vmem:[%s3656_s1 + $0x3a8] sm:$0xff] }
  0x3e   :  { %1750 = vmatpush.bf16.msrb.mxu0 %v2838_v8  ;;  %v2915_v8 = vld [vmem:[%s3656_s1 + $0x368] sm:$0xff] }
  0x3f   :  { %1776 = vmatpush.bf16.msrb.mxu2 %v2854_v9  ;;  %v2931_v9 = vld [vmem:[%s3656_s1 + $0x3e8] sm:$0xff] }
  0x40   :  { %1763 = vmatpush.bf16.msrb.mxu1 %v2846_v14  ;;  %v2905_v14 = vld [vmem:[%s3656_s1 + $0x318] sm:$0xff] }
  0x41   :  { %1789 = vmatpush.bf16.msrb.mxu3 %v2862_v15  ;;  %1751 = vmatmul.bf16.vlgmr.msrb.gmra.mxu0 %v466_v21  ;;  %v2921_v15 = vld [vmem:[%s3656_s1 + $0x398] sm:$0xff]  ;;  %v2928_v21 = vld [vmem:[%s3656_s1 + $0x3d0] sm:$0xff] }
  0x42   :  { %1795 = vmatpush.bf16.msra.mxu0 %v2877_v12  ;;  %1777 = vmatmul.bf16.vlgmr.msrb.gmra.mxu2 %v468_v20  ;;  %v2914_v12 = vld [vmem:[%s3656_s1 + $0x360] sm:$0xff]  ;;  %v2912_v20 = vld [vmem:[%s3656_s1 + $0x350] sm:$0xff] }
  0x43   :  { %1821 = vmatpush.bf16.msra.mxu2 %v2893_v13  ;;  %1764 = vmatmul.bf16.vlgmr.msrb.gmra.mxu1 %v467_v25  ;;  %v2930_v13 = vld [vmem:[%s3656_s1 + $0x3e0] sm:$0xff]  ;;  %v22_v25 = vld [vmem:[%s3657_s0 + $0x38] sm:$0xff] }
  0x44   :  { %1808 = vmatpush.bf16.msra.mxu1 %v2885_v18  ;;  %1790 = vmatmul.bf16.vlgmr.msrb.gmra.mxu3 %v469_v24  ;;  %v2904_v18 = vld [vmem:[%s3656_s1 + $0x310] sm:$0xff] }
  0x45   :  { %1834 = vmatpush.bf16.msra.mxu3 %v2901_v19  ;;  %v2920_v19 = vld [vmem:[%s3656_s1 + $0x390] sm:$0xff] }
  0x46   :  { %1796 = vmatpush.bf16.msra.mxu0 %v2876_v22  ;;  %v2903_v22 = vld [vmem:[%s3656_s1 + $0x308] sm:$0xff]  ;;  %v21_v24 = vld [vmem:[%s3657_s0 + $0x30] sm:$0xff] }
  0x47   :  { %1822 = vmatpush.bf16.msra.mxu2 %v2892_v23  ;;  %v2919_v23 = vld [vmem:[%s3656_s1 + $0x388] sm:$0xff] }
  0x48   :  { %1809 = vmatpush.bf16.msra.mxu1 %v2884_v26  ;;  %v2911_v26 = vld [vmem:[%s3656_s1 + $0x348] sm:$0xff] }
  0x49   :  { %1835 = vmatpush.bf16.msra.mxu3 %v2900_v27  ;;  %v2927_v27 = vld [vmem:[%s3656_s1 + $0x3c8] sm:$0xff] }
  0x4a   :  { %1797 = vmatpush.bf16.msra.mxu0 %v2875_v28  ;;  %v449_v28 = vunpack.c.l.b16 %v21_v24 }
  0x4b   :  { %1823 = vmatpush.bf16.msra.mxu2 %v2891_v29  ;;  %v451_v29 = vunpack.c.l.b16 %v22_v25 }
  0x4c   :  { %1810 = vmatpush.bf16.msra.mxu1 %v2883_v30  ;;  %v2902_v30 = vld [vmem:[%s3656_s1 + $0x300] sm:$0xff] }
  0x4d   :  { %1836 = vmatpush.bf16.msra.mxu3 %v2899_v31  ;;  %v2918_v31 = vld [vmem:[%s3656_s1 + $0x380] sm:$0xff] }
  0x4e   :  { %1798 = vmatpush.bf16.msra.mxu0 %v2874_v32  ;;  %v2941_v32 = vld [vmem:[%s3656_s1 + $0x438] sm:$0xff] }
  0x4f   :  { %1824 = vmatpush.bf16.msra.mxu2 %v2890_v33  ;;  %v2957_v33 = vld [vmem:[%s3656_s1 + $0x4b8] sm:$0xff] }
  0x50   :  { %1811 = vmatpush.bf16.msra.mxu1 %v2882_v34  ;;  %v450_v34 = vunpack.c.h.b16 %v21_v24  ;;  %v2980_v24 = vld [vmem:[%s3656_s1 + $0x570] sm:$0xff] }
  0x51   :  { %1837 = vmatpush.bf16.msra.mxu3 %v2898_v35  ;;  %v452_v35 = vunpack.c.h.b16 %v22_v25  ;;  %v2996_v25 = vld [vmem:[%s3656_s1 + $0x5f0] sm:$0xff] }
  0x52   :  { %1799 = vmatpush.bf16.msra.mxu0 %v2873_v36  ;;  %v2910_v36 = vld [vmem:[%s3656_s1 + $0x340] sm:$0xff] }
  0x53   :  { %1825 = vmatpush.bf16.msra.mxu2 %v2889_v37  ;;  %v2926_v37 = vld [vmem:[%s3656_s1 + $0x3c0] sm:$0xff] }
  0x54   :  { %1812 = vmatpush.bf16.msra.mxu1 %v2881_v38  ;;  %v474_v38 = vpack.c.b16 %v449_v28, %v449_v28  ;;  %v2979_v28 = vld [vmem:[%s3656_s1 + $0x568] sm:$0xff] }
  0x55   :  { %1838 = vmatpush.bf16.msra.mxu3 %v2897_v39  ;;  %v476_v39 = vpack.c.b16 %v451_v29, %v451_v29  ;;  %v2995_v29 = vld [vmem:[%s3656_s1 + $0x5e8] sm:$0xff] }
  0x56   :  { %1800 = vmatpush.bf16.msra.mxu0 %v2872_v40  ;;  %v2949_v40 = vld [vmem:[%s3656_s1 + $0x478] sm:$0xff] }
  0x57   :  { %1826 = vmatpush.bf16.msra.mxu2 %v2888_v41  ;;  %v2965_v41 = vld [vmem:[%s3656_s1 + $0x4f8] sm:$0xff] }
  0x58   :  { %1813 = vmatpush.bf16.msra.mxu1 %v2880_v42  ;;  %v475_v42 = vpack.c.b16 %v450_v34, %v450_v34  ;;  %v2978_v34 = vld [vmem:[%s3656_s1 + $0x560] sm:$0xff] }
  0x59   :  { %1839 = vmatpush.bf16.msra.mxu3 %v2896_v43  ;;  %v477_v43 = vpack.c.b16 %v452_v35, %v452_v35  ;;  %v2994_v35 = vld [vmem:[%s3656_s1 + $0x5e0] sm:$0xff] }
  0x5a   :  { %1801 = vmatpush.bf16.msra.mxu0 %v2871_v44  ;;  %v2940_v44 = vld [vmem:[%s3656_s1 + $0x430] sm:$0xff] }
  0x5b   :  { %1827 = vmatpush.bf16.msra.mxu2 %v2887_v45  ;;  %v2956_v45 = vld [vmem:[%s3656_s1 + $0x4b0] sm:$0xff] }
  0x5c   :  { %1814 = vmatpush.bf16.msra.mxu1 %v2879_v48  ;;  %v2939_v48 = vld [vmem:[%s3656_s1 + $0x428] sm:$0xff] }
  0x5d   :  { %1840 = vmatpush.bf16.msra.mxu3 %v2895_v49  ;;  %v2955_v49 = vld [vmem:[%s3656_s1 + $0x4a8] sm:$0xff] }
  0x5e   :  { %1802 = vmatpush.bf16.msra.mxu0 %v2870_v52  ;;  %v2938_v52 = vld [vmem:[%s3656_s1 + $0x420] sm:$0xff] }
  0x5f   :  { %1828 = vmatpush.bf16.msra.mxu2 %v2886_v53  ;;  %v2954_v53 = vld [vmem:[%s3656_s1 + $0x4a0] sm:$0xff] }
  0x60   :  { %1815 = vmatpush.bf16.msra.mxu1 %v2878_v58  ;;  %v2945_v58 = vld [vmem:[%s3656_s1 + $0x458] sm:$0xff] }
  0x61   :  { %1841 = vmatpush.bf16.msra.mxu3 %v2894_v59  ;;  %1803 = vmatmul.bf16.vlgmr.msra.gmra.mxu0 %v470_v60  ;;  %v2961_v59 = vld [vmem:[%s3656_s1 + $0x4d8] sm:$0xff]  ;;  %v2936_v60 = vld [vmem:[%s3656_s1 + $0x410] sm:$0xff] }
  0x62   :  { %1847 = vmatpush.bf16.msrb.mxu0 %v2909_v54  ;;  %1829 = vmatmul.bf16.vlgmr.msra.gmra.mxu2 %v472_v61  ;;  %v2946_v54 = vld [vmem:[%s3656_s1 + $0x460] sm:$0xff]  ;;  %v2952_v61 = vld [vmem:[%s3656_s1 + $0x490] sm:$0xff] }
  0x63   :  { %1873 = vmatpush.bf16.msrb.mxu2 %v2925_v55  ;;  %1816 = vmatmul.bf16.vlgmr.msra.gmra.mxu1 %v471_v0  ;;  %v2962_v55 = vld [vmem:[%s3656_s1 + $0x4e0] sm:$0xff]  ;;  %v2935_v0 = vld [vmem:[%s3656_s1 + $0x408] sm:$0xff] }
  0x64   :  { %1860 = vmatpush.bf16.msrb.mxu1 %v2917_v62  ;;  %1842 = vmatmul.bf16.vlgmr.msra.gmra.mxu3 %v473_v1  ;;  %v2944_v62 = vld [vmem:[%s3656_s1 + $0x450] sm:$0xff]  ;;  %v2951_v1 = vld [vmem:[%s3656_s1 + $0x488] sm:$0xff] }
  0x65   :  { %1886 = vmatpush.bf16.msrb.mxu3 %v2933_v63  ;;  %v2960_v63 = vld [vmem:[%s3656_s1 + $0x4d0] sm:$0xff] }
  0x66   :  { %1848 = vmatpush.bf16.msrb.mxu0 %v2908_v2  ;;  %v23_v2 = vld [vmem:[%s3657_s0 + $0x40] sm:$0xff] }
  0x67   :  { %1874 = vmatpush.bf16.msrb.mxu2 %v2924_v3  ;;  %v24_v3 = vld [vmem:[%s3657_s0 + $0x48] sm:$0xff] }
  0x68   :  { %1861 = vmatpush.bf16.msrb.mxu1 %v2916_v4  ;;  %v2943_v4 = vld [vmem:[%s3656_s1 + $0x448] sm:$0xff] }
  0x69   :  { %1887 = vmatpush.bf16.msrb.mxu3 %v2932_v5  ;;  %v2959_v5 = vld [vmem:[%s3656_s1 + $0x4c8] sm:$0xff] }
  0x6a   :  { %1849 = vmatpush.bf16.msrb.mxu0 %v2907_v6  ;;  %v453_v6 = vunpack.c.l.b16 %v23_v2 }
  0x6b   :  { %1875 = vmatpush.bf16.msrb.mxu2 %v2923_v7  ;;  %v455_v7 = vunpack.c.l.b16 %v24_v3 }
  0x6c   :  { %1862 = vmatpush.bf16.msrb.mxu1 %v2915_v8  ;;  %v2934_v8 = vld [vmem:[%s3656_s1 + $0x400] sm:$0xff] }
  0x6d   :  { %1888 = vmatpush.bf16.msrb.mxu3 %v2931_v9  ;;  %v2950_v9 = vld [vmem:[%s3656_s1 + $0x480] sm:$0xff] }
  0x6e   :  { %1850 = vmatpush.bf16.msrb.mxu0 %v2906_v10  ;;  %v2973_v10 = vld [vmem:[%s3656_s1 + $0x538] sm:$0xff] }
  0x6f   :  { %1876 = vmatpush.bf16.msrb.mxu2 %v2922_v11  ;;  %v2989_v11 = vld [vmem:[%s3656_s1 + $0x5b8] sm:$0xff] }
  0x70   :  { %1863 = vmatpush.bf16.msrb.mxu1 %v2914_v12  ;;  %v454_v12 = vunpack.c.h.b16 %v23_v2 }
  0x71   :  { %1889 = vmatpush.bf16.msrb.mxu3 %v2930_v13  ;;  %v456_v13 = vunpack.c.h.b16 %v24_v3 }
  0x72   :  { %1851 = vmatpush.bf16.msrb.mxu0 %v2905_v14  ;;  %v2942_v14 = vld [vmem:[%s3656_s1 + $0x440] sm:$0xff] }
  0x73   :  { %1877 = vmatpush.bf16.msrb.mxu2 %v2921_v15  ;;  %v2958_v15 = vld [vmem:[%s3656_s1 + $0x4c0] sm:$0xff] }
  0x74   :  { %1864 = vmatpush.bf16.msrb.mxu1 %v2913_v16  ;;  %v478_v16 = vpack.c.b16 %v453_v6, %v453_v6 }
  0x75   :  { %1890 = vmatpush.bf16.msrb.mxu3 %v2929_v17  ;;  %v480_v17 = vpack.c.b16 %v455_v7, %v455_v7 }
  0x76   :  { %1852 = vmatpush.bf16.msrb.mxu0 %v2904_v18  ;;  %v2981_v18 = vld [vmem:[%s3656_s1 + $0x578] sm:$0xff] }
  0x77   :  { %1878 = vmatpush.bf16.msrb.mxu2 %v2920_v19  ;;  %v2997_v19 = vld [vmem:[%s3656_s1 + $0x5f8] sm:$0xff] }
  0x78   :  { %1865 = vmatpush.bf16.msrb.mxu1 %v2912_v20  ;;  %v479_v20 = vpack.c.b16 %v454_v12, %v454_v12  ;;  %v27_v12 = vld [vmem:[%s3657_s0 + $0x60] sm:$0xf] }
  0x79   :  { %1891 = vmatpush.bf16.msrb.mxu3 %v2928_v21  ;;  %v481_v21 = vpack.c.b16 %v456_v13, %v456_v13  ;;  %v2998_v13 = vld [vmem:[%s3656_s1 + $0x600] sm:$0xff] }
  0x7a   :  { %1853 = vmatpush.bf16.msrb.mxu0 %v2903_v22  ;;  %v2972_v22 = vld [vmem:[%s3656_s1 + $0x530] sm:$0xff] }
  0x7b   :  { %1879 = vmatpush.bf16.msrb.mxu2 %v2919_v23  ;;  %v2988_v23 = vld [vmem:[%s3656_s1 + $0x5b0] sm:$0xff] }
  0x7c   :  { %1866 = vmatpush.bf16.msrb.mxu1 %v2911_v26  ;;  %v2971_v26 = vld [vmem:[%s3656_s1 + $0x528] sm:$0xff] }
  0x7d   :  { %1892 = vmatpush.bf16.msrb.mxu3 %v2927_v27  ;;  %v2987_v27 = vld [vmem:[%s3656_s1 + $0x5a8] sm:$0xff] }
  0x7e   :  { %1854 = vmatpush.bf16.msrb.mxu0 %v2902_v30  ;;  %v3002_v30 = vld [vmem:[%s3658_s2] ss:$0 sm:$0xff] }
  0x7f   :  { %1880 = vmatpush.bf16.msrb.mxu2 %v2918_v31  ;;  %v2970_v31 = vld [vmem:[%s3656_s1 + $0x520] sm:$0xff] }
  0x80   :  { %1867 = vmatpush.bf16.msrb.mxu1 %v2910_v36 }
  0x81   :  { %1893 = vmatpush.bf16.msrb.mxu3 %v2926_v37  ;;  %1855 = vmatmul.bf16.vlgmr.msrb.gmra.mxu0 %v474_v38  ;;  %v2969_v38 = vld [vmem:[%s3656_s1 + $0x518] sm:$0xff] }
  0x82   :  { %1899 = vmatpush.bf16.msra.mxu0 %v2941_v32  ;;  %1881 = vmatmul.bf16.vlgmr.msrb.gmra.mxu2 %v476_v39  ;;  %v2986_v32 = vld [vmem:[%s3656_s1 + $0x5a0] sm:$0xff]  ;;  %v2985_v39 = vld [vmem:[%s3656_s1 + $0x598] sm:$0xff] }
  0x83   :  { %1925 = vmatpush.bf16.msra.mxu2 %v2957_v33  ;;  %1868 = vmatmul.bf16.vlgmr.msrb.gmra.mxu1 %v475_v42  ;;  %v2993_v42 = vld [vmem:[%s3656_s1 + $0x5d8] sm:$0xff] }
  0x84   :  { %1912 = vmatpush.bf16.msra.mxu1 %v2949_v40  ;;  %1894 = vmatmul.bf16.vlgmr.msrb.gmra.mxu3 %v477_v43 }
  0x85   :  { %1938 = vmatpush.bf16.msra.mxu3 %v2965_v41  ;;  %v2977_v41 = vld [vmem:[%s3656_s1 + $0x558] sm:$0xff] }
  0x86   :  { %1900 = vmatpush.bf16.msra.mxu0 %v2940_v44  ;;  %v2968_v44 = vld [vmem:[%s3656_s1 + $0x510] sm:$0xff] }
  0x87   :  { %1926 = vmatpush.bf16.msra.mxu2 %v2956_v45  ;;  %v2984_v45 = vld [vmem:[%s3656_s1 + $0x590] sm:$0xff] }
  0x88   :  { %1913 = vmatpush.bf16.msra.mxu1 %v2948_v46 }
  0x89   :  { %1939 = vmatpush.bf16.msra.mxu3 %v2964_v47 }
  0x8a   :  { %1901 = vmatpush.bf16.msra.mxu0 %v2939_v48 }
  0x8b   :  { %1927 = vmatpush.bf16.msra.mxu2 %v2955_v49  ;;  %v2976_v49 = vld [vmem:[%s3656_s1 + $0x550] sm:$0xff] }
  0x8c   :  { %1914 = vmatpush.bf16.msra.mxu1 %v2947_v50  ;;  %v2992_v50 = vld [vmem:[%s3656_s1 + $0x5d0] sm:$0xff] }
  0x8d   :  { %1940 = vmatpush.bf16.msra.mxu3 %v2963_v51 }
  0x8e   :  { %1902 = vmatpush.bf16.msra.mxu0 %v2938_v52  ;;  %v2967_v52 = vld [vmem:[%s3656_s1 + $0x508] sm:$0xff] }
  0x8f   :  { %1928 = vmatpush.bf16.msra.mxu2 %v2954_v53 }
  0x90   :  { %1915 = vmatpush.bf16.msra.mxu1 %v2946_v54  ;;  %v2983_v54 = vld [vmem:[%s3656_s1 + $0x588] sm:$0xff] }
  0x91   :  { %1941 = vmatpush.bf16.msra.mxu3 %v2962_v55  ;;  %v25_v55 = vld [vmem:[%s3657_s0 + $0x50] sm:$0xff] }
  0x92   :  { %1903 = vmatpush.bf16.msra.mxu0 %v2937_v56  ;;  %v26_v56 = vld [vmem:[%s3657_s0 + $0x58] sm:$0xff] }
  0x93   :  { %1929 = vmatpush.bf16.msra.mxu2 %v2953_v57  ;;  %v2975_v57 = vld [vmem:[%s3656_s1 + $0x548] sm:$0xff]  ;;  %v460_v2 = vunpack.c.h.b16 %v26_v56 }
  0x94   :  { %1916 = vmatpush.bf16.msra.mxu1 %v2945_v58  ;;  %v2991_v58 = vld [vmem:[%s3656_s1 + $0x5c8] sm:$0xff] }
  0x95   :  { %1942 = vmatpush.bf16.msra.mxu3 %v2961_v59  ;;  %v457_v59 = vunpack.c.l.b16 %v25_v55 }
  0x96   :  { %1904 = vmatpush.bf16.msra.mxu0 %v2936_v60  ;;  %v459_v60 = vunpack.c.l.b16 %v26_v56 }
  0x97   :  { %1930 = vmatpush.bf16.msra.mxu2 %v2952_v61  ;;  %v482_v6 = vpack.c.b16 %v457_v59, %v457_v59 }
  0x98   :  { %1917 = vmatpush.bf16.msra.mxu1 %v2944_v62  ;;  %v2966_v62 = vld [vmem:[%s3656_s1 + $0x500] sm:$0xff]  ;;  %v484_v7 = vpack.c.b16 %v459_v60, %v459_v60 }
  0x99   :  { %1943 = vmatpush.bf16.msra.mxu3 %v2960_v63  ;;  %v2982_v63 = vld [vmem:[%s3656_s1 + $0x580] sm:$0xff] }
  0x9a   :  { %1905 = vmatpush.bf16.msra.mxu0 %v2935_v0  ;;  %v3001_v0 = vld [vmem:[%s3656_s1 + $0x618] sm:$0xff] }
  0x9b   :  { %1931 = vmatpush.bf16.msra.mxu2 %v2951_v1  ;;  %v458_v1 = vunpack.c.h.b16 %v25_v55 }
  0x9c   :  { %1918 = vmatpush.bf16.msra.mxu1 %v2943_v4  ;;  %v2974_v4 = vld [vmem:[%s3656_s1 + $0x540] sm:$0xff] }
  0x9d   :  { %1944 = vmatpush.bf16.msra.mxu3 %v2959_v5  ;;  %v2990_v5 = vld [vmem:[%s3656_s1 + $0x5c0] sm:$0xff] }
  0x9e   :  { %1906 = vmatpush.bf16.msra.mxu0 %v2934_v8  ;;  %v1700_v33 = vpop.f32.mrf.mxu0  ;;  %v483_v8 = vpack.c.b16 %v458_v1, %v458_v1 }
  0x9f   :  { %1932 = vmatpush.bf16.msra.mxu2 %v2950_v9  ;;  %v1701_v36 = vadd.f32 %v3002_v30, %v1700_v33  ;;  %v485_v9 = vpack.c.b16 %v460_v2, %v460_v2 }
  0xa0   :  { %1919 = vmatpush.bf16.msra.mxu1 %v2942_v14  ;;  %v1713_v37 = vpop.f32.mrf.mxu1 }
  0xa1   :  { %1945 = vmatpush.bf16.msra.mxu3 %v2958_v15  ;;  %1907 = vmatmul.bf16.vlgmr.msra.gmra.mxu0 %v478_v16  ;;  %v1714_v40 = vadd.f32 %v1713_v37, %v1701_v36  ;;  %v461_v16 = vunpack.c.l.b16 %v27_v12 }
  0xa2   :  { %1951 = vmatpush.bf16.msrb.mxu0 %v2973_v10  ;;  %1933 = vmatmul.bf16.vlgmr.msra.gmra.mxu2 %v480_v17  ;;  %v3000_v10 = vld [vmem:[%s3656_s1 + $0x610] sm:$0xff] }
  0xa3   :  { %1977 = vmatpush.bf16.msrb.mxu2 %v2989_v11  ;;  %1920 = vmatmul.bf16.vlgmr.msra.gmra.mxu1 %v479_v20  ;;  %v2999_v11 = vld [vmem:[%s3656_s1 + $0x608] sm:$0xff] }
  0xa4   :  { %1964 = vmatpush.bf16.msrb.mxu1 %v2981_v18  ;;  %1946 = vmatmul.bf16.vlgmr.msra.gmra.mxu3 %v481_v21 }
  0xa5   :  { %1990 = vmatpush.bf16.msrb.mxu3 %v2997_v19  ;;  %v1726_v43 = vpop.f32.mrf.mxu2  ;;  %v486_v19 = vpack.c.b16 %v461_v16, %v461_v16 }
  0xa6   :  { %1952 = vmatpush.bf16.msrb.mxu0 %v2972_v22  ;;  %v1727_v46 = vadd.f32 %v1726_v43, %v1714_v40  ;;  %v1702_v48 = vpop.f32.mrf.mxu0 }
  0xa7   :  { %1978 = vmatpush.bf16.msrb.mxu2 %v2988_v23  ;;  %v1739_v47 = vpop.f32.mrf.mxu3 }
  0xa8   :  { %1965 = vmatpush.bf16.msrb.mxu1 %v2980_v24  ;;  %v1740_v51 = vadd.f32 %v1739_v47, %v1727_v46  ;;  %v1715_v53 = vpop.f32.mrf.mxu1 }
  0xa9   :  { %1991 = vmatpush.bf16.msrb.mxu3 %v2996_v25 }
  0xaa   :  { %1953 = vmatpush.bf16.msrb.mxu0 %v2971_v26 }
  0xab   :  { %1979 = vmatpush.bf16.msrb.mxu2 %v2987_v27 }
  0xac   :  { %1966 = vmatpush.bf16.msrb.mxu1 %v2979_v28 }
  0xad   :  { %1992 = vmatpush.bf16.msrb.mxu3 %v2995_v29  ;;  %v1728_v61 = vpop.f32.mrf.mxu2 }
  0xae   :  { %1954 = vmatpush.bf16.msrb.mxu0 %v2970_v31 }
  0xaf   :  { %1980 = vmatpush.bf16.msrb.mxu2 %v2986_v32  ;;  %v1741_v3 = vpop.f32.mrf.mxu3 }
  0xb0   :  { %1967 = vmatpush.bf16.msrb.mxu1 %v2978_v34 }
  0xb1   :  { %1993 = vmatpush.bf16.msrb.mxu3 %v2994_v35 }
  0xb2   :  { %1955 = vmatpush.bf16.msrb.mxu0 %v2969_v38 }
  0xb3   :  { %1981 = vmatpush.bf16.msrb.mxu2 %v2985_v39 }
  0xb4   :  { %1968 = vmatpush.bf16.msrb.mxu1 %v2977_v41 }
  0xb5   :  { %1994 = vmatpush.bf16.msrb.mxu3 %v2993_v42 }
  0xb6   :  { %1956 = vmatpush.bf16.msrb.mxu0 %v2968_v44 }
  0xb7   :  { %1982 = vmatpush.bf16.msrb.mxu2 %v2984_v45 }
  0xb8   :  { %1969 = vmatpush.bf16.msrb.mxu1 %v2976_v49 }
  0xb9   :  { %1995 = vmatpush.bf16.msrb.mxu3 %v2992_v50 }
  0xba   :  { %1957 = vmatpush.bf16.msrb.mxu0 %v2967_v52 }
  0xbb   :  { %1983 = vmatpush.bf16.msrb.mxu2 %v2983_v54 }
  0xbc   :  { %1970 = vmatpush.bf16.msrb.mxu1 %v2975_v57 }
  0xbd   :  { %1996 = vmatpush.bf16.msrb.mxu3 %v2991_v58 }
  0xbe   :  { %1958 = vmatpush.bf16.msrb.mxu0 %v2966_v62  ;;  %v1752_v14 = vpop.f32.mrf.mxu0 }
  0xbf   :  { %1984 = vmatpush.bf16.msrb.mxu2 %v2982_v63  ;;  %v1753_v15 = vadd.f32 %v1752_v14, %v1740_v51 }
  0xc0   :  { %1971 = vmatpush.bf16.msrb.mxu1 %v2974_v4  ;;  %v1765_v17 = vpop.f32.mrf.mxu1 }
  0xc1   :  { %1997 = vmatpush.bf16.msrb.mxu3 %v2990_v5  ;;  %1959 = vmatmul.bf16.vlgmr.msrb.gmra.mxu0 %v482_v6  ;;  %v1766_v18 = vadd.f32 %v1765_v17, %v1753_v15 }
  0xc2   :  { %2007 = vmatpush.bf16.msra.mxu0 %v3001_v0  ;;  %1985 = vmatmul.bf16.vlgmr.msrb.gmra.mxu2 %v484_v7 }
  0xc3   :  { %1972 = vmatmul.bf16.vlgmr.msrb.gmra.mxu1 %v483_v8 }
  0xc4   :  { %1998 = vmatmul.bf16.vlgmr.msrb.gmra.mxu3 %v485_v9 }
  0xc5   :  { %v1778_v20 = vpop.f32.mrf.mxu2 }
  0xc6   :  { %2008 = vmatpush.bf16.msra.mxu0 %v3000_v10  ;;  %v1779_v21 = vadd.f32 %v1778_v20, %v1766_v18  ;;  %v1754_v23 = vpop.f32.mrf.mxu0 }
  0xc7   :  { %v1791_v22 = vpop.f32.mrf.mxu3 }
  0xc8   :  { %v1792_v24 = vadd.f32 %v1791_v22, %v1779_v21  ;;  %v1767_v25 = vpop.f32.mrf.mxu1 }
  0xca   :  { %2009 = vmatpush.bf16.msra.mxu0 %v2999_v11 }
  0xcd   :  { %v1780_v26 = vpop.f32.mrf.mxu2 }
  0xce   :  { %2010 = vmatpush.bf16.msra.mxu0 %v2998_v13 }
  0xcf   :  { %v1793_v27 = vpop.f32.mrf.mxu3 }
  0xd1   :  { %2805 = vmatmul.msk.bf16.vlgmr.msra.gmra.mxu0 %vm1687_vm0, %v486_v19 }
  0xde   :  { %v1804_v28 = vpop.f32.mrf.mxu0 }
  0xdf   :  { %v1805_v29 = vadd.f32 %v1804_v28, %v1792_v24 }
  0xe0   :  { %v1817_v30 = vpop.f32.mrf.mxu1 }
  0xe1   :  { %v1818_v31 = vadd.f32 %v1817_v30, %v1805_v29 }
  0xe5   :  { %v1830_v32 = vpop.f32.mrf.mxu2 }
  0xe6   :  { %v1831_v33 = vadd.f32 %v1830_v32, %v1818_v31  ;;  %v1806_v35 = vpop.f32.mrf.mxu0 }
  0xe7   :  { %v1843_v34 = vpop.f32.mrf.mxu3 }
  0xe8   :  { %v1844_v36 = vadd.f32 %v1843_v34, %v1831_v33  ;;  %v1819_v37 = vpop.f32.mrf.mxu1 }
  0xed   :  { %v1832_v38 = vpop.f32.mrf.mxu2 }
  0xef   :  { %v1845_v39 = vpop.f32.mrf.mxu3 }
  0xfe   :  { %v1856_v40 = vpop.f32.mrf.mxu0 }
  0xff   :  { %v1857_v54 = vadd.f32 %v1856_v40, %v1844_v36 }
 0x100   :  { %v1869_v41 = vpop.f32.mrf.mxu1 }
 0x101   :  { %v1870_v56 = vadd.f32 %v1869_v41, %v1857_v54 }
 0x105   :  { %v1882_v42 = vpop.f32.mrf.mxu2 }
 0x106   :  { %v1858_v44 = vpop.f32.mrf.mxu0  ;;  %v1883_v58 = vadd.f32 %v1882_v42, %v1870_v56 }
 0x107   :  { %v1895_v43 = vpop.f32.mrf.mxu3 }
 0x108   :  { %v1871_v45 = vpop.f32.mrf.mxu1  ;;  %v1896_v59 = vadd.f32 %v1895_v43, %v1883_v58 }
 0x10d   :  { %v1884_v46 = vpop.f32.mrf.mxu2 }
 0x10f   :  { %v1897_v47 = vpop.f32.mrf.mxu3 }
 0x11e   :  { %v1908_v48 = vpop.f32.mrf.mxu0 }
 0x11f   :  { %v1909_v60 = vadd.f32 %v1908_v48, %v1896_v59 }
 0x120   :  { %v1921_v49 = vpop.f32.mrf.mxu1 }
 0x121   :  { %v1922_v61 = vadd.f32 %v1921_v49, %v1909_v60 }
 0x125   :  { %v1934_v50 = vpop.f32.mrf.mxu2 }
 0x126   :  { %v1910_v52 = vpop.f32.mrf.mxu0  ;;  %v1935_v62 = vadd.f32 %v1934_v50, %v1922_v61 }
 0x127   :  { %v1947_v51 = vpop.f32.mrf.mxu3 }
 0x128   :  { %v1923_v53 = vpop.f32.mrf.mxu1  ;;  %v1948_v1 = vadd.f32 %v1947_v51, %v1935_v62 }
 0x12d   :  { %v1936_v55 = vpop.f32.mrf.mxu2 }
 0x12f   :  { %v1949_v57 = vpop.f32.mrf.mxu3 }
 0x13e   :  { %v1960_v63 = vpop.f32.mrf.mxu0 }
 0x13f   :  { %v1961_v2 = vadd.f32 %v1960_v63, %v1948_v1 }
 0x140   :  { %v1973_v0 = vpop.f32.mrf.mxu1 }
 0x141   :  { %v1974_v6 = vadd.f32 %v1973_v0, %v1961_v2 }
 0x145   :  { %v1986_v3 = vpop.f32.mrf.mxu2 }
 0x146   :  { %v1962_v4 = vpop.f32.mrf.mxu0  ;;  %v1987_v8 = vadd.f32 %v1986_v3, %v1974_v6 }
 0x147   :  { %v1999_v5 = vpop.f32.mrf.mxu3 }
 0x148   :  { %v1975_v7 = vpop.f32.mrf.mxu1  ;;  %v2000_v10 = vadd.f32 %v1999_v5, %v1987_v8 }
 0x14d   :  { %v1988_v9 = vpop.f32.mrf.mxu2 }
 0x14e   :  { %v2012_v12 = vpop.f32.mrf.mxu0 }
 0x14f   :  { %v2001_v11 = vpop.f32.mrf.mxu3  ;;  %v2013_v13 = vadd.f32 %v2012_v12, %v2000_v10 }
 0x151   :  { %2016 = vst [vmem:[%s3659_s3] sm:$0xff] %v2013_v13 }
 0x156   :  { %v2014_v14 = vpop.f32.mrf.mxu0 }

// kernel: cnn_forward.4
= control target key start
LH: loop header
LB: loop body
LE: loop exit
PB: predicated region body
PF: predicated region fallthrough
CT: control target
= control target key end

     0   :  { %vm164_vm0 = vcmask 261120   ;;  %vm1006_vm1 = vcmask 523264   ;;  %vm7154_vm2 = vcmask 519168   ;;  %vm7155_vm3 = vsmask.f32 3328  ;;  %s14863_s1 = inlined_call_operand.vmem [shape: bf16[5,160,64], index: 1, kind: input, shape index: {}]   ;;  %s14864_s0 = inlined_call_operand.vmem [shape: bf16[2,288,160], index: 0, kind: input, shape index: {}]   ;;  %s14865_s2 = inlined_call_operand.vmem [shape: f32[1,64], index: 2, kind: input, shape index: {}]   ;;  %s14866_s3 = inlined_call_operand.vmem [shape: bf16[2,7,7,64], index: 3, kind: output, shape index: {}]  }
   0x1   :  { %v10418_v0 = vld [vmem:[%s14863_s1 + $0x88] sm:$0xff]  ;;  %v10420_v1 = vld [vmem:[%s14863_s1 + $0x98] sm:$0xff]  ;;  %v10417_v4 = vld [vmem:[%s14863_s1 + $0x80] sm:$0xff] }
   0x2   :  { %v10404_v2 = vld [vmem:[%s14863_s1 + $0x38] sm:$0xff]  ;;  %v11040_v3 = vld [vmem:[%s14863_s1 + $0x48] sm:$0xff]  ;;  %177 = vmatpush.bf16.msra.mxu0 %v10418_v0  ;;  %212 = vmatpush.bf16.msra.mxu1 %v10420_v1  ;;  %v10419_v5 = vld [vmem:[%s14863_s1 + $0x90] sm:$0xff] }
   0x3   :  { %v10391_v6 = vld [vmem:[%s14864_s0 + $0x14] sm:$0xf]  ;;  %319 = vmatpush.bf16.msra.mxu2 %v10404_v2  ;;  %10991 = vmatpush.bf16.msra.mxu3 %v11040_v3  ;;  %v11058_v8 = vld [vmem:[%s14863_s1 + $0x40] sm:$0xff]  ;;  %v7281_v9 = vld [vmem:[%s14864_s0 + $0x18] sm:$0xf0] }
   0x4   :  { %v10403_v7 = vld [vmem:[%s14863_s1 + $0x30] sm:$0xff]  ;;  %v10438_v10 = vld [vmem:[%s14863_s1 + $0xe8] sm:$0xff]  ;;  %v7284_v11 = vor.u32 %v10391_v6, %v7281_v9  ;;  %v10436_v12 = vld [vmem:[%s14863_s1 + $0xd8] sm:$0xff] }
   0x5   :  { %v10416_v13 = vld [vmem:[%s14863_s1 + $0x78] sm:$0xff]  ;;  %v10402_v14 = vld [vmem:[%s14863_s1 + $0x28] sm:$0xff]  ;;  %v10435_v15 = vld [vmem:[%s14863_s1 + $0xd0] sm:$0xff] }
   0x6   :  { %178 = vmatpush.bf16.msra.mxu0 %v10417_v4  ;;  %213 = vmatpush.bf16.msra.mxu1 %v10419_v5  ;;  %v10415_v16 = vld [vmem:[%s14863_s1 + $0x70] sm:$0xff]  ;;  %v10401_v17 = vld [vmem:[%s14863_s1 + $0x20] sm:$0xff]  ;;  %v10434_v19 = vld [vmem:[%s14863_s1 + $0xc8] sm:$0xff] }
   0x7   :  { %320 = vmatpush.bf16.msra.mxu2 %v10403_v7  ;;  %10992 = vmatpush.bf16.msra.mxu3 %v11058_v8  ;;  %v10437_v18 = vld [vmem:[%s14863_s1 + $0xe0] sm:$0xff]  ;;  %v10414_v20 = vld [vmem:[%s14863_s1 + $0x68] sm:$0xff]  ;;  %v10400_v21 = vld [vmem:[%s14863_s1 + $0x18] sm:$0xff] }
   0x8   :  { %v10433_v22 = vld [vmem:[%s14863_s1 + $0xc0] sm:$0xff]  ;;  %v7289_v25 = vld [vmem:[%s14864_s0 + $0x28] sm:$0xf0]  ;;  %v10399_v26 = vld [vmem:[%s14863_s1 + $0x10] sm:$0xff] }
   0x9   :  { %7349 = vmatmul.msk.bf16.vlgmr.msra.gmra.mxu1 %vm164_vm0, %v7284_v11  ;;  %v10413_v23 = vld [vmem:[%s14863_s1 + $0x60] sm:$0xff]  ;;  %v7365_v28 = vld [vmem:[%s14864_s0 + $0x128] sm:$0xf0]  ;;  %v10432_v29 = vld [vmem:[%s14863_s1 + $0xb8] sm:$0xff] }
   0xa   :  { %514 = vmatpush.bf16.msrb.mxu1 %v10436_v12  ;;  %7410 = vmatmul.msk.bf16.vlgmr.msra.gmra.mxu3 %vm164_vm0, %v7284_v11  ;;  %v10407_v24 = vld [vmem:[%s14864_s0 + $0x24] sm:$0xf]  ;;  %v10412_v32 = vld [vmem:[%s14863_s1 + $0x58] sm:$0xff]  ;;  %v10398_v33 = vld [vmem:[%s14863_s1 + $0x8] sm:$0xff] }
   0xb   :  { %549 = vmatpush.bf16.msrb.mxu3 %v10438_v10  ;;  %179 = vmatpush.bf16.msra.mxu0 %v10416_v13  ;;  %v10393_v27 = vld [vmem:[%s14864_s0 + $0x124] sm:$0xf]  ;;  %v7292_v30 = vor.u32 %v10407_v24, %v7289_v25  ;;  %v10431_v34 = vld [vmem:[%s14863_s1 + $0xb0] sm:$0xff]  ;;  %v10392_v38 = vld [vmem:[%s14864_s0 + $0x14] sm:$0xf0] }
   0xc   :  { %321 = vmatpush.bf16.msra.mxu2 %v10402_v14  ;;  %v7368_v31 = vor.u32 %v10393_v27, %v7365_v28  ;;  %v10411_v35 = vld [vmem:[%s14863_s1 + $0x50] sm:$0xff]  ;;  %v10397_v36 = vld [vmem:[%s14863_s1] sm:$0xff]  ;;  %v10474_v39 = vld [vmem:[%s14863_s1 + $0x188] sm:$0xff] }
   0xd   :  { %v7279_v37 = vld [vmem:[%s14864_s0 + $0x10] sm:$0xf]  ;;  %v7355_v40 = vld [vmem:[%s14864_s0] sm:$0xf]  ;;  %v10390_v41 = vld [vmem:[%s14864_s0 + $0x4] sm:$0xf0] }
   0xe   :  { %515 = vmatpush.bf16.msrb.mxu1 %v10435_v15  ;;  %v10454_v42 = vld [vmem:[%s14863_s1 + $0x128] sm:$0xff]  ;;  %v7280_v44 = vor.u32 %v10392_v38, %v7279_v37  ;;  %v7356_v45 = vor.u32 %v10390_v41, %v7355_v40  ;;  %v10453_v46 = vld [vmem:[%s14863_s1 + $0x120] sm:$0xff]  ;;  %v10395_v47 = vld [vmem:[%s14864_s0 + $0x134] sm:$0xf] }
   0xf   :  { %550 = vmatpush.bf16.msrb.mxu3 %v10437_v18  ;;  %180 = vmatpush.bf16.msra.mxu0 %v10415_v16  ;;  %v10430_v43 = vld [vmem:[%s14863_s1 + $0xa8] sm:$0xff]  ;;  %v7297_v48 = vld [vmem:[%s14864_s0 + $0x138] sm:$0xf0]  ;;  %v10429_v49 = vld [vmem:[%s14863_s1 + $0xa0] sm:$0xff] }
  0x10   :  { %322 = vmatpush.bf16.msra.mxu2 %v10401_v17  ;;  %v10452_v50 = vld [vmem:[%s14863_s1 + $0x118] sm:$0xff]  ;;  %v7300_v51 = vor.u32 %v10395_v47, %v7297_v48  ;;  %v10451_v52 = vld [vmem:[%s14863_s1 + $0x110] sm:$0xff]  ;;  %v7287_v53 = vld [vmem:[%s14864_s0 + $0x20] sm:$0xf] }
  0x11   :  { %v10408_v54 = vld [vmem:[%s14864_s0 + $0x24] sm:$0xf0]  ;;  %v10472_v55 = vld [vmem:[%s14863_s1 + $0x178] sm:$0xff]  ;;  %v10409_v58 = vld [vmem:[%s14864_s0 + $0x144] sm:$0xf] }
  0x12   :  { %516 = vmatpush.bf16.msrb.mxu1 %v10434_v19  ;;  %v10450_v56 = vld [vmem:[%s14863_s1 + $0x108] sm:$0xff]  ;;  %v7288_v57 = vor.u32 %v10408_v54, %v7287_v53  ;;  %v10449_v60 = vld [vmem:[%s14863_s1 + $0x100] sm:$0xff]  ;;  %v10471_v61 = vld [vmem:[%s14863_s1 + $0x170] sm:$0xff] }
  0x13   :  { %181 = vmatpush.bf16.msra.mxu0 %v10414_v20  ;;  %955 = vmatpush.bf16.msra.mxu3 %v10474_v39  ;;  %v7305_v59 = vld [vmem:[%s14864_s0 + $0x148] sm:$0xf0]  ;;  %v10421_v62 = vld [vmem:[%s14864_s0 + $0x24] sm:$0xf]  ;;  %v7295_v2 = vld [vmem:[%s14864_s0 + $0x130] sm:$0xf] }
  0x14   :  { %323 = vmatpush.bf16.msra.mxu2 %v10400_v21  ;;  %v7437_v63 = vld [vmem:[%s14864_s0 + $0x28] sm:$0xf0]  ;;  %v7308_v0 = vor.u32 %v10409_v58, %v7305_v59  ;;  %v10396_v4 = vld [vmem:[%s14864_s0 + $0x134] sm:$0xf0]  ;;  %v10473_v5 = vld [vmem:[%s14863_s1 + $0x180] sm:$0xff] }
  0x15   :  { %v7440_v1 = vor.u32 %v10421_v62, %v7437_v63  ;;  %v10470_v6 = vld [vmem:[%s14863_s1 + $0x168] sm:$0xff]  ;;  %v7363_v7 = vld [vmem:[%s14864_s0 + $0x120] sm:$0xf]  ;;  %v10447_v9 = vld [vmem:[%s14863_s1 + $0xf0] sm:$0xff]  ;;  %v7296_v10 = vor.u32 %v10396_v4, %v7295_v2 }
  0x16   :  { %517 = vmatpush.bf16.msrb.mxu1 %v10433_v22  ;;  %v7435_v12 = vld [vmem:[%s14864_s0 + $0x20] sm:$0xf]  ;;  %v10422_v13 = vld [vmem:[%s14864_s0 + $0x24] sm:$0xf0]  ;;  %v10456_v14 = vld [vmem:[%s14863_s1 + $0x138] sm:$0xff] }
  0x17   :  { %182 = vmatpush.bf16.msra.mxu0 %v10413_v23  ;;  %956 = vmatpush.bf16.msra.mxu3 %v10473_v5  ;;  %v10469_v15 = vld [vmem:[%s14863_s1 + $0x160] sm:$0xff]  ;;  %v10423_v16 = vld [vmem:[%s14864_s0 + $0x34] sm:$0xf]  ;;  %v7445_v17 = vld [vmem:[%s14864_s0 + $0x38] sm:$0xf0]  ;;  %v7436_v18 = vor.u32 %v10422_v13, %v7435_v12 }
  0x18   :  { %324 = vmatpush.bf16.msra.mxu2 %v10399_v26  ;;  %v7448_v19 = vor.u32 %v10423_v16, %v7445_v17  ;;  %v7303_v20 = vld [vmem:[%s14864_s0 + $0x140] sm:$0xf]  ;;  %v10410_v21 = vld [vmem:[%s14864_s0 + $0x144] sm:$0xf0]  ;;  %v10455_v22 = vld [vmem:[%s14863_s1 + $0x130] sm:$0xff] }
  0x19   :  { %7350 = vmatmul.msk.bf16.gmra.mxu1 %vm164_vm0, %v7292_v30  ;;  %v10468_v23 = vld [vmem:[%s14863_s1 + $0x158] sm:$0xff]  ;;  %v10504_v24 = vld [vmem:[%s14863_s1 + $0x88] sm:$0xff]  ;;  %v7304_v25 = vor.u32 %v10410_v21, %v7303_v20  ;;  %v7443_v26 = vld [vmem:[%s14864_s0 + $0x30] sm:$0xf] }
  0x1a   :  { %518 = vmatpush.bf16.msrb.mxu1 %v10432_v29  ;;  %7411 = vmatmul.msk.bf16.gmra.mxu3 %vm164_vm0, %v7368_v31  ;;  %v10424_v27 = vld [vmem:[%s14864_s0 + $0x34] sm:$0xf0]  ;;  %v10467_v28 = vld [vmem:[%s14863_s1 + $0x150] sm:$0xff]  ;;  %v10503_v29 = vld [vmem:[%s14863_s1 + $0x80] sm:$0xff] }
  0x1b   :  { %183 = vmatpush.bf16.msra.mxu0 %v10412_v32  ;;  %v10425_v30 = vld [vmem:[%s14864_s0 + $0x144] sm:$0xf]  ;;  %v7453_v31 = vld [vmem:[%s14864_s0 + $0x148] sm:$0xf0]  ;;  %v7444_v32 = vor.u32 %v10424_v27, %v7443_v26  ;;  %v10502_v38 = vld [vmem:[%s14863_s1 + $0x78] sm:$0xff] }
  0x1c   :  { %325 = vmatpush.bf16.msra.mxu2 %v10398_v33  ;;  %v7456_v33 = vor.u32 %v10425_v30, %v7453_v31  ;;  %v10466_v37 = vld [vmem:[%s14863_s1 + $0x148] sm:$0xff]  ;;  %v10389_v39 = vld [vmem:[%s14864_s0 + $0x4] sm:$0xf]  ;;  %v7461_v47 = vld [vmem:[%s14864_s0 + $0x158] sm:$0xf0] }
  0x1d   :  { %v7357_v40 = vld [vmem:[%s14864_s0 + $0x8] sm:$0xf0]  ;;  %v10442_v53 = vld [vmem:[%s14864_s0 + $0x44] sm:$0xf0]  ;;  %v10439_v54 = vld [vmem:[%s14864_s0 + $0x34] sm:$0xf] }
  0x1e   :  { %519 = vmatpush.bf16.msrb.mxu1 %v10431_v34  ;;  %v7531_v34 = vld [vmem:[%s14864_s0 + $0x30] sm:$0xf]  ;;  %v10500_v58 = vld [vmem:[%s14863_s1 + $0x68] sm:$0xff]  ;;  %v10490_v59 = vld [vmem:[%s14863_s1 + $0x38] sm:$0xff] }
  0x1f   :  { %184 = vmatpush.bf16.msra.mxu0 %v10411_v35  ;;  %v10440_v35 = vld [vmem:[%s14864_s0 + $0x34] sm:$0xf0]  ;;  %v10457_v62 = vld [vmem:[%s14864_s0 + $0x44] sm:$0xf]  ;;  %v7629_v63 = vld [vmem:[%s14864_s0 + $0x48] sm:$0xf0] }
  0x20   :  { %326 = vmatpush.bf16.msra.mxu2 %v10397_v36  ;;  %v10492_v36 = vld [vmem:[%s14863_s1 + $0x48] sm:$0xff]  ;;  %v7532_v41 = vor.u32 %v10440_v35, %v7531_v34  ;;  %v7632_v2 = vor.u32 %v10457_v62, %v7629_v63  ;;  %v10489_v4 = vld [vmem:[%s14863_s1 + $0x30] sm:$0xff]  ;;  %v10498_v5 = vld [vmem:[%s14863_s1 + $0x58] sm:$0xff] }
  0x21   :  { %v10497_v12 = vld [vmem:[%s14863_s1 + $0x50] sm:$0xff]  ;;  %v10458_v16 = vld [vmem:[%s14864_s0 + $0x44] sm:$0xf0]  ;;  %v7549_v26 = vld [vmem:[%s14864_s0 + $0x158] sm:$0xf0] }
  0x22   :  { %520 = vmatpush.bf16.msrb.mxu1 %v10430_v43  ;;  %185 = vmatmul.bf16.vlgmr.msra.gmra.mxu0 %v7280_v44  ;;  %v10506_v43 = vld [vmem:[%s14863_s1 + $0x98] sm:$0xff]  ;;  %v10459_v17 = vld [vmem:[%s14864_s0 + $0x54] sm:$0xf]  ;;  %v10461_v35 = vld [vmem:[%s14864_s0 + $0x164] sm:$0xf] }
  0x23   :  { %717 = vmatpush.bf16.msrb.mxu0 %v10454_v42  ;;  %327 = vmatmul.bf16.vlgmr.msra.gmra.mxu2 %v7356_v45  ;;  %v7360_v42 = vor.u32 %v10389_v39, %v7357_v40  ;;  %v10426_v45 = vld [vmem:[%s14864_s0 + $0x144] sm:$0xf0]  ;;  %v10486_v31 = vld [vmem:[%s14863_s1 + $0x18] sm:$0xff]  ;;  %vm11992_vm4 = vmand %vm7154_vm2, %vm7155_vm3 }
  0x24   :  { %354 = vmatpush.bf16.msrb.mxu2 %v11040_v3  ;;  %v10448_v3 = vld [vmem:[%s14863_s1 + $0xf8] sm:$0xff] }
  0x25   :  { %v10460_v34 = vld [vmem:[%s14864_s0 + $0x54] sm:$0xf0] }
  0x26   :  { %521 = vmatpush.bf16.msrb.mxu1 %v10429_v49  ;;  %v10465_v49 = vld [vmem:[%s14863_s1 + $0x140] sm:$0xff] }
  0x27   :  { %718 = vmatpush.bf16.msrb.mxu0 %v10453_v46  ;;  %v10427_v46 = vld [vmem:[%s14864_s0 + $0x154] sm:$0xf] }
  0x28   :  { %355 = vmatpush.bf16.msrb.mxu2 %v11058_v8  ;;  %v10394_v8 = vld [vmem:[%s14864_s0 + $0x124] sm:$0xf0] }
  0x29   :  { %7351 = vmatmul.msk.bf16.gmra.mxu1 %vm164_vm0, %v7300_v51  ;;  %v7364_v11 = vor.u32 %v10394_v8, %v7363_v7  ;;  %v10444_v7 = vld [vmem:[%s14864_s0 + $0x154] sm:$0xf0]  ;;  %v10491_v8 = vld [vmem:[%s14863_s1 + $0x40] sm:$0xff] }
  0x2a   :  { %7412 = vmatmul.msk.bf16.gmra.mxu3 %vm164_vm0, %v7300_v51  ;;  %920 = vmatpush.bf16.msra.mxu1 %v10472_v55  ;;  %v10501_v51 = vld [vmem:[%s14863_s1 + $0x70] sm:$0xff]  ;;  %v7533_v55 = vld [vmem:[%s14864_s0 + $0x38] sm:$0xf0] }
  0x2b   :  { %719 = vmatpush.bf16.msrb.mxu0 %v10452_v50  ;;  %v7464_v50 = vor.u32 %v10427_v46, %v7461_v47  ;;  %v10542_v46 = vld [vmem:[%s14863_s1 + $0x138] sm:$0xff]  ;;  %v10445_v47 = vld [vmem:[%s14864_s0 + $0x164] sm:$0xf] }
  0x2c   :  { %752 = vmatpush.bf16.msra.mxu2 %v10456_v14  ;;  %v10488_v14 = vld [vmem:[%s14863_s1 + $0x28] sm:$0xff] }
  0x2e   :  { %921 = vmatpush.bf16.msra.mxu1 %v10471_v61  ;;  %v10428_v61 = vld [vmem:[%s14864_s0 + $0x154] sm:$0xf0] }
  0x2f   :  { %720 = vmatpush.bf16.msrb.mxu0 %v10451_v52  ;;  %v7539_v52 = vld [vmem:[%s14864_s0 + $0x40] sm:$0xf] }
  0x30   :  { %753 = vmatpush.bf16.msra.mxu2 %v10455_v22  ;;  %v10487_v22 = vld [vmem:[%s14863_s1 + $0x20] sm:$0xff] }
  0x32   :  { %190 = vmatmul.bf16.gmra.mxu0 %v7288_v57  ;;  %922 = vmatpush.bf16.msra.mxu1 %v10470_v6  ;;  %v7536_v57 = vor.u32 %v10439_v54, %v7533_v55  ;;  %v7547_v6 = vld [vmem:[%s14864_s0 + $0x150] sm:$0xf]  ;;  %v10484_v55 = vld [vmem:[%s14863_s1 + $0x8] sm:$0xff] }
  0x33   :  { %721 = vmatpush.bf16.msrb.mxu0 %v10450_v56  ;;  %332 = vmatmul.bf16.gmra.mxu2 %v7280_v44  ;;  %v7451_v44 = vld [vmem:[%s14864_s0 + $0x140] sm:$0xf]  ;;  %v7540_v56 = vor.u32 %v10442_v53, %v7539_v52 }
  0x34   :  { %v7452_v48 = vor.u32 %v10426_v45, %v7451_v44  ;;  %v7723_v44 = vld [vmem:[%s14864_s0 + $0x30] sm:$0xf]  ;;  %v10478_v45 = vld [vmem:[%s14864_s0 + $0x34] sm:$0xf0] }
  0x36   :  { %923 = vmatpush.bf16.msra.mxu1 %v10469_v15  ;;  %v7627_v15 = vld [vmem:[%s14864_s0 + $0x40] sm:$0xf] }
  0x37   :  { %722 = vmatpush.bf16.msrb.mxu0 %v10449_v60  ;;  %v7459_v60 = vld [vmem:[%s14864_s0 + $0x150] sm:$0xf] }
  0x39   :  { %7352 = vmatmul.msk.bf16.gmra.mxu1 %vm164_vm0, %v7308_v0  ;;  %v7460_v0 = vor.u32 %v10428_v61, %v7459_v60  ;;  %v7653_v60 = vld [vmem:[%s14864_s0 + $0x178] sm:$0xf0] }
  0x3a   :  { %7505 = vmatmul.msk.bf16.vlgmr.msrb.gmra.mxu3 %vm164_vm0, %v7440_v1  ;;  %924 = vmatpush.bf16.msra.mxu1 %v10468_v23  ;;  %v10499_v1 = vld [vmem:[%s14863_s1 + $0x60] sm:$0xff] }
  0x3b   :  { %723 = vmatpush.bf16.msrb.mxu0 %v10448_v3  ;;  %1352 = vmatpush.bf16.msrb.mxu3 %v10492_v36  ;;  %v10505_v3 = vld [vmem:[%s14863_s1 + $0x90] sm:$0xff]  ;;  %v7555_v23 = vld [vmem:[%s14864_s0 + $0x160] sm:$0xf]  ;;  %v7645_v36 = vld [vmem:[%s14864_s0 + $0x168] sm:$0xf0] }
  0x3c   :  { %v7648_v40 = vor.u32 %v10461_v35, %v7645_v36  ;;  %v10523_v36 = vld [vmem:[%s14863_s1 + $0xe0] sm:$0xff] }
  0x3e   :  { %925 = vmatpush.bf16.msra.mxu1 %v10467_v28 }
  0x3f   :  { %724 = vmatpush.bf16.msrb.mxu0 %v10447_v9  ;;  %v10441_v9 = vld [vmem:[%s14864_s0 + $0x44] sm:$0xf]  ;;  %1353 = vmatpush.bf16.msrb.mxu3 %v10491_v8  ;;  %v10494_v8 = vld [vmem:[%s14864_s0 + $0x44] sm:$0xf0] }
  0x42   :  { %195 = vmatmul.bf16.gmra.mxu0 %v7296_v10  ;;  %926 = vmatpush.bf16.msra.mxu1 %v10466_v37 }
  0x43   :  { %337 = vmatmul.bf16.gmra.mxu2 %v7364_v11  ;;  %1175 = vmatpush.bf16.msra.mxu0 %v10504_v24  ;;  %v7548_v11 = vor.u32 %v10444_v7, %v7547_v6  ;;  %v10446_v24 = vld [vmem:[%s14864_s0 + $0x164] sm:$0xf0]  ;;  %v10519_v6 = vld [vmem:[%s14863_s1 + $0xc0] sm:$0xff] }
  0x44   :  { %v7556_v28 = vor.u32 %v10446_v24, %v7555_v23  ;;  %v7731_v7 = vld [vmem:[%s14864_s0 + $0x40] sm:$0xf]  ;;  %v10475_v23 = vld [vmem:[%s14864_s0 + $0x24] sm:$0xf]  ;;  %v7801_v24 = vld [vmem:[%s14864_s0 + $0x28] sm:$0xf0] }
  0x46   :  { %927 = vmatpush.bf16.msra.mxu1 %v10465_v49 }
  0x47   :  { %1176 = vmatpush.bf16.msra.mxu0 %v10503_v29 }
  0x49   :  { %522 = vmatmul.bf16.vlgmr.msrb.gmra.mxu1 %v7436_v18  ;;  %v7637_v18 = vld [vmem:[%s14864_s0 + $0x58] sm:$0xf0] }
  0x4a   :  { %7506 = vmatmul.msk.bf16.gmra.mxu3 %vm164_vm0, %v7448_v19  ;;  %1317 = vmatpush.bf16.msrb.mxu1 %v10490_v59  ;;  %v7628_v19 = vor.u32 %v10458_v16, %v7627_v15  ;;  %v7640_v21 = vor.u32 %v10459_v17, %v7637_v18  ;;  %v10463_v59 = vld [vmem:[%s14864_s0 + $0x174] sm:$0xf] }
  0x4b   :  { %1177 = vmatpush.bf16.msra.mxu0 %v10502_v38 }
  0x4e   :  { %1318 = vmatpush.bf16.msrb.mxu1 %v10489_v4  ;;  %v7656_v4 = vor.u32 %v10463_v59, %v7653_v60 }
  0x4f   :  { %1178 = vmatpush.bf16.msra.mxu0 %v10501_v51 }
  0x52   :  { %200 = vmatmul.bf16.gmra.mxu0 %v7304_v25  ;;  %1319 = vmatpush.bf16.msrb.mxu1 %v10488_v14  ;;  %v10443_v25 = vld [vmem:[%s14864_s0 + $0x154] sm:$0xf] }
  0x53   :  { %342 = vmatmul.bf16.gmra.mxu2 %v7296_v10  ;;  %1179 = vmatpush.bf16.msra.mxu0 %v10500_v58  ;;  %v7541_v10 = vld [vmem:[%s14864_s0 + $0x48] sm:$0xf0]  ;;  %v7552_v30 = vor.u32 %v10443_v25, %v7549_v26  ;;  %v10462_v58 = vld [vmem:[%s14864_s0 + $0x164] sm:$0xf0] }
  0x54   :  { %v7544_v13 = vor.u32 %v10441_v9, %v7541_v10  ;;  %v10477_v9 = vld [vmem:[%s14864_s0 + $0x34] sm:$0xf]  ;;  %v7725_v10 = vld [vmem:[%s14864_s0 + $0x38] sm:$0xf0] }
  0x55   :  { %v11531_v17 = vor.u32 %v10477_v9, %v7725_v10 }
  0x56   :  { %1320 = vmatpush.bf16.msrb.mxu1 %v10487_v22  ;;  %v10464_v22 = vld [vmem:[%s14864_s0 + $0x174] sm:$0xf0] }
  0x57   :  { %1180 = vmatpush.bf16.msra.mxu0 %v10499_v1 }
  0x59   :  { %527 = vmatmul.bf16.gmra.mxu1 %v7444_v32  ;;  %v10522_v32 = vld [vmem:[%s14863_s1 + $0xd8] sm:$0xff] }
  0x5a   :  { %7507 = vmatmul.msk.bf16.gmra.mxu3 %vm164_vm0, %v7456_v33  ;;  %1321 = vmatpush.bf16.msrb.mxu1 %v10486_v31  ;;  %v7635_v33 = vld [vmem:[%s14864_s0 + $0x50] sm:$0xf] }
  0x5b   :  { %1181 = vmatpush.bf16.msra.mxu0 %v10498_v5  ;;  %v7636_v38 = vor.u32 %v10460_v34, %v7635_v33  ;;  %v7804_v33 = vor.u32 %v10475_v23, %v7801_v24 }
  0x5f   :  { %1182 = vmatpush.bf16.msra.mxu0 %v10497_v12 }
  0x62   :  { %725 = vmatmul.bf16.vlgmr.msrb.gmra.mxu0 %v7532_v41  ;;  %v10485_v41 = vld [vmem:[%s14863_s1 + $0x10] sm:$0xff] }
  0x63   :  { %7409 = vmatmul.msk.bf16.vlgmr.msrb.gmra.mxu2 %vm164_vm0, %v7360_v42  ;;  %1511 = vmatpush.bf16.msrb.mxu0 %v10522_v32  ;;  %v10521_v42 = vld [vmem:[%s14863_s1 + $0xd0] sm:$0xff] }
  0x64   :  { %1210 = vmatpush.bf16.msrb.mxu2 %v10506_v43  ;;  %v10524_v43 = vld [vmem:[%s14863_s1 + $0xe8] sm:$0xff]  ;;  %1322 = vmatpush.bf16.msrb.mxu1 %v10485_v41  ;;  %v10541_v41 = vld [vmem:[%s14863_s1 + $0x130] sm:$0xff] }
  0x67   :  { %1512 = vmatpush.bf16.msrb.mxu0 %v10521_v42  ;;  %v10493_v42 = vld [vmem:[%s14864_s0 + $0x44] sm:$0xf] }
  0x68   :  { %1211 = vmatpush.bf16.msrb.mxu2 %v10505_v3  ;;  %1323 = vmatpush.bf16.msrb.mxu1 %v10484_v55 }
  0x69   :  { %532 = vmatmul.bf16.gmra.mxu1 %v7452_v48  ;;  %v7557_v48 = vld [vmem:[%s14864_s0 + $0x168] sm:$0xf0] }
  0x6a   :  { %7508 = vmatmul.msk.bf16.gmra.mxu3 %vm164_vm0, %v7464_v50  ;;  %v11480_v50 = vor.u32 %v10478_v45, %v7723_v44  ;;  %v7560_v53 = vor.u32 %v10445_v47, %v7557_v48  ;;  %v10515_v47 = vld [vmem:[%s14863_s1 + $0xa0] sm:$0xff] }
  0x72   :  { %730 = vmatmul.bf16.gmra.mxu0 %v7540_v56  ;;  %v10520_v56 = vld [vmem:[%s14863_s1 + $0xc8] sm:$0xff] }
  0x73   :  { %7601 = vmatmul.msk.bf16.vlgmr.msra.gmra.mxu2 %vm164_vm0, %v7536_v57  ;;  %v7643_v57 = vld [vmem:[%s14864_s0 + $0x160] sm:$0xf]  ;;  %1513 = vmatpush.bf16.msrb.mxu0 %v10520_v56  ;;  %v10538_v56 = vld [vmem:[%s14863_s1 + $0x118] sm:$0xff] }
  0x74   :  { %1546 = vmatpush.bf16.msra.mxu2 %v10524_v43  ;;  %v7644_v63 = vor.u32 %v10462_v58, %v7643_v57  ;;  %v7733_v43 = vld [vmem:[%s14864_s0 + $0x48] sm:$0xf0]  ;;  %v7799_v57 = vld [vmem:[%s14864_s0 + $0x20] sm:$0xf]  ;;  %v10476_v58 = vld [vmem:[%s14864_s0 + $0x24] sm:$0xf0] }
  0x75   :  { %v7800_v60 = vor.u32 %v10476_v58, %v7799_v57  ;;  %v7807_v57 = vld [vmem:[%s14864_s0 + $0x140] sm:$0xf] }
  0x77   :  { %1514 = vmatpush.bf16.msrb.mxu0 %v10519_v6  ;;  %v10496_v6 = vld [vmem:[%s14864_s0 + $0x164] sm:$0xf0] }
  0x78   :  { %1547 = vmatpush.bf16.msra.mxu2 %v10523_v36  ;;  %v10557_v36 = vld [vmem:[%s14863_s1 + $0x170] sm:$0xff] }
  0x79   :  { %537 = vmatmul.bf16.gmra.mxu1 %v7460_v0  ;;  %v10483_v0 = vld [vmem:[%s14863_s1] sm:$0xff] }
  0x7a   :  { %7697 = vmatmul.msk.bf16.vlgmr.msra.gmra.mxu3 %vm164_vm0, %v7632_v2  ;;  %1324 = vmatpush.bf16.msrb.mxu1 %v10483_v0 }
  0x7b   :  { %1748 = vmatpush.bf16.msra.mxu3 %v10542_v46 }
  0x7f   :  { %1749 = vmatpush.bf16.msra.mxu3 %v10541_v41 }
  0x82   :  { %735 = vmatmul.bf16.gmra.mxu0 %v7548_v11 }
  0x83   :  { %7602 = vmatmul.msk.bf16.gmra.mxu2 %vm164_vm0, %v7544_v13  ;;  %v7732_v13 = vor.u32 %v10494_v8, %v7731_v7  ;;  %v7741_v7 = vld [vmem:[%s14864_s0 + $0x158] sm:$0xf0] }
  0x86   :  { %v215_v20 = vpop.f32.mrf.mxu1 }
  0x89   :  { %928 = vmatmul.bf16.vlgmr.msra.gmra.mxu1 %v7628_v19  ;;  %v10518_v19 = vld [vmem:[%s14863_s1 + $0xb8] sm:$0xff] }
  0x8a   :  { %7698 = vmatmul.msk.bf16.gmra.mxu3 %vm164_vm0, %v7640_v21  ;;  %v7651_v21 = vld [vmem:[%s14864_s0 + $0x170] sm:$0xf]  ;;  %1515 = vmatpush.bf16.msrb.mxu0 %v10518_v19  ;;  %v10536_v19 = vld [vmem:[%s14863_s1 + $0x108] sm:$0xff] }
  0x8d   :  { %v11430_v27 = vpop.f32.mrf.mxu3 }
  0x8e   :  { %v217_v29 = vpop.f32.mrf.mxu1 }
  0x92   :  { %740 = vmatmul.bf16.gmra.mxu0 %v7556_v28  ;;  %v7652_v28 = vor.u32 %v10464_v22, %v7651_v21  ;;  %v10479_v21 = vld [vmem:[%s14864_s0 + $0x144] sm:$0xf] }
  0x93   :  { %7603 = vmatmul.msk.bf16.gmra.mxu2 %vm164_vm0, %v7552_v30 }
  0x95   :  { %v11451_v37 = vpop.f32.mrf.mxu3 }
  0x96   :  { %v220_v39 = vpop.f32.mrf.mxu1 }
  0x99   :  { %933 = vmatmul.bf16.gmra.mxu1 %v7636_v38  ;;  %v10539_v38 = vld [vmem:[%s14863_s1 + $0x120] sm:$0xff] }
  0x9a   :  { %7699 = vmatmul.msk.bf16.gmra.mxu3 %vm164_vm0, %v7648_v40  ;;  %v10482_v40 = vld [vmem:[%s14864_s0 + $0x154] sm:$0xf0] }
  0x9d   :  { %v11478_v49 = vpop.f32.mrf.mxu3 }
  0x9e   :  { %v222_v52 = vpop.f32.mrf.mxu1 }
  0x9f   :  { %v186_v51 = vpop.f32.mrf.mxu0 }
  0xa0   :  { %v216_v54 = vadd.f32 %v215_v20, %v186_v51  ;;  %v10540_v20 = vld [vmem:[%s14863_s1 + $0x128] sm:$0xff] }
  0xa1   :  { %1713 = vmatpush.bf16.msra.mxu1 %v10540_v20  ;;  %v10558_v20 = vld [vmem:[%s14863_s1 + $0x178] sm:$0xff] }
  0xa2   :  { %1183 = vmatmul.bf16.vlgmr.msra.gmra.mxu0 %v11480_v50 }
  0xa3   :  { %7604 = vmatmul.msk.bf16.gmra.mxu2 %vm164_vm0, %v7560_v53  ;;  %v7736_v53 = vor.u32 %v10493_v42, %v7733_v43 }
  0xa5   :  { %v11502_v62 = vpop.f32.mrf.mxu3  ;;  %1714 = vmatpush.bf16.msra.mxu1 %v10539_v38  ;;  %v10560_v38 = vld [vmem:[%s14863_s1 + $0x188] sm:$0xff] }
  0xa6   :  { %v328_v61 = vpop.f32.mrf.mxu2  ;;  %v11509_v3 = vpop.f32.mrf.mxu1 }
  0xa7   :  { %v11507_v1 = vadd.f32 %v328_v61, %v216_v54  ;;  %v188_v2 = vpop.f32.mrf.mxu0 }
  0xa8   :  { %v218_v5 = vadd.f32 %v217_v29, %v188_v2  ;;  %v10517_v29 = vld [vmem:[%s14863_s1 + $0xb0] sm:$0xff] }
  0xa9   :  { %938 = vmatmul.bf16.gmra.mxu1 %v7644_v63  ;;  %1516 = vmatpush.bf16.msrb.mxu0 %v10517_v29 }
  0xaa   :  { %7700 = vmatmul.msk.bf16.gmra.mxu3 %vm164_vm0, %v7656_v4  ;;  %1715 = vmatpush.bf16.msra.mxu1 %v10538_v56  ;;  %v10537_v4 = vld [vmem:[%s14863_s1 + $0x110] sm:$0xff]  ;;  %v10556_v56 = vld [vmem:[%s14863_s1 + $0x168] sm:$0xff] }
  0xad   :  { %v11527_v12 = vpop.f32.mrf.mxu3 }
  0xae   :  { %v330_v11 = vpop.f32.mrf.mxu2  ;;  %v227_v16 = vpop.f32.mrf.mxu1  ;;  %1716 = vmatpush.bf16.msra.mxu1 %v10537_v4 }
  0xaf   :  { %v11529_v14 = vadd.f32 %v330_v11, %v218_v5  ;;  %v191_v15 = vpop.f32.mrf.mxu0  ;;  %v7747_v5 = vld [vmem:[%s14864_s0 + $0x160] sm:$0xf] }
  0xb0   :  { %v221_v18 = vadd.f32 %v220_v39, %v191_v15  ;;  %v10516_v39 = vld [vmem:[%s14863_s1 + $0xa8] sm:$0xff]  ;;  %v7748_v10 = vor.u32 %v10496_v6, %v7747_v5 }
  0xb1   :  { %1517 = vmatpush.bf16.msrb.mxu0 %v10516_v39  ;;  %v10495_v39 = vld [vmem:[%s14864_s0 + $0x164] sm:$0xf] }
  0xb2   :  { %1188 = vmatmul.bf16.gmra.mxu0 %v7732_v13  ;;  %1717 = vmatpush.bf16.msra.mxu1 %v10536_v19 }
  0xb3   :  { %7793 = vmatmul.msk.bf16.vlgmr.msrb.gmra.mxu2 %vm164_vm0, %v11531_v17 }
  0xb4   :  { %1950 = vmatpush.bf16.msrb.mxu2 %v10560_v38 }
  0xb5   :  { %v11553_v26 = vpop.f32.mrf.mxu3  ;;  %1518 = vmatpush.bf16.msrb.mxu0 %v10515_v47 }
  0xb6   :  { %v333_v25 = vpop.f32.mrf.mxu2  ;;  %v230_v32 = vpop.f32.mrf.mxu1 }
  0xb7   :  { %v334_v30 = vadd.f32 %v333_v25, %v221_v18  ;;  %v193_v31 = vpop.f32.mrf.mxu0 }
  0xb8   :  { %v223_v34 = vadd.f32 %v222_v52, %v193_v31 }
  0xb9   :  { %v11559_v35 = vadd.f32 %v11430_v27, %v334_v30  ;;  %943 = vmatmul.bf16.gmra.mxu1 %v7652_v28  ;;  %v7739_v27 = vld [vmem:[%s14864_s0 + $0x150] sm:$0xf]  ;;  %1915 = vmatpush.bf16.msra.mxu0 %v10558_v20 }
  0xba   :  { %7853 = vmatmul.msk.bf16.vlgmr.msrb.gmra.mxu3 %vm164_vm0, %v7804_v33  ;;  %v11588_v46 = vor.u32 %v10482_v40, %v7739_v27  ;;  %v7749_v27 = vld [vmem:[%s14864_s0 + $0x168] sm:$0xf0] }
  0xbd   :  { %v11586_v45 = vpop.f32.mrf.mxu3  ;;  %1916 = vmatpush.bf16.msra.mxu0 %v10557_v36  ;;  %v10512_v36 = vld [vmem:[%s14864_s0 + $0x164] sm:$0xf0] }
  0xbe   :  { %v335_v44 = vpop.f32.mrf.mxu2  ;;  %v232_v52 = vpop.f32.mrf.mxu1 }
  0xbf   :  { %v336_v48 = vadd.f32 %v335_v44, %v223_v34  ;;  %v196_v51 = vpop.f32.mrf.mxu0  ;;  %v10535_v34 = vld [vmem:[%s14863_s1 + $0x100] sm:$0xff] }
  0xc0   :  { %v226_v54 = vadd.f32 %v11509_v3, %v196_v51  ;;  %1718 = vmatpush.bf16.msra.mxu1 %v10535_v34  ;;  %v7895_v34 = vld [vmem:[%s14864_s0 + $0x160] sm:$0xf] }
  0xc1   :  { %v11595_v55 = vadd.f32 %v11451_v37, %v336_v48  ;;  %v7752_v48 = vor.u32 %v10495_v39, %v7749_v27  ;;  %1917 = vmatpush.bf16.msra.mxu0 %v10556_v56 }
  0xc2   :  { %1193 = vmatmul.bf16.gmra.mxu0 %v11588_v46 }
  0xc3   :  { %7794 = vmatmul.msk.bf16.gmra.mxu2 %vm164_vm0, %v7736_v53 }
  0xc5   :  { %v11608_v59 = vpop.f32.mrf.mxu3 }
  0xc6   :  { %v338_v37 = vpop.f32.mrf.mxu2  ;;  %v11610_v0 = vpop.f32.mrf.mxu1 }
  0xc7   :  { %v339_v61 = vadd.f32 %v338_v37, %v226_v54  ;;  %v198_v63 = vpop.f32.mrf.mxu0  ;;  %v10534_v54 = vld [vmem:[%s14863_s1 + $0xf8] sm:$0xff] }
  0xc8   :  { %v228_v2 = vadd.f32 %v227_v16, %v198_v63  ;;  %1719 = vmatpush.bf16.msra.mxu1 %v10534_v54 }
  0xc9   :  { %v11613_v3 = vadd.f32 %v11478_v49, %v339_v61  ;;  %1325 = vmatmul.bf16.vlgmr.msrb.gmra.mxu1 %v7800_v60  ;;  %v10481_v49 = vld [vmem:[%s14864_s0 + $0x154] sm:$0xf]  ;;  %v553_v61 = vadd.f32 %v11586_v45, %v11610_v0  ;;  %v7887_v45 = vld [vmem:[%s14864_s0 + $0x50] sm:$0xf]  ;;  %v10507_v0 = vld [vmem:[%s14864_s0 + $0x44] sm:$0xf] }
  0xca   :  { %7854 = vmatmul.msk.bf16.gmra.mxu3 %vm164_vm0, %v11531_v17  ;;  %v11634_v16 = vor.u32 %v10481_v49, %v7741_v7  ;;  %v10533_v60 = vld [vmem:[%s14863_s1 + $0xf0] sm:$0xff] }
  0xcc   :  { %1720 = vmatpush.bf16.msra.mxu1 %v10533_v60 }
  0xcd   :  { %v557_v9 = vpop.f32.mrf.mxu3 }
  0xce   :  { %v340_v8 = vpop.f32.mrf.mxu2  ;;  %v11632_v15 = vpop.f32.mrf.mxu1 }
  0xcf   :  { %v341_v11 = vadd.f32 %v340_v8, %v228_v2  ;;  %v201_v13 = vpop.f32.mrf.mxu0 }
  0xd0   :  { %v231_v17 = vadd.f32 %v230_v32, %v201_v13 }
  0xd1   :  { %v11637_v18 = vadd.f32 %v11502_v62, %v341_v11  ;;  %v7809_v62 = vld [vmem:[%s14864_s0 + $0x148] sm:$0xf0]  ;;  %v555_v11 = vadd.f32 %v11608_v59, %v11632_v15  ;;  %v7977_v59 = vld [vmem:[%s14864_s0 + $0x58] sm:$0xf0] }
  0xd2   :  { %1198 = vmatmul.bf16.gmra.mxu0 %v7748_v10  ;;  %v7812_v29 = vor.u32 %v10479_v21, %v7809_v62  ;;  %v10555_v10 = vld [vmem:[%s14863_s1 + $0x160] sm:$0xff] }
  0xd3   :  { %7795 = vmatmul.msk.bf16.gmra.mxu2 %vm164_vm0, %v11634_v16  ;;  %1918 = vmatpush.bf16.msra.mxu0 %v10555_v10 }
  0xd5   :  { %v559_v23 = vpop.f32.mrf.mxu3 }
  0xd6   :  { %v343_v22 = vpop.f32.mrf.mxu2  ;;  %v528_v28 = vpop.f32.mrf.mxu1 }
  0xd7   :  { %v344_v24 = vadd.f32 %v343_v22, %v231_v17  ;;  %v203_v25 = vpop.f32.mrf.mxu0  ;;  %v558_v31 = vadd.f32 %v557_v9, %v528_v28  ;;  %v10554_v22 = vld [vmem:[%s14863_s1 + $0x158] sm:$0xff] }
  0xd8   :  { %v233_v30 = vadd.f32 %v232_v52, %v203_v25  ;;  %1919 = vmatpush.bf16.msra.mxu0 %v10554_v22 }
  0xd9   :  { %v11654_v32 = vadd.f32 %v11527_v12, %v344_v24  ;;  %v11657_v33 = vadd.f32 %v558_v31, %v11559_v35  ;;  %1330 = vmatmul.bf16.gmra.mxu1 %v11480_v50  ;;  %v7879_v12 = vld [vmem:[%s14864_s0 + $0x40] sm:$0xf]  ;;  %v10508_v50 = vld [vmem:[%s14864_s0 + $0x44] sm:$0xf0]  ;;  %v10592_v35 = vld [vmem:[%s14863_s1 + $0x98] sm:$0xff] }
  0xda   :  { %7855 = vmatmul.msk.bf16.gmra.mxu3 %vm164_vm0, %v7812_v29  ;;  %v7880_v42 = vor.u32 %v10508_v50, %v7879_v12  ;;  %v10552_v31 = vld [vmem:[%s14863_s1 + $0x148] sm:$0xff]  ;;  %v7896_v50 = vor.u32 %v10512_v36, %v7895_v34 }
  0xdb   :  { %2204 = vmatpush.bf16.msrb.mxu3 %v10592_v35  ;;  %v10551_v35 = vld [vmem:[%s14863_s1 + $0x140] sm:$0xff] }
  0xdd   :  { %v562_v41 = vpop.f32.mrf.mxu3 }
  0xde   :  { %v345_v40 = vpop.f32.mrf.mxu2  ;;  %v530_v44 = vpop.f32.mrf.mxu1 }
  0xdf   :  { %v346_v43 = vadd.f32 %v345_v40, %v233_v30  ;;  %v11685_v47 = vpop.f32.mrf.mxu0  ;;  %v560_v51 = vadd.f32 %v559_v23, %v530_v44  ;;  %v10526_v44 = vld [vmem:[%s14864_s0 + $0x54] sm:$0xf0] }
  0xe1   :  { %v11688_v52 = vadd.f32 %v11553_v26, %v346_v43  ;;  %v11691_v53 = vadd.f32 %v560_v51, %v11595_v55  ;;  %v10480_v26 = vld [vmem:[%s14864_s0 + $0x144] sm:$0xf0]  ;;  %v7975_v43 = vld [vmem:[%s14864_s0 + $0x50] sm:$0xf]  ;;  %v10527_v51 = vld [vmem:[%s14864_s0 + $0x64] sm:$0xf] }
  0xe2   :  { %1519 = vmatmul.bf16.vlgmr.msrb.gmra.mxu0 %v7880_v42  ;;  %v7808_v37 = vor.u32 %v10480_v26, %v7807_v57  ;;  %v7976_v57 = vor.u32 %v10526_v44, %v7975_v43  ;;  %v10513_v44 = vld [vmem:[%s14864_s0 + $0x174] sm:$0xf] }
  0xe3   :  { %7796 = vmatmul.msk.bf16.gmra.mxu2 %vm164_vm0, %v7752_v48 }
  0xe5   :  { %v564_v58 = vpop.f32.mrf.mxu3 }
  0xe6   :  { %v357_v55 = vpop.f32.mrf.mxu2  ;;  %v533_v2 = vpop.f32.mrf.mxu1 }
  0xe7   :  { %v358_v63 = vadd.f32 %v357_v55, %v11507_v1  ;;  %v11712_v4 = vpop.f32.mrf.mxu0  ;;  %v563_v5 = vadd.f32 %v562_v41, %v533_v2  ;;  %v10510_v1 = vld [vmem:[%s14864_s0 + $0x54] sm:$0xf0] }
  0xe8   :  { %v7888_v9 = vor.u32 %v10510_v1, %v7887_v45  ;;  %v10514_v45 = vld [vmem:[%s14864_s0 + $0x174] sm:$0xf0]  ;;  %v10589_v1 = vld [vmem:[%s14863_s1 + $0x80] sm:$0xff] }
  0xe9   :  { %v11714_v6 = vadd.f32 %v553_v61, %v358_v63  ;;  %v11717_v49 = vadd.f32 %v563_v5, %v11613_v3  ;;  %1335 = vmatmul.bf16.gmra.mxu1 %v7808_v37  ;;  %v7881_v3 = vld [vmem:[%s14864_s0 + $0x48] sm:$0xf0]  ;;  %v10559_v63 = vld [vmem:[%s14863_s1 + $0x180] sm:$0xff]  ;;  %v10591_v5 = vld [vmem:[%s14863_s1 + $0x90] sm:$0xff] }
  0xea   :  { %7856 = vmatmul.msk.bf16.gmra.mxu3 %vm164_vm0, %v11634_v16  ;;  %v7884_v19 = vor.u32 %v10507_v0, %v7881_v3  ;;  %v10590_v61 = vld [vmem:[%s14863_s1 + $0x88] sm:$0xff]  ;;  %1951 = vmatpush.bf16.msrb.mxu2 %v10559_v63 }
  0xeb   :  { %2169 = vmatpush.bf16.msrb.mxu1 %v10590_v61  ;;  %2205 = vmatpush.bf16.msrb.mxu3 %v10591_v5 }
  0xed   :  { %v567_v8 = vpop.f32.mrf.mxu3 }
  0xee   :  { %v359_v7 = vpop.f32.mrf.mxu2  ;;  %v535_v16 = vpop.f32.mrf.mxu1 }
  0xef   :  { %v360_v13 = vadd.f32 %v359_v7, %v11529_v14  ;;  %v11739_v17 = vpop.f32.mrf.mxu0  ;;  %v565_v20 = vadd.f32 %v564_v58, %v535_v16  ;;  %v10525_v14 = vld [vmem:[%s14864_s0 + $0x54] sm:$0xf]  ;;  %v10511_v7 = vld [vmem:[%s14864_s0 + $0x164] sm:$0xf]  ;;  %2170 = vmatpush.bf16.msrb.mxu1 %v10589_v1  ;;  %v10530_v1 = vld [vmem:[%s14864_s0 + $0x174] sm:$0xf0] }
  0xf0   :  { %v7980_v28 = vor.u32 %v10525_v14, %v7977_v59  ;;  %v10588_v59 = vld [vmem:[%s14863_s1 + $0x78] sm:$0xff] }
  0xf1   :  { %v11741_v21 = vadd.f32 %v555_v11, %v360_v13  ;;  %v11744_v62 = vadd.f32 %v565_v20, %v11637_v18  ;;  %v10553_v18 = vld [vmem:[%s14863_s1 + $0x150] sm:$0xff] }
  0xf2   :  { %1524 = vmatmul.bf16.gmra.mxu0 %v7888_v9 }
  0xf3   :  { %7949 = vmatmul.msk.bf16.vlgmr.msra.gmra.mxu2 %vm164_vm0, %v7884_v19  ;;  %1920 = vmatpush.bf16.msra.mxu0 %v10553_v18 }
  0xf4   :  { %2171 = vmatpush.bf16.msrb.mxu1 %v10588_v59 }
  0xf5   :  { %v569_v15 = vpop.f32.mrf.mxu3 }
  0xf6   :  { %v755_v23 = vpop.f32.mrf.mxu2  ;;  %v538_v24 = vpop.f32.mrf.mxu1 }
  0xf7   :  { %v11759_v25 = vpop.f32.mrf.mxu0  ;;  %v568_v29 = vadd.f32 %v567_v8, %v538_v24  ;;  %1921 = vmatpush.bf16.msra.mxu0 %v10552_v31  ;;  %v756_v48 = vadd.f32 %v755_v23, %v11685_v47  ;;  %v11809_v47 = vld [vmem:[%s14865_s2] ss:$0 sm:$0xff]  ;;  %v7897_v8 = vld [vmem:[%s14864_s0 + $0x168] sm:$0xf0]  ;;  %v10528_v23 = vld [vmem:[%s14864_s0 + $0x64] sm:$0xf0] }
  0xf8   :  { %v7900_v19 = vor.u32 %v10511_v7, %v7897_v8  ;;  %v10529_v24 = vld [vmem:[%s14864_s0 + $0x174] sm:$0xf]  ;;  %v10531_v7 = vld [vmem:[%s14864_s0 + $0x184] sm:$0xf]  ;;  %v8001_v8 = vld [vmem:[%s14864_s0 + $0x188] sm:$0xf0] }
  0xf9   :  { %v11762_v30 = vadd.f32 %v568_v29, %v11654_v32  ;;  %1340 = vmatmul.bf16.gmra.mxu1 %v11588_v46  ;;  %v10509_v32 = vld [vmem:[%s14864_s0 + $0x54] sm:$0xf]  ;;  %v7889_v46 = vld [vmem:[%s14864_s0 + $0x58] sm:$0xf0]  ;;  %v775_v37 = vadd.f32 %v756_v48, %v11714_v6  ;;  %v7903_v6 = vld [vmem:[%s14864_s0 + $0x170] sm:$0xf] }
  0xfa   :  { %8045 = vmatmul.msk.bf16.vlgmr.msra.gmra.mxu3 %vm164_vm0, %v7980_v28  ;;  %v7892_v40 = vor.u32 %v10509_v32, %v7889_v46  ;;  %v7904_v13 = vor.u32 %v10514_v45, %v7903_v6  ;;  %v7993_v28 = vld [vmem:[%s14864_s0 + $0x178] sm:$0xf0]  ;;  %v10587_v32 = vld [vmem:[%s14863_s1 + $0x70] sm:$0xff] }
  0xfb   :  { %1922 = vmatpush.bf16.msra.mxu0 %v10551_v35  ;;  %2172 = vmatpush.bf16.msrb.mxu1 %v10587_v32  ;;  %v7905_v48 = vld [vmem:[%s14864_s0 + $0x178] sm:$0xf0] }
  0xfc   :  { %v10576_v6 = vld [vmem:[%s14863_s1 + $0x38] sm:$0xff] }
  0xfd   :  { %v958_v12 = vpop.f32.mrf.mxu3  ;;  %v10584_v45 = vld [vmem:[%s14863_s1 + $0x58] sm:$0xff] }
  0xfe   :  { %v757_v38 = vpop.f32.mrf.mxu2  ;;  %v540_v39 = vpop.f32.mrf.mxu1 }
  0xff   :  { %v11784_v27 = vpop.f32.mrf.mxu0  ;;  %v570_v41 = vadd.f32 %v569_v15, %v540_v39  ;;  %v758_v0 = vadd.f32 %v757_v38, %v11712_v4  ;;  %v7983_v15 = vld [vmem:[%s14864_s0 + $0x60] sm:$0xf]  ;;  %v7996_v38 = vor.u32 %v10529_v24, %v7993_v28  ;;  %v10586_v39 = vld [vmem:[%s14863_s1 + $0x68] sm:$0xff]  ;;  %2311 = vmatpush.bf16.msrb.mxu0 %v10576_v6  ;;  %v10546_v24 = vld [vmem:[%s14864_s0 + $0x74] sm:$0xf0] }
 0x100   :  { %v7984_v36 = vor.u32 %v10528_v23, %v7983_v15  ;;  %2173 = vmatpush.bf16.msrb.mxu1 %v10586_v39  ;;  %v10578_v15 = vld [vmem:[%s14863_s1 + $0x48] sm:$0xff] }
 0x101   :  { %v11787_v42 = vadd.f32 %v570_v41, %v11688_v52  ;;  %v7985_v52 = vld [vmem:[%s14864_s0 + $0x68] sm:$0xf0]  ;;  %v776_v20 = vadd.f32 %v758_v0, %v11741_v21  ;;  %2346 = vmatpush.bf16.msra.mxu2 %v10578_v15 }
 0x102   :  { %1529 = vmatmul.bf16.gmra.mxu0 %v7896_v50  ;;  %v7988_v58 = vor.u32 %v10527_v51, %v7985_v52  ;;  %v10610_v23 = vld [vmem:[%s14863_s1 + $0xe8] sm:$0xff] }
 0x103   :  { %7950 = vmatmul.msk.bf16.gmra.mxu2 %vm164_vm0, %v7892_v40  ;;  %v8071_v40 = vld [vmem:[%s14864_s0 + $0x60] sm:$0xf]  ;;  %2540 = vmatpush.bf16.msra.mxu3 %v10610_v23 }
 0x105   :  { %v960_v56 = vpop.f32.mrf.mxu3 }
 0x106   :  { %v760_v54 = vpop.f32.mrf.mxu2  ;;  %v929_v55 = vpop.f32.mrf.mxu1 }
 0x107   :  { %v11803_v26 = vpop.f32.mrf.mxu0  ;;  %v959_v60 = vadd.f32 %v958_v12, %v929_v55  ;;  %v761_v21 = vadd.f32 %v760_v54, %v11739_v17 }
 0x109   :  { %v978_v2 = vadd.f32 %v959_v60, %v775_v37  ;;  %1721 = vmatmul.bf16.vlgmr.msra.gmra.mxu1 %v7976_v57  ;;  %v777_v12 = vadd.f32 %v761_v21, %v11657_v33  ;;  %v10544_v33 = vld [vmem:[%s14864_s0 + $0x64] sm:$0xf0]  ;;  %v10585_v57 = vld [vmem:[%s14863_s1 + $0x60] sm:$0xff]  ;;  %v7908_v60 = vor.u32 %v10513_v44, %v7905_v48  ;;  %v10572_v48 = vld [vmem:[%s14863_s1 + $0x18] sm:$0xff] }
 0x10a   :  { %8046 = vmatmul.msk.bf16.gmra.mxu3 %vm164_vm0, %v7988_v58  ;;  %2174 = vmatpush.bf16.msrb.mxu1 %v10585_v57  ;;  %v8169_v57 = vld [vmem:[%s14864_s0 + $0x58] sm:$0xf0] }
 0x10b   :  { %v990_v3 = vadd.f32 %v11809_v47, %v978_v2 }
 0x10d   :  { %v998_v9 = vmax.f32 %v990_v3, 0.0  ;;  %v963_v11 = vpop.f32.mrf.mxu3 }
 0x10e   :  { %v762_v10 = vpop.f32.mrf.mxu2  ;;  %v931_v4 = vpop.f32.mrf.mxu1  ;;  %2175 = vmatpush.bf16.msrb.mxu1 %v10584_v45 }
 0x10f   :  { %v11838_v16 = vpop.f32.mrf.mxu0  ;;  %1007 = vst.msk [vmem:[#allocation2] sm:$0xff] %vm1006_vm1, %v998_v9  ;;  %v961_v22 = vadd.f32 %v960_v56, %v931_v4  ;;  %v763_v41 = vadd.f32 %v762_v10, %v11759_v25  ;;  %v8072_v56 = vor.u32 %v10544_v33, %v8071_v40  ;;  %v10583_v4 = vld [vmem:[%s14863_s1 + $0x50] sm:$0xff] }
 0x111   :  { %v979_v14 = vadd.f32 %v961_v22, %v776_v20  ;;  %v778_v61 = vadd.f32 %v763_v41, %v11691_v53  ;;  %v7991_v53 = vld [vmem:[%s14864_s0 + $0x170] sm:$0xf]  ;;  %v8004_v22 = vor.u32 %v10531_v7, %v8001_v8  ;;  %v10570_v7 = vld [vmem:[%s14863_s1 + $0x8] sm:$0xff] }
 0x112   :  { %1534 = vmatmul.bf16.gmra.mxu0 %v7904_v13  ;;  %v7992_v13 = vor.u32 %v10530_v1, %v7991_v53  ;;  %2176 = vmatpush.bf16.msrb.mxu1 %v10583_v4  ;;  %v8081_v4 = vld [vmem:[%s14864_s0 + $0x78] sm:$0xf0] }
 0x113   :  { %7951 = vmatmul.msk.bf16.gmra.mxu2 %vm164_vm0, %v7900_v19  ;;  %v991_v18 = vadd.f32 %v11809_v47, %v979_v14 }
 0x115   :  { %v999_v29 = vmax.f32 %v991_v18, 0.0  ;;  %v965_v34 = vpop.f32.mrf.mxu3  ;;  %v10574_v18 = vld [vmem:[%s14863_s1 + $0x28] sm:$0xff] }
 0x116   :  { %v765_v31 = vpop.f32.mrf.mxu2  ;;  %v934_v46 = vpop.f32.mrf.mxu1 }
 0x117   :  { %v11863_v17 = vpop.f32.mrf.mxu0  ;;  %1008 = vst.msk [vmem:[#allocation2 + $0x8] sm:$0xff] %vm1006_vm1, %v999_v29  ;;  %v964_v50 = vadd.f32 %v963_v11, %v934_v46  ;;  %v766_v0 = vadd.f32 %v765_v31, %v11784_v27  ;;  %v10575_v27 = vld [vmem:[%s14863_s1 + $0x30] sm:$0xff]  ;;  %v10543_v31 = vld [vmem:[%s14864_s0 + $0x64] sm:$0xf] }
 0x118   :  { %2312 = vmatpush.bf16.msrb.mxu0 %v10575_v27  ;;  %v10545_v27 = vld [vmem:[%s14864_s0 + $0x74] sm:$0xf] }
 0x119   :  { %v980_v35 = vadd.f32 %v964_v50, %v777_v12  ;;  %1726 = vmatmul.bf16.gmra.mxu1 %v7984_v36  ;;  %v779_v14 = vadd.f32 %v766_v0, %v11717_v49  ;;  %v8079_v49 = vld [vmem:[%s14864_s0 + $0x70] sm:$0xf] }
 0x11a   :  { %8047 = vmatmul.msk.bf16.gmra.mxu3 %vm164_vm0, %v7996_v38  ;;  %v8080_v38 = vor.u32 %v10546_v24, %v8079_v49 }
 0x11b   :  { %v992_v43 = vadd.f32 %v11809_v47, %v980_v35 }
 0x11c   :  { %2313 = vmatpush.bf16.msrb.mxu0 %v10574_v18 }
 0x11d   :  { %v1000_v51 = vmax.f32 %v992_v43, 0.0  ;;  %v968_v54 = vpop.f32.mrf.mxu3 }
 0x11e   :  { %v767_v52 = vpop.f32.mrf.mxu2  ;;  %v6979_v25 = vld [vmem:[#allocation2] ss:$2 sm:$0xff]  ;;  %v7035_v55 = vld [vmem:[#allocation2 + $0x1] ss:$2 sm:$0xff]  ;;  %v936_v58 = vpop.f32.mrf.mxu1 }
 0x11f   :  { %v11888_v37 = vpop.f32.mrf.mxu0  ;;  %v7090_v63 = vmax.f32 %v6979_v25, %v7035_v55  ;;  %1009 = vst.msk [vmem:[#allocation2 + $0x10] sm:$0xff] %vm1006_vm1, %v1000_v51  ;;  %v966_v2 = vadd.f32 %v965_v34, %v936_v58  ;;  %v768_v28 = vadd.f32 %v767_v52, %v11803_v26  ;;  %v8073_v34 = vld [vmem:[%s14864_s0 + $0x68] sm:$0xf0]  ;;  %v10573_v26 = vld [vmem:[%s14863_s1 + $0x20] sm:$0xff] }
 0x120   :  { %v8076_v40 = vor.u32 %v10543_v31, %v8073_v34  ;;  %2314 = vmatpush.bf16.msrb.mxu0 %v10573_v26  ;;  %v7999_v51 = vld [vmem:[%s14864_s0 + $0x180] sm:$0xf]  ;;  %v10564_v26 = vld [vmem:[%s14864_s0 + $0x54] sm:$0xf0] }
 0x121   :  { %7118 = vst.msk [vmem:[#allocation3] sm:$0xff] %vm1006_vm1, %v7090_v63  ;;  %v981_v5 = vadd.f32 %v966_v2, %v778_v61  ;;  %v780_v33 = vadd.f32 %v768_v28, %v11744_v62  ;;  %v10532_v62 = vld [vmem:[%s14864_s0 + $0x184] sm:$0xf0]  ;;  %v10571_v61 = vld [vmem:[%s14863_s1 + $0x10] sm:$0xff]  ;;  %v8084_v28 = vor.u32 %v10545_v27, %v8081_v4 }
 0x122   :  { %1923 = vmatmul.bf16.vlgmr.msra.gmra.mxu0 %v8072_v56  ;;  %v10563_v56 = vld [vmem:[%s14864_s0 + $0x54] sm:$0xf] }
 0x123   :  { %7952 = vmatmul.msk.bf16.gmra.mxu2 %vm164_vm0, %v7908_v60  ;;  %v993_v3 = vadd.f32 %v11809_v47, %v981_v5  ;;  %v8000_v60 = vor.u32 %v10532_v62, %v7999_v51  ;;  %v11982_v5 = vor.u32 %v10563_v56, %v8169_v57  ;;  %v10605_v56 = vld [vmem:[%s14863_s1 + $0xc0] sm:$0xff]  ;;  %v10550_v57 = vld [vmem:[%s14864_s0 + $0x194] sm:$0xf0] }
 0x124   :  { %2315 = vmatpush.bf16.msrb.mxu0 %v10572_v48 }
 0x125   :  { %v1001_v9 = vmax.f32 %v993_v3, 0.0  ;;  %v970_v11 = vpop.f32.mrf.mxu3 }
 0x126   :  { %v770_v10 = vpop.f32.mrf.mxu2  ;;  %v939_v19 = vpop.f32.mrf.mxu1 }
 0x127   :  { %v11920_v20 = vpop.f32.mrf.mxu0  ;;  %1010 = vst.msk [vmem:[#allocation2 + $0x18] sm:$0xff] %vm1006_vm1, %v1001_v9  ;;  %v969_v59 = vadd.f32 %v968_v54, %v939_v19  ;;  %v771_v52 = vadd.f32 %v770_v10, %v11838_v16  ;;  %v10548_v9 = vld [vmem:[%s14864_s0 + $0x184] sm:$0xf0] }
 0x128   :  { %2316 = vmatpush.bf16.msrb.mxu0 %v10571_v61  ;;  %v7146_v53 = vld [vmem:[#allocation3] sm:$0xff] }
 0x129   :  { %v982_v21 = vadd.f32 %v969_v59, %v779_v14  ;;  %1731 = vmatmul.bf16.gmra.mxu1 %v7992_v13  ;;  %v781_v6 = vadd.f32 %v771_v52, %v11762_v30  ;;  %v8087_v30 = vld [vmem:[%s14864_s0 + $0x180] sm:$0xf] }
 0x12a   :  { %8048 = vmatmul.msk.bf16.gmra.mxu3 %vm164_vm0, %v8004_v22  ;;  %v8088_v15 = vor.u32 %v10548_v9, %v8087_v30  ;;  %v10626_v30 = vld [vmem:[%s14863_s1 + $0x128] sm:$0xff] }
 0x12b   :  { %v994_v29 = vadd.f32 %v11809_v47, %v982_v21  ;;  %v10580_v9 = vld [vmem:[%s14864_s0 + $0x64] sm:$0xf0] }
 0x12c   :  { %2317 = vmatpush.bf16.msrb.mxu0 %v10570_v7  ;;  %v10604_v7 = vld [vmem:[%s14863_s1 + $0xb8] sm:$0xff] }
 0x12d   :  { %v1002_v36 = vmax.f32 %v994_v29, 0.0  ;;  %v973_v46 = vpop.f32.mrf.mxu3  ;;  %v10608_v29 = vld [vmem:[%s14863_s1 + $0xd8] sm:$0xff] }
 0x12e   :  { %v772_v32 = vpop.f32.mrf.mxu2  ;;  %v6981_v12 = vld [vmem:[#allocation2 + $0x10] ss:$2 sm:$0xff]  ;;  %v7037_v50 = vld [vmem:[#allocation2 + $0x11] ss:$2 sm:$0xff]  ;;  %v941_v35 = vpop.f32.mrf.mxu1  ;;  %2505 = vmatpush.bf16.msra.mxu1 %v10608_v29 }
 0x12f   :  { %v11951_v39 = vpop.f32.mrf.mxu0  ;;  %v7091_v41 = vmax.f32 %v6981_v12, %v7037_v50  ;;  %1011 = vst.msk [vmem:[#allocation2 + $0xe0] sm:$0xff] %vm1006_vm1, %v1002_v36  ;;  %v971_v43 = vadd.f32 %v970_v11, %v941_v35  ;;  %v773_v11 = vadd.f32 %v772_v32, %v11863_v17  ;;  %v10569_v17 = vld [vmem:[%s14863_s1] sm:$0xff]  ;;  %v8177_v35 = vld [vmem:[%s14864_s0 + $0x68] sm:$0xf0]  ;;  %v10628_v29 = vld [vmem:[%s14863_s1 + $0x138] sm:$0xff] }
 0x130   :  { %v10577_v32 = vld [vmem:[%s14863_s1 + $0x40] sm:$0xff]  ;;  %2318 = vmatpush.bf16.msrb.mxu0 %v10569_v17 }
 0x131   :  { %7119 = vst.msk [vmem:[#allocation3 + $0x8] sm:$0xff] %vm1006_vm1, %v7091_v41  ;;  %v983_v44 = vadd.f32 %v971_v43, %v780_v33  ;;  %v782_v31 = vadd.f32 %v773_v11, %v11787_v42  ;;  %2347 = vmatpush.bf16.msra.mxu2 %v10577_v32  ;;  %v10579_v50 = vld [vmem:[%s14864_s0 + $0x64] sm:$0xf]  ;;  %v8185_v11 = vld [vmem:[%s14864_s0 + $0x178] sm:$0xf0] }
 0x132   :  { %1928 = vmatmul.bf16.gmra.mxu0 %v8080_v38  ;;  %v8167_v38 = vld [vmem:[%s14864_s0 + $0x50] sm:$0xf]  ;;  %v8180_v62 = vor.u32 %v10579_v50, %v8177_v35 }
 0x133   :  { %8141 = vmatmul.msk.bf16.vlgmr.msrb.gmra.mxu2 %vm164_vm0, %v8076_v40  ;;  %v995_v54 = vadd.f32 %v11809_v47, %v983_v44  ;;  %v10606_v40 = vld [vmem:[%s14863_s1 + $0xc8] sm:$0xff]  ;;  %v12055_v44 = vor.u32 %v10564_v26, %v8167_v38 }
 0x134   :  { %2707 = vmatpush.bf16.msra.mxu0 %v10626_v30 }
 0x135   :  { %v1003_v25 = vmax.f32 %v995_v54, 0.0  ;;  %v975_v55 = vpop.f32.mrf.mxu3  ;;  %2742 = vmatpush.bf16.msrb.mxu2 %v10628_v29 }
 0x136   :  { %v1213_v58 = vpop.f32.mrf.mxu2  ;;  %v944_v63 = vpop.f32.mrf.mxu1 }
 0x137   :  { %v11978_v16 = vadd.f32 %v1213_v58, %v11888_v37  ;;  %v11980_v2 = vpop.f32.mrf.mxu0  ;;  %1012 = vst.msk [vmem:[#allocation2 + $0xe8] sm:$0xff] %vm1006_vm1, %v1003_v25  ;;  %v974_v45 = vadd.f32 %v973_v46, %v944_v63  ;;  %v7157_v37 = vld [vmem:[%s14866_s3] sm:$0xf]  ;;  %v10607_v46 = vld [vmem:[%s14863_s1 + $0xd0] sm:$0xff]  ;;  %v10547_v25 = vld [vmem:[%s14864_s0 + $0x184] sm:$0xf] }
 0x138   :  { %v7148_v1 = vld [vmem:[#allocation3 + $0x8] sm:$0xff]  ;;  %2506 = vmatpush.bf16.msra.mxu1 %v10607_v46  ;;  %v8097_v46 = vld [vmem:[%s14864_s0 + $0x198] sm:$0xf0] }
 0x139   :  { %v7150_v0 = vmax.f32 %v7146_v53, %v7148_v1  ;;  %v984_v3 = vadd.f32 %v974_v45, %v781_v6  ;;  %1736 = vmatmul.bf16.gmra.mxu1 %v8000_v60 }
 0x13a   :  { %8237 = vmatmul.msk.bf16.vlgmr.msrb.gmra.mxu3 %vm164_vm0, %v11982_v5 }
 0x13b   :  { %v7152_v10 = vpack.c.bf16 %v7150_v0, %v7150_v0  ;;  %v996_v13 = vadd.f32 %v11809_v47, %v984_v3 }
 0x13c   :  { %2507 = vmatpush.bf16.msra.mxu1 %v10606_v40 }
 0x13d   :  { %v7158_v19 = vsel %vm11992_vm4, %v7152_v10, %v7157_v37  ;;  %v1004_v22 = vmax.f32 %v996_v13, 0.0  ;;  %v1355_v59 = vpop.f32.mrf.mxu3  ;;  %v10567_v10 = vld [vmem:[%s14864_s0 + $0x174] sm:$0xf] }
 0x13e   :  { %v1215_v14 = vpop.f32.mrf.mxu2  ;;  %7159 = vst [vmem:[%s14866_s3] sm:$0xf] %v7158_v19  ;;  %v7007_v23 = vld [vmem:[#allocation2 + $0xe0] ss:$2 sm:$0xff]  ;;  %v7063_v21 = vld [vmem:[#allocation2 + $0xe1] ss:$2 sm:$0xff]  ;;  %v946_v49 = vpop.f32.mrf.mxu1 }
 0x13f   :  { %v1216_v18 = vadd.f32 %v1215_v14, %v11920_v20  ;;  %v12021_v24 = vpop.f32.mrf.mxu0  ;;  %v7104_v34 = vmax.f32 %v7007_v23, %v7063_v21  ;;  %1013 = vst.msk [vmem:[#allocation2 + $0xf0] sm:$0xff] %vm1006_vm1, %v1004_v22  ;;  %v976_v36 = vadd.f32 %v975_v55, %v946_v49  ;;  %v10609_v20 = vld [vmem:[%s14863_s1 + $0xe0] sm:$0xff]  ;;  %v8089_v55 = vld [vmem:[%s14864_s0 + $0x188] sm:$0xf0]  ;;  %v7160_v21 = vld [vmem:[%s14866_s3 + $0x1c] sm:$0xf] }
 0x140   :  { %2541 = vmatpush.bf16.msra.mxu3 %v10609_v20  ;;  %2508 = vmatpush.bf16.msra.mxu1 %v10605_v56  ;;  %v8092_v1 = vor.u32 %v10547_v25, %v8089_v55  ;;  %v10549_v20 = vld [vmem:[%s14864_s0 + $0x194] sm:$0xf]  ;;  %v8193_v56 = vld [vmem:[%s14864_s0 + $0x188] sm:$0xf0]  ;;  %v10601_v55 = vld [vmem:[%s14863_s1 + $0xa0] sm:$0xff] }
 0x141   :  { %7132 = vst.msk [vmem:[#allocation3 + $0x70] sm:$0xff] %vm1006_vm1, %v7104_v34  ;;  %v985_v42 = vadd.f32 %v976_v36, %v782_v31  ;;  %v8243_v31 = vld [vmem:[%s14864_s0 + $0x40] sm:$0xf]  ;;  %v10562_v34 = vld [vmem:[%s14864_s0 + $0x44] sm:$0xf0] }
 0x142   :  { %1933 = vmatmul.bf16.gmra.mxu0 %v8088_v15  ;;  %v10646_v36 = vld [vmem:[%s14863_s1 + $0x188] sm:$0xff] }
 0x143   :  { %8142 = vmatmul.msk.bf16.gmra.mxu2 %vm164_vm0, %v8084_v28  ;;  %v997_v12 = vadd.f32 %v11809_v47, %v985_v42  ;;  %v10625_v28 = vld [vmem:[%s14863_s1 + $0x120] sm:$0xff] }
 0x144   :  { %2509 = vmatpush.bf16.msra.mxu1 %v10604_v7  ;;  %2708 = vmatpush.bf16.msra.mxu0 %v10625_v28 }
 0x145   :  { %v1005_v33 = vmax.f32 %v997_v12, 0.0  ;;  %v1357_v43 = vpop.f32.mrf.mxu3  ;;  %2944 = vmatpush.bf16.msrb.mxu3 %v10646_v36  ;;  %v8244_v12 = vor.u32 %v10562_v34, %v8243_v31  ;;  %v10627_v36 = vld [vmem:[%s14863_s1 + $0x130] sm:$0xff] }
 0x146   :  { %v1218_v41 = vpop.f32.mrf.mxu2  ;;  %v1326_v51 = vpop.f32.mrf.mxu1  ;;  %2743 = vmatpush.bf16.msrb.mxu2 %v10627_v36 }
 0x147   :  { %v1219_v47 = vadd.f32 %v1218_v41, %v11951_v39  ;;  %v12058_v48 = vpop.f32.mrf.mxu0  ;;  %1014 = vst.msk [vmem:[#allocation2 + $0xf8] sm:$0xff] %vm1006_vm1, %v1005_v33  ;;  %v1327_v52 = vadd.f32 %v1326_v51, %v11978_v16  ;;  %v8095_v39 = vld [vmem:[%s14864_s0 + $0x190] sm:$0xf]  ;;  %v8100_v33 = vor.u32 %v10549_v20, %v8097_v46  ;;  %v10624_v51 = vld [vmem:[%s14863_s1 + $0x118] sm:$0xff]  ;;  %v10566_v46 = vld [vmem:[%s14864_s0 + $0x164] sm:$0xf0] }
 0x148   :  { %v8096_v61 = vor.u32 %v10550_v57, %v8095_v39  ;;  %v7147_v17 = vld [vmem:[#allocation3 + $0x70] sm:$0xff]  ;;  %2709 = vmatpush.bf16.msra.mxu0 %v10624_v51  ;;  %v10620_v20 = vld [vmem:[%s14863_s1 + $0xf8] sm:$0xff] }
 0x149   :  { %v12062_v54 = vadd.f32 %v1355_v59, %v1327_v52  ;;  %2177 = vmatmul.bf16.vlgmr.msrb.gmra.mxu1 %v12055_v44  ;;  %v12109_v59 = vor.u32 %v10567_v10, %v8185_v11  ;;  %v10581_v52 = vld [vmem:[%s14864_s0 + $0x184] sm:$0xf] }
 0x14a   :  { %8238 = vmatmul.msk.bf16.gmra.mxu3 %vm164_vm0, %v8180_v62  ;;  %v10568_v62 = vld [vmem:[%s14864_s0 + $0x174] sm:$0xf0] }
 0x14d   :  { %v1360_v60 = vpop.f32.mrf.mxu3 }
 0x14e   :  { %v1220_v58 = vpop.f32.mrf.mxu2  ;;  %v7009_v16 = vld [vmem:[#allocation2 + $0xf0] ss:$2 sm:$0xff]  ;;  %v7065_v63 = vld [vmem:[#allocation2 + $0xf1] ss:$2 sm:$0xff]  ;;  %v1328_v53 = vpop.f32.mrf.mxu1 }
 0x14f   :  { %v1221_v6 = vadd.f32 %v1220_v58, %v11980_v2  ;;  %v12082_v45 = vpop.f32.mrf.mxu0  ;;  %v7105_v0 = vmax.f32 %v7009_v16, %v7065_v63  ;;  %v1329_v37 = vadd.f32 %v1328_v53, %v1216_v18  ;;  %v8175_v2 = vld [vmem:[%s14864_s0 + $0x60] sm:$0xf]  ;;  %v8196_v16 = vor.u32 %v10581_v52, %v8193_v56  ;;  %v10623_v53 = vld [vmem:[%s14863_s1 + $0x110] sm:$0xff]  ;;  %v8333_v56 = vld [vmem:[%s14864_s0 + $0x78] sm:$0xf0] }
 0x150   :  { %v8176_v4 = vor.u32 %v10580_v9, %v8175_v2  ;;  %2710 = vmatpush.bf16.msra.mxu0 %v10623_v53  ;;  %v10595_v52 = vld [vmem:[%s14864_s0 + $0x74] sm:$0xf]  ;;  %v10565_v53 = vld [vmem:[%s14864_s0 + $0x164] sm:$0xf] }
 0x151   :  { %7133 = vst.msk [vmem:[#allocation3 + $0x78] sm:$0xff] %vm1006_vm1, %v7105_v0  ;;  %v12085_v3 = vadd.f32 %v1357_v43, %v1329_v37 }
 0x152   :  { %1938 = vmatmul.bf16.gmra.mxu0 %v8096_v61 }
 0x153   :  { %8143 = vmatmul.msk.bf16.gmra.mxu2 %vm164_vm0, %v8092_v1  ;;  %v10561_v1 = vld [vmem:[%s14864_s0 + $0x44] sm:$0xf] }
 0x155   :  { %v1362_v27 = vpop.f32.mrf.mxu3 }
 0x156   :  { %v1223_v13 = vpop.f32.mrf.mxu2  ;;  %v1331_v14 = vpop.f32.mrf.mxu1 }
 0x157   :  { %v1224_v19 = vadd.f32 %v1223_v13, %v12021_v24  ;;  %v12107_v22 = vpop.f32.mrf.mxu0  ;;  %v1332_v15 = vadd.f32 %v1331_v14, %v1219_v47  ;;  %v10603_v24 = vld [vmem:[%s14863_s1 + $0xb0] sm:$0xff]  ;;  %v10602_v47 = vld [vmem:[%s14863_s1 + $0xa8] sm:$0xff] }
 0x158   :  { %v7149_v23 = vld [vmem:[#allocation3 + $0x78] sm:$0xff]  ;;  %2510 = vmatpush.bf16.msra.mxu1 %v10603_v24  ;;  %v10622_v13 = vld [vmem:[%s14863_s1 + $0x108] sm:$0xff] }
 0x159   :  { %v7151_v18 = vmax.f32 %v7147_v17, %v7149_v23  ;;  %v12114_v49 = vadd.f32 %v1360_v60, %v1332_v15  ;;  %2182 = vmatmul.bf16.gmra.mxu1 %v8176_v4  ;;  %v8191_v4 = vld [vmem:[%s14864_s0 + $0x180] sm:$0xf]  ;;  %2711 = vmatpush.bf16.msra.mxu0 %v10622_v13  ;;  %v8331_v13 = vld [vmem:[%s14864_s0 + $0x70] sm:$0xf] }
 0x15a   :  { %8239 = vmatmul.msk.bf16.gmra.mxu3 %vm164_vm0, %v12109_v59  ;;  %v10621_v23 = vld [vmem:[%s14863_s1 + $0x100] sm:$0xff] }
 0x15b   :  { %v7153_v32 = vpack.c.bf16 %v7151_v18, %v7151_v18 }
 0x15c   :  { %2511 = vmatpush.bf16.msra.mxu1 %v10602_v47 }
 0x15d   :  { %v7161_v42 = vsel %vm11992_vm4, %v7153_v32, %v7160_v21  ;;  %v1365_v26 = vpop.f32.mrf.mxu3  ;;  %2712 = vmatpush.bf16.msra.mxu0 %v10621_v23  ;;  %v10643_v32 = vld [vmem:[%s14863_s1 + $0x170] sm:$0xff] }
 0x15e   :  { %v1225_v38 = vpop.f32.mrf.mxu2  ;;  %7162 = vst [vmem:[%s14866_s3 + $0x1c] sm:$0xf] %v7161_v42  ;;  %v1333_v35 = vpop.f32.mrf.mxu1  ;;  %v10645_v42 = vld [vmem:[%s14863_s1 + $0x180] sm:$0xff] }
 0x15f   :  { %v1226_v50 = vadd.f32 %v1225_v38, %v12058_v48  ;;  %v1520_v40 = vpop.f32.mrf.mxu0  ;;  %v1334_v41 = vadd.f32 %v1333_v35, %v1221_v6  ;;  %v8183_v48 = vld [vmem:[%s14864_s0 + $0x170] sm:$0xf]  ;;  %2945 = vmatpush.bf16.msrb.mxu3 %v10645_v42  ;;  %v10664_v42 = vld [vmem:[%s14863_s1 + $0x48] sm:$0xff] }
 0x160   :  { %v12169_v25 = vor.u32 %v10568_v62, %v8183_v48  ;;  %2512 = vmatpush.bf16.msra.mxu1 %v10601_v55  ;;  %v10642_v48 = vld [vmem:[%s14863_s1 + $0x168] sm:$0xff]  ;;  %v8323_v62 = vld [vmem:[%s14864_s0 + $0x60] sm:$0xf] }
 0x161   :  { %v12148_v43 = vadd.f32 %v1362_v27, %v1334_v41  ;;  %v10644_v27 = vld [vmem:[%s14863_s1 + $0x178] sm:$0xff]  ;;  %2713 = vmatpush.bf16.msra.mxu0 %v10620_v20 }
 0x162   :  { %2319 = vmatmul.bf16.vlgmr.msrb.gmra.mxu0 %v8244_v12 }
 0x163   :  { %8144 = vmatmul.msk.bf16.gmra.mxu2 %vm164_vm0, %v8100_v33 }
 0x164   :  { %2909 = vmatpush.bf16.msrb.mxu1 %v10644_v27  ;;  %v8341_v27 = vld [vmem:[%s14864_s0 + $0x188] sm:$0xf0] }
 0x165   :  { %v1367_v57 = vpop.f32.mrf.mxu3 }
 0x166   :  { %v1228_v39 = vpop.f32.mrf.mxu2  ;;  %v1336_v60 = vpop.f32.mrf.mxu1 }
 0x167   :  { %v1229_v58 = vadd.f32 %v1228_v39, %v12082_v45  ;;  %v1522_v61 = vpop.f32.mrf.mxu0  ;;  %v1337_v63 = vadd.f32 %v1336_v60, %v1224_v19  ;;  %v8245_v45 = vld [vmem:[%s14864_s0 + $0x48] sm:$0xf0]  ;;  %v10582_v19 = vld [vmem:[%s14864_s0 + $0x184] sm:$0xf0] }
 0x168   :  { %v8248_v9 = vor.u32 %v10561_v1, %v8245_v45  ;;  %v8192_v17 = vor.u32 %v10582_v19, %v8191_v4  ;;  %2910 = vmatpush.bf16.msrb.mxu1 %v10643_v32  ;;  %v8253_v1 = vld [vmem:[%s14864_s0 + $0x168] sm:$0xf0] }
 0x169   :  { %v12175_v6 = vadd.f32 %v1365_v26, %v1337_v63  ;;  %2187 = vmatmul.bf16.gmra.mxu1 %v12169_v25  ;;  %v10641_v63 = vld [vmem:[%s14863_s1 + $0x160] sm:$0xff] }
 0x16a   :  { %8240 = vmatmul.msk.bf16.gmra.mxu3 %vm164_vm0, %v8196_v16 }
 0x16c   :  { %2911 = vmatpush.bf16.msrb.mxu1 %v10642_v48  ;;  %v10637_v48 = vld [vmem:[%s14863_s1 + $0x140] sm:$0xff] }
 0x16d   :  { %v1370_v37 = vpop.f32.mrf.mxu3 }
 0x16e   :  { %v1230_v0 = vpop.f32.mrf.mxu2  ;;  %v1338_v30 = vpop.f32.mrf.mxu1 }
 0x16f   :  { %v1231_v7 = vadd.f32 %v1230_v0, %v12107_v22  ;;  %v1525_v2 = vpop.f32.mrf.mxu0  ;;  %v1339_v10 = vadd.f32 %v1338_v30, %v1226_v50  ;;  %v8325_v22 = vld [vmem:[%s14864_s0 + $0x68] sm:$0xf0]  ;;  %v10619_v50 = vld [vmem:[%s14863_s1 + $0xf0] sm:$0xff]  ;;  %v8256_v30 = vor.u32 %v10565_v53, %v8253_v1 }
 0x170   :  { %2714 = vmatpush.bf16.msra.mxu0 %v10619_v50  ;;  %2912 = vmatpush.bf16.msrb.mxu1 %v10641_v63  ;;  %v8339_v50 = vld [vmem:[%s14864_s0 + $0x180] sm:$0xf] }
 0x171   :  { %v12189_v11 = vadd.f32 %v1367_v57, %v1339_v10  ;;  %v10676_v10 = vld [vmem:[%s14863_s1 + $0x88] sm:$0xff] }
 0x172   :  { %2324 = vmatmul.bf16.gmra.mxu0 %v12055_v44  ;;  %v10593_v44 = vld [vmem:[%s14864_s0 + $0x64] sm:$0xf] }
 0x173   :  { %8297 = vmatmul.msk.bf16.vlgmr.msra.gmra.mxu2 %vm164_vm0, %v8248_v9  ;;  %v8328_v28 = vor.u32 %v10593_v44, %v8325_v22  ;;  %v10640_v9 = vld [vmem:[%s14863_s1 + $0x158] sm:$0xff] }
 0x174   :  { %2913 = vmatpush.bf16.msrb.mxu1 %v10640_v9  ;;  %3163 = vmatpush.bf16.msrb.mxu0 %v10676_v10 }
 0x175   :  { %v1372_v14 = vpop.f32.mrf.mxu3 }
 0x176   :  { %v1549_v15 = vpop.f32.mrf.mxu2  ;;  %v1341_v18 = vpop.f32.mrf.mxu1 }
 0x177   :  { %v1550_v21 = vadd.f32 %v1549_v15, %v1520_v40  ;;  %v1527_v24 = vpop.f32.mrf.mxu0  ;;  %v1342_v29 = vadd.f32 %v1341_v18, %v1229_v58  ;;  %v10612_v18 = vld [vmem:[%s14864_s0 + $0x74] sm:$0xf0] }
 0x179   :  { %v12215_v31 = vadd.f32 %v1550_v21, %v12062_v54  ;;  %v12217_v34 = vadd.f32 %v1370_v37, %v1342_v29  ;;  %2192 = vmatmul.bf16.gmra.mxu1 %v8192_v17  ;;  %v8251_v54 = vld [vmem:[%s14864_s0 + $0x160] sm:$0xf]  ;;  %v8419_v21 = vld [vmem:[%s14864_s0 + $0x70] sm:$0xf] }
 0x17a   :  { %8393 = vmatmul.msk.bf16.vlgmr.msra.gmra.mxu3 %vm164_vm0, %v8328_v28  ;;  %v8252_v12 = vor.u32 %v10566_v46, %v8251_v54  ;;  %v8420_v29 = vor.u32 %v10612_v18, %v8419_v21  ;;  %v10675_v54 = vld [vmem:[%s14863_s1 + $0x80] sm:$0xff]  ;;  %v10678_v46 = vld [vmem:[%s14863_s1 + $0x98] sm:$0xff] }
 0x17b   :  { %3164 = vmatpush.bf16.msrb.mxu0 %v10675_v54  ;;  %3198 = vmatpush.bf16.msra.mxu2 %v10678_v46  ;;  %v12422_v21 = vld [vmem:[%s14865_s2] ss:$0 sm:$0xff]  ;;  %v8435_v54 = vld [vmem:[%s14864_s0 + $0x190] sm:$0xf]  ;;  %v10616_v46 = vld [vmem:[%s14864_s0 + $0x194] sm:$0xf0] }
 0x17c   :  { %3340 = vmatpush.bf16.msra.mxu3 %v10664_v42  ;;  %v10613_v42 = vld [vmem:[%s14864_s0 + $0x84] sm:$0xf] }
 0x17d   :  { %v12238_v26 = vpop.f32.mrf.mxu3 }
 0x17e   :  { %v1551_v38 = vpop.f32.mrf.mxu2  ;;  %v1343_v40 = vpop.f32.mrf.mxu1 }
 0x17f   :  { %v1552_v35 = vadd.f32 %v1551_v38, %v1522_v61  ;;  %v1530_v33 = vpop.f32.mrf.mxu0  ;;  %v1344_v41 = vadd.f32 %v1343_v40, %v1231_v7  ;;  %v8336_v61 = vor.u32 %v10595_v52, %v8333_v56  ;;  %v8349_v40 = vld [vmem:[%s14864_s0 + $0x198] sm:$0xf0] }
 0x181   :  { %v12244_v47 = vadd.f32 %v1552_v35, %v12085_v3  ;;  %v12246_v51 = vadd.f32 %v1372_v14, %v1344_v41  ;;  %v10594_v3 = vld [vmem:[%s14864_s0 + $0x64] sm:$0xf0]  ;;  %v10599_v35 = vld [vmem:[%s14864_s0 + $0x194] sm:$0xf] }
 0x182   :  { %2329 = vmatmul.bf16.gmra.mxu0 %v8252_v12  ;;  %v10638_v12 = vld [vmem:[%s14863_s1 + $0x148] sm:$0xff]  ;;  %v8352_v56 = vor.u32 %v10599_v35, %v8349_v40  ;;  %v10669_v35 = vld [vmem:[%s14863_s1 + $0x50] sm:$0xff] }
 0x183   :  { %8298 = vmatmul.msk.bf16.gmra.mxu2 %vm164_vm0, %v11982_v5  ;;  %v8324_v5 = vor.u32 %v10594_v3, %v8323_v62 }
 0x185   :  { %v12265_v57 = vpop.f32.mrf.mxu3 }
 0x186   :  { %v1554_v39 = vpop.f32.mrf.mxu2  ;;  %v12267_v60 = vpop.f32.mrf.mxu1 }
 0x187   :  { %v1555_v55 = vadd.f32 %v1554_v39, %v1525_v2  ;;  %v1532_v58 = vpop.f32.mrf.mxu0 }
 0x189   :  { %v12270_v16 = vadd.f32 %v1555_v55, %v12114_v49  ;;  %2513 = vmatmul.bf16.vlgmr.msra.gmra.mxu1 %v8324_v5  ;;  %v10674_v5 = vld [vmem:[%s14863_s1 + $0x78] sm:$0xff]  ;;  %v8427_v55 = vld [vmem:[%s14864_s0 + $0x80] sm:$0xf] }
 0x18a   :  { %8394 = vmatmul.msk.bf16.gmra.mxu3 %vm164_vm0, %v8336_v61  ;;  %v8421_v61 = vld [vmem:[%s14864_s0 + $0x78] sm:$0xf0]  ;;  %3165 = vmatpush.bf16.msrb.mxu0 %v10674_v5 }
 0x18d   :  { %v12282_v0 = vpop.f32.mrf.mxu3 }
 0x18e   :  { %v1556_v45 = vpop.f32.mrf.mxu2  ;;  %v12284_v7 = vpop.f32.mrf.mxu1 }
 0x18f   :  { %v1557_v49 = vadd.f32 %v1556_v45, %v1527_v24  ;;  %v1535_v37 = vpop.f32.mrf.mxu0  ;;  %v10673_v45 = vld [vmem:[%s14863_s1 + $0x70] sm:$0xff] }
 0x190   :  { %3166 = vmatpush.bf16.msrb.mxu0 %v10673_v45 }
 0x191   :  { %v12287_v2 = vadd.f32 %v1557_v49, %v12148_v43  ;;  %v10596_v43 = vld [vmem:[%s14864_s0 + $0x74] sm:$0xf0] }
 0x192   :  { %2334 = vmatmul.bf16.gmra.mxu0 %v12169_v25  ;;  %v10597_v25 = vld [vmem:[%s14864_s0 + $0x184] sm:$0xf]  ;;  %v8332_v44 = vor.u32 %v10596_v43, %v8331_v13  ;;  %v10672_v13 = vld [vmem:[%s14863_s1 + $0x68] sm:$0xff]  ;;  %v1752_v43 = vadd.f32 %v12238_v26, %v12267_v60 }
 0x193   :  { %8299 = vmatmul.msk.bf16.gmra.mxu2 %vm164_vm0, %v8256_v30  ;;  %v8344_v17 = vor.u32 %v10597_v25, %v8341_v27  ;;  %v8347_v25 = vld [vmem:[%s14864_s0 + $0x190] sm:$0xf]  ;;  %v10600_v27 = vld [vmem:[%s14864_s0 + $0x194] sm:$0xf0] }
 0x194   :  { %3167 = vmatpush.bf16.msrb.mxu0 %v10672_v13 }
 0x195   :  { %v12309_v19 = vpop.f32.mrf.mxu3 }
 0x196   :  { %v1559_v4 = vpop.f32.mrf.mxu2  ;;  %v12311_v15 = vpop.f32.mrf.mxu1 }
 0x197   :  { %v1560_v22 = vadd.f32 %v1559_v4, %v1530_v33  ;;  %v1537_v14 = vpop.f32.mrf.mxu0  ;;  %v8517_v4 = vld [vmem:[%s14864_s0 + $0x88] sm:$0xf0]  ;;  %v1757_v5 = vadd.f32 %v12282_v0, %v12311_v15  ;;  %v8525_v0 = vld [vmem:[%s14864_s0 + $0x98] sm:$0xf0] }
 0x199   :  { %v12314_v23 = vadd.f32 %v1560_v22, %v12175_v6  ;;  %2518 = vmatmul.bf16.gmra.mxu1 %v8332_v44  ;;  %v10639_v6 = vld [vmem:[%s14863_s1 + $0x150] sm:$0xff]  ;;  %v8348_v44 = vor.u32 %v10600_v27, %v8347_v25  ;;  %v10671_v22 = vld [vmem:[%s14863_s1 + $0x60] sm:$0xff]  ;;  %v10662_v27 = vld [vmem:[%s14863_s1 + $0x38] sm:$0xff] }
 0x19a   :  { %8395 = vmatmul.msk.bf16.gmra.mxu3 %vm164_vm0, %v8344_v17  ;;  %2914 = vmatpush.bf16.msrb.mxu1 %v10639_v6 }
 0x19b   :  { %3168 = vmatpush.bf16.msrb.mxu0 %v10671_v22 }
 0x19d   :  { %v12323_v28 = vpop.f32.mrf.mxu3 }
 0x19e   :  { %v1561_v24 = vpop.f32.mrf.mxu2  ;;  %v12328_v32 = vpop.f32.mrf.mxu1  ;;  %2915 = vmatpush.bf16.msrb.mxu1 %v10638_v12 }
 0x19f   :  { %v1562_v36 = vadd.f32 %v1561_v24, %v1532_v58  ;;  %v1924_v20 = vpop.f32.mrf.mxu0  ;;  %v10614_v58 = vld [vmem:[%s14864_s0 + $0x84] sm:$0xf0] }
 0x1a0   :  { %v8428_v1 = vor.u32 %v10614_v58, %v8427_v55  ;;  %v10631_v58 = vld [vmem:[%s14864_s0 + $0x94] sm:$0xf] }
 0x1a1   :  { %v12340_v38 = vadd.f32 %v1562_v36, %v12189_v11  ;;  %v10598_v11 = vld [vmem:[%s14864_s0 + $0x184] sm:$0xf0]  ;;  %v10670_v36 = vld [vmem:[%s14863_s1 + $0x58] sm:$0xff]  ;;  %v8528_v13 = vor.u32 %v10631_v58, %v8525_v0 }
 0x1a2   :  { %2715 = vmatmul.bf16.vlgmr.msra.gmra.mxu0 %v8420_v29  ;;  %2916 = vmatpush.bf16.msrb.mxu1 %v10637_v48 }
 0x1a3   :  { %8300 = vmatmul.msk.bf16.gmra.mxu2 %vm164_vm0, %v12109_v59  ;;  %v8340_v59 = vor.u32 %v10598_v11, %v8339_v50  ;;  %3169 = vmatpush.bf16.msrb.mxu0 %v10670_v36  ;;  %v8436_v11 = vor.u32 %v10616_v46, %v8435_v54 }
 0x1a5   :  { %v12359_v41 = vpop.f32.mrf.mxu3 }
 0x1a6   :  { %v1564_v33 = vpop.f32.mrf.mxu2  ;;  %v12364_v3 = vpop.f32.mrf.mxu1  ;;  %3305 = vmatpush.bf16.msra.mxu1 %v10662_v27 }
 0x1a7   :  { %v1565_v62 = vadd.f32 %v1564_v33, %v1535_v37  ;;  %v1926_v52 = vpop.f32.mrf.mxu0  ;;  %3170 = vmatpush.bf16.msrb.mxu0 %v10669_v35  ;;  %v8523_v35 = vld [vmem:[%s14864_s0 + $0x90] sm:$0xf] }
 0x1a9   :  { %v12367_v39 = vadd.f32 %v1565_v62, %v12217_v34  ;;  %2523 = vmatmul.bf16.gmra.mxu1 %v8340_v59  ;;  %v10611_v34 = vld [vmem:[%s14864_s0 + $0x74] sm:$0xf] }
 0x1aa   :  { %8396 = vmatmul.msk.bf16.gmra.mxu3 %vm164_vm0, %v8352_v56  ;;  %v8424_v9 = vor.u32 %v10611_v34, %v8421_v61 }
 0x1ad   :  { %v12385_v53 = vpop.f32.mrf.mxu3 }
 0x1ae   :  { %v1566_v63 = vpop.f32.mrf.mxu2  ;;  %v12390_v37 = vpop.f32.mrf.mxu1 }
 0x1af   :  { %v1567_v49 = vadd.f32 %v1566_v63, %v1537_v14  ;;  %v1929_v30 = vpop.f32.mrf.mxu0  ;;  %v1771_v14 = vadd.f32 %v1752_v43, %v12215_v31  ;;  %v1754_v31 = vadd.f32 %v12265_v57, %v12284_v7  ;;  %v8429_v57 = vld [vmem:[%s14864_s0 + $0x88] sm:$0xf0] }
 0x1b0   :  { %v8432_v62 = vor.u32 %v10613_v42, %v8429_v57  ;;  %v10661_v57 = vld [vmem:[%s14863_s1 + $0x30] sm:$0xff] }
 0x1b1   :  { %v12393_v10 = vadd.f32 %v1567_v49, %v12246_v51  ;;  %v10629_v51 = vld [vmem:[%s14864_s0 + $0x84] sm:$0xf]  ;;  %v1772_v40 = vadd.f32 %v1754_v31, %v12244_v47  ;;  %v8515_v47 = vld [vmem:[%s14864_s0 + $0x80] sm:$0xf]  ;;  %3306 = vmatpush.bf16.msra.mxu1 %v10661_v57 }
 0x1b2   :  { %2720 = vmatmul.bf16.gmra.mxu0 %v8428_v1  ;;  %v8520_v29 = vor.u32 %v10629_v51, %v8517_v4  ;;  %v1773_v1 = vadd.f32 %v1757_v5, %v12270_v16  ;;  %v1759_v51 = vadd.f32 %v12309_v19, %v12328_v32  ;;  %v10618_v4 = vld [vmem:[%s14864_s0 + $0x1a4] sm:$0xf0]  ;;  %v8437_v19 = vld [vmem:[%s14864_s0 + $0x198] sm:$0xf0] }
 0x1b3   :  { %8489 = vmatmul.msk.bf16.vlgmr.msrb.gmra.mxu2 %vm164_vm0, %v8424_v9 }
 0x1b4   :  { %v1774_v36 = vadd.f32 %v1759_v51, %v12287_v2 }
 0x1b5   :  { %v12413_v26 = vpop.f32.mrf.mxu3 }
 0x1b6   :  { %v1953_v60 = vpop.f32.mrf.mxu2  ;;  %v12424_v18 = vpop.f32.mrf.mxu1 }
 0x1b7   :  { %v1954_v17 = vadd.f32 %v1953_v60, %v1924_v20  ;;  %v12426_v24 = vpop.f32.mrf.mxu0  ;;  %v10615_v60 = vld [vmem:[%s14864_s0 + $0x194] sm:$0xf] }
 0x1b8   :  { %v8440_v42 = vor.u32 %v10615_v60, %v8437_v19 }
 0x1b9   :  { %v1973_v6 = vadd.f32 %v1954_v17, %v1771_v14  ;;  %2528 = vmatmul.bf16.gmra.mxu1 %v8348_v44 }
 0x1ba   :  { %8585 = vmatmul.msk.bf16.vlgmr.msrb.gmra.mxu3 %vm164_vm0, %v8520_v29 }
 0x1bb   :  { %v1985_v20 = vadd.f32 %v12422_v21, %v1973_v6  ;;  %v10677_v6 = vld [vmem:[%s14863_s1 + $0x90] sm:$0xff] }
 0x1bc   :  { %3199 = vmatpush.bf16.msra.mxu2 %v10677_v6  ;;  %v1767_v6 = vadd.f32 %v12385_v53, %v12424_v18  ;;  %v8541_v53 = vld [vmem:[%s14864_s0 + $0x1b8] sm:$0xf0] }
 0x1bd   :  { %v1993_v7 = vmax.f32 %v1985_v20, 0.0  ;;  %v2207_v50 = vpop.f32.mrf.mxu3 }
 0x1be   :  { %v1955_v12 = vpop.f32.mrf.mxu2  ;;  %v12452_v59 = vpop.f32.mrf.mxu1 }
 0x1bf   :  { %2001 = vst.msk [vmem:[#allocation2 + $0x20] sm:$0xff] %vm1006_vm1, %v1993_v7  ;;  %v1956_v33 = vadd.f32 %v1955_v12, %v1926_v52  ;;  %v12454_v48 = vpop.f32.mrf.mxu0  ;;  %v10630_v52 = vld [vmem:[%s14864_s0 + $0x84] sm:$0xf0]  ;;  %v10663_v7 = vld [vmem:[%s14863_s1 + $0x40] sm:$0xff] }
 0x1c0   :  { %v8516_v63 = vor.u32 %v10630_v52, %v8515_v47  ;;  %3341 = vmatpush.bf16.msra.mxu3 %v10663_v7  ;;  %v10693_v7 = vld [vmem:[%s14863_s1 + $0xd0] sm:$0xff] }
 0x1c1   :  { %v1974_v56 = vadd.f32 %v1956_v33, %v1772_v40  ;;  %v10632_v40 = vld [vmem:[%s14864_s0 + $0x94] sm:$0xf0]  ;;  %v10633_v33 = vld [vmem:[%s14864_s0 + $0x1a4] sm:$0xf] }
 0x1c2   :  { %2725 = vmatmul.bf16.gmra.mxu0 %v8436_v11  ;;  %v8524_v5 = vor.u32 %v10632_v40, %v8523_v35 }
 0x1c3   :  { %v1986_v55 = vadd.f32 %v12422_v21, %v1974_v56  ;;  %8490 = vmatmul.msk.bf16.gmra.mxu2 %vm164_vm0, %v8432_v62 }
 0x1c5   :  { %v1994_v15 = vmax.f32 %v1986_v55, 0.0  ;;  %v2209_v61 = vpop.f32.mrf.mxu3  ;;  %v10659_v55 = vld [vmem:[%s14863_s1 + $0x20] sm:$0xff] }
 0x1c6   :  { %v1958_v34 = vpop.f32.mrf.mxu2  ;;  %v2178_v9 = vpop.f32.mrf.mxu1 }
 0x1c7   :  { %2002 = vst.msk [vmem:[#allocation2 + $0x28] sm:$0xff] %vm1006_vm1, %v1994_v15  ;;  %v1959_v45 = vadd.f32 %v1958_v34, %v1929_v30  ;;  %v12474_v49 = vpop.f32.mrf.mxu0  ;;  %v12476_v43 = vadd.f32 %v2207_v50, %v2178_v9  ;;  %v8443_v30 = vld [vmem:[%s14864_s0 + $0x1a0] sm:$0xf]  ;;  %v1762_v50 = vadd.f32 %v12323_v28, %v12364_v3  ;;  %v8533_v28 = vld [vmem:[%s14864_s0 + $0x1a8] sm:$0xf0] }
 0x1c8   :  { %v8444_v29 = vor.u32 %v10618_v4, %v8443_v30  ;;  %v8536_v15 = vor.u32 %v10633_v33, %v8533_v28  ;;  %v10617_v9 = vld [vmem:[%s14864_s0 + $0x1a4] sm:$0xf]  ;;  %v10657_v30 = vld [vmem:[%s14863_s1 + $0x10] sm:$0xff] }
 0x1c9   :  { %v1975_v25 = vadd.f32 %v1959_v45, %v1773_v1  ;;  %2917 = vmatmul.bf16.vlgmr.msrb.gmra.mxu1 %v8516_v63  ;;  %v1775_v47 = vadd.f32 %v1762_v50, %v12314_v23  ;;  %v10658_v63 = vld [vmem:[%s14863_s1 + $0x18] sm:$0xff]  ;;  %v1764_v23 = vadd.f32 %v12359_v41, %v12390_v37  ;;  %v8445_v41 = vld [vmem:[%s14864_s0 + $0x1a8] sm:$0xf0] }
 0x1ca   :  { %8586 = vmatmul.msk.bf16.gmra.mxu3 %vm164_vm0, %v8528_v13  ;;  %v10650_v45 = vld [vmem:[%s14864_s0 + $0x74] sm:$0xf0] }
 0x1cb   :  { %v1987_v16 = vadd.f32 %v12422_v21, %v1975_v25  ;;  %v1776_v4 = vadd.f32 %v1764_v23, %v12340_v38  ;;  %v10694_v38 = vld [vmem:[%s14863_s1 + $0xd8] sm:$0xff] }
 0x1cc   :  { %3499 = vmatpush.bf16.msra.mxu0 %v10694_v38 }
 0x1cd   :  { %v1995_v32 = vmax.f32 %v1987_v16, 0.0  ;;  %v2212_v17 = vpop.f32.mrf.mxu3 }
 0x1ce   :  { %v6983_v44 = vld [vmem:[#allocation2 + $0x20] ss:$2 sm:$0xff]  ;;  %v7039_v22 = vld [vmem:[#allocation2 + $0x21] ss:$2 sm:$0xff]  ;;  %v1960_v14 = vpop.f32.mrf.mxu2  ;;  %v2180_v46 = vpop.f32.mrf.mxu1 }
 0x1cf   :  { %v7092_v31 = vmax.f32 %v6983_v44, %v7039_v22  ;;  %2003 = vst.msk [vmem:[#allocation2 + $0x30] sm:$0xff] %vm1006_vm1, %v1995_v32  ;;  %v1961_v20 = vadd.f32 %v1960_v14, %v12426_v24  ;;  %v12503_v54 = vpop.f32.mrf.mxu0  ;;  %v12511_v12 = vadd.f32 %v2209_v61, %v2180_v46  ;;  %v10660_v24 = vld [vmem:[%s14863_s1 + $0x28] sm:$0xff]  ;;  %v8448_v22 = vor.u32 %v10617_v9, %v8445_v41 }
 0x1d0   :  { %3307 = vmatpush.bf16.msra.mxu1 %v10660_v24  ;;  %v1777_v24 = vadd.f32 %v1767_v6, %v12367_v39  ;;  %3500 = vmatpush.bf16.msra.mxu0 %v10693_v7  ;;  %v10365_v39 = vld [vmem:[%s14866_s3 + $0x4] sm:$0xf] }
 0x1d1   :  { %7120 = vst.msk [vmem:[#allocation3 + $0x10] sm:$0xff] %vm1006_vm1, %v7092_v31  ;;  %v1976_v2 = vadd.f32 %v1961_v20, %v1774_v36  ;;  %v8531_v36 = vld [vmem:[%s14864_s0 + $0x1a0] sm:$0xf]  ;;  %v10634_v31 = vld [vmem:[%s14864_s0 + $0x1a4] sm:$0xf0] }
 0x1d2   :  { %2730 = vmatmul.bf16.gmra.mxu0 %v8444_v29  ;;  %v10635_v20 = vld [vmem:[%s14864_s0 + $0x1b4] sm:$0xf]  ;;  %v8532_v57 = vor.u32 %v10634_v31, %v8531_v36  ;;  %v10711_v7 = vld [vmem:[%s14863_s1 + $0x120] sm:$0xff] }
 0x1d3   :  { %v1988_v11 = vadd.f32 %v12422_v21, %v1976_v2  ;;  %8491 = vmatmul.msk.bf16.gmra.mxu2 %vm164_vm0, %v8440_v42  ;;  %v10655_v2 = vld [vmem:[%s14863_s1] sm:$0xff]  ;;  %v8544_v40 = vor.u32 %v10635_v20, %v8541_v53 }
 0x1d4   :  { %3308 = vmatpush.bf16.msra.mxu1 %v10659_v55  ;;  %v1769_v55 = vadd.f32 %v12413_v26, %v12452_v59  ;;  %v8613_v26 = vld [vmem:[%s14864_s0 + $0x78] sm:$0xf0] }
 0x1d5   :  { %v1996_v3 = vmax.f32 %v1988_v11, 0.0  ;;  %v2214_v56 = vpop.f32.mrf.mxu3 }
 0x1d6   :  { %v1963_v62 = vpop.f32.mrf.mxu2  ;;  %v2183_v0 = vpop.f32.mrf.mxu1  ;;  %v1778_v9 = vadd.f32 %v1769_v55, %v12393_v10  ;;  %v10691_v10 = vld [vmem:[%s14863_s1 + $0xc0] sm:$0xff] }
 0x1d7   :  { %2004 = vst.msk [vmem:[#allocation2 + $0x38] sm:$0xff] %vm1006_vm1, %v1996_v3  ;;  %v1964_v52 = vadd.f32 %v1963_v62, %v12454_v48  ;;  %v12539_v58 = vpop.f32.mrf.mxu0  ;;  %v12541_v34 = vadd.f32 %v2212_v17, %v2183_v0  ;;  %v8611_v48 = vld [vmem:[%s14864_s0 + $0x70] sm:$0xf]  ;;  %v10666_v0 = vld [vmem:[%s14864_s0 + $0x84] sm:$0xf0] }
 0x1d8   :  { %3309 = vmatpush.bf16.msra.mxu1 %v10658_v63  ;;  %v12562_v16 = vor.u32 %v10650_v45, %v8611_v48  ;;  %v7163_v33 = vld [vmem:[#allocation3 + $0x10] sm:$0xff] }
 0x1d9   :  { %v1977_v61 = vadd.f32 %v1964_v52, %v1775_v47  ;;  %2922 = vmatmul.bf16.gmra.mxu1 %v8524_v5  ;;  %v8619_v52 = vld [vmem:[%s14864_s0 + $0x80] sm:$0xf] }
 0x1da   :  { %8587 = vmatmul.msk.bf16.gmra.mxu3 %vm164_vm0, %v8536_v15  ;;  %v10649_v15 = vld [vmem:[%s14864_s0 + $0x74] sm:$0xf]  ;;  %v8620_v45 = vor.u32 %v10666_v0, %v8619_v52 }
 0x1db   :  { %v1989_v1 = vadd.f32 %v12422_v21, %v1977_v61 }
 0x1dc   :  { %3310 = vmatpush.bf16.msra.mxu1 %v10657_v30  ;;  %v10714_v30 = vld [vmem:[%s14863_s1 + $0x138] sm:$0xff] }
 0x1dd   :  { %v1997_v37 = vmax.f32 %v1989_v1, 0.0  ;;  %v2217_v51 = vpop.f32.mrf.mxu3  ;;  %3736 = vmatpush.bf16.msrb.mxu3 %v10714_v30 }
 0x1de   :  { %v6985_v13 = vld [vmem:[#allocation2 + $0x30] ss:$2 sm:$0xff]  ;;  %v7041_v25 = vld [vmem:[#allocation2 + $0x31] ss:$2 sm:$0xff]  ;;  %v1965_v27 = vpop.f32.mrf.mxu2  ;;  %v2185_v32 = vpop.f32.mrf.mxu1 }
 0x1df   :  { %v7093_v60 = vmax.f32 %v6985_v13, %v7041_v25  ;;  %2005 = vst.msk [vmem:[#allocation2 + $0x100] sm:$0xff] %vm1006_vm1, %v1997_v37  ;;  %v1966_v19 = vadd.f32 %v1965_v27, %v12474_v49  ;;  %v2320_v44 = vpop.f32.mrf.mxu0  ;;  %v12570_v14 = vadd.f32 %v2214_v56, %v2185_v32  ;;  %v10656_v49 = vld [vmem:[%s14863_s1 + $0x8] sm:$0xff]  ;;  %v12643_v27 = vor.u32 %v10649_v15, %v8613_v26  ;;  %v10710_v15 = vld [vmem:[%s14863_s1 + $0x118] sm:$0xff] }
 0x1e0   :  { %v12573_v17 = vadd.f32 %v2320_v44, %v12476_v43  ;;  %3311 = vmatpush.bf16.msra.mxu1 %v10656_v49  ;;  %v10636_v44 = vld [vmem:[%s14864_s0 + $0x1b4] sm:$0xf0]  ;;  %v10648_v26 = vld [vmem:[%s14864_s0 + $0x64] sm:$0xf0] }
 0x1e1   :  { %7121 = vst.msk [vmem:[#allocation3 + $0x18] sm:$0xff] %vm1006_vm1, %v7093_v60  ;;  %v1978_v29 = vadd.f32 %v1966_v19, %v1776_v4  ;;  %v10712_v19 = vld [vmem:[%s14863_s1 + $0x128] sm:$0xff] }
 0x1e2   :  { %3171 = vmatmul.bf16.vlgmr.msrb.gmra.mxu0 %v12562_v16 }
 0x1e3   :  { %v1990_v43 = vadd.f32 %v12422_v21, %v1978_v29  ;;  %8492 = vmatmul.msk.bf16.gmra.mxu2 %vm164_vm0, %v8448_v22  ;;  %v10690_v22 = vld [vmem:[%s14863_s1 + $0xb8] sm:$0xff]  ;;  %v8689_v29 = vld [vmem:[%s14864_s0 + $0x68] sm:$0xf0] }
 0x1e4   :  { %3312 = vmatpush.bf16.msra.mxu1 %v10655_v2  ;;  %v10713_v2 = vld [vmem:[%s14863_s1 + $0x130] sm:$0xff] }
 0x1e5   :  { %v1998_v18 = vmax.f32 %v1990_v43, 0.0  ;;  %v2219_v42 = vpop.f32.mrf.mxu3  ;;  %3737 = vmatpush.bf16.msrb.mxu3 %v10713_v2 }
 0x1e6   :  { %v1968_v46 = vpop.f32.mrf.mxu2  ;;  %v2188_v11 = vpop.f32.mrf.mxu1 }
 0x1e7   :  { %2006 = vst.msk [vmem:[#allocation2 + $0x108] sm:$0xff] %vm1006_vm1, %v1998_v18  ;;  %v1969_v50 = vadd.f32 %v1968_v46, %v12503_v54  ;;  %v2322_v35 = vpop.f32.mrf.mxu0  ;;  %v12608_v3 = vadd.f32 %v2217_v51, %v2188_v11  ;;  %v10692_v54 = vld [vmem:[%s14863_s1 + $0xc8] sm:$0xff]  ;;  %v10689_v18 = vld [vmem:[%s14863_s1 + $0xb0] sm:$0xff] }
 0x1e8   :  { %v7165_v28 = vld [vmem:[#allocation3 + $0x18] sm:$0xff]  ;;  %v12611_v62 = vadd.f32 %v2322_v35, %v12511_v12  ;;  %3501 = vmatpush.bf16.msra.mxu0 %v10692_v54  ;;  %v10696_v51 = vld [vmem:[%s14863_s1 + $0xe8] sm:$0xff]  ;;  %3701 = vmatpush.bf16.msrb.mxu1 %v10712_v19 }
 0x1e9   :  { %v7167_v56 = vmax.f32 %v7163_v33, %v7165_v28  ;;  %v1979_v5 = vadd.f32 %v1969_v50, %v1777_v24  ;;  %2927 = vmatmul.bf16.gmra.mxu1 %v8532_v57  ;;  %3534 = vmatpush.bf16.msrb.mxu2 %v10696_v51  ;;  %v8627_v57 = vld [vmem:[%s14864_s0 + $0x190] sm:$0xf]  ;;  %v10688_v24 = vld [vmem:[%s14863_s1 + $0xa8] sm:$0xff]  ;;  %v10665_v50 = vld [vmem:[%s14864_s0 + $0x84] sm:$0xf] }
 0x1ea   :  { %8588 = vmatmul.msk.bf16.gmra.mxu3 %vm164_vm0, %v8544_v40  ;;  %v8621_v11 = vld [vmem:[%s14864_s0 + $0x88] sm:$0xf0]  ;;  %v10709_v51 = vld [vmem:[%s14863_s1 + $0x110] sm:$0xff] }
 0x1eb   :  { %v7169_v47 = vpack.c.bf16 %v7167_v56, %v7167_v56  ;;  %v1991_v12 = vadd.f32 %v12422_v21, %v1979_v5 }
 0x1ec   :  { %3502 = vmatpush.bf16.msra.mxu0 %v10691_v10  ;;  %3702 = vmatpush.bf16.msrb.mxu1 %v10711_v7  ;;  %v8635_v10 = vld [vmem:[%s14864_s0 + $0x1a0] sm:$0xf] }
 0x1ed   :  { %v7173_v59 = vsel %vm11992_vm4, %v7169_v47, %v10365_v39  ;;  %v1999_v61 = vmax.f32 %v1991_v12, 0.0  ;;  %v2222_v48 = vpop.f32.mrf.mxu3  ;;  %v8624_v47 = vor.u32 %v10665_v50, %v8621_v11  ;;  %v10687_v12 = vld [vmem:[%s14863_s1 + $0xa0] sm:$0xff]  ;;  %v10729_v50 = vld [vmem:[%s14863_s1 + $0x170] sm:$0xff]  ;;  %v10732_v11 = vld [vmem:[%s14863_s1 + $0x188] sm:$0xff] }
 0x1ee   :  { %10366 = vst [vmem:[%s14866_s3 + $0x4] sm:$0xf] %v7173_v59  ;;  %v7011_v63 = vld [vmem:[#allocation2 + $0x100] ss:$2 sm:$0xff]  ;;  %v7067_v23 = vld [vmem:[#allocation2 + $0x101] ss:$2 sm:$0xff]  ;;  %v1970_v1 = vpop.f32.mrf.mxu2  ;;  %v2190_v13 = vpop.f32.mrf.mxu1 }
 0x1ef   :  { %v7106_v41 = vmax.f32 %v7011_v63, %v7067_v23  ;;  %2007 = vst.msk [vmem:[#allocation2 + $0x110] sm:$0xff] %vm1006_vm1, %v1999_v61  ;;  %v1971_v37 = vadd.f32 %v1970_v1, %v12539_v58  ;;  %v2325_v25 = vpop.f32.mrf.mxu0  ;;  %v12654_v4 = vadd.f32 %v2219_v42, %v2190_v13  ;;  %v10367_v13 = vld [vmem:[%s14866_s3 + $0x20] sm:$0xf] }
 0x1f0   :  { %v12657_v58 = vadd.f32 %v2325_v25, %v12541_v34  ;;  %v8539_v34 = vld [vmem:[%s14864_s0 + $0x1b0] sm:$0xf]  ;;  %3503 = vmatpush.bf16.msra.mxu0 %v10690_v22  ;;  %3703 = vmatpush.bf16.msrb.mxu1 %v10710_v15 }
 0x1f1   :  { %7134 = vst.msk [vmem:[#allocation3 + $0x80] sm:$0xff] %vm1006_vm1, %v7106_v41  ;;  %v1980_v60 = vadd.f32 %v1971_v37, %v1778_v9  ;;  %v8540_v43 = vor.u32 %v10636_v44, %v8539_v34 }
 0x1f2   :  { %3176 = vmatmul.bf16.gmra.mxu0 %v8620_v45 }
 0x1f3   :  { %v1992_v32 = vadd.f32 %v12422_v21, %v1980_v60  ;;  %8681 = vmatmul.msk.bf16.vlgmr.msra.gmra.mxu2 %vm164_vm0, %v12643_v27  ;;  %v10647_v21 = vld [vmem:[%s14864_s0 + $0x64] sm:$0xf]  ;;  %v8629_v60 = vld [vmem:[%s14864_s0 + $0x198] sm:$0xf0] }
 0x1f4   :  { %v8692_v53 = vor.u32 %v10647_v21, %v8689_v29  ;;  %3504 = vmatpush.bf16.msra.mxu0 %v10689_v18  ;;  %3704 = vmatpush.bf16.msrb.mxu1 %v10709_v51  ;;  %v10682_v51 = vld [vmem:[%s14864_s0 + $0x94] sm:$0xf0] }
 0x1f5   :  { %v2000_v38 = vmax.f32 %v1992_v32, 0.0  ;;  %v2224_v49 = vpop.f32.mrf.mxu3 }
 0x1f6   :  { %v2349_v6 = vpop.f32.mrf.mxu2  ;;  %v2193_v31 = vpop.f32.mrf.mxu1 }
 0x1f7   :  { %2008 = vst.msk [vmem:[#allocation2 + $0x118] sm:$0xff] %vm1006_vm1, %v2000_v38  ;;  %v2350_v36 = vadd.f32 %v2349_v6, %v12573_v17  ;;  %v2327_v20 = vpop.f32.mrf.mxu0  ;;  %v12686_v46 = vadd.f32 %v2222_v48, %v2193_v31  ;;  %v10695_v17 = vld [vmem:[%s14863_s1 + $0xe0] sm:$0xff] }
 0x1f8   :  { %v12689_v42 = vadd.f32 %v2327_v20, %v12570_v14  ;;  %v10654_v14 = vld [vmem:[%s14864_s0 + $0x194] sm:$0xf0]  ;;  %3535 = vmatpush.bf16.msrb.mxu2 %v10695_v17  ;;  %3505 = vmatpush.bf16.msra.mxu0 %v10688_v24  ;;  %v7164_v48 = vld [vmem:[#allocation3 + $0x80] sm:$0xff]  ;;  %v8697_v20 = vld [vmem:[%s14864_s0 + $0x188] sm:$0xf0] }
 0x1f9   :  { %2932 = vmatmul.bf16.gmra.mxu1 %v8540_v43  ;;  %v12716_v56 = vor.u32 %v10654_v14, %v8627_v57  ;;  %v10708_v43 = vld [vmem:[%s14863_s1 + $0x108] sm:$0xff]  ;;  %v10651_v31 = vld [vmem:[%s14864_s0 + $0x184] sm:$0xf] }
 0x1fa   :  { %8741 = vmatmul.msk.bf16.vlgmr.msra.gmra.mxu3 %vm164_vm0, %v8692_v53  ;;  %3705 = vmatpush.bf16.msrb.mxu1 %v10708_v43  ;;  %v8700_v17 = vor.u32 %v10651_v31, %v8697_v20  ;;  %v10707_v24 = vld [vmem:[%s14863_s1 + $0x100] sm:$0xff]  ;;  %v10725_v31 = vld [vmem:[%s14863_s1 + $0x150] sm:$0xff] }
 0x1fc   :  { %3506 = vmatpush.bf16.msra.mxu0 %v10687_v12  ;;  %3938 = vmatpush.bf16.msra.mxu2 %v10732_v11 }
 0x1fd   :  { %v2543_v28 = vpop.f32.mrf.mxu3 }
 0x1fe   :  { %v7013_v35 = vld [vmem:[#allocation2 + $0x110] ss:$2 sm:$0xff]  ;;  %v7069_v40 = vld [vmem:[#allocation2 + $0x111] ss:$2 sm:$0xff]  ;;  %v2351_v33 = vpop.f32.mrf.mxu2  ;;  %v2195_v54 = vpop.f32.mrf.mxu1  ;;  %3706 = vmatpush.bf16.msrb.mxu1 %v10707_v24 }
 0x1ff   :  { %v7107_v5 = vmax.f32 %v7013_v35, %v7069_v40  ;;  %v2352_v39 = vadd.f32 %v2351_v33, %v12611_v62  ;;  %v2330_v55 = vpop.f32.mrf.mxu0  ;;  %v2225_v52 = vadd.f32 %v2224_v49, %v2195_v54  ;;  %v8687_v62 = vld [vmem:[%s14864_s0 + $0x60] sm:$0xf]  ;;  %v10764_v40 = vld [vmem:[%s14863_s1 + $0x98] sm:$0xff]  ;;  %v10667_v33 = vld [vmem:[%s14864_s0 + $0x1a4] sm:$0xf] }
 0x200   :  { %v2331_v0 = vadd.f32 %v2330_v55, %v12608_v3  ;;  %v8688_v61 = vor.u32 %v10648_v26, %v8687_v62  ;;  %v8767_v35 = vld [vmem:[%s14864_s0 + $0x80] sm:$0xf]  ;;  %4192 = vmatpush.bf16.msra.mxu3 %v10764_v40  ;;  %v10706_v62 = vld [vmem:[%s14863_s1 + $0xf8] sm:$0xff]  ;;  %v10728_v26 = vld [vmem:[%s14863_s1 + $0x168] sm:$0xff] }
 0x201   :  { %7135 = vst.msk [vmem:[#allocation3 + $0x88] sm:$0xff] %vm1006_vm1, %v7107_v5 }
 0x202   :  { %3181 = vmatmul.bf16.gmra.mxu0 %v12716_v56  ;;  %3707 = vmatpush.bf16.msrb.mxu1 %v10706_v62 }
 0x203   :  { %8682 = vmatmul.msk.bf16.gmra.mxu2 %vm164_vm0, %v8624_v47 }
 0x205   :  { %v2545_v59 = vpop.f32.mrf.mxu3 }
 0x206   :  { %v2354_v3 = vpop.f32.mrf.mxu2  ;;  %v2514_v1 = vpop.f32.mrf.mxu1 }
 0x207   :  { %v2355_v63 = vadd.f32 %v2354_v3, %v12657_v58  ;;  %v2332_v23 = vpop.f32.mrf.mxu0  ;;  %v2544_v41 = vadd.f32 %v2543_v28, %v2514_v1  ;;  %v10653_v58 = vld [vmem:[%s14864_s0 + $0x194] sm:$0xf]  ;;  %v8637_v28 = vld [vmem:[%s14864_s0 + $0x1a8] sm:$0xf0]  ;;  %v8695_v3 = vld [vmem:[%s14864_s0 + $0x180] sm:$0xf] }
 0x208   :  { %v7166_v45 = vld [vmem:[#allocation3 + $0x88] sm:$0xff]  ;;  %v2333_v9 = vadd.f32 %v2332_v23, %v12654_v4  ;;  %v12765_v29 = vor.u32 %v10653_v58, %v8629_v60  ;;  %v10705_v1 = vld [vmem:[%s14863_s1 + $0xf0] sm:$0xff] }
 0x209   :  { %v7168_v37 = vmax.f32 %v7164_v48, %v7166_v45  ;;  %v12740_v25 = vadd.f32 %v2544_v41, %v2350_v36  ;;  %3313 = vmatmul.bf16.vlgmr.msra.gmra.mxu1 %v8688_v61  ;;  %v10668_v4 = vld [vmem:[%s14864_s0 + $0x1a4] sm:$0xf0]  ;;  %v10730_v36 = vld [vmem:[%s14863_s1 + $0x178] sm:$0xff] }
 0x20a   :  { %8742 = vmatmul.msk.bf16.gmra.mxu3 %vm164_vm0, %v12643_v27  ;;  %v8636_v34 = vor.u32 %v10668_v4, %v8635_v10  ;;  %3903 = vmatpush.bf16.msrb.mxu0 %v10730_v36  ;;  %v8769_v10 = vld [vmem:[%s14864_s0 + $0x88] sm:$0xf0] }
 0x20b   :  { %v7170_v30 = vpack.c.bf16 %v7168_v37, %v7168_v37  ;;  %3708 = vmatpush.bf16.msrb.mxu1 %v10705_v1  ;;  %v10762_v1 = vld [vmem:[%s14863_s1 + $0x88] sm:$0xff] }
 0x20d   :  { %v7176_v27 = vsel %vm11992_vm4, %v7170_v30, %v10367_v13  ;;  %v2548_v32 = vpop.f32.mrf.mxu3  ;;  %v8775_v13 = vld [vmem:[%s14864_s0 + $0x90] sm:$0xf]  ;;  %v10679_v30 = vld [vmem:[%s14864_s0 + $0x84] sm:$0xf] }
 0x20e   :  { %10368 = vst [vmem:[%s14866_s3 + $0x20] sm:$0xf] %v7176_v27  ;;  %v2356_v19 = vpop.f32.mrf.mxu2  ;;  %v2516_v21 = vpop.f32.mrf.mxu1  ;;  %3904 = vmatpush.bf16.msrb.mxu0 %v10729_v50  ;;  %v8776_v60 = vor.u32 %v10682_v51, %v8775_v13  ;;  %v10727_v27 = vld [vmem:[%s14863_s1 + $0x160] sm:$0xff]  ;;  %v10686_v13 = vld [vmem:[%s14864_s0 + $0x1b4] sm:$0xf0] }
 0x20f   :  { %v2357_v44 = vadd.f32 %v2356_v19, %v12689_v42  ;;  %v2335_v22 = vpop.f32.mrf.mxu0  ;;  %v2546_v49 = vadd.f32 %v2545_v59, %v2516_v21  ;;  %v10652_v59 = vld [vmem:[%s14864_s0 + $0x184] sm:$0xf0]  ;;  %4157 = vmatpush.bf16.msra.mxu1 %v10762_v1  ;;  %v10761_v51 = vld [vmem:[%s14863_s1 + $0x80] sm:$0xff] }
 0x210   :  { %v2336_v38 = vadd.f32 %v2335_v22, %v12686_v46  ;;  %v8696_v23 = vor.u32 %v10652_v59, %v8695_v3 }
 0x211   :  { %v12768_v6 = vadd.f32 %v2546_v49, %v2352_v39  ;;  %v8865_v49 = vld [vmem:[%s14864_s0 + $0x98] sm:$0xf0] }
 0x212   :  { %3186 = vmatmul.bf16.gmra.mxu0 %v8636_v34 }
 0x213   :  { %8683 = vmatmul.msk.bf16.gmra.mxu2 %vm164_vm0, %v12765_v29  ;;  %3905 = vmatpush.bf16.msrb.mxu0 %v10728_v26 }
 0x214   :  { %4158 = vmatpush.bf16.msra.mxu1 %v10761_v51  ;;  %v10756_v51 = vld [vmem:[%s14863_s1 + $0x58] sm:$0xff] }
 0x215   :  { %v2550_v18 = vpop.f32.mrf.mxu3 }
 0x216   :  { %v2359_v53 = vpop.f32.mrf.mxu2  ;;  %v2519_v57 = vpop.f32.mrf.mxu1 }
 0x217   :  { %v2360_v46 = vadd.f32 %v2359_v53, %v2331_v0  ;;  %v2337_v42 = vpop.f32.mrf.mxu0  ;;  %v2549_v14 = vadd.f32 %v2548_v32, %v2519_v57  ;;  %3906 = vmatpush.bf16.msrb.mxu0 %v10727_v27  ;;  %v10724_v57 = vld [vmem:[%s14863_s1 + $0x148] sm:$0xff] }
 0x218   :  { %v2338_v7 = vadd.f32 %v2337_v42, %v2225_v52  ;;  %v8640_v52 = vor.u32 %v10667_v33, %v8637_v28 }
 0x219   :  { %v12784_v2 = vadd.f32 %v2549_v14, %v2355_v63  ;;  %3318 = vmatmul.bf16.gmra.mxu1 %v12562_v16  ;;  %v10680_v16 = vld [vmem:[%s14864_s0 + $0x84] sm:$0xf0]  ;;  %v10681_v14 = vld [vmem:[%s14864_s0 + $0x94] sm:$0xf] }
 0x21a   :  { %8743 = vmatmul.msk.bf16.gmra.mxu3 %vm164_vm0, %v8700_v17  ;;  %v8768_v54 = vor.u32 %v10680_v16, %v8767_v35  ;;  %v8783_v17 = vld [vmem:[%s14864_s0 + $0x1a0] sm:$0xf] }
 0x21b   :  { %v10723_v35 = vld [vmem:[%s14863_s1 + $0x140] sm:$0xff] }
 0x21d   :  { %v2553_v39 = vpop.f32.mrf.mxu3 }
 0x21e   :  { %v2361_v5 = vpop.f32.mrf.mxu2  ;;  %v2521_v47 = vpop.f32.mrf.mxu1 }
 0x21f   :  { %v2362_v55 = vadd.f32 %v2361_v5, %v2333_v9  ;;  %v12812_v12 = vpop.f32.mrf.mxu0  ;;  %v2551_v0 = vadd.f32 %v2550_v18, %v2521_v47  ;;  %v10699_v47 = vld [vmem:[%s14864_s0 + $0xa4] sm:$0xf] }
 0x221   :  { %v12814_v15 = vadd.f32 %v2551_v0, %v2357_v44  ;;  %v8772_v44 = vor.u32 %v10679_v30, %v8769_v10 }
 0x222   :  { %3507 = vmatmul.bf16.vlgmr.msra.gmra.mxu0 %v8768_v54  ;;  %v10698_v54 = vld [vmem:[%s14864_s0 + $0x94] sm:$0xf0] }
 0x223   :  { %8684 = vmatmul.msk.bf16.gmra.mxu2 %vm164_vm0, %v8640_v52  ;;  %v8873_v52 = vld [vmem:[%s14864_s0 + $0xa8] sm:$0xf0] }
 0x225   :  { %v2555_v63 = vpop.f32.mrf.mxu3 }
 0x226   :  { %v2364_v61 = vpop.f32.mrf.mxu2  ;;  %v2524_v45 = vpop.f32.mrf.mxu1 }
 0x227   :  { %v2365_v48 = vadd.f32 %v2364_v61, %v2336_v38  ;;  %v12832_v9 = vpop.f32.mrf.mxu0  ;;  %v2554_v41 = vadd.f32 %v2553_v39, %v2524_v45  ;;  %v10697_v38 = vld [vmem:[%s14864_s0 + $0x94] sm:$0xf]  ;;  %v8863_v39 = vld [vmem:[%s14864_s0 + $0x90] sm:$0xf]  ;;  %v8876_v61 = vor.u32 %v10699_v47, %v8873_v52  ;;  %v8793_v47 = vld [vmem:[%s14864_s0 + $0x1b8] sm:$0xf0] }
 0x228   :  { %v8868_v18 = vor.u32 %v10697_v38, %v8865_v49  ;;  %v8864_v26 = vor.u32 %v10698_v54, %v8863_v39 }
 0x229   :  { %v12834_v37 = vadd.f32 %v2554_v41, %v2360_v46  ;;  %3323 = vmatmul.bf16.gmra.mxu1 %v8696_v23  ;;  %v8791_v41 = vld [vmem:[%s14864_s0 + $0x1b0] sm:$0xf] }
 0x22a   :  { %8744 = vmatmul.msk.bf16.gmra.mxu3 %vm164_vm0, %v12765_v29  ;;  %v10726_v29 = vld [vmem:[%s14863_s1 + $0x158] sm:$0xff] }
 0x22b   :  { %3907 = vmatpush.bf16.msrb.mxu0 %v10726_v29 }
 0x22d   :  { %v2558_v58 = vpop.f32.mrf.mxu3 }
 0x22e   :  { %v2366_v4 = vpop.f32.mrf.mxu2  ;;  %v2526_v32 = vpop.f32.mrf.mxu1 }
 0x22f   :  { %v2367_v19 = vadd.f32 %v2366_v4, %v2338_v7  ;;  %v12853_v34 = vpop.f32.mrf.mxu0  ;;  %v2556_v22 = vadd.f32 %v2555_v63, %v2526_v32  ;;  %3908 = vmatpush.bf16.msrb.mxu0 %v10725_v31  ;;  %v10684_v7 = vld [vmem:[%s14864_s0 + $0x1a4] sm:$0xf0]  ;;  %v10683_v4 = vld [vmem:[%s14864_s0 + $0x1a4] sm:$0xf]  ;;  %v8792_v32 = vor.u32 %v10686_v13, %v8791_v41  ;;  %v10748_v13 = vld [vmem:[%s14863_s1 + $0x38] sm:$0xff] }
 0x230   :  { %v8784_v11 = vor.u32 %v10684_v7, %v8783_v17  ;;  %v10700_v31 = vld [vmem:[%s14864_s0 + $0xa4] sm:$0xf0] }
 0x231   :  { %v12855_v21 = vadd.f32 %v2556_v22, %v2362_v55 }
 0x232   :  { %3512 = vmatmul.bf16.gmra.mxu0 %v8776_v60 }
 0x233   :  { %8837 = vmatmul.msk.bf16.vlgmr.msrb.gmra.mxu2 %vm164_vm0, %v8772_v44  ;;  %3909 = vmatpush.bf16.msrb.mxu0 %v10724_v57 }
 0x235   :  { %v2560_v43 = vpop.f32.mrf.mxu3 }
 0x236   :  { %v2745_v36 = vpop.f32.mrf.mxu2  ;;  %v2529_v20 = vpop.f32.mrf.mxu1 }
 0x237   :  { %v12870_v53 = vpop.f32.mrf.mxu0  ;;  %v2559_v46 = vadd.f32 %v2558_v58, %v2529_v20  ;;  %3910 = vmatpush.bf16.msrb.mxu0 %v10723_v35  ;;  %v2746_v55 = vadd.f32 %v2745_v36, %v12812_v12  ;;  %v12918_v12 = vld [vmem:[%s14865_s2] ss:$0 sm:$0xff]  ;;  %v8785_v58 = vld [vmem:[%s14864_s0 + $0x1a8] sm:$0xf0] }
 0x238   :  { %v8871_v36 = vld [vmem:[%s14864_s0 + $0xa0] sm:$0xf] }
 0x239   :  { %v12872_v42 = vadd.f32 %v2559_v46, %v2365_v48  ;;  %3328 = vmatmul.bf16.gmra.mxu1 %v12716_v56  ;;  %v8777_v56 = vld [vmem:[%s14864_s0 + $0x98] sm:$0xf0]  ;;  %v2765_v63 = vadd.f32 %v2746_v55, %v12740_v25  ;;  %v10731_v48 = vld [vmem:[%s14863_s1 + $0x180] sm:$0xff]  ;;  %v10763_v25 = vld [vmem:[%s14863_s1 + $0x90] sm:$0xff] }
 0x23a   :  { %8933 = vmatmul.msk.bf16.vlgmr.msrb.gmra.mxu3 %vm164_vm0, %v8868_v18  ;;  %v8780_v33 = vor.u32 %v10681_v14, %v8777_v56  ;;  %3939 = vmatpush.bf16.msra.mxu2 %v10731_v48  ;;  %v10701_v18 = vld [vmem:[%s14864_s0 + $0x1b4] sm:$0xf]  ;;  %v8881_v46 = vld [vmem:[%s14864_s0 + $0x1b8] sm:$0xf0]  ;;  %v8872_v14 = vor.u32 %v10700_v31, %v8871_v36  ;;  %v10750_v31 = vld [vmem:[%s14863_s1 + $0x48] sm:$0xff] }
 0x23b   :  { %4193 = vmatpush.bf16.msra.mxu3 %v10763_v25  ;;  %v10759_v56 = vld [vmem:[%s14863_s1 + $0x70] sm:$0xff]  ;;  %4299 = vmatpush.bf16.msra.mxu0 %v10748_v13 }
 0x23c   :  { %v10685_v55 = vld [vmem:[%s14864_s0 + $0x1b4] sm:$0xf] }
 0x23d   :  { %v2947_v50 = vpop.f32.mrf.mxu3  ;;  %v8796_v1 = vor.u32 %v10685_v55, %v8793_v47 }
 0x23e   :  { %v2747_v24 = vpop.f32.mrf.mxu2  ;;  %v2531_v16 = vpop.f32.mrf.mxu1  ;;  %4334 = vmatpush.bf16.msrb.mxu2 %v10750_v31 }
 0x23f   :  { %v12894_v40 = vpop.f32.mrf.mxu0  ;;  %v2561_v28 = vadd.f32 %v2560_v43, %v2531_v16  ;;  %v2748_v30 = vadd.f32 %v2747_v24, %v12832_v9  ;;  %v8788_v9 = vor.u32 %v10683_v4, %v8785_v58  ;;  %v10760_v43 = vld [vmem:[%s14863_s1 + $0x78] sm:$0xff]  ;;  %v10703_v58 = vld [vmem:[%s14864_s0 + $0x1c4] sm:$0xf] }
 0x240   :  { %4159 = vmatpush.bf16.msra.mxu1 %v10760_v43 }
 0x241   :  { %v12896_v5 = vadd.f32 %v2561_v28, %v2367_v19  ;;  %v2766_v29 = vadd.f32 %v2748_v30, %v12768_v6  ;;  %v8959_v28 = vld [vmem:[%s14864_s0 + $0xa0] sm:$0xf]  ;;  %v10702_v30 = vld [vmem:[%s14864_s0 + $0x1b4] sm:$0xf0] }
 0x242   :  { %3517 = vmatmul.bf16.gmra.mxu0 %v8784_v11 }
 0x243   :  { %8838 = vmatmul.msk.bf16.gmra.mxu2 %vm164_vm0, %v8780_v33  ;;  %v10758_v33 = vld [vmem:[%s14863_s1 + $0x68] sm:$0xff] }
 0x244   :  { %4160 = vmatpush.bf16.msra.mxu1 %v10759_v56 }
 0x245   :  { %v2949_v62 = vpop.f32.mrf.mxu3 }
 0x246   :  { %v2750_v0 = vpop.f32.mrf.mxu2  ;;  %v2918_v59 = vpop.f32.mrf.mxu1 }
 0x247   :  { %v12912_v3 = vpop.f32.mrf.mxu0  ;;  %v2948_v23 = vadd.f32 %v2947_v50, %v2918_v59  ;;  %v2751_v6 = vadd.f32 %v2750_v0, %v12853_v34  ;;  %v8884_v50 = vor.u32 %v10701_v18, %v8881_v46  ;;  %v10757_v59 = vld [vmem:[%s14863_s1 + $0x60] sm:$0xff]  ;;  %v10746_v18 = vld [vmem:[%s14863_s1 + $0x28] sm:$0xff]  ;;  %v10718_v46 = vld [vmem:[%s14864_s0 + $0xb4] sm:$0xf0] }
 0x248   :  { %4161 = vmatpush.bf16.msra.mxu1 %v10758_v33 }
 0x249   :  { %v2967_v45 = vadd.f32 %v2948_v23, %v2765_v63  ;;  %3709 = vmatmul.bf16.vlgmr.msrb.gmra.mxu1 %v8864_v26  ;;  %v2767_v11 = vadd.f32 %v2751_v6, %v12784_v2  ;;  %v10716_v2 = vld [vmem:[%s14864_s0 + $0xa4] sm:$0xf0] }
 0x24a   :  { %8934 = vmatmul.msk.bf16.gmra.mxu3 %vm164_vm0, %v8876_v61  ;;  %v8960_v26 = vor.u32 %v10716_v2, %v8959_v28  ;;  %v10782_v6 = vld [vmem:[%s14863_s1 + $0xe8] sm:$0xff] }
 0x24b   :  { %v2979_v10 = vadd.f32 %v12918_v12, %v2967_v45  ;;  %4528 = vmatpush.bf16.msrb.mxu3 %v10782_v6 }
 0x24c   :  { %4162 = vmatpush.bf16.msra.mxu1 %v10757_v59  ;;  %v10735_v59 = vld [vmem:[%s14864_s0 + $0x94] sm:$0xf] }
 0x24d   :  { %v2987_v60 = vmax.f32 %v2979_v10, 0.0  ;;  %v2952_v19 = vpop.f32.mrf.mxu3 }
 0x24e   :  { %v2752_v27 = vpop.f32.mrf.mxu2  ;;  %v2920_v22 = vpop.f32.mrf.mxu1 }
 0x24f   :  { %v12947_v44 = vpop.f32.mrf.mxu0  ;;  %2995 = vst.msk [vmem:[#allocation2 + $0x40] sm:$0xff] %vm1006_vm1, %v2987_v60  ;;  %v2950_v38 = vadd.f32 %v2949_v62, %v2920_v22  ;;  %v2753_v39 = vadd.f32 %v2752_v27, %v12870_v53  ;;  %v8889_v60 = vld [vmem:[%s14864_s0 + $0x1c8] sm:$0xf0] }
 0x250   :  { %4163 = vmatpush.bf16.msra.mxu1 %v10756_v51 }
 0x251   :  { %v2968_v49 = vadd.f32 %v2950_v38, %v2766_v29  ;;  %v2768_v48 = vadd.f32 %v2753_v39, %v12814_v15  ;;  %v8879_v15 = vld [vmem:[%s14864_s0 + $0x1b0] sm:$0xf] }
 0x252   :  { %3522 = vmatmul.bf16.gmra.mxu0 %v8792_v32  ;;  %v8880_v22 = vor.u32 %v10702_v30, %v8879_v15 }
 0x253   :  { %8839 = vmatmul.msk.bf16.gmra.mxu2 %vm164_vm0, %v8788_v9  ;;  %v2980_v20 = vadd.f32 %v12918_v12, %v2968_v49  ;;  %v10755_v9 = vld [vmem:[%s14863_s1 + $0x50] sm:$0xff]  ;;  %v8892_v49 = vor.u32 %v10703_v58, %v8889_v60  ;;  %v10369_v60 = vld [vmem:[%s14866_s3 + $0x8] sm:$0xf] }
 0x254   :  { %4164 = vmatpush.bf16.msra.mxu1 %v10755_v9  ;;  %v8969_v9 = vld [vmem:[%s14864_s0 + $0xb8] sm:$0xf0] }
 0x255   :  { %v2988_v57 = vmax.f32 %v2980_v20, 0.0  ;;  %v2954_v7 = vpop.f32.mrf.mxu3 }
 0x256   :  { %v2755_v17 = vpop.f32.mrf.mxu2  ;;  %v2923_v24 = vpop.f32.mrf.mxu1 }
 0x257   :  { %v12972_v34 = vpop.f32.mrf.mxu0  ;;  %2996 = vst.msk [vmem:[#allocation2 + $0x48] sm:$0xff] %vm1006_vm1, %v2988_v57  ;;  %v2953_v35 = vadd.f32 %v2952_v19, %v2923_v24  ;;  %v2756_v10 = vadd.f32 %v2755_v17, %v12894_v40  ;;  %v10747_v40 = vld [vmem:[%s14863_s1 + $0x30] sm:$0xff] }
 0x258   :  { %4300 = vmatpush.bf16.msra.mxu0 %v10747_v40  ;;  %v10717_v40 = vld [vmem:[%s14864_s0 + $0xb4] sm:$0xf] }
 0x259   :  { %v2969_v16 = vadd.f32 %v2953_v35, %v2767_v11  ;;  %3714 = vmatmul.bf16.gmra.mxu1 %v8872_v14  ;;  %v2769_v43 = vadd.f32 %v2756_v10, %v12834_v37  ;;  %v8967_v37 = vld [vmem:[%s14864_s0 + $0xb0] sm:$0xf]  ;;  %v8961_v14 = vld [vmem:[%s14864_s0 + $0xa8] sm:$0xf0] }
 0x25a   :  { %8935 = vmatmul.msk.bf16.gmra.mxu3 %vm164_vm0, %v8884_v50  ;;  %v8968_v11 = vor.u32 %v10718_v46, %v8967_v37 }
 0x25b   :  { %v2981_v54 = vadd.f32 %v12918_v12, %v2969_v16 }
 0x25c   :  { %4301 = vmatpush.bf16.msra.mxu0 %v10746_v18 }
 0x25d   :  { %v2989_v52 = vmax.f32 %v2981_v54, 0.0  ;;  %v2957_v62 = vpop.f32.mrf.mxu3 }
 0x25e   :  { %v2757_v0 = vpop.f32.mrf.mxu2  ;;  %v6987_v53 = vld [vmem:[#allocation2 + $0x40] ss:$2 sm:$0xff]  ;;  %v7043_v61 = vld [vmem:[#allocation2 + $0x41] ss:$2 sm:$0xff]  ;;  %v2925_v63 = vpop.f32.mrf.mxu1 }
 0x25f   :  { %v12997_v23 = vpop.f32.mrf.mxu0  ;;  %v7094_v45 = vmax.f32 %v6987_v53, %v7043_v61  ;;  %2997 = vst.msk [vmem:[#allocation2 + $0x50] sm:$0xff] %vm1006_vm1, %v2989_v52  ;;  %v2955_v25 = vadd.f32 %v2954_v7, %v2925_v63  ;;  %v2758_v57 = vadd.f32 %v2757_v0, %v12912_v3  ;;  %v10715_v7 = vld [vmem:[%s14864_s0 + $0xa4] sm:$0xf]  ;;  %v10744_v52 = vld [vmem:[%s14863_s1 + $0x18] sm:$0xff]  ;;  %v8887_v0 = vld [vmem:[%s14864_s0 + $0x1c0] sm:$0xf] }
 0x260   :  { %v10745_v3 = vld [vmem:[%s14863_s1 + $0x20] sm:$0xff]  ;;  %v8964_v2 = vor.u32 %v10715_v7, %v8961_v14  ;;  %v9057_v53 = vld [vmem:[%s14864_s0 + $0x98] sm:$0xf0] }
 0x261   :  { %7122 = vst.msk [vmem:[#allocation3 + $0x20] sm:$0xff] %vm1006_vm1, %v7094_v45  ;;  %v2970_v41 = vadd.f32 %v2955_v25, %v2768_v48  ;;  %v2770_v39 = vadd.f32 %v2758_v57, %v12855_v21  ;;  %4302 = vmatpush.bf16.msra.mxu0 %v10745_v3  ;;  %v10704_v21 = vld [vmem:[%s14864_s0 + $0x1c4] sm:$0xf0]  ;;  %v10743_v45 = vld [vmem:[%s14863_s1 + $0x10] sm:$0xff]  ;;  %v13091_v13 = vor.u32 %v10735_v59, %v9057_v53  ;;  %v10736_v3 = vld [vmem:[%s14864_s0 + $0x94] sm:$0xf0] }
 0x262   :  { %3911 = vmatmul.bf16.vlgmr.msrb.gmra.mxu0 %v8960_v26  ;;  %v8888_v48 = vor.u32 %v10704_v21, %v8887_v0  ;;  %v8972_v57 = vor.u32 %v10717_v40, %v8969_v9  ;;  %v10778_v21 = vld [vmem:[%s14863_s1 + $0xc8] sm:$0xff]  ;;  %v10722_v59 = vld [vmem:[%s14864_s0 + $0x1d4] sm:$0xf0]  ;;  %v10777_v53 = vld [vmem:[%s14863_s1 + $0xc0] sm:$0xff] }
 0x263   :  { %8840 = vmatmul.msk.bf16.gmra.mxu2 %vm164_vm0, %v8796_v1  ;;  %v2982_v4 = vadd.f32 %v12918_v12, %v2970_v41 }
 0x265   :  { %v2990_v27 = vmax.f32 %v2982_v4, 0.0  ;;  %v2959_v32 = vpop.f32.mrf.mxu3  ;;  %4303 = vmatpush.bf16.msra.mxu0 %v10744_v52 }
 0x266   :  { %v2760_v19 = vpop.f32.mrf.mxu2  ;;  %v2928_v29 = vpop.f32.mrf.mxu1 }
 0x267   :  { %v13029_v38 = vpop.f32.mrf.mxu0  ;;  %2998 = vst.msk [vmem:[#allocation2 + $0x58] sm:$0xff] %vm1006_vm1, %v2990_v27  ;;  %v2958_v36 = vadd.f32 %v2957_v62, %v2928_v29  ;;  %v2761_v62 = vadd.f32 %v2760_v19, %v12947_v44  ;;  %v10720_v27 = vld [vmem:[%s14864_s0 + $0x1c4] sm:$0xf0] }
 0x268   :  { %v7178_v30 = vld [vmem:[#allocation3 + $0x20] sm:$0xff] }
 0x269   :  { %v2971_v20 = vadd.f32 %v2958_v36, %v2769_v43  ;;  %3719 = vmatmul.bf16.gmra.mxu1 %v8880_v22  ;;  %v2771_v51 = vadd.f32 %v2761_v62, %v12872_v42  ;;  %4304 = vmatpush.bf16.msra.mxu0 %v10743_v45  ;;  %v8975_v42 = vld [vmem:[%s14864_s0 + $0x1c0] sm:$0xf] }
 0x26a   :  { %8936 = vmatmul.msk.bf16.gmra.mxu3 %vm164_vm0, %v8892_v49  ;;  %v8976_v31 = vor.u32 %v10720_v27, %v8975_v42  ;;  %v9063_v42 = vld [vmem:[%s14864_s0 + $0xa0] sm:$0xf]  ;;  %v10752_v27 = vld [vmem:[%s14864_s0 + $0xa4] sm:$0xf0] }
 0x26b   :  { %v2983_v17 = vadd.f32 %v12918_v12, %v2971_v20  ;;  %v9064_v9 = vor.u32 %v10752_v27, %v9063_v42 }
 0x26d   :  { %v2991_v56 = vmax.f32 %v2983_v17, 0.0  ;;  %v2962_v50 = vpop.f32.mrf.mxu3 }
 0x26e   :  { %v2762_v24 = vpop.f32.mrf.mxu2  ;;  %v6989_v35 = vld [vmem:[#allocation2 + $0x50] ss:$2 sm:$0xff]  ;;  %v7045_v16 = vld [vmem:[#allocation2 + $0x51] ss:$2 sm:$0xff]  ;;  %v2930_v33 = vpop.f32.mrf.mxu1 }
 0x26f   :  { %v13060_v28 = vpop.f32.mrf.mxu0  ;;  %v7095_v54 = vmax.f32 %v6989_v35, %v7045_v16  ;;  %2999 = vst.msk [vmem:[#allocation2 + $0x120] sm:$0xff] %vm1006_vm1, %v2991_v56  ;;  %v2960_v55 = vadd.f32 %v2959_v32, %v2930_v33  ;;  %v2763_v32 = vadd.f32 %v2762_v24, %v12972_v34  ;;  %v10741_v34 = vld [vmem:[%s14863_s1] sm:$0xff]  ;;  %v10780_v56 = vld [vmem:[%s14863_s1 + $0xd8] sm:$0xff]  ;;  %v9065_v33 = vld [vmem:[%s14864_s0 + $0xa8] sm:$0xf0] }
 0x270   :  { %v10749_v24 = vld [vmem:[%s14863_s1 + $0x40] sm:$0xff]  ;;  %4493 = vmatpush.bf16.msrb.mxu1 %v10780_v56  ;;  %v10818_v56 = vld [vmem:[%s14863_s1 + $0x188] sm:$0xff] }
 0x271   :  { %7123 = vst.msk [vmem:[#allocation3 + $0x28] sm:$0xff] %vm1006_vm1, %v7095_v54  ;;  %v2972_v47 = vadd.f32 %v2960_v55, %v2770_v39  ;;  %v2772_v17 = vadd.f32 %v2763_v32, %v12896_v5  ;;  %v10751_v16 = vld [vmem:[%s14864_s0 + $0xa4] sm:$0xf]  ;;  %4335 = vmatpush.bf16.msrb.mxu2 %v10749_v24  ;;  %v9073_v32 = vld [vmem:[%s14864_s0 + $0x1b8] sm:$0xf0] }
 0x272   :  { %3916 = vmatmul.bf16.gmra.mxu0 %v8968_v11  ;;  %v9055_v11 = vld [vmem:[%s14864_s0 + $0x90] sm:$0xf]  ;;  %v9068_v0 = vor.u32 %v10751_v16, %v9065_v33 }
 0x273   :  { %9029 = vmatmul.msk.bf16.vlgmr.msra.gmra.mxu2 %vm164_vm0, %v8964_v2  ;;  %v2984_v26 = vadd.f32 %v12918_v12, %v2972_v47  ;;  %v13157_v55 = vor.u32 %v10736_v3, %v9055_v11 }
 0x275   :  { %v2992_v61 = vmax.f32 %v2984_v26, 0.0  ;;  %v2964_v63 = vpop.f32.mrf.mxu3 }
 0x276   :  { %v3201_v1 = vpop.f32.mrf.mxu2  ;;  %v2933_v25 = vpop.f32.mrf.mxu1 }
 0x277   :  { %v13087_v44 = vadd.f32 %v3201_v1, %v12997_v23  ;;  %v13089_v41 = vpop.f32.mrf.mxu0  ;;  %3000 = vst.msk [vmem:[#allocation2 + $0x128] sm:$0xff] %vm1006_vm1, %v2992_v61  ;;  %v2963_v15 = vadd.f32 %v2962_v50, %v2933_v25  ;;  %v10742_v23 = vld [vmem:[%s14863_s1 + $0x8] sm:$0xff]  ;;  %v10779_v50 = vld [vmem:[%s14863_s1 + $0xd0] sm:$0xff]  ;;  %v10719_v61 = vld [vmem:[%s14864_s0 + $0x1c4] sm:$0xf] }
 0x278   :  { %v7180_v10 = vld [vmem:[#allocation3 + $0x28] sm:$0xff]  ;;  %4305 = vmatpush.bf16.msra.mxu0 %v10742_v23  ;;  %4494 = vmatpush.bf16.msrb.mxu1 %v10779_v50 }
 0x279   :  { %v7182_v4 = vmax.f32 %v7178_v30, %v7180_v10  ;;  %v2973_v58 = vadd.f32 %v2963_v15, %v2771_v51  ;;  %3724 = vmatmul.bf16.gmra.mxu1 %v8888_v48 }
 0x27a   :  { %9125 = vmatmul.msk.bf16.vlgmr.msra.gmra.mxu3 %vm164_vm0, %v13091_v13 }
 0x27b   :  { %v7184_v19 = vpack.c.bf16 %v7182_v4, %v7182_v4  ;;  %v2985_v22 = vadd.f32 %v12918_v12, %v2973_v58 }
 0x27c   :  { %4306 = vmatpush.bf16.msra.mxu0 %v10741_v34  ;;  %4495 = vmatpush.bf16.msrb.mxu1 %v10778_v21  ;;  %v10740_v21 = vld [vmem:[%s14864_s0 + $0x1b4] sm:$0xf0] }
 0x27d   :  { %v7188_v29 = vsel %vm11992_vm4, %v7184_v19, %v10369_v60  ;;  %v2993_v49 = vmax.f32 %v2985_v22, 0.0  ;;  %v3343_v36 = vpop.f32.mrf.mxu3  ;;  %v10776_v60 = vld [vmem:[%s14863_s1 + $0xb8] sm:$0xff]  ;;  %v10739_v19 = vld [vmem:[%s14864_s0 + $0x1b4] sm:$0xf] }
 0x27e   :  { %v3203_v43 = vpop.f32.mrf.mxu2  ;;  %10370 = vst [vmem:[%s14866_s3 + $0x8] sm:$0xf] %v7188_v29  ;;  %v7015_v6 = vld [vmem:[#allocation2 + $0x120] ss:$2 sm:$0xff]  ;;  %v7071_v20 = vld [vmem:[#allocation2 + $0x121] ss:$2 sm:$0xff]  ;;  %v2935_v37 = vpop.f32.mrf.mxu1 }
 0x27f   :  { %v3204_v18 = vadd.f32 %v3203_v43, %v13029_v38  ;;  %v13126_v46 = vpop.f32.mrf.mxu0  ;;  %v7108_v7 = vmax.f32 %v7015_v6, %v7071_v20  ;;  %3001 = vst.msk [vmem:[#allocation2 + $0x130] sm:$0xff] %vm1006_vm1, %v2993_v49  ;;  %v2965_v14 = vadd.f32 %v2964_v63, %v2935_v37  ;;  %v10781_v38 = vld [vmem:[%s14863_s1 + $0xe0] sm:$0xff]  ;;  %v8977_v63 = vld [vmem:[%s14864_s0 + $0x1c8] sm:$0xf0] }
 0x280   :  { %4529 = vmatpush.bf16.msrb.mxu3 %v10781_v38  ;;  %v8980_v10 = vor.u32 %v10719_v61, %v8977_v63  ;;  %4496 = vmatpush.bf16.msrb.mxu1 %v10777_v53  ;;  %v10371_v20 = vld [vmem:[%s14866_s3 + $0x24] sm:$0xf]  ;;  %v10721_v38 = vld [vmem:[%s14864_s0 + $0x1d4] sm:$0xf] }
 0x281   :  { %7136 = vst.msk [vmem:[#allocation3 + $0x90] sm:$0xff] %vm1006_vm1, %v7108_v7  ;;  %v2974_v5 = vadd.f32 %v2965_v14, %v2772_v17  ;;  %v10800_v17 = vld [vmem:[%s14863_s1 + $0x138] sm:$0xff]  ;;  %v9131_v7 = vld [vmem:[%s14864_s0 + $0x80] sm:$0xf]  ;;  %v10734_v14 = vld [vmem:[%s14864_s0 + $0x84] sm:$0xf0] }
 0x282   :  { %3921 = vmatmul.bf16.gmra.mxu0 %v8976_v31  ;;  %4730 = vmatpush.bf16.msra.mxu2 %v10800_v17  ;;  %v10773_v63 = vld [vmem:[%s14863_s1 + $0xa0] sm:$0xff] }
 0x283   :  { %9030 = vmatmul.msk.bf16.gmra.mxu2 %vm164_vm0, %v8972_v57  ;;  %v2986_v35 = vadd.f32 %v12918_v12, %v2974_v5  ;;  %v10797_v57 = vld [vmem:[%s14863_s1 + $0x120] sm:$0xff]  ;;  %v8985_v5 = vld [vmem:[%s14864_s0 + $0x1d8] sm:$0xf0] }
 0x284   :  { %4497 = vmatpush.bf16.msrb.mxu1 %v10776_v60  ;;  %4932 = vmatpush.bf16.msra.mxu3 %v10818_v56  ;;  %v10799_v56 = vld [vmem:[%s14863_s1 + $0x130] sm:$0xff] }
 0x285   :  { %v2994_v2 = vmax.f32 %v2986_v35, 0.0  ;;  %v3345_v54 = vpop.f32.mrf.mxu3  ;;  %v9132_v35 = vor.u32 %v10734_v14, %v9131_v7 }
 0x286   :  { %v3206_v39 = vpop.f32.mrf.mxu2  ;;  %v3314_v12 = vpop.f32.mrf.mxu1  ;;  %4731 = vmatpush.bf16.msra.mxu2 %v10799_v56 }
 0x287   :  { %v3207_v47 = vadd.f32 %v3206_v39, %v13060_v28  ;;  %v13160_v52 = vpop.f32.mrf.mxu0  ;;  %3002 = vst.msk [vmem:[#allocation2 + $0x138] sm:$0xff] %vm1006_vm1, %v2994_v2  ;;  %v3315_v62 = vadd.f32 %v3314_v12, %v13087_v44  ;;  %v8983_v28 = vld [vmem:[%s14864_s0 + $0x1d0] sm:$0xf]  ;;  %v8988_v39 = vor.u32 %v10721_v38, %v8985_v5  ;;  %v10774_v12 = vld [vmem:[%s14863_s1 + $0xa8] sm:$0xff]  ;;  %v10792_v38 = vld [vmem:[%s14863_s1 + $0xf8] sm:$0xff] }
 0x288   :  { %v8984_v45 = vor.u32 %v10722_v59, %v8983_v28  ;;  %v7179_v34 = vld [vmem:[#allocation3 + $0x90] sm:$0xff]  ;;  %v9081_v28 = vld [vmem:[%s14864_s0 + $0x1c8] sm:$0xf0]  ;;  %v10738_v5 = vld [vmem:[%s14864_s0 + $0x1a4] sm:$0xf0] }
 0x289   :  { %v13167_v26 = vadd.f32 %v3343_v36, %v3315_v62  ;;  %4165 = vmatmul.bf16.vlgmr.msra.gmra.mxu1 %v13157_v55  ;;  %v13214_v36 = vor.u32 %v10739_v19, %v9073_v32  ;;  %v10753_v62 = vld [vmem:[%s14864_s0 + $0x1c4] sm:$0xf] }
 0x28a   :  { %9126 = vmatmul.msk.bf16.gmra.mxu3 %vm164_vm0, %v9068_v0  ;;  %v10796_v0 = vld [vmem:[%s14863_s1 + $0x118] sm:$0xff] }
 0x28d   :  { %v3348_v48 = vpop.f32.mrf.mxu3 }
 0x28e   :  { %v3208_v1 = vpop.f32.mrf.mxu2  ;;  %v7017_v44 = vld [vmem:[#allocation2 + $0x130] ss:$2 sm:$0xff]  ;;  %v7073_v25 = vld [vmem:[#allocation2 + $0x131] ss:$2 sm:$0xff]  ;;  %v3316_v30 = vpop.f32.mrf.mxu1 }
 0x28f   :  { %v3209_v51 = vadd.f32 %v3208_v1, %v13089_v41  ;;  %v13187_v15 = vpop.f32.mrf.mxu0  ;;  %v7109_v4 = vmax.f32 %v7017_v44, %v7073_v25  ;;  %v3317_v58 = vadd.f32 %v3316_v30, %v3204_v18  ;;  %v10798_v41 = vld [vmem:[%s14863_s1 + $0x128] sm:$0xff]  ;;  %v9084_v44 = vor.u32 %v10753_v62, %v9081_v28  ;;  %v10795_v30 = vld [vmem:[%s14863_s1 + $0x110] sm:$0xff]  ;;  %v9221_v28 = vld [vmem:[%s14864_s0 + $0xb8] sm:$0xf0] }
 0x290   :  { %4695 = vmatpush.bf16.msrb.mxu0 %v10798_v41  ;;  %v10767_v62 = vld [vmem:[%s14864_s0 + $0xb4] sm:$0xf] }
 0x291   :  { %7137 = vst.msk [vmem:[#allocation3 + $0x98] sm:$0xff] %vm1006_vm1, %v7109_v4  ;;  %v13190_v23 = vadd.f32 %v3345_v54, %v3317_v58 }
 0x292   :  { %3926 = vmatmul.bf16.gmra.mxu0 %v8984_v45 }
 0x293   :  { %9031 = vmatmul.msk.bf16.gmra.mxu2 %vm164_vm0, %v8980_v10  ;;  %v10733_v10 = vld [vmem:[%s14864_s0 + $0x84] sm:$0xf] }
 0x294   :  { %4696 = vmatpush.bf16.msrb.mxu0 %v10797_v57 }
 0x295   :  { %v3350_v40 = vpop.f32.mrf.mxu3 }
 0x296   :  { %v3211_v22 = vpop.f32.mrf.mxu2  ;;  %v3319_v43 = vpop.f32.mrf.mxu1 }
 0x297   :  { %v3212_v29 = vadd.f32 %v3211_v22, %v13126_v46  ;;  %v13212_v49 = vpop.f32.mrf.mxu0  ;;  %v3320_v31 = vadd.f32 %v3319_v43, %v3207_v47  ;;  %v10775_v46 = vld [vmem:[%s14863_s1 + $0xb0] sm:$0xff]  ;;  %v10794_v22 = vld [vmem:[%s14863_s1 + $0x108] sm:$0xff] }
 0x298   :  { %v7181_v6 = vld [vmem:[#allocation3 + $0x98] sm:$0xff]  ;;  %4498 = vmatpush.bf16.msrb.mxu1 %v10775_v46  ;;  %4697 = vmatpush.bf16.msrb.mxu0 %v10796_v0 }
 0x299   :  { %v7183_v18 = vmax.f32 %v7179_v34, %v7181_v6  ;;  %v13219_v37 = vadd.f32 %v3348_v48, %v3320_v31  ;;  %4170 = vmatmul.bf16.gmra.mxu1 %v9064_v9  ;;  %v9079_v9 = vld [vmem:[%s14864_s0 + $0x1c0] sm:$0xf] }
 0x29a   :  { %9127 = vmatmul.msk.bf16.gmra.mxu3 %vm164_vm0, %v13214_v36  ;;  %v10793_v6 = vld [vmem:[%s14863_s1 + $0x100] sm:$0xff] }
 0x29b   :  { %v7185_v24 = vpack.c.bf16 %v7183_v18, %v7183_v18 }
 0x29c   :  { %4499 = vmatpush.bf16.msrb.mxu1 %v10774_v12  ;;  %4698 = vmatpush.bf16.msrb.mxu0 %v10795_v30  ;;  %v10737_v30 = vld [vmem:[%s14864_s0 + $0x1a4] sm:$0xf] }
 0x29d   :  { %v7191_v50 = vsel %vm11992_vm4, %v7185_v24, %v10371_v20  ;;  %v3353_v3 = vpop.f32.mrf.mxu3  ;;  %v10815_v24 = vld [vmem:[%s14863_s1 + $0x170] sm:$0xff] }
 0x29e   :  { %v3213_v11 = vpop.f32.mrf.mxu2  ;;  %10372 = vst [vmem:[%s14866_s3 + $0x24] sm:$0xf] %v7191_v50  ;;  %v3321_v33 = vpop.f32.mrf.mxu1  ;;  %v10817_v50 = vld [vmem:[%s14863_s1 + $0x180] sm:$0xff] }
 0x29f   :  { %v3214_v16 = vadd.f32 %v3213_v11, %v13160_v52  ;;  %v3508_v2 = vpop.f32.mrf.mxu0  ;;  %v3322_v54 = vadd.f32 %v3321_v33, %v3209_v51  ;;  %v9071_v52 = vld [vmem:[%s14864_s0 + $0x1b0] sm:$0xf]  ;;  %4933 = vmatpush.bf16.msra.mxu3 %v10817_v50  ;;  %v10836_v50 = vld [vmem:[%s14863_s1 + $0x48] sm:$0xff] }
 0x2a0   :  { %v13274_v61 = vor.u32 %v10740_v21, %v9071_v52  ;;  %4500 = vmatpush.bf16.msrb.mxu1 %v10773_v63  ;;  %4699 = vmatpush.bf16.msrb.mxu0 %v10794_v22  ;;  %v10814_v52 = vld [vmem:[%s14863_s1 + $0x168] sm:$0xff]  ;;  %v9211_v21 = vld [vmem:[%s14864_s0 + $0xa0] sm:$0xf]  ;;  %v9219_v22 = vld [vmem:[%s14864_s0 + $0xb0] sm:$0xf] }
 0x2a1   :  { %v13253_v47 = vadd.f32 %v3350_v40, %v3322_v54  ;;  %v10816_v40 = vld [vmem:[%s14863_s1 + $0x178] sm:$0xff] }
 0x2a2   :  { %4307 = vmatmul.bf16.vlgmr.msra.gmra.mxu0 %v9132_v35 }
 0x2a3   :  { %9032 = vmatmul.msk.bf16.gmra.mxu2 %vm164_vm0, %v8988_v39 }
 0x2a4   :  { %4897 = vmatpush.bf16.msra.mxu1 %v10816_v40  ;;  %4700 = vmatpush.bf16.msrb.mxu0 %v10793_v6  ;;  %v9229_v40 = vld [vmem:[%s14864_s0 + $0x1c8] sm:$0xf0] }
 0x2a5   :  { %v3355_v53 = vpop.f32.mrf.mxu3 }
 0x2a6   :  { %v3216_v59 = vpop.f32.mrf.mxu2  ;;  %v3324_v48 = vpop.f32.mrf.mxu1 }
 0x2a7   :  { %v3217_v1 = vadd.f32 %v3216_v59, %v13187_v15  ;;  %v3510_v45 = vpop.f32.mrf.mxu0  ;;  %v3325_v25 = vadd.f32 %v3324_v48, %v3212_v29  ;;  %v9133_v15 = vld [vmem:[%s14864_s0 + $0x88] sm:$0xf0]  ;;  %v10754_v29 = vld [vmem:[%s14864_s0 + $0x1c4] sm:$0xf0] }
 0x2a8   :  { %v9136_v27 = vor.u32 %v10733_v10, %v9133_v15  ;;  %v9080_v34 = vor.u32 %v10754_v29, %v9079_v9  ;;  %4898 = vmatpush.bf16.msra.mxu1 %v10815_v24  ;;  %4701 = vmatpush.bf16.msrb.mxu0 %v10792_v38  ;;  %v9141_v10 = vld [vmem:[%s14864_s0 + $0x1a8] sm:$0xf0] }
 0x2a9   :  { %v13280_v51 = vadd.f32 %v3353_v3, %v3325_v25  ;;  %4175 = vmatmul.bf16.gmra.mxu1 %v13274_v61  ;;  %v10813_v25 = vld [vmem:[%s14863_s1 + $0x160] sm:$0xff] }
 0x2aa   :  { %9128 = vmatmul.msk.bf16.gmra.mxu3 %vm164_vm0, %v9084_v44 }
 0x2ac   :  { %4899 = vmatpush.bf16.msra.mxu1 %v10814_v52  ;;  %v10809_v52 = vld [vmem:[%s14863_s1 + $0x140] sm:$0xff] }
 0x2ad   :  { %v3358_v58 = vpop.f32.mrf.mxu3 }
 0x2ae   :  { %v3218_v4 = vpop.f32.mrf.mxu2  ;;  %v3326_v41 = vpop.f32.mrf.mxu1 }
 0x2af   :  { %v3219_v60 = vadd.f32 %v3218_v4, %v13212_v49  ;;  %v3513_v42 = vpop.f32.mrf.mxu0  ;;  %v3327_v19 = vadd.f32 %v3326_v41, %v3214_v16  ;;  %v9213_v49 = vld [vmem:[%s14864_s0 + $0xa8] sm:$0xf0]  ;;  %v10791_v16 = vld [vmem:[%s14863_s1 + $0xf0] sm:$0xff]  ;;  %v9144_v41 = vor.u32 %v10737_v30, %v9141_v10 }
 0x2b0   :  { %4702 = vmatpush.bf16.msrb.mxu0 %v10791_v16  ;;  %4900 = vmatpush.bf16.msra.mxu1 %v10813_v25  ;;  %v9227_v16 = vld [vmem:[%s14864_s0 + $0x1c0] sm:$0xf] }
 0x2b1   :  { %v13294_v32 = vadd.f32 %v3355_v53, %v3327_v19  ;;  %v10848_v19 = vld [vmem:[%s14863_s1 + $0x88] sm:$0xff] }
 0x2b2   :  { %4312 = vmatmul.bf16.gmra.mxu0 %v13157_v55  ;;  %v10765_v55 = vld [vmem:[%s14864_s0 + $0xa4] sm:$0xf] }
 0x2b3   :  { %9185 = vmatmul.msk.bf16.vlgmr.msrb.gmra.mxu2 %vm164_vm0, %v9136_v27  ;;  %v9216_v57 = vor.u32 %v10765_v55, %v9213_v49  ;;  %v10812_v27 = vld [vmem:[%s14863_s1 + $0x158] sm:$0xff] }
 0x2b4   :  { %4901 = vmatpush.bf16.msra.mxu1 %v10812_v27  ;;  %5151 = vmatpush.bf16.msra.mxu0 %v10848_v19 }
 0x2b5   :  { %v3360_v43 = vpop.f32.mrf.mxu3 }
 0x2b6   :  { %v3537_v31 = vpop.f32.mrf.mxu2  ;;  %v3329_v18 = vpop.f32.mrf.mxu1 }
 0x2b7   :  { %v3538_v20 = vadd.f32 %v3537_v31, %v3508_v2  ;;  %v3515_v46 = vpop.f32.mrf.mxu0  ;;  %v3330_v17 = vadd.f32 %v3329_v18, %v3217_v1  ;;  %v10784_v18 = vld [vmem:[%s14864_s0 + $0xb4] sm:$0xf0] }
 0x2b9   :  { %v13320_v7 = vadd.f32 %v3538_v20, %v13167_v26  ;;  %v13322_v14 = vadd.f32 %v3358_v58, %v3330_v17  ;;  %4180 = vmatmul.bf16.gmra.mxu1 %v9080_v34  ;;  %v9139_v26 = vld [vmem:[%s14864_s0 + $0x1a0] sm:$0xf]  ;;  %v9307_v20 = vld [vmem:[%s14864_s0 + $0xb0] sm:$0xf] }
 0x2ba   :  { %9281 = vmatmul.msk.bf16.vlgmr.msrb.gmra.mxu3 %vm164_vm0, %v9216_v57  ;;  %v9140_v35 = vor.u32 %v10738_v5, %v9139_v26  ;;  %v9308_v17 = vor.u32 %v10784_v18, %v9307_v20  ;;  %v10847_v26 = vld [vmem:[%s14863_s1 + $0x80] sm:$0xff]  ;;  %v10850_v5 = vld [vmem:[%s14863_s1 + $0x98] sm:$0xff] }
 0x2bb   :  { %5152 = vmatpush.bf16.msra.mxu0 %v10847_v26  ;;  %5186 = vmatpush.bf16.msrb.mxu2 %v10850_v5  ;;  %v13527_v20 = vld [vmem:[%s14865_s2] ss:$0 sm:$0xff]  ;;  %v9323_v26 = vld [vmem:[%s14864_s0 + $0x1d0] sm:$0xf]  ;;  %v10788_v5 = vld [vmem:[%s14864_s0 + $0x1d4] sm:$0xf0] }
 0x2bc   :  { %5328 = vmatpush.bf16.msrb.mxu3 %v10836_v50  ;;  %v10785_v50 = vld [vmem:[%s14864_s0 + $0xc4] sm:$0xf] }
 0x2bd   :  { %v13343_v3 = vpop.f32.mrf.mxu3 }
 0x2be   :  { %v3539_v11 = vpop.f32.mrf.mxu2  ;;  %v3331_v2 = vpop.f32.mrf.mxu1 }
 0x2bf   :  { %v3540_v33 = vadd.f32 %v3539_v11, %v3510_v45  ;;  %v3518_v39 = vpop.f32.mrf.mxu0  ;;  %v3332_v54 = vadd.f32 %v3331_v2, %v3219_v60  ;;  %v9224_v45 = vor.u32 %v10767_v62, %v9221_v28  ;;  %v9237_v2 = vld [vmem:[%s14864_s0 + $0x1d8] sm:$0xf0] }
 0x2c1   :  { %v13349_v12 = vadd.f32 %v3540_v33, %v13190_v23  ;;  %v13351_v0 = vadd.f32 %v3360_v43, %v3332_v54  ;;  %v10766_v23 = vld [vmem:[%s14864_s0 + $0xa4] sm:$0xf0]  ;;  %v10771_v33 = vld [vmem:[%s14864_s0 + $0x1d4] sm:$0xf] }
 0x2c2   :  { %4317 = vmatmul.bf16.gmra.mxu0 %v9140_v35  ;;  %v10810_v35 = vld [vmem:[%s14863_s1 + $0x148] sm:$0xff]  ;;  %v9240_v28 = vor.u32 %v10771_v33, %v9237_v2  ;;  %v10841_v33 = vld [vmem:[%s14863_s1 + $0x50] sm:$0xff] }
 0x2c3   :  { %9186 = vmatmul.msk.bf16.gmra.mxu2 %vm164_vm0, %v13091_v13  ;;  %v9212_v13 = vor.u32 %v10766_v23, %v9211_v21 }
 0x2c5   :  { %v13370_v53 = vpop.f32.mrf.mxu3 }
 0x2c6   :  { %v3542_v59 = vpop.f32.mrf.mxu2  ;;  %v13372_v48 = vpop.f32.mrf.mxu1 }
 0x2c7   :  { %v3543_v63 = vadd.f32 %v3542_v59, %v3513_v42  ;;  %v3520_v1 = vpop.f32.mrf.mxu0 }
 0x2c9   :  { %v13375_v44 = vadd.f32 %v3543_v63, %v13219_v37  ;;  %4501 = vmatmul.bf16.vlgmr.msrb.gmra.mxu1 %v9212_v13  ;;  %v10846_v13 = vld [vmem:[%s14863_s1 + $0x78] sm:$0xff]  ;;  %v9315_v63 = vld [vmem:[%s14864_s0 + $0xc0] sm:$0xf] }
 0x2ca   :  { %9282 = vmatmul.msk.bf16.gmra.mxu3 %vm164_vm0, %v9224_v45  ;;  %v9309_v45 = vld [vmem:[%s14864_s0 + $0xb8] sm:$0xf0]  ;;  %5153 = vmatpush.bf16.msra.mxu0 %v10846_v13 }
 0x2cd   :  { %v13387_v4 = vpop.f32.mrf.mxu3 }
 0x2ce   :  { %v3544_v15 = vpop.f32.mrf.mxu2  ;;  %v13389_v60 = vpop.f32.mrf.mxu1 }
 0x2cf   :  { %v3545_v37 = vadd.f32 %v3544_v15, %v3515_v46  ;;  %v3523_v58 = vpop.f32.mrf.mxu0  ;;  %v10845_v15 = vld [vmem:[%s14863_s1 + $0x70] sm:$0xff] }
 0x2d0   :  { %5154 = vmatpush.bf16.msra.mxu0 %v10845_v15 }
 0x2d1   :  { %v13392_v42 = vadd.f32 %v3545_v37, %v13253_v47  ;;  %v10768_v47 = vld [vmem:[%s14864_s0 + $0xb4] sm:$0xf0] }
 0x2d2   :  { %4322 = vmatmul.bf16.gmra.mxu0 %v13274_v61  ;;  %v10769_v61 = vld [vmem:[%s14864_s0 + $0x1c4] sm:$0xf]  ;;  %v9220_v55 = vor.u32 %v10768_v47, %v9219_v22  ;;  %v10844_v22 = vld [vmem:[%s14863_s1 + $0x68] sm:$0xff]  ;;  %v3740_v47 = vadd.f32 %v13343_v3, %v13372_v48 }
 0x2d3   :  { %9187 = vmatmul.msk.bf16.gmra.mxu2 %vm164_vm0, %v9144_v41  ;;  %v9232_v34 = vor.u32 %v10769_v61, %v9229_v40  ;;  %v9235_v61 = vld [vmem:[%s14864_s0 + $0x1d0] sm:$0xf]  ;;  %v10772_v40 = vld [vmem:[%s14864_s0 + $0x1d4] sm:$0xf0] }
 0x2d4   :  { %5155 = vmatpush.bf16.msra.mxu0 %v10844_v22 }
 0x2d5   :  { %v13414_v29 = vpop.f32.mrf.mxu3 }
 0x2d6   :  { %v3547_v9 = vpop.f32.mrf.mxu2  ;;  %v13416_v31 = vpop.f32.mrf.mxu1 }
 0x2d7   :  { %v3548_v49 = vadd.f32 %v3547_v9, %v3518_v39  ;;  %v3525_v43 = vpop.f32.mrf.mxu0  ;;  %v9405_v9 = vld [vmem:[%s14864_s0 + $0xc8] sm:$0xf0]  ;;  %v3745_v13 = vadd.f32 %v13387_v4, %v13416_v31  ;;  %v9413_v4 = vld [vmem:[%s14864_s0 + $0xd8] sm:$0xf0] }
 0x2d9   :  { %v13419_v6 = vadd.f32 %v3548_v49, %v13280_v51  ;;  %4506 = vmatmul.bf16.gmra.mxu1 %v9220_v55  ;;  %v10811_v51 = vld [vmem:[%s14863_s1 + $0x150] sm:$0xff]  ;;  %v9236_v55 = vor.u32 %v10772_v40, %v9235_v61  ;;  %v10843_v49 = vld [vmem:[%s14863_s1 + $0x60] sm:$0xff]  ;;  %v10834_v40 = vld [vmem:[%s14863_s1 + $0x38] sm:$0xff] }
 0x2da   :  { %9283 = vmatmul.msk.bf16.gmra.mxu3 %vm164_vm0, %v9232_v34  ;;  %4902 = vmatpush.bf16.msra.mxu1 %v10811_v51 }
 0x2db   :  { %5156 = vmatpush.bf16.msra.mxu0 %v10843_v49 }
 0x2dd   :  { %v13428_v57 = vpop.f32.mrf.mxu3 }
 0x2de   :  { %v3549_v46 = vpop.f32.mrf.mxu2  ;;  %v13433_v24 = vpop.f32.mrf.mxu1  ;;  %4903 = vmatpush.bf16.msra.mxu1 %v10810_v35 }
 0x2df   :  { %v3550_v56 = vadd.f32 %v3549_v46, %v3520_v1  ;;  %v3912_v38 = vpop.f32.mrf.mxu0  ;;  %v10786_v1 = vld [vmem:[%s14864_s0 + $0xc4] sm:$0xf0] }
 0x2e0   :  { %v9316_v10 = vor.u32 %v10786_v1, %v9315_v63  ;;  %v10803_v1 = vld [vmem:[%s14864_s0 + $0xd4] sm:$0xf] }
 0x2e1   :  { %v13445_v11 = vadd.f32 %v3550_v56, %v13294_v32  ;;  %v10770_v32 = vld [vmem:[%s14864_s0 + $0x1c4] sm:$0xf0]  ;;  %v10842_v56 = vld [vmem:[%s14863_s1 + $0x58] sm:$0xff]  ;;  %v9416_v22 = vor.u32 %v10803_v1, %v9413_v4 }
 0x2e2   :  { %4703 = vmatmul.bf16.vlgmr.msrb.gmra.mxu0 %v9308_v17  ;;  %4904 = vmatpush.bf16.msra.mxu1 %v10809_v52 }
 0x2e3   :  { %9188 = vmatmul.msk.bf16.gmra.mxu2 %vm164_vm0, %v13214_v36  ;;  %v9228_v36 = vor.u32 %v10770_v32, %v9227_v16  ;;  %5157 = vmatpush.bf16.msra.mxu0 %v10842_v56  ;;  %v9324_v32 = vor.u32 %v10788_v5, %v9323_v26 }
 0x2e5   :  { %v13464_v54 = vpop.f32.mrf.mxu3 }
 0x2e6   :  { %v3552_v39 = vpop.f32.mrf.mxu2  ;;  %v13469_v23 = vpop.f32.mrf.mxu1  ;;  %5293 = vmatpush.bf16.msrb.mxu1 %v10834_v40 }
 0x2e7   :  { %v3553_v21 = vadd.f32 %v3552_v39, %v3523_v58  ;;  %v3914_v62 = vpop.f32.mrf.mxu0  ;;  %5158 = vmatpush.bf16.msra.mxu0 %v10841_v33  ;;  %v9411_v33 = vld [vmem:[%s14864_s0 + $0xd0] sm:$0xf] }
 0x2e9   :  { %v13472_v59 = vadd.f32 %v3553_v21, %v13322_v14  ;;  %4511 = vmatmul.bf16.gmra.mxu1 %v9228_v36  ;;  %v10783_v14 = vld [vmem:[%s14864_s0 + $0xb4] sm:$0xf] }
 0x2ea   :  { %9284 = vmatmul.msk.bf16.gmra.mxu3 %vm164_vm0, %v9240_v28  ;;  %v9312_v27 = vor.u32 %v10783_v14, %v9309_v45 }
 0x2ed   :  { %v13490_v30 = vpop.f32.mrf.mxu3 }
 0x2ee   :  { %v3554_v25 = vpop.f32.mrf.mxu2  ;;  %v13495_v58 = vpop.f32.mrf.mxu1 }
 0x2ef   :  { %v3555_v37 = vadd.f32 %v3554_v25, %v3525_v43  ;;  %v3917_v41 = vpop.f32.mrf.mxu0  ;;  %v3759_v43 = vadd.f32 %v3740_v47, %v13320_v7  ;;  %v3742_v7 = vadd.f32 %v13370_v53, %v13389_v60  ;;  %v9317_v53 = vld [vmem:[%s14864_s0 + $0xc8] sm:$0xf0] }
 0x2f0   :  { %v9320_v21 = vor.u32 %v10785_v50, %v9317_v53  ;;  %v10833_v53 = vld [vmem:[%s14863_s1 + $0x30] sm:$0xff] }
 0x2f1   :  { %v13498_v19 = vadd.f32 %v3555_v37, %v13351_v0  ;;  %v10801_v0 = vld [vmem:[%s14864_s0 + $0xc4] sm:$0xf]  ;;  %v3760_v2 = vadd.f32 %v3742_v7, %v13349_v12  ;;  %v9403_v12 = vld [vmem:[%s14864_s0 + $0xc0] sm:$0xf]  ;;  %5294 = vmatpush.bf16.msrb.mxu1 %v10833_v53 }
 0x2f2   :  { %4708 = vmatmul.bf16.gmra.mxu0 %v9316_v10  ;;  %v9408_v17 = vor.u32 %v10801_v0, %v9405_v9  ;;  %v3761_v10 = vadd.f32 %v3745_v13, %v13375_v44  ;;  %v3747_v0 = vadd.f32 %v13414_v29, %v13433_v24  ;;  %v10790_v9 = vld [vmem:[%s14864_s0 + $0x1e4] sm:$0xf0]  ;;  %v9325_v29 = vld [vmem:[%s14864_s0 + $0x1d8] sm:$0xf0] }
 0x2f3   :  { %9377 = vmatmul.msk.bf16.vlgmr.msra.gmra.mxu2 %vm164_vm0, %v9312_v27 }
 0x2f4   :  { %v3762_v56 = vadd.f32 %v3747_v0, %v13392_v42 }
 0x2f5   :  { %v13518_v3 = vpop.f32.mrf.mxu3 }
 0x2f6   :  { %v3941_v48 = vpop.f32.mrf.mxu2  ;;  %v13529_v18 = vpop.f32.mrf.mxu1 }
 0x2f7   :  { %v3942_v34 = vadd.f32 %v3941_v48, %v3912_v38  ;;  %v13531_v46 = vpop.f32.mrf.mxu0  ;;  %v10787_v48 = vld [vmem:[%s14864_s0 + $0x1d4] sm:$0xf] }
 0x2f8   :  { %v9328_v50 = vor.u32 %v10787_v48, %v9325_v29 }
 0x2f9   :  { %v3961_v51 = vadd.f32 %v3942_v34, %v3759_v43  ;;  %4516 = vmatmul.bf16.gmra.mxu1 %v9236_v55 }
 0x2fa   :  { %9473 = vmatmul.msk.bf16.vlgmr.msra.gmra.mxu3 %vm164_vm0, %v9408_v17 }
 0x2fb   :  { %v3973_v38 = vadd.f32 %v13527_v20, %v3961_v51  ;;  %v10849_v51 = vld [vmem:[%s14863_s1 + $0x90] sm:$0xff] }
 0x2fc   :  { %5187 = vmatpush.bf16.msrb.mxu2 %v10849_v51  ;;  %v3755_v51 = vadd.f32 %v13490_v30, %v13529_v18  ;;  %v9429_v30 = vld [vmem:[%s14864_s0 + $0x1f8] sm:$0xf0] }
 0x2fd   :  { %v3981_v60 = vmax.f32 %v3973_v38, 0.0  ;;  %v4195_v16 = vpop.f32.mrf.mxu3 }
 0x2fe   :  { %v3943_v35 = vpop.f32.mrf.mxu2  ;;  %v13557_v36 = vpop.f32.mrf.mxu1 }
 0x2ff   :  { %3989 = vst.msk [vmem:[#allocation2 + $0x60] sm:$0xff] %vm1006_vm1, %v3981_v60  ;;  %v3944_v39 = vadd.f32 %v3943_v35, %v3914_v62  ;;  %v13559_v52 = vpop.f32.mrf.mxu0  ;;  %v10802_v62 = vld [vmem:[%s14864_s0 + $0xc4] sm:$0xf0]  ;;  %v10835_v60 = vld [vmem:[%s14863_s1 + $0x40] sm:$0xff] }
 0x300   :  { %v9404_v25 = vor.u32 %v10802_v62, %v9403_v12  ;;  %5329 = vmatpush.bf16.msrb.mxu3 %v10835_v60  ;;  %v10865_v60 = vld [vmem:[%s14863_s1 + $0xd0] sm:$0xff] }
 0x301   :  { %v3962_v28 = vadd.f32 %v3944_v39, %v3760_v2  ;;  %v10804_v2 = vld [vmem:[%s14864_s0 + $0xd4] sm:$0xf0]  ;;  %v10805_v39 = vld [vmem:[%s14864_s0 + $0x1e4] sm:$0xf] }
 0x302   :  { %4713 = vmatmul.bf16.gmra.mxu0 %v9324_v32  ;;  %v9412_v13 = vor.u32 %v10804_v2, %v9411_v33 }
 0x303   :  { %v3974_v63 = vadd.f32 %v13527_v20, %v3962_v28  ;;  %9378 = vmatmul.msk.bf16.gmra.mxu2 %vm164_vm0, %v9320_v21 }
 0x305   :  { %v3982_v31 = vmax.f32 %v3974_v63, 0.0  ;;  %v4197_v45 = vpop.f32.mrf.mxu3  ;;  %v10831_v63 = vld [vmem:[%s14863_s1 + $0x20] sm:$0xff] }
 0x306   :  { %v3946_v14 = vpop.f32.mrf.mxu2  ;;  %v4166_v27 = vpop.f32.mrf.mxu1 }
 0x307   :  { %3990 = vst.msk [vmem:[#allocation2 + $0x68] sm:$0xff] %vm1006_vm1, %v3982_v31  ;;  %v3947_v15 = vadd.f32 %v3946_v14, %v3917_v41  ;;  %v13579_v37 = vpop.f32.mrf.mxu0  ;;  %v13581_v47 = vadd.f32 %v4195_v16, %v4166_v27  ;;  %v9331_v41 = vld [vmem:[%s14864_s0 + $0x1e0] sm:$0xf]  ;;  %v3750_v16 = vadd.f32 %v13428_v57, %v13469_v23  ;;  %v9421_v57 = vld [vmem:[%s14864_s0 + $0x1e8] sm:$0xf0] }
 0x308   :  { %v9332_v17 = vor.u32 %v10790_v9, %v9331_v41  ;;  %v9424_v31 = vor.u32 %v10805_v39, %v9421_v57  ;;  %v10789_v27 = vld [vmem:[%s14864_s0 + $0x1e4] sm:$0xf]  ;;  %v10829_v41 = vld [vmem:[%s14863_s1 + $0x10] sm:$0xff] }
 0x309   :  { %v3963_v61 = vadd.f32 %v3947_v15, %v3761_v10  ;;  %4905 = vmatmul.bf16.vlgmr.msra.gmra.mxu1 %v9404_v25  ;;  %v3763_v12 = vadd.f32 %v3750_v16, %v13419_v6  ;;  %v10830_v25 = vld [vmem:[%s14863_s1 + $0x18] sm:$0xff]  ;;  %v3752_v6 = vadd.f32 %v13464_v54, %v13495_v58  ;;  %v9333_v54 = vld [vmem:[%s14864_s0 + $0x1e8] sm:$0xf0] }
 0x30a   :  { %9474 = vmatmul.msk.bf16.gmra.mxu3 %vm164_vm0, %v9416_v22  ;;  %v10822_v15 = vld [vmem:[%s14864_s0 + $0xb4] sm:$0xf0] }
 0x30b   :  { %v3975_v44 = vadd.f32 %v13527_v20, %v3963_v61  ;;  %v3764_v9 = vadd.f32 %v3752_v6, %v13445_v11  ;;  %v10866_v11 = vld [vmem:[%s14863_s1 + $0xd8] sm:$0xff] }
 0x30c   :  { %5487 = vmatpush.bf16.msrb.mxu0 %v10866_v11 }
 0x30d   :  { %v3983_v24 = vmax.f32 %v3975_v44, 0.0  ;;  %v4200_v34 = vpop.f32.mrf.mxu3 }
 0x30e   :  { %v6991_v55 = vld [vmem:[#allocation2 + $0x60] ss:$2 sm:$0xff]  ;;  %v7047_v49 = vld [vmem:[#allocation2 + $0x61] ss:$2 sm:$0xff]  ;;  %v3948_v43 = vpop.f32.mrf.mxu2  ;;  %v4168_v5 = vpop.f32.mrf.mxu1 }
 0x30f   :  { %v7096_v7 = vmax.f32 %v6991_v55, %v7047_v49  ;;  %3991 = vst.msk [vmem:[#allocation2 + $0x70] sm:$0xff] %vm1006_vm1, %v3983_v24  ;;  %v3949_v38 = vadd.f32 %v3948_v43, %v13531_v46  ;;  %v13608_v26 = vpop.f32.mrf.mxu0  ;;  %v13616_v35 = vadd.f32 %v4197_v45, %v4168_v5  ;;  %v10832_v46 = vld [vmem:[%s14863_s1 + $0x28] sm:$0xff]  ;;  %v9336_v49 = vor.u32 %v10789_v27, %v9333_v54 }
 0x310   :  { %5295 = vmatpush.bf16.msrb.mxu1 %v10832_v46  ;;  %v3765_v46 = vadd.f32 %v3755_v51, %v13472_v59  ;;  %5488 = vmatpush.bf16.msrb.mxu0 %v10865_v60  ;;  %v10373_v59 = vld [vmem:[%s14866_s3 + $0xc] sm:$0xf]  ;;  %v10883_v60 = vld [vmem:[%s14863_s1 + $0x120] sm:$0xff] }
 0x311   :  { %7124 = vst.msk [vmem:[#allocation3 + $0x30] sm:$0xff] %vm1006_vm1, %v7096_v7  ;;  %v3964_v42 = vadd.f32 %v3949_v38, %v3762_v56  ;;  %v9419_v56 = vld [vmem:[%s14864_s0 + $0x1e0] sm:$0xf]  ;;  %v10806_v7 = vld [vmem:[%s14864_s0 + $0x1e4] sm:$0xf0] }
 0x312   :  { %4718 = vmatmul.bf16.gmra.mxu0 %v9332_v17  ;;  %v10807_v38 = vld [vmem:[%s14864_s0 + $0x1f4] sm:$0xf]  ;;  %v9420_v53 = vor.u32 %v10806_v7, %v9419_v56 }
 0x313   :  { %v3976_v32 = vadd.f32 %v13527_v20, %v3964_v42  ;;  %9379 = vmatmul.msk.bf16.gmra.mxu2 %vm164_vm0, %v9328_v50  ;;  %v10827_v42 = vld [vmem:[%s14863_s1] sm:$0xff]  ;;  %v9432_v2 = vor.u32 %v10807_v38, %v9429_v30 }
 0x314   :  { %5296 = vmatpush.bf16.msrb.mxu1 %v10831_v63  ;;  %v3757_v63 = vadd.f32 %v13518_v3, %v13557_v36  ;;  %v9501_v3 = vld [vmem:[%s14864_s0 + $0xb8] sm:$0xf0] }
 0x315   :  { %v3984_v23 = vmax.f32 %v3976_v32, 0.0  ;;  %v4202_v28 = vpop.f32.mrf.mxu3 }
 0x316   :  { %v3951_v21 = vpop.f32.mrf.mxu2  ;;  %v4171_v4 = vpop.f32.mrf.mxu1  ;;  %v3766_v27 = vadd.f32 %v3757_v63, %v13498_v19  ;;  %v10863_v19 = vld [vmem:[%s14863_s1 + $0xc0] sm:$0xff] }
 0x317   :  { %3992 = vst.msk [vmem:[#allocation2 + $0x78] sm:$0xff] %vm1006_vm1, %v3984_v23  ;;  %v3952_v62 = vadd.f32 %v3951_v21, %v13559_v52  ;;  %v13644_v1 = vpop.f32.mrf.mxu0  ;;  %v13646_v14 = vadd.f32 %v4200_v34, %v4171_v4  ;;  %v9499_v52 = vld [vmem:[%s14864_s0 + $0xb0] sm:$0xf]  ;;  %v10838_v4 = vld [vmem:[%s14864_s0 + $0xc4] sm:$0xf0] }
 0x318   :  { %5297 = vmatpush.bf16.msrb.mxu1 %v10830_v25  ;;  %v13667_v44 = vor.u32 %v10822_v15, %v9499_v52  ;;  %v7193_v39 = vld [vmem:[#allocation3 + $0x30] sm:$0xff] }
 0x319   :  { %v3965_v45 = vadd.f32 %v3952_v62, %v3763_v12  ;;  %4910 = vmatmul.bf16.gmra.mxu1 %v9412_v13  ;;  %v9507_v62 = vld [vmem:[%s14864_s0 + $0xc0] sm:$0xf] }
 0x31a   :  { %9475 = vmatmul.msk.bf16.gmra.mxu3 %vm164_vm0, %v9424_v31  ;;  %v10821_v31 = vld [vmem:[%s14864_s0 + $0xb4] sm:$0xf]  ;;  %v9508_v15 = vor.u32 %v10838_v4, %v9507_v62 }
 0x31b   :  { %v3977_v10 = vadd.f32 %v13527_v20, %v3965_v45 }
 0x31c   :  { %5298 = vmatpush.bf16.msrb.mxu1 %v10829_v41  ;;  %v10886_v41 = vld [vmem:[%s14863_s1 + $0x138] sm:$0xff] }
 0x31d   :  { %v3985_v58 = vmax.f32 %v3977_v10, 0.0  ;;  %v4205_v0 = vpop.f32.mrf.mxu3  ;;  %5724 = vmatpush.bf16.msra.mxu3 %v10886_v41 }
 0x31e   :  { %v6993_v22 = vld [vmem:[#allocation2 + $0x70] ss:$2 sm:$0xff]  ;;  %v7049_v61 = vld [vmem:[#allocation2 + $0x71] ss:$2 sm:$0xff]  ;;  %v3953_v40 = vpop.f32.mrf.mxu2  ;;  %v4173_v24 = vpop.f32.mrf.mxu1 }
 0x31f   :  { %v7097_v48 = vmax.f32 %v6993_v22, %v7049_v61  ;;  %3993 = vst.msk [vmem:[#allocation2 + $0x140] sm:$0xff] %vm1006_vm1, %v3985_v58  ;;  %v3954_v29 = vadd.f32 %v3953_v40, %v13579_v37  ;;  %v4308_v55 = vpop.f32.mrf.mxu0  ;;  %v13675_v43 = vadd.f32 %v4202_v28, %v4173_v24  ;;  %v10828_v37 = vld [vmem:[%s14863_s1 + $0x8] sm:$0xff]  ;;  %v13748_v40 = vor.u32 %v10821_v31, %v9501_v3  ;;  %v10882_v31 = vld [vmem:[%s14863_s1 + $0x118] sm:$0xff] }
 0x320   :  { %v13678_v34 = vadd.f32 %v4308_v55, %v13581_v47  ;;  %5299 = vmatpush.bf16.msrb.mxu1 %v10828_v37  ;;  %v10808_v55 = vld [vmem:[%s14864_s0 + $0x1f4] sm:$0xf0]  ;;  %v10820_v3 = vld [vmem:[%s14864_s0 + $0xa4] sm:$0xf0] }
 0x321   :  { %7125 = vst.msk [vmem:[#allocation3 + $0x38] sm:$0xff] %vm1006_vm1, %v7097_v48  ;;  %v3966_v17 = vadd.f32 %v3954_v29, %v3764_v9  ;;  %v10884_v29 = vld [vmem:[%s14863_s1 + $0x128] sm:$0xff] }
 0x322   :  { %5159 = vmatmul.bf16.vlgmr.msra.gmra.mxu0 %v13667_v44 }
 0x323   :  { %v3978_v47 = vadd.f32 %v13527_v20, %v3966_v17  ;;  %9380 = vmatmul.msk.bf16.gmra.mxu2 %vm164_vm0, %v9336_v49  ;;  %v10862_v49 = vld [vmem:[%s14863_s1 + $0xb8] sm:$0xff]  ;;  %v9577_v17 = vld [vmem:[%s14864_s0 + $0xa8] sm:$0xf0] }
 0x324   :  { %5300 = vmatpush.bf16.msrb.mxu1 %v10827_v42  ;;  %v10885_v42 = vld [vmem:[%s14863_s1 + $0x130] sm:$0xff] }
 0x325   :  { %v3986_v18 = vmax.f32 %v3978_v47, 0.0  ;;  %v4207_v50 = vpop.f32.mrf.mxu3  ;;  %5725 = vmatpush.bf16.msra.mxu3 %v10885_v42 }
 0x326   :  { %v3956_v5 = vpop.f32.mrf.mxu2  ;;  %v4176_v32 = vpop.f32.mrf.mxu1 }
 0x327   :  { %3994 = vst.msk [vmem:[#allocation2 + $0x148] sm:$0xff] %vm1006_vm1, %v3986_v18  ;;  %v3957_v16 = vadd.f32 %v3956_v5, %v13608_v26  ;;  %v4310_v33 = vpop.f32.mrf.mxu0  ;;  %v13713_v23 = vadd.f32 %v4205_v0, %v4176_v32  ;;  %v10864_v26 = vld [vmem:[%s14863_s1 + $0xc8] sm:$0xff]  ;;  %v10861_v18 = vld [vmem:[%s14863_s1 + $0xb0] sm:$0xff] }
 0x328   :  { %v7195_v57 = vld [vmem:[#allocation3 + $0x38] sm:$0xff]  ;;  %v13716_v21 = vadd.f32 %v4310_v33, %v13616_v35  ;;  %5489 = vmatpush.bf16.msrb.mxu0 %v10864_v26  ;;  %v10868_v0 = vld [vmem:[%s14863_s1 + $0xe8] sm:$0xff]  ;;  %5689 = vmatpush.bf16.msra.mxu1 %v10884_v29 }
 0x329   :  { %v7197_v28 = vmax.f32 %v7193_v39, %v7195_v57  ;;  %v3967_v13 = vadd.f32 %v3957_v16, %v3765_v46  ;;  %4915 = vmatmul.bf16.gmra.mxu1 %v9420_v53  ;;  %5522 = vmatpush.bf16.msra.mxu2 %v10868_v0  ;;  %v9515_v53 = vld [vmem:[%s14864_s0 + $0x1d0] sm:$0xf]  ;;  %v10860_v46 = vld [vmem:[%s14863_s1 + $0xa8] sm:$0xff]  ;;  %v10837_v16 = vld [vmem:[%s14864_s0 + $0xc4] sm:$0xf] }
 0x32a   :  { %9476 = vmatmul.msk.bf16.gmra.mxu3 %vm164_vm0, %v9432_v2  ;;  %v9509_v32 = vld [vmem:[%s14864_s0 + $0xc8] sm:$0xf0]  ;;  %v10881_v0 = vld [vmem:[%s14863_s1 + $0x110] sm:$0xff] }
 0x32b   :  { %v7199_v12 = vpack.c.bf16 %v7197_v28, %v7197_v28  ;;  %v3979_v35 = vadd.f32 %v13527_v20, %v3967_v13 }
 0x32c   :  { %5490 = vmatpush.bf16.msrb.mxu0 %v10863_v19  ;;  %5690 = vmatpush.bf16.msra.mxu1 %v10883_v60  ;;  %v9523_v19 = vld [vmem:[%s14864_s0 + $0x1e0] sm:$0xf] }
 0x32d   :  { %v7203_v36 = vsel %vm11992_vm4, %v7199_v12, %v10373_v59  ;;  %v3987_v45 = vmax.f32 %v3979_v35, 0.0  ;;  %v4210_v52 = vpop.f32.mrf.mxu3  ;;  %v9512_v12 = vor.u32 %v10837_v16, %v9509_v32  ;;  %v10859_v35 = vld [vmem:[%s14863_s1 + $0xa0] sm:$0xff]  ;;  %v10901_v16 = vld [vmem:[%s14863_s1 + $0x170] sm:$0xff]  ;;  %v10904_v32 = vld [vmem:[%s14863_s1 + $0x188] sm:$0xff] }
 0x32e   :  { %10374 = vst [vmem:[%s14866_s3 + $0xc] sm:$0xf] %v7203_v36  ;;  %v7019_v25 = vld [vmem:[#allocation2 + $0x140] ss:$2 sm:$0xff]  ;;  %v7075_v6 = vld [vmem:[#allocation2 + $0x141] ss:$2 sm:$0xff]  ;;  %v3958_v10 = vpop.f32.mrf.mxu2  ;;  %v4178_v22 = vpop.f32.mrf.mxu1 }
 0x32f   :  { %v7110_v54 = vmax.f32 %v7019_v25, %v7075_v6  ;;  %3995 = vst.msk [vmem:[#allocation2 + $0x150] sm:$0xff] %vm1006_vm1, %v3987_v45  ;;  %v3959_v58 = vadd.f32 %v3958_v10, %v13644_v1  ;;  %v4313_v61 = vpop.f32.mrf.mxu0  ;;  %v13759_v9 = vadd.f32 %v4207_v50, %v4178_v22  ;;  %v10375_v22 = vld [vmem:[%s14866_s3 + $0x28] sm:$0xf] }
 0x330   :  { %v13762_v1 = vadd.f32 %v4313_v61, %v13646_v14  ;;  %v9427_v14 = vld [vmem:[%s14864_s0 + $0x1f0] sm:$0xf]  ;;  %5491 = vmatpush.bf16.msrb.mxu0 %v10862_v49  ;;  %5691 = vmatpush.bf16.msra.mxu1 %v10882_v31 }
 0x331   :  { %7138 = vst.msk [vmem:[#allocation3 + $0xa0] sm:$0xff] %vm1006_vm1, %v7110_v54  ;;  %v3968_v48 = vadd.f32 %v3959_v58, %v3766_v27  ;;  %v9428_v47 = vor.u32 %v10808_v55, %v9427_v14 }
 0x332   :  { %5164 = vmatmul.bf16.gmra.mxu0 %v9508_v15 }
 0x333   :  { %v3980_v24 = vadd.f32 %v13527_v20, %v3968_v48  ;;  %9569 = vmatmul.msk.bf16.vlgmr.msrb.gmra.mxu2 %vm164_vm0, %v13748_v40  ;;  %v10819_v20 = vld [vmem:[%s14864_s0 + $0xa4] sm:$0xf]  ;;  %v9517_v48 = vld [vmem:[%s14864_s0 + $0x1d8] sm:$0xf0] }
 0x334   :  { %v9580_v30 = vor.u32 %v10819_v20, %v9577_v17  ;;  %5492 = vmatpush.bf16.msrb.mxu0 %v10861_v18  ;;  %5692 = vmatpush.bf16.msra.mxu1 %v10881_v0  ;;  %v10854_v0 = vld [vmem:[%s14864_s0 + $0xd4] sm:$0xf0] }
 0x335   :  { %v3988_v11 = vmax.f32 %v3980_v24, 0.0  ;;  %v4212_v37 = vpop.f32.mrf.mxu3 }
 0x336   :  { %v4337_v51 = vpop.f32.mrf.mxu2  ;;  %v4181_v7 = vpop.f32.mrf.mxu1 }
 0x337   :  { %3996 = vst.msk [vmem:[#allocation2 + $0x158] sm:$0xff] %vm1006_vm1, %v3988_v11  ;;  %v4338_v56 = vadd.f32 %v4337_v51, %v13678_v34  ;;  %v4315_v38 = vpop.f32.mrf.mxu0  ;;  %v13791_v5 = vadd.f32 %v4210_v52, %v4181_v7  ;;  %v10867_v34 = vld [vmem:[%s14863_s1 + $0xe0] sm:$0xff] }
 0x338   :  { %v13794_v50 = vadd.f32 %v4315_v38, %v13675_v43  ;;  %v10826_v43 = vld [vmem:[%s14864_s0 + $0x1d4] sm:$0xf0]  ;;  %5523 = vmatpush.bf16.msra.mxu2 %v10867_v34  ;;  %5493 = vmatpush.bf16.msrb.mxu0 %v10860_v46  ;;  %v7194_v52 = vld [vmem:[#allocation3 + $0xa0] sm:$0xff]  ;;  %v9585_v38 = vld [vmem:[%s14864_s0 + $0x1c8] sm:$0xf0] }
 0x339   :  { %4920 = vmatmul.bf16.gmra.mxu1 %v9428_v47  ;;  %v13821_v28 = vor.u32 %v10826_v43, %v9515_v53  ;;  %v10880_v47 = vld [vmem:[%s14863_s1 + $0x108] sm:$0xff]  ;;  %v10823_v7 = vld [vmem:[%s14864_s0 + $0x1c4] sm:$0xf] }
 0x33a   :  { %9629 = vmatmul.msk.bf16.vlgmr.msrb.gmra.mxu3 %vm164_vm0, %v9580_v30  ;;  %5693 = vmatpush.bf16.msra.mxu1 %v10880_v47  ;;  %v9588_v34 = vor.u32 %v10823_v7, %v9585_v38  ;;  %v10879_v46 = vld [vmem:[%s14863_s1 + $0x100] sm:$0xff]  ;;  %v10897_v7 = vld [vmem:[%s14863_s1 + $0x150] sm:$0xff] }
 0x33c   :  { %5494 = vmatpush.bf16.msrb.mxu0 %v10859_v35  ;;  %5926 = vmatpush.bf16.msrb.mxu2 %v10904_v32 }
 0x33d   :  { %v4531_v57 = vpop.f32.mrf.mxu3 }
 0x33e   :  { %v7021_v33 = vld [vmem:[#allocation2 + $0x150] ss:$2 sm:$0xff]  ;;  %v7077_v2 = vld [vmem:[#allocation2 + $0x151] ss:$2 sm:$0xff]  ;;  %v4339_v39 = vpop.f32.mrf.mxu2  ;;  %v4183_v26 = vpop.f32.mrf.mxu1  ;;  %5694 = vmatpush.bf16.msra.mxu1 %v10879_v46 }
 0x33f   :  { %v7111_v13 = vmax.f32 %v7021_v33, %v7077_v2  ;;  %v4340_v59 = vadd.f32 %v4339_v39, %v13716_v21  ;;  %v4318_v63 = vpop.f32.mrf.mxu0  ;;  %v4213_v62 = vadd.f32 %v4212_v37, %v4183_v26  ;;  %v9575_v21 = vld [vmem:[%s14864_s0 + $0xa0] sm:$0xf]  ;;  %v10936_v2 = vld [vmem:[%s14863_s1 + $0x98] sm:$0xff]  ;;  %v10839_v39 = vld [vmem:[%s14864_s0 + $0x1e4] sm:$0xf] }
 0x340   :  { %v4319_v4 = vadd.f32 %v4318_v63, %v13713_v23  ;;  %v9576_v45 = vor.u32 %v10820_v3, %v9575_v21  ;;  %v9655_v33 = vld [vmem:[%s14864_s0 + $0xc0] sm:$0xf]  ;;  %6180 = vmatpush.bf16.msrb.mxu3 %v10936_v2  ;;  %v10878_v21 = vld [vmem:[%s14863_s1 + $0xf8] sm:$0xff]  ;;  %v10900_v3 = vld [vmem:[%s14863_s1 + $0x168] sm:$0xff] }
 0x341   :  { %7139 = vst.msk [vmem:[#allocation3 + $0xa8] sm:$0xff] %vm1006_vm1, %v7111_v13 }
 0x342   :  { %5169 = vmatmul.bf16.gmra.mxu0 %v13821_v28  ;;  %5695 = vmatpush.bf16.msra.mxu1 %v10878_v21 }
 0x343   :  { %9570 = vmatmul.msk.bf16.gmra.mxu2 %vm164_vm0, %v9512_v12 }
 0x345   :  { %v4533_v36 = vpop.f32.mrf.mxu3 }
 0x346   :  { %v4342_v23 = vpop.f32.mrf.mxu2  ;;  %v4502_v10 = vpop.f32.mrf.mxu1 }
 0x347   :  { %v4343_v25 = vadd.f32 %v4342_v23, %v13762_v1  ;;  %v4320_v6 = vpop.f32.mrf.mxu0  ;;  %v4532_v54 = vadd.f32 %v4531_v57, %v4502_v10  ;;  %v10825_v1 = vld [vmem:[%s14864_s0 + $0x1d4] sm:$0xf]  ;;  %v9525_v57 = vld [vmem:[%s14864_s0 + $0x1e8] sm:$0xf0]  ;;  %v9583_v23 = vld [vmem:[%s14864_s0 + $0x1c0] sm:$0xf] }
 0x348   :  { %v7196_v15 = vld [vmem:[#allocation3 + $0xa8] sm:$0xff]  ;;  %v4321_v27 = vadd.f32 %v4320_v6, %v13759_v9  ;;  %v13870_v17 = vor.u32 %v10825_v1, %v9517_v48  ;;  %v10877_v10 = vld [vmem:[%s14863_s1 + $0xf0] sm:$0xff] }
 0x349   :  { %v7198_v58 = vmax.f32 %v7194_v52, %v7196_v15  ;;  %v13845_v61 = vadd.f32 %v4532_v54, %v4338_v56  ;;  %5301 = vmatmul.bf16.vlgmr.msrb.gmra.mxu1 %v9576_v45  ;;  %v10840_v9 = vld [vmem:[%s14864_s0 + $0x1e4] sm:$0xf0]  ;;  %v10902_v56 = vld [vmem:[%s14863_s1 + $0x178] sm:$0xff] }
 0x34a   :  { %9630 = vmatmul.msk.bf16.gmra.mxu3 %vm164_vm0, %v13748_v40  ;;  %v9524_v14 = vor.u32 %v10840_v9, %v9523_v19  ;;  %5891 = vmatpush.bf16.msra.mxu0 %v10902_v56  ;;  %v9657_v19 = vld [vmem:[%s14864_s0 + $0xc8] sm:$0xf0] }
 0x34b   :  { %v7200_v41 = vpack.c.bf16 %v7198_v58, %v7198_v58  ;;  %5696 = vmatpush.bf16.msra.mxu1 %v10877_v10  ;;  %v10934_v10 = vld [vmem:[%s14863_s1 + $0x88] sm:$0xff] }
 0x34d   :  { %v7206_v40 = vsel %vm11992_vm4, %v7200_v41, %v10375_v22  ;;  %v4536_v24 = vpop.f32.mrf.mxu3  ;;  %v9663_v22 = vld [vmem:[%s14864_s0 + $0xd0] sm:$0xf]  ;;  %v10851_v41 = vld [vmem:[%s14864_s0 + $0xc4] sm:$0xf] }
 0x34e   :  { %10376 = vst [vmem:[%s14866_s3 + $0x28] sm:$0xf] %v7206_v40  ;;  %v4344_v29 = vpop.f32.mrf.mxu2  ;;  %v4504_v20 = vpop.f32.mrf.mxu1  ;;  %5892 = vmatpush.bf16.msra.mxu0 %v10901_v16  ;;  %v9664_v48 = vor.u32 %v10854_v0, %v9663_v22  ;;  %v10899_v40 = vld [vmem:[%s14863_s1 + $0x160] sm:$0xff]  ;;  %v10858_v22 = vld [vmem:[%s14864_s0 + $0x1f4] sm:$0xf0] }
 0x34f   :  { %v4345_v55 = vadd.f32 %v4344_v29, %v13794_v50  ;;  %v4323_v49 = vpop.f32.mrf.mxu0  ;;  %v4534_v37 = vadd.f32 %v4533_v36, %v4504_v20  ;;  %v10824_v36 = vld [vmem:[%s14864_s0 + $0x1c4] sm:$0xf0]  ;;  %6145 = vmatpush.bf16.msrb.mxu1 %v10934_v10  ;;  %v10933_v0 = vld [vmem:[%s14863_s1 + $0x80] sm:$0xff] }
 0x350   :  { %v4324_v11 = vadd.f32 %v4323_v49, %v13791_v5  ;;  %v9584_v6 = vor.u32 %v10824_v36, %v9583_v23 }
 0x351   :  { %v13873_v51 = vadd.f32 %v4534_v37, %v4340_v59  ;;  %v9753_v37 = vld [vmem:[%s14864_s0 + $0xd8] sm:$0xf0] }
 0x352   :  { %5174 = vmatmul.bf16.gmra.mxu0 %v9524_v14 }
 0x353   :  { %9571 = vmatmul.msk.bf16.gmra.mxu2 %vm164_vm0, %v13870_v17  ;;  %5893 = vmatpush.bf16.msra.mxu0 %v10900_v3 }
 0x354   :  { %6146 = vmatpush.bf16.msrb.mxu1 %v10933_v0  ;;  %v10928_v0 = vld [vmem:[%s14863_s1 + $0x58] sm:$0xff] }
 0x355   :  { %v4538_v18 = vpop.f32.mrf.mxu3 }
 0x356   :  { %v4347_v30 = vpop.f32.mrf.mxu2  ;;  %v4507_v53 = vpop.f32.mrf.mxu1 }
 0x357   :  { %v4348_v5 = vadd.f32 %v4347_v30, %v4319_v4  ;;  %v4325_v50 = vpop.f32.mrf.mxu0  ;;  %v4537_v43 = vadd.f32 %v4536_v24, %v4507_v53  ;;  %5894 = vmatpush.bf16.msra.mxu0 %v10899_v40  ;;  %v10896_v53 = vld [vmem:[%s14863_s1 + $0x148] sm:$0xff] }
 0x358   :  { %v4326_v60 = vadd.f32 %v4325_v50, %v4213_v62  ;;  %v9528_v62 = vor.u32 %v10839_v39, %v9525_v57 }
 0x359   :  { %v13889_v42 = vadd.f32 %v4537_v43, %v4343_v25  ;;  %5306 = vmatmul.bf16.gmra.mxu1 %v13667_v44  ;;  %v10852_v44 = vld [vmem:[%s14864_s0 + $0xc4] sm:$0xf0]  ;;  %v10853_v43 = vld [vmem:[%s14864_s0 + $0xd4] sm:$0xf] }
 0x35a   :  { %9631 = vmatmul.msk.bf16.gmra.mxu3 %vm164_vm0, %v9588_v34  ;;  %v9656_v26 = vor.u32 %v10852_v44, %v9655_v33  ;;  %v9671_v34 = vld [vmem:[%s14864_s0 + $0x1e0] sm:$0xf] }
 0x35b   :  { %v10895_v33 = vld [vmem:[%s14863_s1 + $0x140] sm:$0xff] }
 0x35d   :  { %v4541_v59 = vpop.f32.mrf.mxu3 }
 0x35e   :  { %v4349_v13 = vpop.f32.mrf.mxu2  ;;  %v4509_v12 = vpop.f32.mrf.mxu1 }
 0x35f   :  { %v4350_v63 = vadd.f32 %v4349_v13, %v4321_v27  ;;  %v13917_v35 = vpop.f32.mrf.mxu0  ;;  %v4539_v4 = vadd.f32 %v4538_v18, %v4509_v12  ;;  %v10871_v12 = vld [vmem:[%s14864_s0 + $0xe4] sm:$0xf] }
 0x361   :  { %v13919_v31 = vadd.f32 %v4539_v4, %v4345_v55  ;;  %v9660_v55 = vor.u32 %v10851_v41, %v9657_v19 }
 0x362   :  { %5495 = vmatmul.bf16.vlgmr.msrb.gmra.mxu0 %v9656_v26  ;;  %v10870_v26 = vld [vmem:[%s14864_s0 + $0xd4] sm:$0xf0] }
 0x363   :  { %9572 = vmatmul.msk.bf16.gmra.mxu2 %vm164_vm0, %v9528_v62  ;;  %v9761_v62 = vld [vmem:[%s14864_s0 + $0xe8] sm:$0xf0] }
 0x365   :  { %v4543_v25 = vpop.f32.mrf.mxu3 }
 0x366   :  { %v4352_v45 = vpop.f32.mrf.mxu2  ;;  %v4512_v15 = vpop.f32.mrf.mxu1 }
 0x367   :  { %v4353_v52 = vadd.f32 %v4352_v45, %v4324_v11  ;;  %v13937_v27 = vpop.f32.mrf.mxu0  ;;  %v4542_v54 = vadd.f32 %v4541_v59, %v4512_v15  ;;  %v10869_v11 = vld [vmem:[%s14864_s0 + $0xd4] sm:$0xf]  ;;  %v9751_v59 = vld [vmem:[%s14864_s0 + $0xd0] sm:$0xf]  ;;  %v9764_v45 = vor.u32 %v10871_v12, %v9761_v62  ;;  %v9681_v12 = vld [vmem:[%s14864_s0 + $0x1f8] sm:$0xf0] }
 0x368   :  { %v9756_v18 = vor.u32 %v10869_v11, %v9753_v37  ;;  %v9752_v3 = vor.u32 %v10870_v26, %v9751_v59 }
 0x369   :  { %v13939_v58 = vadd.f32 %v4542_v54, %v4348_v5  ;;  %5311 = vmatmul.bf16.gmra.mxu1 %v9584_v6  ;;  %v9679_v54 = vld [vmem:[%s14864_s0 + $0x1f0] sm:$0xf] }
 0x36a   :  { %9632 = vmatmul.msk.bf16.gmra.mxu3 %vm164_vm0, %v13870_v17  ;;  %v10898_v17 = vld [vmem:[%s14863_s1 + $0x158] sm:$0xff] }
 0x36b   :  { %5895 = vmatpush.bf16.msra.mxu0 %v10898_v17 }
 0x36d   :  { %v4546_v1 = vpop.f32.mrf.mxu3 }
 0x36e   :  { %v4354_v9 = vpop.f32.mrf.mxu2  ;;  %v4514_v24 = vpop.f32.mrf.mxu1 }
 0x36f   :  { %v4355_v29 = vadd.f32 %v4354_v9, %v4326_v60  ;;  %v13958_v14 = vpop.f32.mrf.mxu0  ;;  %v4544_v49 = vadd.f32 %v4543_v25, %v4514_v24  ;;  %5896 = vmatpush.bf16.msra.mxu0 %v10897_v7  ;;  %v10856_v60 = vld [vmem:[%s14864_s0 + $0x1e4] sm:$0xf0]  ;;  %v10855_v9 = vld [vmem:[%s14864_s0 + $0x1e4] sm:$0xf]  ;;  %v9680_v24 = vor.u32 %v10858_v22, %v9679_v54  ;;  %v10920_v22 = vld [vmem:[%s14863_s1 + $0x38] sm:$0xff] }
 0x370   :  { %v9672_v32 = vor.u32 %v10856_v60, %v9671_v34  ;;  %v10872_v7 = vld [vmem:[%s14864_s0 + $0xe4] sm:$0xf0] }
 0x371   :  { %v13960_v20 = vadd.f32 %v4544_v49, %v4350_v63 }
 0x372   :  { %5500 = vmatmul.bf16.gmra.mxu0 %v9664_v48 }
 0x373   :  { %9725 = vmatmul.msk.bf16.vlgmr.msra.gmra.mxu2 %vm164_vm0, %v9660_v55  ;;  %5897 = vmatpush.bf16.msra.mxu0 %v10896_v53 }
 0x375   :  { %v4548_v47 = vpop.f32.mrf.mxu3 }
 0x376   :  { %v4733_v56 = vpop.f32.mrf.mxu2  ;;  %v4517_v38 = vpop.f32.mrf.mxu1 }
 0x377   :  { %v13975_v30 = vpop.f32.mrf.mxu0  ;;  %v4547_v5 = vadd.f32 %v4546_v1, %v4517_v38  ;;  %5898 = vmatpush.bf16.msra.mxu0 %v10895_v33  ;;  %v4734_v63 = vadd.f32 %v4733_v56, %v13917_v35  ;;  %v14023_v35 = vld [vmem:[%s14865_s2] ss:$0 sm:$0xff]  ;;  %v9673_v1 = vld [vmem:[%s14864_s0 + $0x1e8] sm:$0xf0] }
 0x378   :  { %v9759_v56 = vld [vmem:[%s14864_s0 + $0xe0] sm:$0xf] }
 0x379   :  { %v13977_v50 = vadd.f32 %v4547_v5, %v4353_v52  ;;  %5316 = vmatmul.bf16.gmra.mxu1 %v13821_v28  ;;  %v9665_v28 = vld [vmem:[%s14864_s0 + $0xd8] sm:$0xf0]  ;;  %v4753_v25 = vadd.f32 %v4734_v63, %v13845_v61  ;;  %v10903_v52 = vld [vmem:[%s14863_s1 + $0x180] sm:$0xff]  ;;  %v10935_v61 = vld [vmem:[%s14863_s1 + $0x90] sm:$0xff] }
 0x37a   :  { %9821 = vmatmul.msk.bf16.vlgmr.msra.gmra.mxu3 %vm164_vm0, %v9756_v18  ;;  %v9668_v39 = vor.u32 %v10853_v43, %v9665_v28  ;;  %5927 = vmatpush.bf16.msrb.mxu2 %v10903_v52  ;;  %v10873_v18 = vld [vmem:[%s14864_s0 + $0x1f4] sm:$0xf]  ;;  %v9769_v5 = vld [vmem:[%s14864_s0 + $0x1f8] sm:$0xf0]  ;;  %v9760_v43 = vor.u32 %v10872_v7, %v9759_v56  ;;  %v10922_v7 = vld [vmem:[%s14863_s1 + $0x48] sm:$0xff] }
 0x37b   :  { %6181 = vmatpush.bf16.msrb.mxu3 %v10935_v61  ;;  %v10931_v28 = vld [vmem:[%s14863_s1 + $0x70] sm:$0xff]  ;;  %6287 = vmatpush.bf16.msrb.mxu0 %v10920_v22 }
 0x37c   :  { %v10857_v63 = vld [vmem:[%s14864_s0 + $0x1f4] sm:$0xf] }
 0x37d   :  { %v4935_v16 = vpop.f32.mrf.mxu3  ;;  %v9684_v10 = vor.u32 %v10857_v63, %v9681_v12 }
 0x37e   :  { %v4735_v46 = vpop.f32.mrf.mxu2  ;;  %v4519_v44 = vpop.f32.mrf.mxu1  ;;  %6322 = vmatpush.bf16.msra.mxu2 %v10922_v7 }
 0x37f   :  { %v13999_v2 = vpop.f32.mrf.mxu0  ;;  %v4549_v57 = vadd.f32 %v4548_v47, %v4519_v44  ;;  %v4736_v41 = vadd.f32 %v4735_v46, %v13937_v27  ;;  %v9676_v27 = vor.u32 %v10855_v9, %v9673_v1  ;;  %v10932_v47 = vld [vmem:[%s14863_s1 + $0x78] sm:$0xff]  ;;  %v10875_v1 = vld [vmem:[%s14864_s0 + $0x204] sm:$0xf] }
 0x380   :  { %6147 = vmatpush.bf16.msrb.mxu1 %v10932_v47 }
 0x381   :  { %v14001_v13 = vadd.f32 %v4549_v57, %v4355_v29  ;;  %v4754_v17 = vadd.f32 %v4736_v41, %v13873_v51  ;;  %v9847_v57 = vld [vmem:[%s14864_s0 + $0xe0] sm:$0xf]  ;;  %v10874_v41 = vld [vmem:[%s14864_s0 + $0x1f4] sm:$0xf0] }
 0x382   :  { %5505 = vmatmul.bf16.gmra.mxu0 %v9672_v32 }
 0x383   :  { %9726 = vmatmul.msk.bf16.gmra.mxu2 %vm164_vm0, %v9668_v39  ;;  %v10930_v39 = vld [vmem:[%s14863_s1 + $0x68] sm:$0xff] }
 0x384   :  { %6148 = vmatpush.bf16.msrb.mxu1 %v10931_v28 }
 0x385   :  { %v4937_v21 = vpop.f32.mrf.mxu3 }
 0x386   :  { %v4738_v4 = vpop.f32.mrf.mxu2  ;;  %v4906_v36 = vpop.f32.mrf.mxu1 }
 0x387   :  { %v14017_v23 = vpop.f32.mrf.mxu0  ;;  %v4936_v6 = vadd.f32 %v4935_v16, %v4906_v36  ;;  %v4739_v51 = vadd.f32 %v4738_v4, %v13958_v14  ;;  %v9772_v16 = vor.u32 %v10873_v18, %v9769_v5  ;;  %v10929_v36 = vld [vmem:[%s14863_s1 + $0x60] sm:$0xff]  ;;  %v10918_v18 = vld [vmem:[%s14863_s1 + $0x28] sm:$0xff]  ;;  %v10890_v5 = vld [vmem:[%s14864_s0 + $0xf4] sm:$0xf0] }
 0x388   :  { %6149 = vmatpush.bf16.msrb.mxu1 %v10930_v39 }
 0x389   :  { %v4955_v15 = vadd.f32 %v4936_v6, %v4753_v25  ;;  %5697 = vmatmul.bf16.vlgmr.msra.gmra.mxu1 %v9752_v3  ;;  %v4755_v32 = vadd.f32 %v4739_v51, %v13889_v42  ;;  %v10888_v42 = vld [vmem:[%s14864_s0 + $0xe4] sm:$0xf0] }
 0x38a   :  { %9822 = vmatmul.msk.bf16.gmra.mxu3 %vm164_vm0, %v9764_v45  ;;  %v9848_v3 = vor.u32 %v10888_v42, %v9847_v57  ;;  %v10954_v51 = vld [vmem:[%s14863_s1 + $0xe8] sm:$0xff] }
 0x38b   :  { %v4967_v19 = vadd.f32 %v14023_v35, %v4955_v15  ;;  %6516 = vmatpush.bf16.msra.mxu3 %v10954_v51 }
 0x38c   :  { %6150 = vmatpush.bf16.msrb.mxu1 %v10929_v36  ;;  %v10907_v36 = vld [vmem:[%s14864_s0 + $0xd4] sm:$0xf] }
 0x38d   :  { %v4975_v48 = vmax.f32 %v4967_v19, 0.0  ;;  %v4940_v29 = vpop.f32.mrf.mxu3 }
 0x38e   :  { %v4740_v40 = vpop.f32.mrf.mxu2  ;;  %v4908_v49 = vpop.f32.mrf.mxu1 }
 0x38f   :  { %v14052_v55 = vpop.f32.mrf.mxu0  ;;  %4983 = vst.msk [vmem:[#allocation2 + $0x80] sm:$0xff] %vm1006_vm1, %v4975_v48  ;;  %v4938_v11 = vadd.f32 %v4937_v21, %v4908_v49  ;;  %v4741_v59 = vadd.f32 %v4740_v40, %v13975_v30  ;;  %v9777_v48 = vld [vmem:[%s14864_s0 + $0x208] sm:$0xf0] }
 0x390   :  { %6151 = vmatpush.bf16.msrb.mxu1 %v10928_v0 }
 0x391   :  { %v4956_v37 = vadd.f32 %v4938_v11, %v4754_v17  ;;  %v4756_v52 = vadd.f32 %v4741_v59, %v13919_v31  ;;  %v9767_v31 = vld [vmem:[%s14864_s0 + $0x1f0] sm:$0xf] }
 0x392   :  { %5510 = vmatmul.bf16.gmra.mxu0 %v9680_v24  ;;  %v9768_v49 = vor.u32 %v10874_v41, %v9767_v31 }
 0x393   :  { %9727 = vmatmul.msk.bf16.gmra.mxu2 %vm164_vm0, %v9676_v27  ;;  %v4968_v38 = vadd.f32 %v14023_v35, %v4956_v37  ;;  %v10927_v27 = vld [vmem:[%s14863_s1 + $0x50] sm:$0xff]  ;;  %v9780_v37 = vor.u32 %v10875_v1, %v9777_v48 }
 0x394   :  { %6152 = vmatpush.bf16.msrb.mxu1 %v10927_v27  ;;  %v10377_v48 = vld [vmem:[%s14866_s3 + $0x10] sm:$0xf]  ;;  %v9857_v27 = vld [vmem:[%s14864_s0 + $0xf8] sm:$0xf0] }
 0x395   :  { %v4976_v53 = vmax.f32 %v4968_v38, 0.0  ;;  %v4942_v60 = vpop.f32.mrf.mxu3 }
 0x396   :  { %v4743_v34 = vpop.f32.mrf.mxu2  ;;  %v4911_v46 = vpop.f32.mrf.mxu1 }
 0x397   :  { %v14077_v14 = vpop.f32.mrf.mxu0  ;;  %4984 = vst.msk [vmem:[#allocation2 + $0x88] sm:$0xff] %vm1006_vm1, %v4976_v53  ;;  %v4941_v33 = vadd.f32 %v4940_v29, %v4911_v46  ;;  %v4744_v19 = vadd.f32 %v4743_v34, %v13999_v2  ;;  %v10919_v2 = vld [vmem:[%s14863_s1 + $0x30] sm:$0xff] }
 0x398   :  { %6288 = vmatpush.bf16.msrb.mxu0 %v10919_v2  ;;  %v10889_v2 = vld [vmem:[%s14864_s0 + $0xf4] sm:$0xf] }
 0x399   :  { %v4957_v44 = vadd.f32 %v4941_v33, %v4755_v32  ;;  %5702 = vmatmul.bf16.gmra.mxu1 %v9760_v43  ;;  %v4757_v47 = vadd.f32 %v4744_v19, %v13939_v58  ;;  %v9855_v58 = vld [vmem:[%s14864_s0 + $0xf0] sm:$0xf]  ;;  %v9849_v43 = vld [vmem:[%s14864_s0 + $0xe8] sm:$0xf0] }
 0x39a   :  { %9823 = vmatmul.msk.bf16.gmra.mxu3 %vm164_vm0, %v9772_v16  ;;  %v9856_v32 = vor.u32 %v10890_v5, %v9855_v58 }
 0x39b   :  { %v4969_v26 = vadd.f32 %v14023_v35, %v4957_v44 }
 0x39c   :  { %6289 = vmatpush.bf16.msrb.mxu0 %v10918_v18 }
 0x39d   :  { %v4977_v62 = vmax.f32 %v4969_v26, 0.0  ;;  %v4945_v21 = vpop.f32.mrf.mxu3 }
 0x39e   :  { %v4745_v4 = vpop.f32.mrf.mxu2  ;;  %v6995_v30 = vld [vmem:[#allocation2 + $0x80] ss:$2 sm:$0xff]  ;;  %v7051_v45 = vld [vmem:[#allocation2 + $0x81] ss:$2 sm:$0xff]  ;;  %v4913_v25 = vpop.f32.mrf.mxu1 }
 0x39f   :  { %v14102_v6 = vpop.f32.mrf.mxu0  ;;  %v7098_v15 = vmax.f32 %v6995_v30, %v7051_v45  ;;  %4985 = vst.msk [vmem:[#allocation2 + $0x90] sm:$0xff] %vm1006_vm1, %v4977_v62  ;;  %v4943_v61 = vadd.f32 %v4942_v60, %v4913_v25  ;;  %v4746_v53 = vadd.f32 %v4745_v4, %v14017_v23  ;;  %v10887_v60 = vld [vmem:[%s14864_s0 + $0xe4] sm:$0xf]  ;;  %v10916_v62 = vld [vmem:[%s14863_s1 + $0x18] sm:$0xff]  ;;  %v9775_v4 = vld [vmem:[%s14864_s0 + $0x200] sm:$0xf] }
 0x3a0   :  { %v10917_v23 = vld [vmem:[%s14863_s1 + $0x20] sm:$0xff]  ;;  %v9852_v42 = vor.u32 %v10887_v60, %v9849_v43  ;;  %v9945_v30 = vld [vmem:[%s14864_s0 + $0xd8] sm:$0xf0] }
 0x3a1   :  { %7126 = vst.msk [vmem:[#allocation3 + $0x40] sm:$0xff] %vm1006_vm1, %v7098_v15  ;;  %v4958_v54 = vadd.f32 %v4943_v61, %v4756_v52  ;;  %v4758_v59 = vadd.f32 %v4746_v53, %v13960_v20  ;;  %6290 = vmatpush.bf16.msrb.mxu0 %v10917_v23  ;;  %v10876_v20 = vld [vmem:[%s14864_s0 + $0x204] sm:$0xf0]  ;;  %v10915_v15 = vld [vmem:[%s14863_s1 + $0x10] sm:$0xff]  ;;  %v14196_v22 = vor.u32 %v10907_v36, %v9945_v30  ;;  %v10908_v23 = vld [vmem:[%s14864_s0 + $0xd4] sm:$0xf0] }
 0x3a2   :  { %5899 = vmatmul.bf16.vlgmr.msra.gmra.mxu0 %v9848_v3  ;;  %v9776_v52 = vor.u32 %v10876_v20, %v9775_v4  ;;  %v9860_v53 = vor.u32 %v10889_v2, %v9857_v27  ;;  %v10950_v20 = vld [vmem:[%s14863_s1 + $0xc8] sm:$0xff]  ;;  %v10894_v36 = vld [vmem:[%s14864_s0 + $0x214] sm:$0xf0]  ;;  %v10949_v30 = vld [vmem:[%s14863_s1 + $0xc0] sm:$0xff] }
 0x3a3   :  { %9728 = vmatmul.msk.bf16.gmra.mxu2 %vm164_vm0, %v9684_v10  ;;  %v4970_v9 = vadd.f32 %v14023_v35, %v4958_v54 }
 0x3a5   :  { %v4978_v40 = vmax.f32 %v4970_v9, 0.0  ;;  %v4947_v24 = vpop.f32.mrf.mxu3  ;;  %6291 = vmatpush.bf16.msrb.mxu0 %v10916_v62 }
 0x3a6   :  { %v4748_v29 = vpop.f32.mrf.mxu2  ;;  %v4916_v17 = vpop.f32.mrf.mxu1 }
 0x3a7   :  { %v14134_v11 = vpop.f32.mrf.mxu0  ;;  %4986 = vst.msk [vmem:[#allocation2 + $0x98] sm:$0xff] %vm1006_vm1, %v4978_v40  ;;  %v4946_v56 = vadd.f32 %v4945_v21, %v4916_v17  ;;  %v4749_v21 = vadd.f32 %v4748_v29, %v14052_v55  ;;  %v10892_v40 = vld [vmem:[%s14864_s0 + $0x204] sm:$0xf0] }
 0x3a8   :  { %v7208_v41 = vld [vmem:[#allocation3 + $0x40] sm:$0xff] }
 0x3a9   :  { %v4959_v38 = vadd.f32 %v4946_v56, %v4757_v47  ;;  %5707 = vmatmul.bf16.gmra.mxu1 %v9768_v49  ;;  %v4759_v0 = vadd.f32 %v4749_v21, %v13977_v50  ;;  %6292 = vmatpush.bf16.msrb.mxu0 %v10915_v15  ;;  %v9863_v50 = vld [vmem:[%s14864_s0 + $0x200] sm:$0xf] }
 0x3aa   :  { %9824 = vmatmul.msk.bf16.gmra.mxu3 %vm164_vm0, %v9780_v37  ;;  %v9864_v7 = vor.u32 %v10892_v40, %v9863_v50  ;;  %v9951_v50 = vld [vmem:[%s14864_s0 + $0xe0] sm:$0xf]  ;;  %v10924_v40 = vld [vmem:[%s14864_s0 + $0xe4] sm:$0xf0] }
 0x3ab   :  { %v4971_v34 = vadd.f32 %v14023_v35, %v4959_v38  ;;  %v9952_v27 = vor.u32 %v10924_v40, %v9951_v50 }
 0x3ad   :  { %v4979_v28 = vmax.f32 %v4971_v34, 0.0  ;;  %v4950_v16 = vpop.f32.mrf.mxu3 }
 0x3ae   :  { %v4750_v46 = vpop.f32.mrf.mxu2  ;;  %v6997_v33 = vld [vmem:[#allocation2 + $0x90] ss:$2 sm:$0xff]  ;;  %v7053_v44 = vld [vmem:[#allocation2 + $0x91] ss:$2 sm:$0xff]  ;;  %v4918_v39 = vpop.f32.mrf.mxu1 }
 0x3af   :  { %v14165_v57 = vpop.f32.mrf.mxu0  ;;  %v7099_v26 = vmax.f32 %v6997_v33, %v7053_v44  ;;  %4987 = vst.msk [vmem:[#allocation2 + $0x160] sm:$0xff] %vm1006_vm1, %v4979_v28  ;;  %v4948_v63 = vadd.f32 %v4947_v24, %v4918_v39  ;;  %v4751_v24 = vadd.f32 %v4750_v46, %v14077_v14  ;;  %v10913_v14 = vld [vmem:[%s14863_s1] sm:$0xff]  ;;  %v10952_v28 = vld [vmem:[%s14863_s1 + $0xd8] sm:$0xff]  ;;  %v9953_v39 = vld [vmem:[%s14864_s0 + $0xe8] sm:$0xf0] }
 0x3b0   :  { %v10921_v46 = vld [vmem:[%s14863_s1 + $0x40] sm:$0xff]  ;;  %6481 = vmatpush.bf16.msra.mxu1 %v10952_v28  ;;  %v10990_v28 = vld [vmem:[%s14863_s1 + $0x188] sm:$0xff] }
 0x3b1   :  { %7127 = vst.msk [vmem:[#allocation3 + $0x48] sm:$0xff] %vm1006_vm1, %v7099_v26  ;;  %v4960_v12 = vadd.f32 %v4948_v63, %v4758_v59  ;;  %v4760_v34 = vadd.f32 %v4751_v24, %v14001_v13  ;;  %v10923_v44 = vld [vmem:[%s14864_s0 + $0xe4] sm:$0xf]  ;;  %6323 = vmatpush.bf16.msra.mxu2 %v10921_v46  ;;  %v9961_v24 = vld [vmem:[%s14864_s0 + $0x1f8] sm:$0xf0] }
 0x3b2   :  { %5904 = vmatmul.bf16.gmra.mxu0 %v9856_v32  ;;  %v9943_v32 = vld [vmem:[%s14864_s0 + $0xd0] sm:$0xf]  ;;  %v9956_v4 = vor.u32 %v10923_v44, %v9953_v39 }
 0x3b3   :  { %9917 = vmatmul.msk.bf16.vlgmr.msrb.gmra.mxu2 %vm164_vm0, %v9852_v42  ;;  %v4972_v3 = vadd.f32 %v14023_v35, %v4960_v12  ;;  %v14262_v63 = vor.u32 %v10908_v23, %v9943_v32 }
 0x3b5   :  { %v4980_v45 = vmax.f32 %v4972_v3, 0.0  ;;  %v4952_v25 = vpop.f32.mrf.mxu3 }
 0x3b6   :  { %v5189_v10 = vpop.f32.mrf.mxu2  ;;  %v4921_v61 = vpop.f32.mrf.mxu1 }
 0x3b7   :  { %v14192_v55 = vadd.f32 %v5189_v10, %v14102_v6  ;;  %v14194_v54 = vpop.f32.mrf.mxu0  ;;  %4988 = vst.msk [vmem:[#allocation2 + $0x168] sm:$0xff] %vm1006_vm1, %v4980_v45  ;;  %v4951_v31 = vadd.f32 %v4950_v16, %v4921_v61  ;;  %v10914_v6 = vld [vmem:[%s14863_s1 + $0x8] sm:$0xff]  ;;  %v10951_v16 = vld [vmem:[%s14863_s1 + $0xd0] sm:$0xff]  ;;  %v10891_v45 = vld [vmem:[%s14864_s0 + $0x204] sm:$0xf] }
 0x3b8   :  { %v7210_v19 = vld [vmem:[#allocation3 + $0x48] sm:$0xff]  ;;  %6293 = vmatpush.bf16.msrb.mxu0 %v10914_v6  ;;  %6482 = vmatpush.bf16.msra.mxu1 %v10951_v16 }
 0x3b9   :  { %v7212_v9 = vmax.f32 %v7208_v41, %v7210_v19  ;;  %v4961_v1 = vadd.f32 %v4951_v31, %v4759_v0  ;;  %5712 = vmatmul.bf16.gmra.mxu1 %v9776_v52 }
 0x3ba   :  { %10013 = vmatmul.msk.bf16.vlgmr.msrb.gmra.mxu3 %vm164_vm0, %v14196_v22 }
 0x3bb   :  { %v7214_v29 = vpack.c.bf16 %v7212_v9, %v7212_v9  ;;  %v4973_v49 = vadd.f32 %v14023_v35, %v4961_v1 }
 0x3bc   :  { %6294 = vmatpush.bf16.msrb.mxu0 %v10913_v14  ;;  %6483 = vmatpush.bf16.msra.mxu1 %v10950_v20  ;;  %v10912_v20 = vld [vmem:[%s14864_s0 + $0x1f4] sm:$0xf0] }
 0x3bd   :  { %v7218_v17 = vsel %vm11992_vm4, %v7214_v29, %v10377_v48  ;;  %v4981_v37 = vmax.f32 %v4973_v49, 0.0  ;;  %v5331_v56 = vpop.f32.mrf.mxu3  ;;  %v10948_v48 = vld [vmem:[%s14863_s1 + $0xb8] sm:$0xff]  ;;  %v10911_v29 = vld [vmem:[%s14864_s0 + $0x1f4] sm:$0xf] }
 0x3be   :  { %v5191_v47 = vpop.f32.mrf.mxu2  ;;  %10378 = vst [vmem:[%s14866_s3 + $0x10] sm:$0xf] %v7218_v17  ;;  %v7023_v51 = vld [vmem:[#allocation2 + $0x160] ss:$2 sm:$0xff]  ;;  %v7079_v38 = vld [vmem:[#allocation2 + $0x161] ss:$2 sm:$0xff]  ;;  %v4923_v58 = vpop.f32.mrf.mxu1 }
 0x3bf   :  { %v5192_v18 = vadd.f32 %v5191_v47, %v14134_v11  ;;  %v14231_v5 = vpop.f32.mrf.mxu0  ;;  %v7112_v60 = vmax.f32 %v7023_v51, %v7079_v38  ;;  %4989 = vst.msk [vmem:[#allocation2 + $0x170] sm:$0xff] %vm1006_vm1, %v4981_v37  ;;  %v4953_v43 = vadd.f32 %v4952_v25, %v4923_v58  ;;  %v10953_v11 = vld [vmem:[%s14863_s1 + $0xe0] sm:$0xff]  ;;  %v9865_v25 = vld [vmem:[%s14864_s0 + $0x208] sm:$0xf0] }
 0x3c0   :  { %6517 = vmatpush.bf16.msra.mxu3 %v10953_v11  ;;  %v9868_v19 = vor.u32 %v10891_v45, %v9865_v25  ;;  %6484 = vmatpush.bf16.msra.mxu1 %v10949_v30  ;;  %v10379_v38 = vld [vmem:[%s14866_s3 + $0x2c] sm:$0xf]  ;;  %v10893_v11 = vld [vmem:[%s14864_s0 + $0x214] sm:$0xf]  ;;  %v10945_v25 = vld [vmem:[%s14863_s1 + $0xa0] sm:$0xff] }
 0x3c1   :  { %7140 = vst.msk [vmem:[#allocation3 + $0xb0] sm:$0xff] %vm1006_vm1, %v7112_v60  ;;  %v4962_v13 = vadd.f32 %v4953_v43, %v4760_v34  ;;  %v10972_v34 = vld [vmem:[%s14863_s1 + $0x138] sm:$0xff]  ;;  %v10019_v60 = vld [vmem:[%s14864_s0 + $0xc0] sm:$0xf]  ;;  %v10906_v43 = vld [vmem:[%s14864_s0 + $0xc4] sm:$0xf0] }
 0x3c2   :  { %5909 = vmatmul.bf16.gmra.mxu0 %v9864_v7  ;;  %6718 = vmatpush.bf16.msrb.mxu2 %v10972_v34 }
 0x3c3   :  { %9918 = vmatmul.msk.bf16.gmra.mxu2 %vm164_vm0, %v9860_v53  ;;  %v4974_v33 = vadd.f32 %v14023_v35, %v4962_v13  ;;  %v10969_v53 = vld [vmem:[%s14863_s1 + $0x120] sm:$0xff]  ;;  %v9873_v13 = vld [vmem:[%s14864_s0 + $0x218] sm:$0xf0] }
 0x3c4   :  { %6485 = vmatpush.bf16.msra.mxu1 %v10948_v48  ;;  %6920 = vmatpush.bf16.msrb.mxu3 %v10990_v28  ;;  %v10971_v28 = vld [vmem:[%s14863_s1 + $0x130] sm:$0xff] }
 0x3c5   :  { %v4982_v42 = vmax.f32 %v4974_v33, 0.0  ;;  %v5333_v26 = vpop.f32.mrf.mxu3  ;;  %v10020_v33 = vor.u32 %v10906_v43, %v10019_v60 }
 0x3c6   :  { %v5194_v59 = vpop.f32.mrf.mxu2  ;;  %v5302_v35 = vpop.f32.mrf.mxu1  ;;  %6719 = vmatpush.bf16.msrb.mxu2 %v10971_v28 }
 0x3c7   :  { %v5195_v12 = vadd.f32 %v5194_v59, %v14165_v57  ;;  %v14265_v62 = vpop.f32.mrf.mxu0  ;;  %4990 = vst.msk [vmem:[#allocation2 + $0x178] sm:$0xff] %vm1006_vm1, %v4982_v42  ;;  %v5303_v21 = vadd.f32 %v5302_v35, %v14192_v55  ;;  %v9871_v57 = vld [vmem:[%s14864_s0 + $0x210] sm:$0xf]  ;;  %v9876_v59 = vor.u32 %v10893_v11, %v9873_v13  ;;  %v10946_v35 = vld [vmem:[%s14863_s1 + $0xa8] sm:$0xff]  ;;  %v10964_v11 = vld [vmem:[%s14863_s1 + $0xf8] sm:$0xff] }
 0x3c8   :  { %v9872_v15 = vor.u32 %v10894_v36, %v9871_v57  ;;  %v7209_v14 = vld [vmem:[#allocation3 + $0xb0] sm:$0xff]  ;;  %v9969_v57 = vld [vmem:[%s14864_s0 + $0x208] sm:$0xf0]  ;;  %v10910_v13 = vld [vmem:[%s14864_s0 + $0x1e4] sm:$0xf0] }
 0x3c9   :  { %v14272_v3 = vadd.f32 %v5331_v56, %v5303_v21  ;;  %6153 = vmatmul.bf16.vlgmr.msrb.gmra.mxu1 %v14262_v63  ;;  %v14319_v56 = vor.u32 %v10911_v29, %v9961_v24  ;;  %v10925_v21 = vld [vmem:[%s14864_s0 + $0x204] sm:$0xf] }
 0x3ca   :  { %10014 = vmatmul.msk.bf16.gmra.mxu3 %vm164_vm0, %v9956_v4  ;;  %v10968_v4 = vld [vmem:[%s14863_s1 + $0x118] sm:$0xff] }
 0x3cd   :  { %v5336_v52 = vpop.f32.mrf.mxu3 }
 0x3ce   :  { %v5196_v10 = vpop.f32.mrf.mxu2  ;;  %v7025_v55 = vld [vmem:[#allocation2 + $0x170] ss:$2 sm:$0xff]  ;;  %v7081_v61 = vld [vmem:[#allocation2 + $0x171] ss:$2 sm:$0xff]  ;;  %v5304_v41 = vpop.f32.mrf.mxu1 }
 0x3cf   :  { %v5197_v0 = vadd.f32 %v5196_v10, %v14194_v54  ;;  %v14292_v31 = vpop.f32.mrf.mxu0  ;;  %v7113_v9 = vmax.f32 %v7025_v55, %v7081_v61  ;;  %v5305_v1 = vadd.f32 %v5304_v41, %v5192_v18  ;;  %v10970_v54 = vld [vmem:[%s14863_s1 + $0x128] sm:$0xff]  ;;  %v9972_v55 = vor.u32 %v10925_v21, %v9969_v57  ;;  %v10967_v41 = vld [vmem:[%s14863_s1 + $0x110] sm:$0xff]  ;;  %v10109_v57 = vld [vmem:[%s14864_s0 + $0xf8] sm:$0xf0] }
 0x3d0   :  { %6683 = vmatpush.bf16.msra.mxu0 %v10970_v54  ;;  %v10939_v21 = vld [vmem:[%s14864_s0 + $0xf4] sm:$0xf] }
 0x3d1   :  { %7141 = vst.msk [vmem:[#allocation3 + $0xb8] sm:$0xff] %vm1006_vm1, %v7113_v9  ;;  %v14295_v6 = vadd.f32 %v5333_v26, %v5305_v1 }
 0x3d2   :  { %5914 = vmatmul.bf16.gmra.mxu0 %v9872_v15 }
 0x3d3   :  { %9919 = vmatmul.msk.bf16.gmra.mxu2 %vm164_vm0, %v9868_v19  ;;  %v10905_v19 = vld [vmem:[%s14864_s0 + $0xc4] sm:$0xf] }
 0x3d4   :  { %6684 = vmatpush.bf16.msra.mxu0 %v10969_v53 }
 0x3d5   :  { %v5338_v2 = vpop.f32.mrf.mxu3 }
 0x3d6   :  { %v5199_v49 = vpop.f32.mrf.mxu2  ;;  %v5307_v47 = vpop.f32.mrf.mxu1 }
 0x3d7   :  { %v5200_v17 = vadd.f32 %v5199_v49, %v14231_v5  ;;  %v14317_v37 = vpop.f32.mrf.mxu0  ;;  %v5308_v7 = vadd.f32 %v5307_v47, %v5195_v12  ;;  %v10947_v5 = vld [vmem:[%s14863_s1 + $0xb0] sm:$0xff]  ;;  %v10966_v49 = vld [vmem:[%s14863_s1 + $0x108] sm:$0xff] }
 0x3d8   :  { %v7211_v51 = vld [vmem:[#allocation3 + $0xb8] sm:$0xff]  ;;  %6486 = vmatpush.bf16.msra.mxu1 %v10947_v5  ;;  %6685 = vmatpush.bf16.msra.mxu0 %v10968_v4 }
 0x3d9   :  { %v7213_v18 = vmax.f32 %v7209_v14, %v7211_v51  ;;  %v14324_v58 = vadd.f32 %v5336_v52, %v5308_v7  ;;  %6158 = vmatmul.bf16.gmra.mxu1 %v9952_v27  ;;  %v9967_v27 = vld [vmem:[%s14864_s0 + $0x200] sm:$0xf] }
 0x3da   :  { %10015 = vmatmul.msk.bf16.gmra.mxu3 %vm164_vm0, %v14319_v56  ;;  %v10965_v51 = vld [vmem:[%s14863_s1 + $0x100] sm:$0xff] }
 0x3db   :  { %v7215_v46 = vpack.c.bf16 %v7213_v18, %v7213_v18 }
 0x3dc   :  { %6487 = vmatpush.bf16.msra.mxu1 %v10946_v35  ;;  %6686 = vmatpush.bf16.msra.mxu0 %v10967_v41  ;;  %v10909_v41 = vld [vmem:[%s14864_s0 + $0x1e4] sm:$0xf] }
 0x3dd   :  { %v7221_v16 = vsel %vm11992_vm4, %v7215_v46, %v10379_v38  ;;  %v5341_v23 = vpop.f32.mrf.mxu3  ;;  %v10987_v46 = vld [vmem:[%s14863_s1 + $0x170] sm:$0xff] }
 0x3de   :  { %v5201_v32 = vpop.f32.mrf.mxu2  ;;  %10380 = vst [vmem:[%s14866_s3 + $0x2c] sm:$0xf] %v7221_v16  ;;  %v5309_v39 = vpop.f32.mrf.mxu1  ;;  %v10989_v16 = vld [vmem:[%s14863_s1 + $0x180] sm:$0xff] }
 0x3df   :  { %v5202_v44 = vadd.f32 %v5201_v32, %v14265_v62  ;;  %v5496_v42 = vpop.f32.mrf.mxu0  ;;  %v5310_v26 = vadd.f32 %v5309_v39, %v5197_v0  ;;  %v9959_v62 = vld [vmem:[%s14864_s0 + $0x1f0] sm:$0xf]  ;;  %6921 = vmatpush.bf16.msrb.mxu3 %v10989_v16  ;;  %v10942_v16 = vld [vmem:[%s14864_s0 + $0x204] sm:$0xf0] }
 0x3e0   :  { %v14379_v45 = vor.u32 %v10912_v20, %v9959_v62  ;;  %6488 = vmatpush.bf16.msra.mxu1 %v10945_v25  ;;  %6687 = vmatpush.bf16.msra.mxu0 %v10966_v49  ;;  %v10986_v62 = vld [vmem:[%s14863_s1 + $0x168] sm:$0xff]  ;;  %v10099_v20 = vld [vmem:[%s14864_s0 + $0xe0] sm:$0xf]  ;;  %v10940_v49 = vld [vmem:[%s14864_s0 + $0xf4] sm:$0xf0] }
 0x3e1   :  { %v14358_v12 = vadd.f32 %v5338_v2, %v5310_v26  ;;  %v10988_v2 = vld [vmem:[%s14863_s1 + $0x178] sm:$0xff] }
 0x3e2   :  { %6295 = vmatmul.bf16.vlgmr.msrb.gmra.mxu0 %v10020_v33 }
 0x3e3   :  { %9920 = vmatmul.msk.bf16.gmra.mxu2 %vm164_vm0, %v9876_v59 }
 0x3e4   :  { %10993 = vmatpush.bf16.msrb.mxu1 %v10988_v2  ;;  %6688 = vmatpush.bf16.msra.mxu0 %v10965_v51  ;;  %v10195_v51 = vld [vmem:[%s14864_s0 + $0xf0] sm:$0xf] }
 0x3e5   :  { %v5343_v30 = vpop.f32.mrf.mxu3 }
 0x3e6   :  { %v5204_v36 = vpop.f32.mrf.mxu2  ;;  %v5312_v52 = vpop.f32.mrf.mxu1 }
 0x3e7   :  { %v5205_v10 = vadd.f32 %v5204_v36, %v14292_v31  ;;  %v5498_v15 = vpop.f32.mrf.mxu0  ;;  %v5313_v61 = vadd.f32 %v5312_v52, %v5200_v17  ;;  %v10021_v31 = vld [vmem:[%s14864_s0 + $0xc8] sm:$0xf0]  ;;  %v10926_v17 = vld [vmem:[%s14864_s0 + $0x204] sm:$0xf0] }
 0x3e8   :  { %v10024_v40 = vor.u32 %v10905_v19, %v10021_v31  ;;  %v9968_v14 = vor.u32 %v10926_v17, %v9967_v27  ;;  %10994 = vmatpush.bf16.msrb.mxu1 %v10987_v46  ;;  %6689 = vmatpush.bf16.msra.mxu0 %v10964_v11  ;;  %v10029_v19 = vld [vmem:[%s14864_s0 + $0x1e8] sm:$0xf0] }
 0x3e9   :  { %v14385_v0 = vadd.f32 %v5341_v23, %v5313_v61  ;;  %6163 = vmatmul.bf16.gmra.mxu1 %v14379_v45  ;;  %v10985_v61 = vld [vmem:[%s14863_s1 + $0x160] sm:$0xff] }
 0x3ea   :  { %10016 = vmatmul.msk.bf16.gmra.mxu3 %vm164_vm0, %v9972_v55 }
 0x3ec   :  { %10995 = vmatpush.bf16.msrb.mxu1 %v10986_v62 }
 0x3ed   :  { %v5346_v1 = vpop.f32.mrf.mxu3 }
 0x3ee   :  { %v5206_v9 = vpop.f32.mrf.mxu2  ;;  %v5314_v54 = vpop.f32.mrf.mxu1 }
 0x3ef   :  { %v5207_v48 = vadd.f32 %v5206_v9, %v14317_v37  ;;  %v5501_v50 = vpop.f32.mrf.mxu0  ;;  %v5315_v29 = vadd.f32 %v5314_v54, %v5202_v44  ;;  %v10101_v37 = vld [vmem:[%s14864_s0 + $0xe8] sm:$0xf0]  ;;  %v10963_v44 = vld [vmem:[%s14863_s1 + $0xf0] sm:$0xff]  ;;  %v10032_v54 = vor.u32 %v10909_v41, %v10029_v19 }
 0x3f0   :  { %6690 = vmatpush.bf16.msra.mxu0 %v10963_v44  ;;  %10996 = vmatpush.bf16.msrb.mxu1 %v10985_v61 }
 0x3f1   :  { %v14399_v24 = vadd.f32 %v5343_v30, %v5315_v29  ;;  %v10107_v29 = vld [vmem:[%s14864_s0 + $0xf0] sm:$0xf] }
 0x3f2   :  { %6300 = vmatmul.bf16.gmra.mxu0 %v14262_v63  ;;  %v10937_v63 = vld [vmem:[%s14864_s0 + $0xe4] sm:$0xf]  ;;  %v10108_v17 = vor.u32 %v10940_v49, %v10107_v29 }
 0x3f3   :  { %10073 = vmatmul.msk.bf16.vlgmr.msra.gmra.mxu2 %vm164_vm0, %v10024_v40  ;;  %v10104_v53 = vor.u32 %v10937_v63, %v10101_v37  ;;  %v10984_v40 = vld [vmem:[%s14863_s1 + $0x158] sm:$0xff] }
 0x3f4   :  { %6885 = vmatpush.bf16.msrb.mxu0 %v10988_v2  ;;  %10997 = vmatpush.bf16.msrb.mxu1 %v10984_v40 }
 0x3f5   :  { %v5348_v47 = vpop.f32.mrf.mxu3 }
 0x3f6   :  { %v5525_v7 = vpop.f32.mrf.mxu2  ;;  %v5317_v18 = vpop.f32.mrf.mxu1 }
 0x3f7   :  { %v5526_v38 = vadd.f32 %v5525_v7, %v5496_v42  ;;  %v5503_v5 = vpop.f32.mrf.mxu0  ;;  %v5318_v34 = vadd.f32 %v5317_v18, %v5205_v10 }
 0x3f8   :  { %6886 = vmatpush.bf16.msrb.mxu0 %v10987_v46 }
 0x3f9   :  { %v14425_v60 = vadd.f32 %v5526_v38, %v14272_v3  ;;  %v14427_v43 = vadd.f32 %v5346_v1, %v5318_v34  ;;  %6168 = vmatmul.bf16.gmra.mxu1 %v9968_v14  ;;  %v10027_v3 = vld [vmem:[%s14864_s0 + $0x1e0] sm:$0xf]  ;;  %v10956_v38 = vld [vmem:[%s14864_s0 + $0xf4] sm:$0xf0] }
 0x3fa   :  { %10169 = vmatmul.msk.bf16.vlgmr.msra.gmra.mxu3 %vm164_vm0, %v10104_v53  ;;  %v10028_v33 = vor.u32 %v10910_v13, %v10027_v3  ;;  %v10196_v53 = vor.u32 %v10956_v38, %v10195_v51  ;;  %v10982_v3 = vld [vmem:[%s14863_s1 + $0x148] sm:$0xff]  ;;  %v10115_v13 = vld [vmem:[%s14864_s0 + $0x200] sm:$0xf]  ;;  %v10960_v51 = vld [vmem:[%s14864_s0 + $0x214] sm:$0xf0] }
 0x3fb   :  { %v10116_v44 = vor.u32 %v10942_v16, %v10115_v13  ;;  %v10957_v38 = vld [vmem:[%s14864_s0 + $0x104] sm:$0xf] }
 0x3fc   :  { %6887 = vmatpush.bf16.msrb.mxu0 %v10986_v62 }
 0x3fd   :  { %v14448_v23 = vpop.f32.mrf.mxu3 }
 0x3fe   :  { %v5527_v32 = vpop.f32.mrf.mxu2  ;;  %v5319_v42 = vpop.f32.mrf.mxu1 }
 0x3ff   :  { %v5528_v39 = vadd.f32 %v5527_v32, %v5498_v15  ;;  %v5506_v59 = vpop.f32.mrf.mxu0  ;;  %v5320_v26 = vadd.f32 %v5319_v42, %v5207_v48  ;;  %v10112_v15 = vor.u32 %v10939_v21, %v10109_v57  ;;  %v10125_v32 = vld [vmem:[%s14864_s0 + $0x218] sm:$0xf0]  ;;  %v10958_v21 = vld [vmem:[%s14864_s0 + $0x104] sm:$0xf0]  ;;  %v10955_v57 = vld [vmem:[%s14864_s0 + $0xf4] sm:$0xf] }
 0x400   :  { %6888 = vmatpush.bf16.msrb.mxu0 %v10985_v61 }
 0x401   :  { %v14454_v35 = vadd.f32 %v5528_v39, %v14295_v6  ;;  %v14456_v4 = vadd.f32 %v5348_v47, %v5320_v26  ;;  %v10938_v6 = vld [vmem:[%s14864_s0 + $0xe4] sm:$0xf0]  ;;  %v10981_v39 = vld [vmem:[%s14863_s1 + $0x140] sm:$0xff] }
 0x402   :  { %6305 = vmatmul.bf16.gmra.mxu0 %v10028_v33  ;;  %v10100_v30 = vor.u32 %v10938_v6, %v10099_v20  ;;  %v10203_v6 = vld [vmem:[%s14864_s0 + $0x100] sm:$0xf] }
 0x403   :  { %10074 = vmatmul.msk.bf16.gmra.mxu2 %vm164_vm0, %v14196_v22 }
 0x404   :  { %6889 = vmatpush.bf16.msrb.mxu0 %v10984_v40 }
 0x405   :  { %v14475_v22 = vpop.f32.mrf.mxu3 }
 0x406   :  { %v5530_v36 = vpop.f32.mrf.mxu2  ;;  %v14477_v52 = vpop.f32.mrf.mxu1 }
 0x407   :  { %v5531_v25 = vadd.f32 %v5530_v36, %v5501_v50  ;;  %v5508_v10 = vpop.f32.mrf.mxu0 }
 0x409   :  { %v14480_v55 = vadd.f32 %v5531_v25, %v14324_v58  ;;  %6489 = vmatmul.bf16.vlgmr.msra.gmra.mxu1 %v10100_v30  ;;  %v10204_v25 = vor.u32 %v10958_v21, %v10203_v6 }
 0x40a   :  { %10170 = vmatmul.msk.bf16.gmra.mxu3 %vm164_vm0, %v10112_v15 }
 0x40d   :  { %v14492_v58 = vpop.f32.mrf.mxu3 }
 0x40e   :  { %v5532_v31 = vpop.f32.mrf.mxu2  ;;  %v14494_v48 = vpop.f32.mrf.mxu1 }
 0x40f   :  { %v5533_v9 = vadd.f32 %v5532_v31, %v5503_v5  ;;  %v5511_v1 = vpop.f32.mrf.mxu0  ;;  %v5728_v31 = vadd.f32 %v14448_v23, %v14477_v52 }
 0x411   :  { %v14497_v50 = vadd.f32 %v5533_v9, %v14358_v12  ;;  %v10941_v12 = vld [vmem:[%s14864_s0 + $0x204] sm:$0xf]  ;;  %v10123_v9 = vld [vmem:[%s14864_s0 + $0x210] sm:$0xf]  ;;  %v5747_v29 = vadd.f32 %v5728_v31, %v14425_v60 }
 0x412   :  { %6310 = vmatmul.bf16.gmra.mxu0 %v14379_v45  ;;  %v10117_v45 = vld [vmem:[%s14864_s0 + $0x208] sm:$0xf0]  ;;  %v10211_v60 = vld [vmem:[%s14864_s0 + $0x210] sm:$0xf] }
 0x413   :  { %10075 = vmatmul.msk.bf16.gmra.mxu2 %vm164_vm0, %v10032_v54  ;;  %v10120_v7 = vor.u32 %v10941_v12, %v10117_v45  ;;  %v10973_v54 = vld [vmem:[%s14864_s0 + $0x104] sm:$0xf]  ;;  %v14608_v12 = vld [vmem:[%s14865_s2] ss:$0 sm:$0xff] }
 0x415   :  { %v14516_v27 = vpop.f32.mrf.mxu3 }
 0x416   :  { %v5535_v2 = vpop.f32.mrf.mxu2  ;;  %v14518_v47 = vpop.f32.mrf.mxu1 }
 0x417   :  { %v5536_v63 = vadd.f32 %v5535_v2, %v5506_v59  ;;  %v5513_v37 = vpop.f32.mrf.mxu0 }
 0x419   :  { %v14521_v14 = vadd.f32 %v5536_v63, %v14385_v0  ;;  %6494 = vmatmul.bf16.gmra.mxu1 %v10108_v17  ;;  %v10983_v0 = vld [vmem:[%s14863_s1 + $0x150] sm:$0xff] }
 0x41a   :  { %10171 = vmatmul.msk.bf16.gmra.mxu3 %vm164_vm0, %v10120_v7  ;;  %10998 = vmatpush.bf16.msrb.mxu1 %v10983_v0 }
 0x41b   :  { %6890 = vmatpush.bf16.msrb.mxu0 %v10983_v0  ;;  %v10212_v0 = vor.u32 %v10960_v51, %v10211_v60 }
 0x41d   :  { %v14530_v5 = vpop.f32.mrf.mxu3 }
 0x41e   :  { %v5537_v18 = vpop.f32.mrf.mxu2  ;;  %v14535_v28 = vpop.f32.mrf.mxu1  ;;  %10999 = vmatpush.bf16.msrb.mxu1 %v10982_v3 }
 0x41f   :  { %v5538_v34 = vadd.f32 %v5537_v18, %v5508_v10  ;;  %v5900_v46 = vpop.f32.mrf.mxu0  ;;  %6891 = vmatpush.bf16.msrb.mxu0 %v10982_v3 }
 0x421   :  { %v14538_v11 = vadd.f32 %v5538_v34, %v14399_v24  ;;  %v10943_v24 = vld [vmem:[%s14864_s0 + $0x214] sm:$0xf] }
 0x422   :  { %6691 = vmatmul.bf16.vlgmr.msra.gmra.mxu0 %v10196_v53  ;;  %v10128_v62 = vor.u32 %v10943_v24, %v10125_v32  ;;  %11000 = vmatpush.bf16.msrb.mxu1 %v10981_v39  ;;  %v5733_v32 = vadd.f32 %v14492_v58, %v14518_v47  ;;  %v10301_v58 = vld [vmem:[%s14864_s0 + $0x118] sm:$0xf0] }
 0x423   :  { %10076 = vmatmul.msk.bf16.gmra.mxu2 %vm164_vm0, %v14319_v56  ;;  %6892 = vmatpush.bf16.msrb.mxu0 %v10981_v39  ;;  %v10975_v39 = vld [vmem:[%s14864_s0 + $0x114] sm:$0xf] }
 0x424   :  { %v5749_v6 = vadd.f32 %v5733_v32, %v14480_v55  ;;  %v10219_v55 = vld [vmem:[%s14864_s0 + $0x220] sm:$0xf] }
 0x425   :  { %v14557_v56 = vpop.f32.mrf.mxu3 }
 0x426   :  { %v5540_v33 = vpop.f32.mrf.mxu2  ;;  %v14562_v59 = vpop.f32.mrf.mxu1 }
 0x427   :  { %v5541_v42 = vadd.f32 %v5540_v33, %v5511_v1  ;;  %v5902_v26 = vpop.f32.mrf.mxu0  ;;  %v10944_v1 = vld [vmem:[%s14864_s0 + $0x214] sm:$0xf0] }
 0x428   :  { %v10124_v52 = vor.u32 %v10944_v1, %v10123_v9  ;;  %v10959_v9 = vld [vmem:[%s14864_s0 + $0x214] sm:$0xf] }
 0x429   :  { %v14565_v20 = vadd.f32 %v5541_v42, %v14427_v43  ;;  %6499 = vmatmul.bf16.gmra.mxu1 %v10116_v44  ;;  %v10197_v43 = vld [vmem:[%s14864_s0 + $0xf8] sm:$0xf0]  ;;  %v10976_v44 = vld [vmem:[%s14864_s0 + $0x114] sm:$0xf0] }
 0x42a   :  { %10172 = vmatmul.msk.bf16.gmra.mxu3 %vm164_vm0, %v10128_v62  ;;  %v10200_v41 = vor.u32 %v10955_v57, %v10197_v43 }
 0x42d   :  { %v14580_v30 = vpop.f32.mrf.mxu3 }
 0x42e   :  { %v5542_v36 = vpop.f32.mrf.mxu2  ;;  %v14582_v15 = vpop.f32.mrf.mxu1 }
 0x42f   :  { %v5543_v10 = vadd.f32 %v5542_v36, %v5513_v37  ;;  %v5905_v61 = vpop.f32.mrf.mxu0  ;;  %v5730_v37 = vadd.f32 %v14475_v22, %v14494_v48  ;;  %v10205_v22 = vld [vmem:[%s14864_s0 + $0x108] sm:$0xf0]  ;;  %v10304_v36 = vor.u32 %v10975_v39, %v10301_v58  ;;  %v10961_v58 = vld [vmem:[%s14864_s0 + $0x224] sm:$0xf] }
 0x430   :  { %v10208_v16 = vor.u32 %v10957_v38, %v10205_v22  ;;  %v5738_v38 = vadd.f32 %v14530_v5, %v14562_v59  ;;  %v10309_v5 = vld [vmem:[%s14864_s0 + $0x228] sm:$0xf0] }
 0x431   :  { %v14585_v19 = vadd.f32 %v5543_v10, %v14456_v4  ;;  %v10293_v4 = vld [vmem:[%s14864_s0 + $0x108] sm:$0xf0]  ;;  %v5748_v34 = vadd.f32 %v5730_v37, %v14454_v35  ;;  %v10299_v35 = vld [vmem:[%s14864_s0 + $0x110] sm:$0xf] }
 0x432   :  { %6696 = vmatmul.bf16.gmra.mxu0 %v10204_v25  ;;  %v10296_v17 = vor.u32 %v10973_v54, %v10293_v4  ;;  %v10300_v62 = vor.u32 %v10976_v44, %v10299_v35  ;;  %v5740_v44 = vadd.f32 %v14557_v56, %v14582_v15  ;;  %v10221_v56 = vld [vmem:[%s14864_s0 + $0x228] sm:$0xf0] }
 0x433   :  { %10265 = vmatmul.msk.bf16.vlgmr.msrb.gmra.mxu2 %vm164_vm0, %v10200_v41  ;;  %v5735_v41 = vadd.f32 %v14516_v27, %v14535_v28  ;;  %v10213_v27 = vld [vmem:[%s14864_s0 + $0x218] sm:$0xf0] }
 0x435   :  { %v14602_v40 = vpop.f32.mrf.mxu3 }
 0x436   :  { %v5929_v23 = vpop.f32.mrf.mxu2  ;;  %v14610_v45 = vpop.f32.mrf.mxu1 }
 0x437   :  { %v5930_v49 = vadd.f32 %v5929_v23, %v5900_v46  ;;  %v5907_v2 = vpop.f32.mrf.mxu0 }
 0x439   :  { %v5949_v63 = vadd.f32 %v5930_v49, %v5747_v29  ;;  %6504 = vmatmul.bf16.gmra.mxu1 %v10124_v52  ;;  %v5750_v29 = vadd.f32 %v5735_v41, %v14497_v50  ;;  %v10307_v50 = vld [vmem:[%s14864_s0 + $0x220] sm:$0xf] }
 0x43a   :  { %10361 = vmatmul.msk.bf16.vlgmr.msrb.gmra.mxu3 %vm164_vm0, %v10296_v17 }
 0x43b   :  { %v5961_v7 = vadd.f32 %v14608_v12, %v5949_v63 }
 0x43d   :  { %v5969_v48 = vmax.f32 %v5961_v7, 0.0  ;;  %v6183_v53 = vpop.f32.mrf.mxu3  ;;  %v10216_v7 = vor.u32 %v10959_v9, %v10213_v27  ;;  %v5743_v27 = vadd.f32 %v14580_v30, %v14610_v45  ;;  %v10317_v30 = vld [vmem:[%s14864_s0 + $0x238] sm:$0xf0] }
 0x43e   :  { %v5931_v18 = vpop.f32.mrf.mxu2  ;;  %v14630_v3 = vpop.f32.mrf.mxu1 }
 0x43f   :  { %5977 = vst.msk [vmem:[#allocation2 + $0xa0] sm:$0xff] %vm1006_vm1, %v5969_v48  ;;  %v5932_v46 = vadd.f32 %v5931_v18, %v5902_v26  ;;  %v5910_v13 = vpop.f32.mrf.mxu0  ;;  %v10977_v48 = vld [vmem:[%s14864_s0 + $0x224] sm:$0xf] }
 0x440   :  { %v10312_v32 = vor.u32 %v10977_v48, %v10309_v5 }
 0x441   :  { %v5950_v24 = vadd.f32 %v5932_v46, %v5748_v34  ;;  %v5751_v34 = vadd.f32 %v5738_v38, %v14521_v14  ;;  %v10291_v14 = vld [vmem:[%s14864_s0 + $0x100] sm:$0xf] }
 0x442   :  { %6701 = vmatmul.bf16.gmra.mxu0 %v10212_v0 }
 0x443   :  { %v5962_v33 = vadd.f32 %v14608_v12, %v5950_v24  ;;  %10266 = vmatmul.msk.bf16.gmra.mxu2 %vm164_vm0, %v10208_v16 }
 0x445   :  { %v5970_v47 = vmax.f32 %v5962_v33, 0.0  ;;  %v6185_v26 = vpop.f32.mrf.mxu3 }
 0x446   :  { %v5934_v42 = vpop.f32.mrf.mxu2  ;;  %v6154_v43 = vpop.f32.mrf.mxu1 }
 0x447   :  { %5978 = vst.msk [vmem:[#allocation2 + $0xa8] sm:$0xff] %vm1006_vm1, %v5970_v47  ;;  %v5935_v21 = vadd.f32 %v5934_v42, %v5905_v61  ;;  %v14650_v57 = vpop.f32.mrf.mxu0  ;;  %v14652_v25 = vadd.f32 %v6183_v53, %v6154_v43  ;;  %v10962_v61 = vld [vmem:[%s14864_s0 + $0x224] sm:$0xf0] }
 0x448   :  { %v10220_v52 = vor.u32 %v10962_v61, %v10219_v55 }
 0x449   :  { %v5951_v10 = vadd.f32 %v5935_v21, %v5749_v6  ;;  %6898 = vmatmul.bf16.vlgmr.msrb.gmra.mxu1 %v10300_v62  ;;  %v5752_v21 = vadd.f32 %v5740_v44, %v14538_v11 }
 0x44a   :  { %10362 = vmatmul.msk.bf16.gmra.mxu3 %vm164_vm0, %v10304_v36 }
 0x44b   :  { %v5963_v31 = vadd.f32 %v14608_v12, %v5951_v10 }
 0x44d   :  { %v5971_v28 = vmax.f32 %v5963_v31, 0.0  ;;  %v6188_v23 = vpop.f32.mrf.mxu3  ;;  %v10224_v31 = vor.u32 %v10961_v58, %v10221_v56 }
 0x44e   :  { %v6999_v1 = vld [vmem:[#allocation2 + $0xa0] ss:$2 sm:$0xff]  ;;  %v7055_v54 = vld [vmem:[#allocation2 + $0xa1] ss:$2 sm:$0xff]  ;;  %v5936_v4 = vpop.f32.mrf.mxu2  ;;  %v6156_v37 = vpop.f32.mrf.mxu1 }
 0x44f   :  { %v7100_v49 = vmax.f32 %v6999_v1, %v7055_v54  ;;  %5979 = vst.msk [vmem:[#allocation2 + $0xb0] sm:$0xff] %vm1006_vm1, %v5971_v28  ;;  %v5937_v17 = vadd.f32 %v5936_v4, %v5907_v2  ;;  %v14672_v63 = vpop.f32.mrf.mxu0  ;;  %v14674_v60 = vadd.f32 %v6185_v26, %v6156_v37  ;;  %v10978_v2 = vld [vmem:[%s14864_s0 + $0x224] sm:$0xf0]  ;;  %v10980_v28 = vld [vmem:[%s14864_s0 + $0x234] sm:$0xf0] }
 0x450   :  { %v10308_v0 = vor.u32 %v10978_v2, %v10307_v50  ;;  %v10381_v2 = vld [vmem:[%s14866_s3 + $0x14] sm:$0xf] }
 0x451   :  { %7128 = vst.msk [vmem:[#allocation3 + $0x50] sm:$0xff] %vm1006_vm1, %v7100_v49  ;;  %v5952_v51 = vadd.f32 %v5937_v17, %v5750_v29 }
 0x452   :  { %6706 = vmatmul.bf16.gmra.mxu0 %v10220_v52 }
 0x453   :  { %v5964_v22 = vadd.f32 %v14608_v12, %v5952_v51  ;;  %10267 = vmatmul.msk.bf16.gmra.mxu2 %vm164_vm0, %v10216_v7 }
 0x455   :  { %v5972_v59 = vmax.f32 %v5964_v22, 0.0  ;;  %v6190_v53 = vpop.f32.mrf.mxu3 }
 0x456   :  { %v5939_v18 = vpop.f32.mrf.mxu2  ;;  %v6159_v24 = vpop.f32.mrf.mxu1 }
 0x457   :  { %5980 = vst.msk [vmem:[#allocation2 + $0xb8] sm:$0xff] %vm1006_vm1, %v5972_v59  ;;  %v5940_v46 = vadd.f32 %v5939_v18, %v5910_v13  ;;  %v14695_v16 = vpop.f32.mrf.mxu0  ;;  %v14697_v33 = vadd.f32 %v6188_v23, %v6159_v24  ;;  %v10974_v13 = vld [vmem:[%s14864_s0 + $0x104] sm:$0xf0]  ;;  %v5753_v23 = vadd.f32 %v5743_v27, %v14565_v20  ;;  %v5745_v20 = vadd.f32 %v14602_v40, %v14630_v3 }
 0x458   :  { %v10292_v6 = vor.u32 %v10974_v13, %v10291_v14  ;;  %v7223_v37 = vld [vmem:[#allocation3 + $0x50] sm:$0xff] }
 0x459   :  { %v5953_v35 = vadd.f32 %v5940_v46, %v5751_v34  ;;  %6903 = vmatmul.bf16.gmra.mxu1 %v10308_v0  ;;  %v5754_v34 = vadd.f32 %v5745_v20, %v14585_v19 }
 0x45a   :  { %10363 = vmatmul.msk.bf16.gmra.mxu3 %vm164_vm0, %v10312_v32 }
 0x45b   :  { %v5965_v39 = vadd.f32 %v14608_v12, %v5953_v35 }
 0x45d   :  { %v5973_v15 = vmax.f32 %v5965_v39, 0.0  ;;  %v6193_v62 = vpop.f32.mrf.mxu3 }
 0x45e   :  { %v7001_v47 = vld [vmem:[#allocation2 + $0xb0] ss:$2 sm:$0xff]  ;;  %v7057_v42 = vld [vmem:[#allocation2 + $0xb1] ss:$2 sm:$0xff]  ;;  %v5941_v26 = vpop.f32.mrf.mxu2  ;;  %v6161_v10 = vpop.f32.mrf.mxu1 }
 0x45f   :  { %v7101_v43 = vmax.f32 %v7001_v47, %v7057_v42  ;;  %5981 = vst.msk [vmem:[#allocation2 + $0x180] sm:$0xff] %vm1006_vm1, %v5973_v15  ;;  %v5942_v36 = vadd.f32 %v5941_v26, %v14650_v57  ;;  %v6296_v41 = vpop.f32.mrf.mxu0  ;;  %v6191_v55 = vadd.f32 %v6190_v53, %v6161_v10  ;;  %v10315_v57 = vld [vmem:[%s14864_s0 + $0x230] sm:$0xf] }
 0x460   :  { %v6297_v61 = vadd.f32 %v6296_v41, %v14652_v25  ;;  %v10979_v25 = vld [vmem:[%s14864_s0 + $0x234] sm:$0xf]  ;;  %v10316_v4 = vor.u32 %v10980_v28, %v10315_v57 }
 0x461   :  { %7129 = vst.msk [vmem:[#allocation3 + $0x58] sm:$0xff] %vm1006_vm1, %v7101_v43  ;;  %v5954_v9 = vadd.f32 %v5942_v36, %v5752_v21  ;;  %v10320_v17 = vor.u32 %v10979_v25, %v10317_v30  ;;  %v10383_v25 = vld [vmem:[%s14866_s3 + $0x30] sm:$0xf] }
 0x462   :  { %6893 = vmatmul.bf16.vlgmr.msrb.gmra.mxu0 %v10292_v6 }
 0x463   :  { %v5966_v11 = vadd.f32 %v14608_v12, %v5954_v9  ;;  %10268 = vmatmul.msk.bf16.gmra.mxu2 %vm164_vm0, %v10224_v31 }
 0x465   :  { %v5974_v45 = vmax.f32 %v5966_v11, 0.0  ;;  %v6195_v54 = vpop.f32.mrf.mxu3 }
 0x466   :  { %v5944_v1 = vpop.f32.mrf.mxu2  ;;  %v6164_v29 = vpop.f32.mrf.mxu1 }
 0x467   :  { %5982 = vst.msk [vmem:[#allocation2 + $0x188] sm:$0xff] %vm1006_vm1, %v5974_v45  ;;  %v5945_v52 = vadd.f32 %v5944_v1, %v14672_v63  ;;  %v6298_v49 = vpop.f32.mrf.mxu0  ;;  %v6194_v51 = vadd.f32 %v6193_v62, %v6164_v29 }
 0x468   :  { %v7225_v7 = vld [vmem:[#allocation3 + $0x58] sm:$0xff]  ;;  %v6299_v38 = vadd.f32 %v6298_v49, %v14674_v60 }
 0x469   :  { %v7227_v22 = vmax.f32 %v7223_v37, %v7225_v7  ;;  %v5955_v50 = vadd.f32 %v5945_v52, %v5753_v23  ;;  %6908 = vmatmul.bf16.gmra.mxu1 %v10316_v4 }
 0x46a   :  { %10364 = vmatmul.msk.bf16.gmra.mxu3 %vm164_vm0, %v10320_v17 }
 0x46b   :  { %v7229_v48 = vpack.c.bf16 %v7227_v22, %v7227_v22  ;;  %v5967_v63 = vadd.f32 %v14608_v12, %v5955_v50 }
 0x46d   :  { %v7233_v5 = vsel %vm11992_vm4, %v7229_v48, %v10381_v2  ;;  %v5975_v59 = vmax.f32 %v5967_v63, 0.0  ;;  %v6198_v0 = vpop.f32.mrf.mxu3 }
 0x46e   :  { %10382 = vst [vmem:[%s14866_s3 + $0x14] sm:$0xf] %v7233_v5  ;;  %v7027_v60 = vld [vmem:[#allocation2 + $0x180] ss:$2 sm:$0xff]  ;;  %v7083_v18 = vld [vmem:[#allocation2 + $0x181] ss:$2 sm:$0xff]  ;;  %v5946_v53 = vpop.f32.mrf.mxu2  ;;  %v6166_v46 = vpop.f32.mrf.mxu1 }
 0x46f   :  { %v7114_v40 = vmax.f32 %v7027_v60, %v7083_v18  ;;  %5983 = vst.msk [vmem:[#allocation2 + $0x190] sm:$0xff] %vm1006_vm1, %v5975_v59  ;;  %v5947_v3 = vadd.f32 %v5946_v53, %v14695_v16  ;;  %v6301_v24 = vpop.f32.mrf.mxu0  ;;  %v6196_v32 = vadd.f32 %v6195_v54, %v6166_v46 }
 0x470   :  { %v14756_v35 = vadd.f32 %v6301_v24, %v14697_v33 }
 0x471   :  { %7142 = vst.msk [vmem:[#allocation3 + $0xc0] sm:$0xff] %vm1006_vm1, %v7114_v40  ;;  %v5956_v44 = vadd.f32 %v5947_v3, %v5754_v34 }
 0x473   :  { %v5968_v39 = vadd.f32 %v14608_v12, %v5956_v44 }
 0x475   :  { %v5976_v14 = vmax.f32 %v5968_v39, 0.0  ;;  %v6200_v13 = vpop.f32.mrf.mxu3 }
 0x476   :  { %v6325_v58 = vpop.f32.mrf.mxu2  ;;  %v6169_v56 = vpop.f32.mrf.mxu1 }
 0x477   :  { %5984 = vst.msk [vmem:[#allocation2 + $0x198] sm:$0xff] %vm1006_vm1, %v5976_v14  ;;  %v6326_v19 = vadd.f32 %v6325_v58, %v6297_v61  ;;  %v6303_v15 = vpop.f32.mrf.mxu0  ;;  %v6199_v16 = vadd.f32 %v6198_v0, %v6169_v56 }
 0x478   :  { %v14761_v47 = vadd.f32 %v6303_v15, %v6191_v55  ;;  %v7224_v27 = vld [vmem:[#allocation3 + $0xc0] sm:$0xff] }
 0x47d   :  { %v6519_v62 = vpop.f32.mrf.mxu3 }
 0x47e   :  { %v7029_v42 = vld [vmem:[#allocation2 + $0x190] ss:$2 sm:$0xff]  ;;  %v7085_v26 = vld [vmem:[#allocation2 + $0x191] ss:$2 sm:$0xff]  ;;  %v6327_v33 = vpop.f32.mrf.mxu2  ;;  %v6171_v43 = vpop.f32.mrf.mxu1 }
 0x47f   :  { %v7115_v6 = vmax.f32 %v7029_v42, %v7085_v26  ;;  %v6328_v21 = vadd.f32 %v6327_v33, %v6299_v38  ;;  %v6306_v36 = vpop.f32.mrf.mxu0  ;;  %v6201_v12 = vadd.f32 %v6200_v13, %v6171_v43  ;;  %v14806_v43 = vld [vmem:[%s14865_s2] ss:$0 sm:$0xff] }
 0x480   :  { %v14763_v10 = vadd.f32 %v6306_v36, %v6194_v51 }
 0x481   :  { %7143 = vst.msk [vmem:[#allocation3 + $0xc8] sm:$0xff] %vm1006_vm1, %v7115_v6 }
 0x485   :  { %v6521_v31 = vpop.f32.mrf.mxu3 }
 0x486   :  { %v6330_v41 = vpop.f32.mrf.mxu2  ;;  %v6490_v9 = vpop.f32.mrf.mxu1 }
 0x487   :  { %v6308_v61 = vpop.f32.mrf.mxu0  ;;  %v6520_v57 = vadd.f32 %v6519_v62, %v6490_v9 }
 0x488   :  { %v7226_v55 = vld [vmem:[#allocation3 + $0xc8] sm:$0xff]  ;;  %v14766_v11 = vadd.f32 %v6308_v61, %v6196_v32 }
 0x489   :  { %v7228_v28 = vmax.f32 %v7224_v27, %v7226_v55  ;;  %v14771_v30 = vadd.f32 %v6520_v57, %v6326_v19 }
 0x48b   :  { %v7230_v45 = vpack.c.bf16 %v7228_v28, %v7228_v28 }
 0x48d   :  { %v7236_v1 = vsel %vm11992_vm4, %v7230_v45, %v10383_v25  ;;  %v6524_v4 = vpop.f32.mrf.mxu3 }
 0x48e   :  { %10384 = vst [vmem:[%s14866_s3 + $0x30] sm:$0xf] %v7236_v1  ;;  %v6332_v54 = vpop.f32.mrf.mxu2  ;;  %v6492_v52 = vpop.f32.mrf.mxu1 }
 0x48f   :  { %v6311_v23 = vpop.f32.mrf.mxu0  ;;  %v6522_v49 = vadd.f32 %v6521_v31, %v6492_v52  ;;  %v6333_v9 = vadd.f32 %v6332_v54, %v14761_v47 }
 0x490   :  { %v14778_v29 = vadd.f32 %v6311_v23, %v6199_v16  ;;  %v6331_v16 = vadd.f32 %v6330_v41, %v14756_v35 }
 0x491   :  { %v14780_v17 = vadd.f32 %v6522_v49, %v6328_v21 }
 0x495   :  { %v6526_v7 = vpop.f32.mrf.mxu3 }
 0x496   :  { %v6335_v37 = vpop.f32.mrf.mxu2  ;;  %v6495_v38 = vpop.f32.mrf.mxu1 }
 0x497   :  { %v6313_v51 = vpop.f32.mrf.mxu0  ;;  %v6525_v15 = vadd.f32 %v6524_v4, %v6495_v38  ;;  %v6336_v49 = vadd.f32 %v6335_v37, %v14763_v10 }
 0x498   :  { %v14782_v22 = vadd.f32 %v6313_v51, %v6201_v12 }
 0x499   :  { %v6541_v26 = vadd.f32 %v6525_v15, %v6331_v16 }
 0x49d   :  { %v6529_v2 = vpop.f32.mrf.mxu3 }
 0x49e   :  { %v14784_v50 = vpop.f32.mrf.mxu2  ;;  %v6497_v20 = vpop.f32.mrf.mxu1 }
 0x49f   :  { %v6692_v48 = vpop.f32.mrf.mxu0  ;;  %v6527_v31 = vadd.f32 %v6526_v7, %v6497_v20  ;;  %v6338_v37 = vadd.f32 %v14784_v50, %v14766_v11 }
 0x4a1   :  { %v6542_v41 = vadd.f32 %v6527_v31, %v6333_v9 }
 0x4a5   :  { %v6531_v5 = vpop.f32.mrf.mxu3 }
 0x4a6   :  { %v14786_v63 = vpop.f32.mrf.mxu2  ;;  %v6500_v59 = vpop.f32.mrf.mxu1 }
 0x4a7   :  { %v14788_v60 = vpop.f32.mrf.mxu0  ;;  %v6530_v23 = vadd.f32 %v6529_v2, %v6500_v59  ;;  %v6341_v9 = vadd.f32 %v14786_v63, %v14778_v29 }
 0x4a9   :  { %v6543_v51 = vadd.f32 %v6530_v23, %v6336_v49 }
 0x4ad   :  { %v14792_v53 = vpop.f32.mrf.mxu3 }
 0x4ae   :  { %v14790_v18 = vpop.f32.mrf.mxu2  ;;  %v6502_v0 = vpop.f32.mrf.mxu1 }
 0x4af   :  { %v6697_v34 = vpop.f32.mrf.mxu0  ;;  %v6532_v2 = vadd.f32 %v6531_v5, %v6502_v0 }
 0x4b5   :  { %v14794_v40 = vpop.f32.mrf.mxu3 }
 0x4b6   :  { %v6721_v3 = vpop.f32.mrf.mxu2  ;;  %v14796_v46 = vpop.f32.mrf.mxu1 }
 0x4b7   :  { %v6699_v24 = vpop.f32.mrf.mxu0  ;;  %v6722_v54 = vadd.f32 %v6721_v3, %v6692_v48 }
 0x4b9   :  { %v6741_v15 = vadd.f32 %v6722_v54, %v14771_v30 }
 0x4bd   :  { %v6923_v44 = vpop.f32.mrf.mxu3 }
 0x4be   :  { %v6723_v32 = vpop.f32.mrf.mxu2  ;;  %v14798_v39 = vpop.f32.mrf.mxu1 }
 0x4bf   :  { %v6702_v14 = vpop.f32.mrf.mxu0  ;;  %v6537_v29 = vadd.f32 %v14794_v40, %v14798_v39 }
 0x4c5   :  { %v14800_v58 = vpop.f32.mrf.mxu3 }
 0x4c6   :  { %v6726_v13 = vpop.f32.mrf.mxu2  ;;  %v6899_v56 = vpop.f32.mrf.mxu1 }
 0x4c7   :  { %v6704_v19 = vpop.f32.mrf.mxu0  ;;  %v6727_v42 = vadd.f32 %v6726_v13, %v6697_v34 }
 0x4c9   :  { %v6743_v6 = vadd.f32 %v6727_v42, %v6541_v26 }
 0x4cd   :  { %v6928_v62 = vpop.f32.mrf.mxu3 }
 0x4ce   :  { %v6728_v33 = vpop.f32.mrf.mxu2  ;;  %v6929_v21 = vadd.f32 %v6928_v62, %v6899_v56  ;;  %v6901_v12 = vpop.f32.mrf.mxu1 }
 0x4cf   :  { %v6707_v36 = vpop.f32.mrf.mxu0  ;;  %v6729_v27 = vadd.f32 %v6728_v33, %v6699_v24  ;;  %v6544_v33 = vadd.f32 %v6532_v2, %v6338_v37 }
 0x4d0   :  { %v6945_v61 = vadd.f32 %v6929_v21, %v6743_v6 }
 0x4d1   :  { %v6744_v25 = vadd.f32 %v6729_v27, %v6542_v41 }
 0x4d2   :  { %v6957_v35 = vadd.f32 %v14806_v43, %v6945_v61 }
 0x4d4   :  { %v6965_v55 = vmax.f32 %v6957_v35, 0.0 }
 0x4d5   :  { %v6930_v28 = vpop.f32.mrf.mxu3 }
 0x4d6   :  { %v6731_v57 = vpop.f32.mrf.mxu2  ;;  %6973 = vst.msk [vmem:[#allocation2 + $0xd0] sm:$0xff] %vm1006_vm1, %v6965_v55  ;;  %v6931_v45 = vadd.f32 %v6930_v28, %v6901_v12  ;;  %v6904_v4 = vpop.f32.mrf.mxu1 }
 0x4d7   :  { %v14811_v1 = vpop.f32.mrf.mxu0  ;;  %v6732_v7 = vadd.f32 %v6731_v57, %v6702_v14  ;;  %v6724_v14 = vadd.f32 %v6723_v32, %v14788_v60  ;;  %v6535_v32 = vadd.f32 %v14792_v53, %v14796_v46 }
 0x4d8   :  { %v6946_v52 = vadd.f32 %v6931_v45, %v6744_v25 }
 0x4d9   :  { %v6745_v24 = vadd.f32 %v6732_v7, %v6543_v51  ;;  %v6742_v50 = vadd.f32 %v6724_v14, %v14780_v17  ;;  %v6545_v55 = vadd.f32 %v6535_v32, %v6341_v9 }
 0x4da   :  { %v6958_v47 = vadd.f32 %v14806_v43, %v6946_v52 }
 0x4dc   :  { %v6966_v38 = vmax.f32 %v6958_v47, 0.0 }
 0x4dd   :  { %v6933_v34 = vpop.f32.mrf.mxu3 }
 0x4de   :  { %v6733_v20 = vpop.f32.mrf.mxu2  ;;  %6974 = vst.msk [vmem:[#allocation2 + $0xd8] sm:$0xff] %vm1006_vm1, %v6966_v38  ;;  %v6934_v13 = vadd.f32 %v6933_v34, %v6904_v4  ;;  %v6906_v10 = vpop.f32.mrf.mxu1 }
 0x4df   :  { %v6894_v56 = vpop.f32.mrf.mxu0  ;;  %v6734_v48 = vadd.f32 %v6733_v20, %v6704_v19 }
 0x4e0   :  { %v6924_v16 = vadd.f32 %v6923_v44, %v6894_v56  ;;  %v6947_v59 = vadd.f32 %v6934_v13, %v6745_v24 }
 0x4e1   :  { %v6746_v12 = vadd.f32 %v6734_v48, %v6544_v33 }
 0x4e2   :  { %v6943_v42 = vadd.f32 %v6924_v16, %v6741_v15  ;;  %v6959_v3 = vadd.f32 %v14806_v43, %v6947_v59  ;;  %v10385_v15 = vld [vmem:[%s14866_s3 + $0x18] sm:$0xf] }
 0x4e4   :  { %v6955_v26 = vadd.f32 %v14806_v43, %v6943_v42  ;;  %v6967_v62 = vmax.f32 %v6959_v3, 0.0  ;;  %v10387_v3 = vld [vmem:[%s14866_s3 + $0x34] sm:$0xf] }
 0x4e5   :  { %v7005_v6 = vld [vmem:[#allocation2 + $0xd0] ss:$2 sm:$0xff]  ;;  %v7061_v21 = vld [vmem:[#allocation2 + $0xd1] ss:$2 sm:$0xff]  ;;  %v6935_v5 = vpop.f32.mrf.mxu3 }
 0x4e6   :  { %v6963_v30 = vmax.f32 %v6955_v26, 0.0  ;;  %v6736_v44 = vpop.f32.mrf.mxu2  ;;  %v7103_v0 = vmax.f32 %v7005_v6, %v7061_v21  ;;  %6975 = vst.msk [vmem:[#allocation2 + $0x1a0] sm:$0xff] %vm1006_vm1, %v6967_v62  ;;  %v6936_v31 = vadd.f32 %v6935_v5, %v6906_v10  ;;  %v6909_v17 = vpop.f32.mrf.mxu1 }
 0x4e7   :  { %v6896_v11 = vpop.f32.mrf.mxu0  ;;  %v6737_v27 = vadd.f32 %v6736_v44, %v6707_v36  ;;  %v6343_v36 = vadd.f32 %v14790_v18, %v14782_v22 }
 0x4e8   :  { %6971 = vst.msk [vmem:[#allocation2 + $0xc0] sm:$0xff] %vm1006_vm1, %v6963_v30  ;;  %v6926_v60 = vadd.f32 %v14800_v58, %v6896_v11  ;;  %v6948_v19 = vadd.f32 %v6936_v31, %v6746_v12 }
 0x4e9   :  { %7131 = vst.msk [vmem:[#allocation3 + $0x68] sm:$0xff] %vm1006_vm1, %v7103_v0  ;;  %v6747_v25 = vadd.f32 %v6737_v27, %v6545_v55  ;;  %v6546_v23 = vadd.f32 %v6537_v29, %v6343_v36 }
 0x4ea   :  { %v6944_v61 = vadd.f32 %v6926_v60, %v6742_v50  ;;  %v6960_v35 = vadd.f32 %v14806_v43, %v6948_v19 }
 0x4ec   :  { %v6956_v41 = vadd.f32 %v14806_v43, %v6944_v61  ;;  %v6968_v57 = vmax.f32 %v6960_v35, 0.0 }
 0x4ed   :  { %v6938_v58 = vpop.f32.mrf.mxu3 }
 0x4ee   :  { %v6964_v28 = vmax.f32 %v6956_v41, 0.0  ;;  %6976 = vst.msk [vmem:[#allocation2 + $0x1a8] sm:$0xff] %vm1006_vm1, %v6968_v57  ;;  %v6939_v53 = vadd.f32 %v6938_v58, %v6909_v17  ;;  %v6738_v46 = vpop.f32.mrf.mxu2  ;;  %v6911_v47 = vpop.f32.mrf.mxu1 }
 0x4ef   :  { %v6739_v45 = vadd.f32 %v6738_v46, %v14811_v1 }
 0x4f0   :  { %6972 = vst.msk [vmem:[#allocation2 + $0xc8] sm:$0xff] %vm1006_vm1, %v6964_v28  ;;  %v6949_v63 = vadd.f32 %v6939_v53, %v6747_v25  ;;  %v7240_v24 = vld [vmem:[#allocation3 + $0x68] sm:$0xff] }
 0x4f1   :  { %v6748_v34 = vadd.f32 %v6739_v45, %v6546_v23 }
 0x4f2   :  { %v6961_v4 = vadd.f32 %v14806_v43, %v6949_v63 }
 0x4f4   :  { %v6969_v52 = vmax.f32 %v6961_v4, 0.0 }
 0x4f5   :  { %v7031_v49 = vld [vmem:[#allocation2 + $0x1a0] ss:$2 sm:$0xff]  ;;  %v7087_v7 = vld [vmem:[#allocation2 + $0x1a1] ss:$2 sm:$0xff]  ;;  %v6940_v54 = vpop.f32.mrf.mxu3 }
 0x4f6   :  { %v7116_v51 = vmax.f32 %v7031_v49, %v7087_v7  ;;  %6977 = vst.msk [vmem:[#allocation2 + $0x1b0] sm:$0xff] %vm1006_vm1, %v6969_v52  ;;  %v6941_v40 = vadd.f32 %v6940_v54, %v6911_v47 }
 0x4f7   :  { %v7003_v38 = vld [vmem:[#allocation2 + $0xc0] ss:$2 sm:$0xff]  ;;  %v7059_v20 = vld [vmem:[#allocation2 + $0xc1] ss:$2 sm:$0xff] }
 0x4f8   :  { %v7102_v39 = vmax.f32 %v7003_v38, %v7059_v20  ;;  %7144 = vst.msk [vmem:[#allocation3 + $0xd0] sm:$0xff] %vm1006_vm1, %v7116_v51  ;;  %v6950_v22 = vadd.f32 %v6941_v40, %v6748_v34 }
 0x4fa   :  { %7130 = vst.msk [vmem:[#allocation3 + $0x60] sm:$0xff] %vm1006_vm1, %v7102_v39  ;;  %v6962_v18 = vadd.f32 %v14806_v43, %v6950_v22 }
 0x4fc   :  { %v6970_v1 = vmax.f32 %v6962_v18, 0.0 }
 0x4fe   :  { %6978 = vst.msk [vmem:[#allocation2 + $0x1b8] sm:$0xff] %vm1006_vm1, %v6970_v1 }
 0x4ff   :  { %v7239_v10 = vld [vmem:[#allocation3 + $0xd0] sm:$0xff] }
 0x501   :  { %v7238_v13 = vld [vmem:[#allocation3 + $0x60] sm:$0xff] }
 0x502   :  { %v7242_v56 = vmax.f32 %v7238_v13, %v7240_v24 }
 0x504   :  { %v7244_v16 = vpack.c.bf16 %v7242_v56, %v7242_v56 }
 0x505   :  { %v7033_v59 = vld [vmem:[#allocation2 + $0x1b0] ss:$2 sm:$0xff]  ;;  %v7089_v42 = vld [vmem:[#allocation2 + $0x1b1] ss:$2 sm:$0xff] }
 0x506   :  { %v7248_v2 = vsel %vm11992_vm4, %v7244_v16, %v10385_v15  ;;  %v7117_v43 = vmax.f32 %v7033_v59, %v7089_v42 }
 0x507   :  { %10386 = vst [vmem:[%s14866_s3 + $0x18] sm:$0xf] %v7248_v2 }
 0x508   :  { %7145 = vst.msk [vmem:[#allocation3 + $0xd8] sm:$0xff] %vm1006_vm1, %v7117_v43 }
 0x50f   :  { %v7241_v37 = vld [vmem:[#allocation3 + $0xd8] sm:$0xff] }
 0x510   :  { %v7243_v48 = vmax.f32 %v7239_v10, %v7241_v37 }
 0x512   :  { %v7245_v14 = vpack.c.bf16 %v7243_v48, %v7243_v48 }
 0x514   :  { %v7251_v26 = vsel %vm11992_vm4, %v7245_v14, %v10387_v3 }
 0x515   :  { %10388 = vst [vmem:[%s14866_s3 + $0x34] sm:$0xf] %v7251_v26 }

</bundles_post_ra>
